<compile_context>
chip_gen: v7x
topology: tpu7x:2x2x1
jax: 0.10.0
libtpu: 0.0.40
codegen_flags: <defaults>
</compile_context>

<pallas_src>
import jax
import jax.numpy as jnp
from jax.experimental import pallas as pl
from jax.experimental.pallas import tpu as pltpu


# --------------------------- fused Pallas kernel -----------------------------

def _cnn_gru_fused_kernel(p_ref, w1_ref, b1_ref, w2_ref, b2_ref, wi_ref,
                          wh_ref, bi_ref, bh_ref, wfc_ref, bfc_ref,
                          out_ref, y1p_ref):
    """conv1(3x3,pad1)+ReLU+pool2 -> conv2(3x3,pad1)+ReLU+pool2 -> GRU -> FC.

    p_ref:   (4*4*HP*WP*N, K1) bf16  conv1 im2col patches.  Row order is
             (ph, pw, pi, pj, ho, wo, n): pool group of the first max-pool
             outermost, then parity of the pooled coordinate, then the
             parity-plane offsets, then image index n = t*B + b.  Features are
             (kh, kw, cin), zero-padded to K1.
    w1_ref:  (K1, C1) bf16   conv1 weight columns, rows (kh, kw, cin).
    b1_ref:  (1, C1)  f32
    w2_ref:  (3, 3, C1, C2) bf16   conv2 weights (HWIO).
    b2_ref:  (1, C2)  f32
    wi_ref:  (HP*WP, C2, 3H) bf16  GRU input weights per spatial site.
    wh_ref:  (H, 3H) f32 ; bi_ref/bh_ref: (1, 3H) f32
    wfc_ref: (H, 1) f32  ; bfc_ref: (1, 1) f32
    out_ref: (B, 1) f32
    y1p_ref: (4, HP+2, WP+2, N, C1) bf16 VMEM scratch -- conv1 output as four
             zero-padded (h%2, w%2) parity planes.  The trailing (N, C1) dims
             keep every conv2 patch slice a whole-tile read (leading-dim
             slicing only -> no masked loads/stores).
    """
    B = out_ref.shape[0]
    N = y1p_ref.shape[3]                       # images = T*B
    T = N // B
    C1 = y1p_ref.shape[4]
    HP = y1p_ref.shape[1] - 2                  # parity-plane height = H // 4
    WP = y1p_ref.shape[2] - 2
    C2 = w2_ref.shape[3]
    HG = wh_ref.shape[0]                       # GRU hidden size
    rows1 = 4 * HP * WP * N                    # conv1 rows per pool group
    rows2 = HP * WP * N                        # conv2 rows per pool group

    # ---- conv1: one MXU matmul; bias+ReLU in f32; bf16 cast before the 2x2
    # max-pool (monotone); result lands directly in parity-plane row order.
    a1 = jnp.dot(p_ref[...], w1_ref[...], preferred_element_type=jnp.float32)
    a1 = jnp.maximum(a1 + b1_ref[...], 0.0).astype(jnp.bfloat16)
    g1 = a1.reshape(4, rows1, C1)
    y1 = jnp.maximum(jnp.maximum(g1[0], g1[1]), jnp.maximum(g1[2], g1[3]))

    # Scatter into the zero-padded parity planes (whole-tile stores only).
    y1p_ref[...] = jnp.zeros_like(y1p_ref)
    y1p_ref[:, 1:1 + HP, 1:1 + WP, :, :] = y1.reshape(4, HP, WP, N, C1)

    # ---- conv2: in-kernel "im2col" -- 9 shifted whole-tile slices per pool
    # group, each a (rows2, C1) x (C1, C2) matmul accumulated in f32.
    w2 = w2_ref[...]
    pooled2 = None
    for ph in range(2):
        for pw in range(2):
            acc2 = jnp.zeros((rows2, C2), jnp.float32)
            for kh in range(3):
                qh = ph + kh - 1               # y1 row offset, in [-1, 2]
                pi = qh & 1
                dh = (qh - pi) // 2            # in {-1, 0, 1}
                for kw in range(3):
                    qw = pw + kw - 1
                    pj = qw & 1
                    dw = (qw - pj) // 2
                    xs = y1p_ref[pi * 2 + pj,
                                 1 + dh:1 + dh + HP,
                                 1 + dw:1 + dw + WP, :, :]
                    acc2 = acc2 + jnp.dot(xs.reshape(rows2, C1), w2[kh, kw],
                                          preferred_element_type=jnp.float32)
            grp = jnp.maximum(acc2 + b2_ref[...], 0.0).astype(jnp.bfloat16)
            pooled2 = grp if pooled2 is None else jnp.maximum(pooled2, grp)
    # pooled2: (rows2, C2) bf16, rows ordered (h, w, n).

    # ---- GRU input projection, hoisted out of the recurrence: contract the
    # F = HP*WP*C2 features site-by-site (no lane-merge relayout needed).
    y2r = pooled2.reshape(HP * WP, N, C2)
    wi = wi_ref[...]
    gx_all = jnp.zeros((N, 3 * HG), jnp.float32)
    for j in range(HP * WP):                   # static (=16)
        gx_all = gx_all + jnp.dot(y2r[j], wi[j],
                                  preferred_element_type=jnp.float32)
    gx_all = gx_all + bi_ref[...]              # (N, 3H), rows (t, b)

    # ---- GRU recurrence (PyTorch gate order r, z, n) + Linear(H, 1) head.
    def sig(v):                                # logistic via EUP exp + vrcp
        return pl.reciprocal(1.0 + jnp.exp(-v), approx=True)

    wh = wh_ref[...]
    bh = bh_ref[...]
    h = jnp.zeros((B, HG), jnp.float32)
    for t in range(T):                         # T is static (=4)
        gx = gx_all[t * B:(t + 1) * B, :]
        gh = jnp.dot(h, wh, preferred_element_type=jnp.float32) + bh
        r = sig(gx[:, 0:HG] + gh[:, 0:HG])
        z = sig(gx[:, HG:2 * HG] + gh[:, HG:2 * HG])
        n = jnp.tanh(gx[:, 2 * HG:] + r * gh[:, 2 * HG:])
        h = (1.0 - z) * n + z * h

    out_ref[...] = (jnp.dot(h, wfc_ref[...], preferred_element_type=jnp.float32)
                    + bfc_ref[...])


# --------------------------- wrappers (glue) ---------------------------------

def _conv1_patches(xb, k_pad):
    """(N, H, W, C) -> (4*4*(H//4)*(W//4)*N, k_pad) bf16 conv1 patch matrix.

    Rows ordered (ph, pw, pi, pj, ho, wo, n) -- see kernel docstring; features
    (kh, kw, cin) zero-padded to k_pad.  Built once on the raw input, before
    the single fused launch.
    # TODO(synk): at 224x224 this 9x patch blow-up should move in-kernel
    # (shifted-matmul accumulation, per-image tiling); at 16x16 it is 24 KB.
    """
    N, H, W, C = xb.shape
    assert H % 4 == 0 and W % 4 == 0, "spatial dims must be divisible by 4"
    xp = jnp.pad(xb, ((0, 0), (1, 1), (1, 1), (0, 0)))
    cols = [xp[:, kh:kh + H, kw:kw + W, :] for kh in range(3) for kw in range(3)]
    p = jnp.stack(cols, axis=3).reshape(N, H, W, 9 * C)       # feature = (kh,kw,cin)
    # h = 4*ho + 2*pi + ph  (ho: parity-plane offset, pi: y1 parity, ph: pool)
    p = p.reshape(N, H // 4, 2, 2, W // 4, 2, 2, 9 * C)
    p = p.transpose(3, 6, 2, 5, 1, 4, 0, 7)                   # (ph,pw,pi,pj,ho,wo,n,F)
    p = p.reshape(-1, 9 * C)
    if k_pad > 9 * C:
        p = jnp.pad(p, ((0, 0), (0, k_pad - 9 * C)))
    return p.astype(jnp.bfloat16)


@jax.jit
def cnn_gru_forward_pallas(x, pk):
    """x: (B, T, C, H, W) float32 (PyTorch layout). Returns (B, 1) float32."""
    B, T, C, H, W = x.shape
    N = T * B
    HP, WP = H // 4, W // 4
    C1 = pk['w1c'].shape[1]
    assert pk['wi3'].shape[0] == HP * WP, \
        "GRU weight packing does not match the conv output geometry"

    # Time-major NHWC images (n = t*B + b) -> conv1 patch matrix; all prep
    # happens before the single fused kernel launch.
    xb = jnp.transpose(x, (1, 0, 3, 4, 2)).reshape(N, H, W, C)
    patches = _conv1_patches(xb, pk['w1c'].shape[0])

    return pl.pallas_call(
        _cnn_gru_fused_kernel,
        out_shape=jax.ShapeDtypeStruct((B, 1), jnp.float32),
        in_specs=[pl.BlockSpec(memory_space=pltpu.MemorySpace.VMEM)] * 11,
        out_specs=pl.BlockSpec(memory_space=pltpu.MemorySpace.VMEM),
        scratch_shapes=[pltpu.VMEM((4, HP + 2, WP + 2, N, C1), jnp.bfloat16)],
        compiler_params=pltpu.CompilerParams(
            vmem_limit_bytes=32 * 1024 * 1024),
    )(patches, pk['w1c'], pk['b1'], pk['w2k'], pk['b2'], pk['wi3'],
      pk['wh3'], pk['bi3'], pk['bh3'], pk['wfc'], pk['bfc'])


def pack_params(p, img=16):
    """One-time repack of PyTorch-style params for the fused Pallas kernel."""
    Cin = p['w1'].shape[2]
    C1 = p['w1'].shape[3]
    C2 = p['w2'].shape[3]
    HG = p['w_hh'].shape[1]
    HP = WP = img // 4
    assert p['w_ih'].shape[1] == C2 * HP * WP, \
        "w_ih does not match the conv output geometry"
    k1 = ((9 * Cin + 7) // 8) * 8
    # Conv1 weights -> (K1, C1) columns, rows (kh, kw, cin), zero-padded, bf16.
    w1c = p['w1'].reshape(9 * Cin, C1)
    w1c = jnp.pad(w1c, ((0, k1 - 9 * Cin), (0, 0))).astype(jnp.bfloat16)
    # Conv2 weights stay HWIO for the in-kernel shifted matmuls.
    w2k = p['w2'].astype(jnp.bfloat16)
    # GRU input weight (3H, F) with PyTorch flatten order f = c*(HP*WP)+h*WP+w
    #   -> (j = h*WP + w, c, 3H) so the kernel contracts per spatial site.
    wi3 = (p['w_ih'].reshape(3 * HG, C2, HP * WP)
           .transpose(2, 1, 0).astype(jnp.bfloat16))
    return {
        'w1c': w1c, 'b1': p['b1'].reshape(1, -1),
        'w2k': w2k, 'b2': p['b2'].reshape(1, -1),
        'wi3': wi3,
        'wh3': p['w_hh'].T,                                   # (H, 3H) f32
        'bi3': p['b_ih'].reshape(1, -1),
        'bh3': p['b_hh'].reshape(1, -1),
        'wfc': p['w_fc'].T,                                   # (H, 1)
        'bfc': p['b_fc'].reshape(1, 1),
    }


# --------------------------- reference & params ------------------------------

def init_params(key, hidden_size=32, in_ch=3, img=16):
    keys = jax.random.split(key, 10)
    s = 0.05
    F = 32 * (img // 4) * (img // 4)
    H = hidden_size
    n = lambda k, shape: jax.random.normal(k, shape, jnp.float32) * s
    return {
        'w1': n(keys[0], (3, 3, in_ch, 16)), 'b1': n(keys[1], (16,)),
        'w2': n(keys[2], (3, 3, 16, 32)),    'b2': n(keys[3], (32,)),
        'w_ih': n(keys[4], (3 * H, F)),      'w_hh': n(keys[5], (3 * H, H)),
        'b_ih': n(keys[6], (3 * H,)),        'b_hh': n(keys[7], (3 * H,)),
        'w_fc': n(keys[8], (1, H)),          'b_fc': n(keys[9], (1,)),
    }


def cnn_gru_forward_ref(x, p):
    """Pure-JAX reference reproducing the PyTorch forward (f32, HIGHEST)."""
    hp = jax.lax.Precision.HIGHEST
    B, T, C, H, W = x.shape
    xb = x.reshape(B * T, C, H, W).transpose(0, 2, 3, 1)

    def conv(xi, w, b):
        y = jax.lax.conv_general_dilated(
            xi, w, (1, 1), ((1, 1), (1, 1)),
            dimension_numbers=('NHWC', 'HWIO', 'NHWC'), precision=hp)
        return jnp.maximum(y + b, 0.0)

    def pool(xi):
        n, h, w, c = xi.shape
        return jnp.max(xi.reshape(n, h // 2, 2, w // 2, 2, c), axis=(2, 4))

    y = pool(conv(xb, p['w1'], p['b1']))
    y = pool(conv(y, p['w2'], p['b2']))
    feat = y.transpose(0, 3, 1, 2).reshape(B, T, -1)          # PyTorch (C,H,W) flatten

    Hd = p['w_hh'].shape[1]
    sig = lambda v: 1.0 / (1.0 + jnp.exp(-v))
    h = jnp.zeros((B, Hd), jnp.float32)
    for t in range(T):
        x_t = feat[:, t, :]
        gx = jnp.dot(x_t, p['w_ih'].T, precision=hp) + p['b_ih']
        gh = jnp.dot(h, p['w_hh'].T, precision=hp) + p['b_hh']
        r = sig(gx[:, :Hd] + gh[:, :Hd])
        z = sig(gx[:, Hd:2 * Hd] + gh[:, Hd:2 * Hd])
        n = jnp.tanh(gx[:, 2 * Hd:] + r * gh[:, 2 * Hd:])
        h = (1.0 - z) * n + z * h
    return jnp.dot(h, p['w_fc'].T, precision=hp) + p['b_fc']


# --------------------------- main --------------------------------------------

if __name__ == "__main__":
    B, T, C, H, W = 2, 4, 3, 16, 16
    HIDDEN = 32

    key = jax.random.PRNGKey(0)
    kx, kp = jax.random.split(key)
    x = jax.random.normal(kx, (B, T, C, H, W), jnp.float32)
    params = init_params(kp, hidden_size=HIDDEN, in_ch=C, img=H)
    packed = pack_params(params, img=H)

    out = cnn_gru_forward_pallas(x, packed)
    out = jax.block_until_ready(out)
    assert out.shape == (B, 1), out.shape

    ref = cnn_gru_forward_ref(x, params)
    max_diff = float(jnp.max(jnp.abs(out - ref)))
    assert max_diff < 1e-2, f"mismatch vs reference: {max_diff}"

    print("KERNEL_OK")
</pallas_src>

<mosaic_0001>
module attributes {stable_mosaic.version = 11 : i64} {
  func.func @_cnn_gru_fused_kernel(%arg0: memref<2048x32xbf16, #tpu.memory_space<vmem>>, %arg1: memref<32x16xbf16, #tpu.memory_space<vmem>>, %arg2: memref<1x16xf32, #tpu.memory_space<vmem>>, %arg3: memref<3x3x16x32xbf16, #tpu.memory_space<vmem>>, %arg4: memref<1x32xf32, #tpu.memory_space<vmem>>, %arg5: memref<16x32x96xbf16, #tpu.memory_space<vmem>>, %arg6: memref<32x96xf32, #tpu.memory_space<vmem>>, %arg7: memref<1x96xf32, #tpu.memory_space<vmem>>, %arg8: memref<1x96xf32, #tpu.memory_space<vmem>>, %arg9: memref<32x1xf32, #tpu.memory_space<vmem>>, %arg10: memref<1x1xf32, #tpu.memory_space<vmem>>, %arg11: memref<2x1xf32, #tpu.memory_space<vmem>>, %arg12: memref<4x6x6x8x16xbf16, #tpu.memory_space<vmem>>) attributes {dimension_semantics = [], scalar_prefetch = 0 : i64, scratch_operands = 1 : i64, tpu.core_type = #tpu.core_type<tc>} {
    %c0 = arith.constant 0 : index
    %c0_0 = arith.constant 0 : index
    %0 = vector.load %arg0[%c0, %c0_0] : memref<2048x32xbf16, #tpu.memory_space<vmem>>, vector<2048x32xbf16>
    %c0_1 = arith.constant 0 : index
    %c0_2 = arith.constant 0 : index
    %1 = vector.load %arg1[%c0_1, %c0_2] : memref<32x16xbf16, #tpu.memory_space<vmem>>, vector<32x16xbf16>
    %cst = arith.constant dense<0.000000e+00> : vector<2048x16xf32>
    %2 = tpu.matmul %0, %1, %cst {dimension_numbers = #tpu.dot_dimension_numbers<[1], [0], [0], [1], [0, 0, 1, 1], [], []>} : vector<2048x32xbf16>, vector<32x16xbf16>, vector<2048x16xf32> -> vector<2048x16xf32>
    %c0_3 = arith.constant 0 : index
    %c0_4 = arith.constant 0 : index
    %3 = vector.load %arg2[%c0_3, %c0_4] : memref<1x16xf32, #tpu.memory_space<vmem>>, vector<1x16xf32>
    %4 = vector.broadcast %3 : vector<1x16xf32> to vector<2048x16xf32>
    %5 = arith.addf %2, %4 : vector<2048x16xf32>
    %cst_5 = arith.constant 0.000000e+00 : f32
    %6 = vector.broadcast %cst_5 : f32 to vector<2048x16xf32>
    %7 = arith.maximumf %5, %6 : vector<2048x16xf32>
    %8 = arith.truncf %7 : vector<2048x16xf32> to vector<2048x16xbf16>
    %9 = vector.shape_cast %8 : vector<2048x16xbf16> to vector<4x512x16xbf16>
    %10 = vector.extract_strided_slice %9 {offsets = [0, 0, 0], sizes = [1, 512, 16], strides = [1, 1, 1]} : vector<4x512x16xbf16> to vector<1x512x16xbf16>
    %11 = vector.shape_cast %10 : vector<1x512x16xbf16> to vector<512x16xbf16>
    %12 = vector.extract_strided_slice %9 {offsets = [1, 0, 0], sizes = [1, 512, 16], strides = [1, 1, 1]} : vector<4x512x16xbf16> to vector<1x512x16xbf16>
    %13 = vector.shape_cast %12 : vector<1x512x16xbf16> to vector<512x16xbf16>
    %14 = arith.maximumf %11, %13 : vector<512x16xbf16>
    %15 = vector.extract_strided_slice %9 {offsets = [2, 0, 0], sizes = [1, 512, 16], strides = [1, 1, 1]} : vector<4x512x16xbf16> to vector<1x512x16xbf16>
    %16 = vector.shape_cast %15 : vector<1x512x16xbf16> to vector<512x16xbf16>
    %17 = vector.extract_strided_slice %9 {offsets = [3, 0, 0], sizes = [1, 512, 16], strides = [1, 1, 1]} : vector<4x512x16xbf16> to vector<1x512x16xbf16>
    %18 = vector.shape_cast %17 : vector<1x512x16xbf16> to vector<512x16xbf16>
    %19 = arith.maximumf %16, %18 : vector<512x16xbf16>
    %20 = arith.maximumf %14, %19 : vector<512x16xbf16>
    %cst_6 = arith.constant 0.000000e+00 : bf16
    %21 = vector.broadcast %cst_6 : bf16 to vector<4x6x6x8x16xbf16>
    %c0_7 = arith.constant 0 : index
    %c0_8 = arith.constant 0 : index
    %c0_9 = arith.constant 0 : index
    %c0_10 = arith.constant 0 : index
    %c0_11 = arith.constant 0 : index
    %22 = vector.load %arg12[%c0_7, %c0_8, %c0_9, %c0_10, %c0_11] : memref<4x6x6x8x16xbf16, #tpu.memory_space<vmem>>, vector<4x6x6x8x16xbf16>
    tpu.vector_store %arg12[%c0_7, %c0_8, %c0_9, %c0_10, %c0_11], %21 {strides = array<i32>} : memref<4x6x6x8x16xbf16, #tpu.memory_space<vmem>>, vector<4x6x6x8x16xbf16>,
    %23 = vector.shape_cast %20 : vector<512x16xbf16> to vector<4x4x4x8x16xbf16>
    %c0_12 = arith.constant 0 : index
    %c1 = arith.constant 1 : index
    %c1_13 = arith.constant 1 : index
    %c0_14 = arith.constant 0 : index
    %c0_15 = arith.constant 0 : index
    %24 = vector.load %arg12[%c0_12, %c1, %c1_13, %c0_14, %c0_15] : memref<4x6x6x8x16xbf16, #tpu.memory_space<vmem>>, vector<4x4x4x8x16xbf16>
    tpu.vector_store %arg12[%c0_12, %c1, %c1_13, %c0_14, %c0_15], %23 {strides = array<i32>} : memref<4x6x6x8x16xbf16, #tpu.memory_space<vmem>>, vector<4x4x4x8x16xbf16>,
    %c0_16 = arith.constant 0 : index
    %c0_17 = arith.constant 0 : index
    %c0_18 = arith.constant 0 : index
    %c0_19 = arith.constant 0 : index
    %25 = vector.load %arg3[%c0_16, %c0_17, %c0_18, %c0_19] : memref<3x3x16x32xbf16, #tpu.memory_space<vmem>>, vector<3x3x16x32xbf16>
    %cst_20 = arith.constant 0.000000e+00 : f32
    %26 = vector.broadcast %cst_20 : f32 to vector<128x32xf32>
    %c3 = arith.constant 3 : index
    %c0_21 = arith.constant 0 : index
    %c0_22 = arith.constant 0 : index
    %c0_23 = arith.constant 0 : index
    %c0_24 = arith.constant 0 : index
    %27 = vector.load %arg12[%c3, %c0_21, %c0_22, %c0_23, %c0_24] : memref<4x6x6x8x16xbf16, #tpu.memory_space<vmem>>, vector<1x4x4x8x16xbf16>
    %28 = vector.shape_cast %27 : vector<1x4x4x8x16xbf16> to vector<4x4x8x16xbf16>
    %29 = vector.shape_cast %28 : vector<4x4x8x16xbf16> to vector<128x16xbf16>
    %30 = vector.extract_strided_slice %25 {offsets = [0, 0, 0, 0], sizes = [1, 1, 16, 32], strides = [1, 1, 1, 1]} : vector<3x3x16x32xbf16> to vector<1x1x16x32xbf16>
    %31 = vector.shape_cast %30 : vector<1x1x16x32xbf16> to vector<16x32xbf16>
    %cst_25 = arith.constant dense<0.000000e+00> : vector<128x32xf32>
    %32 = tpu.matmul %29, %31, %cst_25 {dimension_numbers = #tpu.dot_dimension_numbers<[1], [0], [0], [1], [0, 0, 1, 1], [], []>} : vector<128x16xbf16>, vector<16x32xbf16>, vector<128x32xf32> -> vector<128x32xf32>
    %33 = arith.addf %26, %32 : vector<128x32xf32>
    %c2 = arith.constant 2 : index
    %c0_26 = arith.constant 0 : index
    %c1_27 = arith.constant 1 : index
    %c0_28 = arith.constant 0 : index
    %c0_29 = arith.constant 0 : index
    %34 = vector.load %arg12[%c2, %c0_26, %c1_27, %c0_28, %c0_29] : memref<4x6x6x8x16xbf16, #tpu.memory_space<vmem>>, vector<1x4x4x8x16xbf16>
    %35 = vector.shape_cast %34 : vector<1x4x4x8x16xbf16> to vector<4x4x8x16xbf16>
    %36 = vector.shape_cast %35 : vector<4x4x8x16xbf16> to vector<128x16xbf16>
    %37 = vector.extract_strided_slice %25 {offsets = [0, 1, 0, 0], sizes = [1, 1, 16, 32], strides = [1, 1, 1, 1]} : vector<3x3x16x32xbf16> to vector<1x1x16x32xbf16>
    %38 = vector.shape_cast %37 : vector<1x1x16x32xbf16> to vector<16x32xbf16>
    %cst_30 = arith.constant dense<0.000000e+00> : vector<128x32xf32>
    %39 = tpu.matmul %36, %38, %cst_30 {dimension_numbers = #tpu.dot_dimension_numbers<[1], [0], [0], [1], [0, 0, 1, 1], [], []>} : vector<128x16xbf16>, vector<16x32xbf16>, vector<128x32xf32> -> vector<128x32xf32>
    %40 = arith.addf %33, %39 : vector<128x32xf32>
    %c3_31 = arith.constant 3 : index
    %c0_32 = arith.constant 0 : index
    %c1_33 = arith.constant 1 : index
    %c0_34 = arith.constant 0 : index
    %c0_35 = arith.constant 0 : index
    %41 = vector.load %arg12[%c3_31, %c0_32, %c1_33, %c0_34, %c0_35] : memref<4x6x6x8x16xbf16, #tpu.memory_space<vmem>>, vector<1x4x4x8x16xbf16>
    %42 = vector.shape_cast %41 : vector<1x4x4x8x16xbf16> to vector<4x4x8x16xbf16>
    %43 = vector.shape_cast %42 : vector<4x4x8x16xbf16> to vector<128x16xbf16>
    %44 = vector.extract_strided_slice %25 {offsets = [0, 2, 0, 0], sizes = [1, 1, 16, 32], strides = [1, 1, 1, 1]} : vector<3x3x16x32xbf16> to vector<1x1x16x32xbf16>
    %45 = vector.shape_cast %44 : vector<1x1x16x32xbf16> to vector<16x32xbf16>
    %cst_36 = arith.constant dense<0.000000e+00> : vector<128x32xf32>
    %46 = tpu.matmul %43, %45, %cst_36 {dimension_numbers = #tpu.dot_dimension_numbers<[1], [0], [0], [1], [0, 0, 1, 1], [], []>} : vector<128x16xbf16>, vector<16x32xbf16>, vector<128x32xf32> -> vector<128x32xf32>
    %47 = arith.addf %40, %46 : vector<128x32xf32>
    %c1_37 = arith.constant 1 : index
    %c1_38 = arith.constant 1 : index
    %c0_39 = arith.constant 0 : index
    %c0_40 = arith.constant 0 : index
    %c0_41 = arith.constant 0 : index
    %48 = vector.load %arg12[%c1_37, %c1_38, %c0_39, %c0_40, %c0_41] : memref<4x6x6x8x16xbf16, #tpu.memory_space<vmem>>, vector<1x4x4x8x16xbf16>
    %49 = vector.shape_cast %48 : vector<1x4x4x8x16xbf16> to vector<4x4x8x16xbf16>
    %50 = vector.shape_cast %49 : vector<4x4x8x16xbf16> to vector<128x16xbf16>
    %51 = vector.extract_strided_slice %25 {offsets = [1, 0, 0, 0], sizes = [1, 1, 16, 32], strides = [1, 1, 1, 1]} : vector<3x3x16x32xbf16> to vector<1x1x16x32xbf16>
    %52 = vector.shape_cast %51 : vector<1x1x16x32xbf16> to vector<16x32xbf16>
    %cst_42 = arith.constant dense<0.000000e+00> : vector<128x32xf32>
    %53 = tpu.matmul %50, %52, %cst_42 {dimension_numbers = #tpu.dot_dimension_numbers<[1], [0], [0], [1], [0, 0, 1, 1], [], []>} : vector<128x16xbf16>, vector<16x32xbf16>, vector<128x32xf32> -> vector<128x32xf32>
    %54 = arith.addf %47, %53 : vector<128x32xf32>
    %c0_43 = arith.constant 0 : index
    %c1_44 = arith.constant 1 : index
    %c1_45 = arith.constant 1 : index
    %c0_46 = arith.constant 0 : index
    %c0_47 = arith.constant 0 : index
    %55 = vector.load %arg12[%c0_43, %c1_44, %c1_45, %c0_46, %c0_47] : memref<4x6x6x8x16xbf16, #tpu.memory_space<vmem>>, vector<1x4x4x8x16xbf16>
    %56 = vector.shape_cast %55 : vector<1x4x4x8x16xbf16> to vector<4x4x8x16xbf16>
    %57 = vector.shape_cast %56 : vector<4x4x8x16xbf16> to vector<128x16xbf16>
    %58 = vector.extract_strided_slice %25 {offsets = [1, 1, 0, 0], sizes = [1, 1, 16, 32], strides = [1, 1, 1, 1]} : vector<3x3x16x32xbf16> to vector<1x1x16x32xbf16>
    %59 = vector.shape_cast %58 : vector<1x1x16x32xbf16> to vector<16x32xbf16>
    %cst_48 = arith.constant dense<0.000000e+00> : vector<128x32xf32>
    %60 = tpu.matmul %57, %59, %cst_48 {dimension_numbers = #tpu.dot_dimension_numbers<[1], [0], [0], [1], [0, 0, 1, 1], [], []>} : vector<128x16xbf16>, vector<16x32xbf16>, vector<128x32xf32> -> vector<128x32xf32>
    %61 = arith.addf %54, %60 : vector<128x32xf32>
    %c1_49 = arith.constant 1 : index
    %c1_50 = arith.constant 1 : index
    %c1_51 = arith.constant 1 : index
    %c0_52 = arith.constant 0 : index
    %c0_53 = arith.constant 0 : index
    %62 = vector.load %arg12[%c1_49, %c1_50, %c1_51, %c0_52, %c0_53] : memref<4x6x6x8x16xbf16, #tpu.memory_space<vmem>>, vector<1x4x4x8x16xbf16>
    %63 = vector.shape_cast %62 : vector<1x4x4x8x16xbf16> to vector<4x4x8x16xbf16>
    %64 = vector.shape_cast %63 : vector<4x4x8x16xbf16> to vector<128x16xbf16>
    %65 = vector.extract_strided_slice %25 {offsets = [1, 2, 0, 0], sizes = [1, 1, 16, 32], strides = [1, 1, 1, 1]} : vector<3x3x16x32xbf16> to vector<1x1x16x32xbf16>
    %66 = vector.shape_cast %65 : vector<1x1x16x32xbf16> to vector<16x32xbf16>
    %cst_54 = arith.constant dense<0.000000e+00> : vector<128x32xf32>
    %67 = tpu.matmul %64, %66, %cst_54 {dimension_numbers = #tpu.dot_dimension_numbers<[1], [0], [0], [1], [0, 0, 1, 1], [], []>} : vector<128x16xbf16>, vector<16x32xbf16>, vector<128x32xf32> -> vector<128x32xf32>
    %68 = arith.addf %61, %67 : vector<128x32xf32>
    %c3_55 = arith.constant 3 : index
    %c1_56 = arith.constant 1 : index
    %c0_57 = arith.constant 0 : index
    %c0_58 = arith.constant 0 : index
    %c0_59 = arith.constant 0 : index
    %69 = vector.load %arg12[%c3_55, %c1_56, %c0_57, %c0_58, %c0_59] : memref<4x6x6x8x16xbf16, #tpu.memory_space<vmem>>, vector<1x4x4x8x16xbf16>
    %70 = vector.shape_cast %69 : vector<1x4x4x8x16xbf16> to vector<4x4x8x16xbf16>
    %71 = vector.shape_cast %70 : vector<4x4x8x16xbf16> to vector<128x16xbf16>
    %72 = vector.extract_strided_slice %25 {offsets = [2, 0, 0, 0], sizes = [1, 1, 16, 32], strides = [1, 1, 1, 1]} : vector<3x3x16x32xbf16> to vector<1x1x16x32xbf16>
    %73 = vector.shape_cast %72 : vector<1x1x16x32xbf16> to vector<16x32xbf16>
    %cst_60 = arith.constant dense<0.000000e+00> : vector<128x32xf32>
    %74 = tpu.matmul %71, %73, %cst_60 {dimension_numbers = #tpu.dot_dimension_numbers<[1], [0], [0], [1], [0, 0, 1, 1], [], []>} : vector<128x16xbf16>, vector<16x32xbf16>, vector<128x32xf32> -> vector<128x32xf32>
    %75 = arith.addf %68, %74 : vector<128x32xf32>
    %c2_61 = arith.constant 2 : index
    %c1_62 = arith.constant 1 : index
    %c1_63 = arith.constant 1 : index
    %c0_64 = arith.constant 0 : index
    %c0_65 = arith.constant 0 : index
    %76 = vector.load %arg12[%c2_61, %c1_62, %c1_63, %c0_64, %c0_65] : memref<4x6x6x8x16xbf16, #tpu.memory_space<vmem>>, vector<1x4x4x8x16xbf16>
    %77 = vector.shape_cast %76 : vector<1x4x4x8x16xbf16> to vector<4x4x8x16xbf16>
    %78 = vector.shape_cast %77 : vector<4x4x8x16xbf16> to vector<128x16xbf16>
    %79 = vector.extract_strided_slice %25 {offsets = [2, 1, 0, 0], sizes = [1, 1, 16, 32], strides = [1, 1, 1, 1]} : vector<3x3x16x32xbf16> to vector<1x1x16x32xbf16>
    %80 = vector.shape_cast %79 : vector<1x1x16x32xbf16> to vector<16x32xbf16>
    %cst_66 = arith.constant dense<0.000000e+00> : vector<128x32xf32>
    %81 = tpu.matmul %78, %80, %cst_66 {dimension_numbers = #tpu.dot_dimension_numbers<[1], [0], [0], [1], [0, 0, 1, 1], [], []>} : vector<128x16xbf16>, vector<16x32xbf16>, vector<128x32xf32> -> vector<128x32xf32>
    %82 = arith.addf %75, %81 : vector<128x32xf32>
    %c3_67 = arith.constant 3 : index
    %c1_68 = arith.constant 1 : index
    %c1_69 = arith.constant 1 : index
    %c0_70 = arith.constant 0 : index
    %c0_71 = arith.constant 0 : index
    %83 = vector.load %arg12[%c3_67, %c1_68, %c1_69, %c0_70, %c0_71] : memref<4x6x6x8x16xbf16, #tpu.memory_space<vmem>>, vector<1x4x4x8x16xbf16>
    %84 = vector.shape_cast %83 : vector<1x4x4x8x16xbf16> to vector<4x4x8x16xbf16>
    %85 = vector.shape_cast %84 : vector<4x4x8x16xbf16> to vector<128x16xbf16>
    %86 = vector.extract_strided_slice %25 {offsets = [2, 2, 0, 0], sizes = [1, 1, 16, 32], strides = [1, 1, 1, 1]} : vector<3x3x16x32xbf16> to vector<1x1x16x32xbf16>
    %87 = vector.shape_cast %86 : vector<1x1x16x32xbf16> to vector<16x32xbf16>
    %cst_72 = arith.constant dense<0.000000e+00> : vector<128x32xf32>
    %88 = tpu.matmul %85, %87, %cst_72 {dimension_numbers = #tpu.dot_dimension_numbers<[1], [0], [0], [1], [0, 0, 1, 1], [], []>} : vector<128x16xbf16>, vector<16x32xbf16>, vector<128x32xf32> -> vector<128x32xf32>
    %89 = arith.addf %82, %88 : vector<128x32xf32>
    %c0_73 = arith.constant 0 : index
    %c0_74 = arith.constant 0 : index
    %90 = vector.load %arg4[%c0_73, %c0_74] : memref<1x32xf32, #tpu.memory_space<vmem>>, vector<1x32xf32>
    %91 = vector.broadcast %90 : vector<1x32xf32> to vector<128x32xf32>
    %92 = arith.addf %89, %91 : vector<128x32xf32>
    %cst_75 = arith.constant 0.000000e+00 : f32
    %93 = vector.broadcast %cst_75 : f32 to vector<128x32xf32>
    %94 = arith.maximumf %92, %93 : vector<128x32xf32>
    %95 = arith.truncf %94 : vector<128x32xf32> to vector<128x32xbf16>
    %cst_76 = arith.constant 0.000000e+00 : f32
    %96 = vector.broadcast %cst_76 : f32 to vector<128x32xf32>
    %c2_77 = arith.constant 2 : index
    %c0_78 = arith.constant 0 : index
    %c1_79 = arith.constant 1 : index
    %c0_80 = arith.constant 0 : index
    %c0_81 = arith.constant 0 : index
    %97 = vector.load %arg12[%c2_77, %c0_78, %c1_79, %c0_80, %c0_81] : memref<4x6x6x8x16xbf16, #tpu.memory_space<vmem>>, vector<1x4x4x8x16xbf16>
    %98 = vector.shape_cast %97 : vector<1x4x4x8x16xbf16> to vector<4x4x8x16xbf16>
    %99 = vector.shape_cast %98 : vector<4x4x8x16xbf16> to vector<128x16xbf16>
    %100 = vector.extract_strided_slice %25 {offsets = [0, 0, 0, 0], sizes = [1, 1, 16, 32], strides = [1, 1, 1, 1]} : vector<3x3x16x32xbf16> to vector<1x1x16x32xbf16>
    %101 = vector.shape_cast %100 : vector<1x1x16x32xbf16> to vector<16x32xbf16>
    %cst_82 = arith.constant dense<0.000000e+00> : vector<128x32xf32>
    %102 = tpu.matmul %99, %101, %cst_82 {dimension_numbers = #tpu.dot_dimension_numbers<[1], [0], [0], [1], [0, 0, 1, 1], [], []>} : vector<128x16xbf16>, vector<16x32xbf16>, vector<128x32xf32> -> vector<128x32xf32>
    %103 = arith.addf %96, %102 : vector<128x32xf32>
    %c3_83 = arith.constant 3 : index
    %c0_84 = arith.constant 0 : index
    %c1_85 = arith.constant 1 : index
    %c0_86 = arith.constant 0 : index
    %c0_87 = arith.constant 0 : index
    %104 = vector.load %arg12[%c3_83, %c0_84, %c1_85, %c0_86, %c0_87] : memref<4x6x6x8x16xbf16, #tpu.memory_space<vmem>>, vector<1x4x4x8x16xbf16>
    %105 = vector.shape_cast %104 : vector<1x4x4x8x16xbf16> to vector<4x4x8x16xbf16>
    %106 = vector.shape_cast %105 : vector<4x4x8x16xbf16> to vector<128x16xbf16>
    %107 = vector.extract_strided_slice %25 {offsets = [0, 1, 0, 0], sizes = [1, 1, 16, 32], strides = [1, 1, 1, 1]} : vector<3x3x16x32xbf16> to vector<1x1x16x32xbf16>
    %108 = vector.shape_cast %107 : vector<1x1x16x32xbf16> to vector<16x32xbf16>
    %cst_88 = arith.constant dense<0.000000e+00> : vector<128x32xf32>
    %109 = tpu.matmul %106, %108, %cst_88 {dimension_numbers = #tpu.dot_dimension_numbers<[1], [0], [0], [1], [0, 0, 1, 1], [], []>} : vector<128x16xbf16>, vector<16x32xbf16>, vector<128x32xf32> -> vector<128x32xf32>
    %110 = arith.addf %103, %109 : vector<128x32xf32>
    %c2_89 = arith.constant 2 : index
    %c0_90 = arith.constant 0 : index
    %c2_91 = arith.constant 2 : index
    %c0_92 = arith.constant 0 : index
    %c0_93 = arith.constant 0 : index
    %111 = vector.load %arg12[%c2_89, %c0_90, %c2_91, %c0_92, %c0_93] : memref<4x6x6x8x16xbf16, #tpu.memory_space<vmem>>, vector<1x4x4x8x16xbf16>
    %112 = vector.shape_cast %111 : vector<1x4x4x8x16xbf16> to vector<4x4x8x16xbf16>
    %113 = vector.shape_cast %112 : vector<4x4x8x16xbf16> to vector<128x16xbf16>
    %114 = vector.extract_strided_slice %25 {offsets = [0, 2, 0, 0], sizes = [1, 1, 16, 32], strides = [1, 1, 1, 1]} : vector<3x3x16x32xbf16> to vector<1x1x16x32xbf16>
    %115 = vector.shape_cast %114 : vector<1x1x16x32xbf16> to vector<16x32xbf16>
    %cst_94 = arith.constant dense<0.000000e+00> : vector<128x32xf32>
    %116 = tpu.matmul %113, %115, %cst_94 {dimension_numbers = #tpu.dot_dimension_numbers<[1], [0], [0], [1], [0, 0, 1, 1], [], []>} : vector<128x16xbf16>, vector<16x32xbf16>, vector<128x32xf32> -> vector<128x32xf32>
    %117 = arith.addf %110, %116 : vector<128x32xf32>
    %c0_95 = arith.constant 0 : index
    %c1_96 = arith.constant 1 : index
    %c1_97 = arith.constant 1 : index
    %c0_98 = arith.constant 0 : index
    %c0_99 = arith.constant 0 : index
    %118 = vector.load %arg12[%c0_95, %c1_96, %c1_97, %c0_98, %c0_99] : memref<4x6x6x8x16xbf16, #tpu.memory_space<vmem>>, vector<1x4x4x8x16xbf16>
    %119 = vector.shape_cast %118 : vector<1x4x4x8x16xbf16> to vector<4x4x8x16xbf16>
    %120 = vector.shape_cast %119 : vector<4x4x8x16xbf16> to vector<128x16xbf16>
    %121 = vector.extract_strided_slice %25 {offsets = [1, 0, 0, 0], sizes = [1, 1, 16, 32], strides = [1, 1, 1, 1]} : vector<3x3x16x32xbf16> to vector<1x1x16x32xbf16>
    %122 = vector.shape_cast %121 : vector<1x1x16x32xbf16> to vector<16x32xbf16>
    %cst_100 = arith.constant dense<0.000000e+00> : vector<128x32xf32>
    %123 = tpu.matmul %120, %122, %cst_100 {dimension_numbers = #tpu.dot_dimension_numbers<[1], [0], [0], [1], [0, 0, 1, 1], [], []>} : vector<128x16xbf16>, vector<16x32xbf16>, vector<128x32xf32> -> vector<128x32xf32>
    %124 = arith.addf %117, %123 : vector<128x32xf32>
    %c1_101 = arith.constant 1 : index
    %c1_102 = arith.constant 1 : index
    %c1_103 = arith.constant 1 : index
    %c0_104 = arith.constant 0 : index
    %c0_105 = arith.constant 0 : index
    %125 = vector.load %arg12[%c1_101, %c1_102, %c1_103, %c0_104, %c0_105] : memref<4x6x6x8x16xbf16, #tpu.memory_space<vmem>>, vector<1x4x4x8x16xbf16>
    %126 = vector.shape_cast %125 : vector<1x4x4x8x16xbf16> to vector<4x4x8x16xbf16>
    %127 = vector.shape_cast %126 : vector<4x4x8x16xbf16> to vector<128x16xbf16>
    %128 = vector.extract_strided_slice %25 {offsets = [1, 1, 0, 0], sizes = [1, 1, 16, 32], strides = [1, 1, 1, 1]} : vector<3x3x16x32xbf16> to vector<1x1x16x32xbf16>
    %129 = vector.shape_cast %128 : vector<1x1x16x32xbf16> to vector<16x32xbf16>
    %cst_106 = arith.constant dense<0.000000e+00> : vector<128x32xf32>
    %130 = tpu.matmul %127, %129, %cst_106 {dimension_numbers = #tpu.dot_dimension_numbers<[1], [0], [0], [1], [0, 0, 1, 1], [], []>} : vector<128x16xbf16>, vector<16x32xbf16>, vector<128x32xf32> -> vector<128x32xf32>
    %131 = arith.addf %124, %130 : vector<128x32xf32>
    %c0_107 = arith.constant 0 : index
    %c1_108 = arith.constant 1 : index
    %c2_109 = arith.constant 2 : index
    %c0_110 = arith.constant 0 : index
    %c0_111 = arith.constant 0 : index
    %132 = vector.load %arg12[%c0_107, %c1_108, %c2_109, %c0_110, %c0_111] : memref<4x6x6x8x16xbf16, #tpu.memory_space<vmem>>, vector<1x4x4x8x16xbf16>
    %133 = vector.shape_cast %132 : vector<1x4x4x8x16xbf16> to vector<4x4x8x16xbf16>
    %134 = vector.shape_cast %133 : vector<4x4x8x16xbf16> to vector<128x16xbf16>
    %135 = vector.extract_strided_slice %25 {offsets = [1, 2, 0, 0], sizes = [1, 1, 16, 32], strides = [1, 1, 1, 1]} : vector<3x3x16x32xbf16> to vector<1x1x16x32xbf16>
    %136 = vector.shape_cast %135 : vector<1x1x16x32xbf16> to vector<16x32xbf16>
    %cst_112 = arith.constant dense<0.000000e+00> : vector<128x32xf32>
    %137 = tpu.matmul %134, %136, %cst_112 {dimension_numbers = #tpu.dot_dimension_numbers<[1], [0], [0], [1], [0, 0, 1, 1], [], []>} : vector<128x16xbf16>, vector<16x32xbf16>, vector<128x32xf32> -> vector<128x32xf32>
    %138 = arith.addf %131, %137 : vector<128x32xf32>
    %c2_113 = arith.constant 2 : index
    %c1_114 = arith.constant 1 : index
    %c1_115 = arith.constant 1 : index
    %c0_116 = arith.constant 0 : index
    %c0_117 = arith.constant 0 : index
    %139 = vector.load %arg12[%c2_113, %c1_114, %c1_115, %c0_116, %c0_117] : memref<4x6x6x8x16xbf16, #tpu.memory_space<vmem>>, vector<1x4x4x8x16xbf16>
    %140 = vector.shape_cast %139 : vector<1x4x4x8x16xbf16> to vector<4x4x8x16xbf16>
    %141 = vector.shape_cast %140 : vector<4x4x8x16xbf16> to vector<128x16xbf16>
    %142 = vector.extract_strided_slice %25 {offsets = [2, 0, 0, 0], sizes = [1, 1, 16, 32], strides = [1, 1, 1, 1]} : vector<3x3x16x32xbf16> to vector<1x1x16x32xbf16>
    %143 = vector.shape_cast %142 : vector<1x1x16x32xbf16> to vector<16x32xbf16>
    %cst_118 = arith.constant dense<0.000000e+00> : vector<128x32xf32>
    %144 = tpu.matmul %141, %143, %cst_118 {dimension_numbers = #tpu.dot_dimension_numbers<[1], [0], [0], [1], [0, 0, 1, 1], [], []>} : vector<128x16xbf16>, vector<16x32xbf16>, vector<128x32xf32> -> vector<128x32xf32>
    %145 = arith.addf %138, %144 : vector<128x32xf32>
    %c3_119 = arith.constant 3 : index
    %c1_120 = arith.constant 1 : index
    %c1_121 = arith.constant 1 : index
    %c0_122 = arith.constant 0 : index
    %c0_123 = arith.constant 0 : index
    %146 = vector.load %arg12[%c3_119, %c1_120, %c1_121, %c0_122, %c0_123] : memref<4x6x6x8x16xbf16, #tpu.memory_space<vmem>>, vector<1x4x4x8x16xbf16>
    %147 = vector.shape_cast %146 : vector<1x4x4x8x16xbf16> to vector<4x4x8x16xbf16>
    %148 = vector.shape_cast %147 : vector<4x4x8x16xbf16> to vector<128x16xbf16>
    %149 = vector.extract_strided_slice %25 {offsets = [2, 1, 0, 0], sizes = [1, 1, 16, 32], strides = [1, 1, 1, 1]} : vector<3x3x16x32xbf16> to vector<1x1x16x32xbf16>
    %150 = vector.shape_cast %149 : vector<1x1x16x32xbf16> to vector<16x32xbf16>
    %cst_124 = arith.constant dense<0.000000e+00> : vector<128x32xf32>
    %151 = tpu.matmul %148, %150, %cst_124 {dimension_numbers = #tpu.dot_dimension_numbers<[1], [0], [0], [1], [0, 0, 1, 1], [], []>} : vector<128x16xbf16>, vector<16x32xbf16>, vector<128x32xf32> -> vector<128x32xf32>
    %152 = arith.addf %145, %151 : vector<128x32xf32>
    %c2_125 = arith.constant 2 : index
    %c1_126 = arith.constant 1 : index
    %c2_127 = arith.constant 2 : index
    %c0_128 = arith.constant 0 : index
    %c0_129 = arith.constant 0 : index
    %153 = vector.load %arg12[%c2_125, %c1_126, %c2_127, %c0_128, %c0_129] : memref<4x6x6x8x16xbf16, #tpu.memory_space<vmem>>, vector<1x4x4x8x16xbf16>
    %154 = vector.shape_cast %153 : vector<1x4x4x8x16xbf16> to vector<4x4x8x16xbf16>
    %155 = vector.shape_cast %154 : vector<4x4x8x16xbf16> to vector<128x16xbf16>
    %156 = vector.extract_strided_slice %25 {offsets = [2, 2, 0, 0], sizes = [1, 1, 16, 32], strides = [1, 1, 1, 1]} : vector<3x3x16x32xbf16> to vector<1x1x16x32xbf16>
    %157 = vector.shape_cast %156 : vector<1x1x16x32xbf16> to vector<16x32xbf16>
    %cst_130 = arith.constant dense<0.000000e+00> : vector<128x32xf32>
    %158 = tpu.matmul %155, %157, %cst_130 {dimension_numbers = #tpu.dot_dimension_numbers<[1], [0], [0], [1], [0, 0, 1, 1], [], []>} : vector<128x16xbf16>, vector<16x32xbf16>, vector<128x32xf32> -> vector<128x32xf32>
    %159 = arith.addf %152, %158 : vector<128x32xf32>
    %c0_131 = arith.constant 0 : index
    %c0_132 = arith.constant 0 : index
    %160 = vector.load %arg4[%c0_131, %c0_132] : memref<1x32xf32, #tpu.memory_space<vmem>>, vector<1x32xf32>
    %161 = vector.broadcast %160 : vector<1x32xf32> to vector<128x32xf32>
    %162 = arith.addf %159, %161 : vector<128x32xf32>
    %cst_133 = arith.constant 0.000000e+00 : f32
    %163 = vector.broadcast %cst_133 : f32 to vector<128x32xf32>
    %164 = arith.maximumf %162, %163 : vector<128x32xf32>
    %165 = arith.truncf %164 : vector<128x32xf32> to vector<128x32xbf16>
    %166 = arith.maximumf %95, %165 : vector<128x32xbf16>
    %cst_134 = arith.constant 0.000000e+00 : f32
    %167 = vector.broadcast %cst_134 : f32 to vector<128x32xf32>
    %c1_135 = arith.constant 1 : index
    %c1_136 = arith.constant 1 : index
    %c0_137 = arith.constant 0 : index
    %c0_138 = arith.constant 0 : index
    %c0_139 = arith.constant 0 : index
    %168 = vector.load %arg12[%c1_135, %c1_136, %c0_137, %c0_138, %c0_139] : memref<4x6x6x8x16xbf16, #tpu.memory_space<vmem>>, vector<1x4x4x8x16xbf16>
    %169 = vector.shape_cast %168 : vector<1x4x4x8x16xbf16> to vector<4x4x8x16xbf16>
    %170 = vector.shape_cast %169 : vector<4x4x8x16xbf16> to vector<128x16xbf16>
    %171 = vector.extract_strided_slice %25 {offsets = [0, 0, 0, 0], sizes = [1, 1, 16, 32], strides = [1, 1, 1, 1]} : vector<3x3x16x32xbf16> to vector<1x1x16x32xbf16>
    %172 = vector.shape_cast %171 : vector<1x1x16x32xbf16> to vector<16x32xbf16>
    %cst_140 = arith.constant dense<0.000000e+00> : vector<128x32xf32>
    %173 = tpu.matmul %170, %172, %cst_140 {dimension_numbers = #tpu.dot_dimension_numbers<[1], [0], [0], [1], [0, 0, 1, 1], [], []>} : vector<128x16xbf16>, vector<16x32xbf16>, vector<128x32xf32> -> vector<128x32xf32>
    %174 = arith.addf %167, %173 : vector<128x32xf32>
    %c0_141 = arith.constant 0 : index
    %c1_142 = arith.constant 1 : index
    %c1_143 = arith.constant 1 : index
    %c0_144 = arith.constant 0 : index
    %c0_145 = arith.constant 0 : index
    %175 = vector.load %arg12[%c0_141, %c1_142, %c1_143, %c0_144, %c0_145] : memref<4x6x6x8x16xbf16, #tpu.memory_space<vmem>>, vector<1x4x4x8x16xbf16>
    %176 = vector.shape_cast %175 : vector<1x4x4x8x16xbf16> to vector<4x4x8x16xbf16>
    %177 = vector.shape_cast %176 : vector<4x4x8x16xbf16> to vector<128x16xbf16>
    %178 = vector.extract_strided_slice %25 {offsets = [0, 1, 0, 0], sizes = [1, 1, 16, 32], strides = [1, 1, 1, 1]} : vector<3x3x16x32xbf16> to vector<1x1x16x32xbf16>
    %179 = vector.shape_cast %178 : vector<1x1x16x32xbf16> to vector<16x32xbf16>
    %cst_146 = arith.constant dense<0.000000e+00> : vector<128x32xf32>
    %180 = tpu.matmul %177, %179, %cst_146 {dimension_numbers = #tpu.dot_dimension_numbers<[1], [0], [0], [1], [0, 0, 1, 1], [], []>} : vector<128x16xbf16>, vector<16x32xbf16>, vector<128x32xf32> -> vector<128x32xf32>
    %181 = arith.addf %174, %180 : vector<128x32xf32>
    %c1_147 = arith.constant 1 : index
    %c1_148 = arith.constant 1 : index
    %c1_149 = arith.constant 1 : index
    %c0_150 = arith.constant 0 : index
    %c0_151 = arith.constant 0 : index
    %182 = vector.load %arg12[%c1_147, %c1_148, %c1_149, %c0_150, %c0_151] : memref<4x6x6x8x16xbf16, #tpu.memory_space<vmem>>, vector<1x4x4x8x16xbf16>
    %183 = vector.shape_cast %182 : vector<1x4x4x8x16xbf16> to vector<4x4x8x16xbf16>
    %184 = vector.shape_cast %183 : vector<4x4x8x16xbf16> to vector<128x16xbf16>
    %185 = vector.extract_strided_slice %25 {offsets = [0, 2, 0, 0], sizes = [1, 1, 16, 32], strides = [1, 1, 1, 1]} : vector<3x3x16x32xbf16> to vector<1x1x16x32xbf16>
    %186 = vector.shape_cast %185 : vector<1x1x16x32xbf16> to vector<16x32xbf16>
    %cst_152 = arith.constant dense<0.000000e+00> : vector<128x32xf32>
    %187 = tpu.matmul %184, %186, %cst_152 {dimension_numbers = #tpu.dot_dimension_numbers<[1], [0], [0], [1], [0, 0, 1, 1], [], []>} : vector<128x16xbf16>, vector<16x32xbf16>, vector<128x32xf32> -> vector<128x32xf32>
    %188 = arith.addf %181, %187 : vector<128x32xf32>
    %c3_153 = arith.constant 3 : index
    %c1_154 = arith.constant 1 : index
    %c0_155 = arith.constant 0 : index
    %c0_156 = arith.constant 0 : index
    %c0_157 = arith.constant 0 : index
    %189 = vector.load %arg12[%c3_153, %c1_154, %c0_155, %c0_156, %c0_157] : memref<4x6x6x8x16xbf16, #tpu.memory_space<vmem>>, vector<1x4x4x8x16xbf16>
    %190 = vector.shape_cast %189 : vector<1x4x4x8x16xbf16> to vector<4x4x8x16xbf16>
    %191 = vector.shape_cast %190 : vector<4x4x8x16xbf16> to vector<128x16xbf16>
    %192 = vector.extract_strided_slice %25 {offsets = [1, 0, 0, 0], sizes = [1, 1, 16, 32], strides = [1, 1, 1, 1]} : vector<3x3x16x32xbf16> to vector<1x1x16x32xbf16>
    %193 = vector.shape_cast %192 : vector<1x1x16x32xbf16> to vector<16x32xbf16>
    %cst_158 = arith.constant dense<0.000000e+00> : vector<128x32xf32>
    %194 = tpu.matmul %191, %193, %cst_158 {dimension_numbers = #tpu.dot_dimension_numbers<[1], [0], [0], [1], [0, 0, 1, 1], [], []>} : vector<128x16xbf16>, vector<16x32xbf16>, vector<128x32xf32> -> vector<128x32xf32>
    %195 = arith.addf %188, %194 : vector<128x32xf32>
    %c2_159 = arith.constant 2 : index
    %c1_160 = arith.constant 1 : index
    %c1_161 = arith.constant 1 : index
    %c0_162 = arith.constant 0 : index
    %c0_163 = arith.constant 0 : index
    %196 = vector.load %arg12[%c2_159, %c1_160, %c1_161, %c0_162, %c0_163] : memref<4x6x6x8x16xbf16, #tpu.memory_space<vmem>>, vector<1x4x4x8x16xbf16>
    %197 = vector.shape_cast %196 : vector<1x4x4x8x16xbf16> to vector<4x4x8x16xbf16>
    %198 = vector.shape_cast %197 : vector<4x4x8x16xbf16> to vector<128x16xbf16>
    %199 = vector.extract_strided_slice %25 {offsets = [1, 1, 0, 0], sizes = [1, 1, 16, 32], strides = [1, 1, 1, 1]} : vector<3x3x16x32xbf16> to vector<1x1x16x32xbf16>
    %200 = vector.shape_cast %199 : vector<1x1x16x32xbf16> to vector<16x32xbf16>
    %cst_164 = arith.constant dense<0.000000e+00> : vector<128x32xf32>
    %201 = tpu.matmul %198, %200, %cst_164 {dimension_numbers = #tpu.dot_dimension_numbers<[1], [0], [0], [1], [0, 0, 1, 1], [], []>} : vector<128x16xbf16>, vector<16x32xbf16>, vector<128x32xf32> -> vector<128x32xf32>
    %202 = arith.addf %195, %201 : vector<128x32xf32>
    %c3_165 = arith.constant 3 : index
    %c1_166 = arith.constant 1 : index
    %c1_167 = arith.constant 1 : index
    %c0_168 = arith.constant 0 : index
    %c0_169 = arith.constant 0 : index
    %203 = vector.load %arg12[%c3_165, %c1_166, %c1_167, %c0_168, %c0_169] : memref<4x6x6x8x16xbf16, #tpu.memory_space<vmem>>, vector<1x4x4x8x16xbf16>
    %204 = vector.shape_cast %203 : vector<1x4x4x8x16xbf16> to vector<4x4x8x16xbf16>
    %205 = vector.shape_cast %204 : vector<4x4x8x16xbf16> to vector<128x16xbf16>
    %206 = vector.extract_strided_slice %25 {offsets = [1, 2, 0, 0], sizes = [1, 1, 16, 32], strides = [1, 1, 1, 1]} : vector<3x3x16x32xbf16> to vector<1x1x16x32xbf16>
    %207 = vector.shape_cast %206 : vector<1x1x16x32xbf16> to vector<16x32xbf16>
    %cst_170 = arith.constant dense<0.000000e+00> : vector<128x32xf32>
    %208 = tpu.matmul %205, %207, %cst_170 {dimension_numbers = #tpu.dot_dimension_numbers<[1], [0], [0], [1], [0, 0, 1, 1], [], []>} : vector<128x16xbf16>, vector<16x32xbf16>, vector<128x32xf32> -> vector<128x32xf32>
    %209 = arith.addf %202, %208 : vector<128x32xf32>
    %c1_171 = arith.constant 1 : index
    %c2_172 = arith.constant 2 : index
    %c0_173 = arith.constant 0 : index
    %c0_174 = arith.constant 0 : index
    %c0_175 = arith.constant 0 : index
    %210 = vector.load %arg12[%c1_171, %c2_172, %c0_173, %c0_174, %c0_175] : memref<4x6x6x8x16xbf16, #tpu.memory_space<vmem>>, vector<1x4x4x8x16xbf16>
    %211 = vector.shape_cast %210 : vector<1x4x4x8x16xbf16> to vector<4x4x8x16xbf16>
    %212 = vector.shape_cast %211 : vector<4x4x8x16xbf16> to vector<128x16xbf16>
    %213 = vector.extract_strided_slice %25 {offsets = [2, 0, 0, 0], sizes = [1, 1, 16, 32], strides = [1, 1, 1, 1]} : vector<3x3x16x32xbf16> to vector<1x1x16x32xbf16>
    %214 = vector.shape_cast %213 : vector<1x1x16x32xbf16> to vector<16x32xbf16>
    %cst_176 = arith.constant dense<0.000000e+00> : vector<128x32xf32>
    %215 = tpu.matmul %212, %214, %cst_176 {dimension_numbers = #tpu.dot_dimension_numbers<[1], [0], [0], [1], [0, 0, 1, 1], [], []>} : vector<128x16xbf16>, vector<16x32xbf16>, vector<128x32xf32> -> vector<128x32xf32>
    %216 = arith.addf %209, %215 : vector<128x32xf32>
    %c0_177 = arith.constant 0 : index
    %c2_178 = arith.constant 2 : index
    %c1_179 = arith.constant 1 : index
    %c0_180 = arith.constant 0 : index
    %c0_181 = arith.constant 0 : index
    %217 = vector.load %arg12[%c0_177, %c2_178, %c1_179, %c0_180, %c0_181] : memref<4x6x6x8x16xbf16, #tpu.memory_space<vmem>>, vector<1x4x4x8x16xbf16>
    %218 = vector.shape_cast %217 : vector<1x4x4x8x16xbf16> to vector<4x4x8x16xbf16>
    %219 = vector.shape_cast %218 : vector<4x4x8x16xbf16> to vector<128x16xbf16>
    %220 = vector.extract_strided_slice %25 {offsets = [2, 1, 0, 0], sizes = [1, 1, 16, 32], strides = [1, 1, 1, 1]} : vector<3x3x16x32xbf16> to vector<1x1x16x32xbf16>
    %221 = vector.shape_cast %220 : vector<1x1x16x32xbf16> to vector<16x32xbf16>
    %cst_182 = arith.constant dense<0.000000e+00> : vector<128x32xf32>
    %222 = tpu.matmul %219, %221, %cst_182 {dimension_numbers = #tpu.dot_dimension_numbers<[1], [0], [0], [1], [0, 0, 1, 1], [], []>} : vector<128x16xbf16>, vector<16x32xbf16>, vector<128x32xf32> -> vector<128x32xf32>
    %223 = arith.addf %216, %222 : vector<128x32xf32>
    %c1_183 = arith.constant 1 : index
    %c2_184 = arith.constant 2 : index
    %c1_185 = arith.constant 1 : index
    %c0_186 = arith.constant 0 : index
    %c0_187 = arith.constant 0 : index
    %224 = vector.load %arg12[%c1_183, %c2_184, %c1_185, %c0_186, %c0_187] : memref<4x6x6x8x16xbf16, #tpu.memory_space<vmem>>, vector<1x4x4x8x16xbf16>
    %225 = vector.shape_cast %224 : vector<1x4x4x8x16xbf16> to vector<4x4x8x16xbf16>
    %226 = vector.shape_cast %225 : vector<4x4x8x16xbf16> to vector<128x16xbf16>
    %227 = vector.extract_strided_slice %25 {offsets = [2, 2, 0, 0], sizes = [1, 1, 16, 32], strides = [1, 1, 1, 1]} : vector<3x3x16x32xbf16> to vector<1x1x16x32xbf16>
    %228 = vector.shape_cast %227 : vector<1x1x16x32xbf16> to vector<16x32xbf16>
    %cst_188 = arith.constant dense<0.000000e+00> : vector<128x32xf32>
    %229 = tpu.matmul %226, %228, %cst_188 {dimension_numbers = #tpu.dot_dimension_numbers<[1], [0], [0], [1], [0, 0, 1, 1], [], []>} : vector<128x16xbf16>, vector<16x32xbf16>, vector<128x32xf32> -> vector<128x32xf32>
    %230 = arith.addf %223, %229 : vector<128x32xf32>
    %c0_189 = arith.constant 0 : index
    %c0_190 = arith.constant 0 : index
    %231 = vector.load %arg4[%c0_189, %c0_190] : memref<1x32xf32, #tpu.memory_space<vmem>>, vector<1x32xf32>
    %232 = vector.broadcast %231 : vector<1x32xf32> to vector<128x32xf32>
    %233 = arith.addf %230, %232 : vector<128x32xf32>
    %cst_191 = arith.constant 0.000000e+00 : f32
    %234 = vector.broadcast %cst_191 : f32 to vector<128x32xf32>
    %235 = arith.maximumf %233, %234 : vector<128x32xf32>
    %236 = arith.truncf %235 : vector<128x32xf32> to vector<128x32xbf16>
    %237 = arith.maximumf %166, %236 : vector<128x32xbf16>
    %cst_192 = arith.constant 0.000000e+00 : f32
    %238 = vector.broadcast %cst_192 : f32 to vector<128x32xf32>
    %c0_193 = arith.constant 0 : index
    %c1_194 = arith.constant 1 : index
    %c1_195 = arith.constant 1 : index
    %c0_196 = arith.constant 0 : index
    %c0_197 = arith.constant 0 : index
    %239 = vector.load %arg12[%c0_193, %c1_194, %c1_195, %c0_196, %c0_197] : memref<4x6x6x8x16xbf16, #tpu.memory_space<vmem>>, vector<1x4x4x8x16xbf16>
    %240 = vector.shape_cast %239 : vector<1x4x4x8x16xbf16> to vector<4x4x8x16xbf16>
    %241 = vector.shape_cast %240 : vector<4x4x8x16xbf16> to vector<128x16xbf16>
    %242 = vector.extract_strided_slice %25 {offsets = [0, 0, 0, 0], sizes = [1, 1, 16, 32], strides = [1, 1, 1, 1]} : vector<3x3x16x32xbf16> to vector<1x1x16x32xbf16>
    %243 = vector.shape_cast %242 : vector<1x1x16x32xbf16> to vector<16x32xbf16>
    %cst_198 = arith.constant dense<0.000000e+00> : vector<128x32xf32>
    %244 = tpu.matmul %241, %243, %cst_198 {dimension_numbers = #tpu.dot_dimension_numbers<[1], [0], [0], [1], [0, 0, 1, 1], [], []>} : vector<128x16xbf16>, vector<16x32xbf16>, vector<128x32xf32> -> vector<128x32xf32>
    %245 = arith.addf %238, %244 : vector<128x32xf32>
    %c1_199 = arith.constant 1 : index
    %c1_200 = arith.constant 1 : index
    %c1_201 = arith.constant 1 : index
    %c0_202 = arith.constant 0 : index
    %c0_203 = arith.constant 0 : index
    %246 = vector.load %arg12[%c1_199, %c1_200, %c1_201, %c0_202, %c0_203] : memref<4x6x6x8x16xbf16, #tpu.memory_space<vmem>>, vector<1x4x4x8x16xbf16>
    %247 = vector.shape_cast %246 : vector<1x4x4x8x16xbf16> to vector<4x4x8x16xbf16>
    %248 = vector.shape_cast %247 : vector<4x4x8x16xbf16> to vector<128x16xbf16>
    %249 = vector.extract_strided_slice %25 {offsets = [0, 1, 0, 0], sizes = [1, 1, 16, 32], strides = [1, 1, 1, 1]} : vector<3x3x16x32xbf16> to vector<1x1x16x32xbf16>
    %250 = vector.shape_cast %249 : vector<1x1x16x32xbf16> to vector<16x32xbf16>
    %cst_204 = arith.constant dense<0.000000e+00> : vector<128x32xf32>
    %251 = tpu.matmul %248, %250, %cst_204 {dimension_numbers = #tpu.dot_dimension_numbers<[1], [0], [0], [1], [0, 0, 1, 1], [], []>} : vector<128x16xbf16>, vector<16x32xbf16>, vector<128x32xf32> -> vector<128x32xf32>
    %252 = arith.addf %245, %251 : vector<128x32xf32>
    %c0_205 = arith.constant 0 : index
    %c1_206 = arith.constant 1 : index
    %c2_207 = arith.constant 2 : index
    %c0_208 = arith.constant 0 : index
    %c0_209 = arith.constant 0 : index
    %253 = vector.load %arg12[%c0_205, %c1_206, %c2_207, %c0_208, %c0_209] : memref<4x6x6x8x16xbf16, #tpu.memory_space<vmem>>, vector<1x4x4x8x16xbf16>
    %254 = vector.shape_cast %253 : vector<1x4x4x8x16xbf16> to vector<4x4x8x16xbf16>
    %255 = vector.shape_cast %254 : vector<4x4x8x16xbf16> to vector<128x16xbf16>
    %256 = vector.extract_strided_slice %25 {offsets = [0, 2, 0, 0], sizes = [1, 1, 16, 32], strides = [1, 1, 1, 1]} : vector<3x3x16x32xbf16> to vector<1x1x16x32xbf16>
    %257 = vector.shape_cast %256 : vector<1x1x16x32xbf16> to vector<16x32xbf16>
    %cst_210 = arith.constant dense<0.000000e+00> : vector<128x32xf32>
    %258 = tpu.matmul %255, %257, %cst_210 {dimension_numbers = #tpu.dot_dimension_numbers<[1], [0], [0], [1], [0, 0, 1, 1], [], []>} : vector<128x16xbf16>, vector<16x32xbf16>, vector<128x32xf32> -> vector<128x32xf32>
    %259 = arith.addf %252, %258 : vector<128x32xf32>
    %c2_211 = arith.constant 2 : index
    %c1_212 = arith.constant 1 : index
    %c1_213 = arith.constant 1 : index
    %c0_214 = arith.constant 0 : index
    %c0_215 = arith.constant 0 : index
    %260 = vector.load %arg12[%c2_211, %c1_212, %c1_213, %c0_214, %c0_215] : memref<4x6x6x8x16xbf16, #tpu.memory_space<vmem>>, vector<1x4x4x8x16xbf16>
    %261 = vector.shape_cast %260 : vector<1x4x4x8x16xbf16> to vector<4x4x8x16xbf16>
    %262 = vector.shape_cast %261 : vector<4x4x8x16xbf16> to vector<128x16xbf16>
    %263 = vector.extract_strided_slice %25 {offsets = [1, 0, 0, 0], sizes = [1, 1, 16, 32], strides = [1, 1, 1, 1]} : vector<3x3x16x32xbf16> to vector<1x1x16x32xbf16>
    %264 = vector.shape_cast %263 : vector<1x1x16x32xbf16> to vector<16x32xbf16>
    %cst_216 = arith.constant dense<0.000000e+00> : vector<128x32xf32>
    %265 = tpu.matmul %262, %264, %cst_216 {dimension_numbers = #tpu.dot_dimension_numbers<[1], [0], [0], [1], [0, 0, 1, 1], [], []>} : vector<128x16xbf16>, vector<16x32xbf16>, vector<128x32xf32> -> vector<128x32xf32>
    %266 = arith.addf %259, %265 : vector<128x32xf32>
    %c3_217 = arith.constant 3 : index
    %c1_218 = arith.constant 1 : index
    %c1_219 = arith.constant 1 : index
    %c0_220 = arith.constant 0 : index
    %c0_221 = arith.constant 0 : index
    %267 = vector.load %arg12[%c3_217, %c1_218, %c1_219, %c0_220, %c0_221] : memref<4x6x6x8x16xbf16, #tpu.memory_space<vmem>>, vector<1x4x4x8x16xbf16>
    %268 = vector.shape_cast %267 : vector<1x4x4x8x16xbf16> to vector<4x4x8x16xbf16>
    %269 = vector.shape_cast %268 : vector<4x4x8x16xbf16> to vector<128x16xbf16>
    %270 = vector.extract_strided_slice %25 {offsets = [1, 1, 0, 0], sizes = [1, 1, 16, 32], strides = [1, 1, 1, 1]} : vector<3x3x16x32xbf16> to vector<1x1x16x32xbf16>
    %271 = vector.shape_cast %270 : vector<1x1x16x32xbf16> to vector<16x32xbf16>
    %cst_222 = arith.constant dense<0.000000e+00> : vector<128x32xf32>
    %272 = tpu.matmul %269, %271, %cst_222 {dimension_numbers = #tpu.dot_dimension_numbers<[1], [0], [0], [1], [0, 0, 1, 1], [], []>} : vector<128x16xbf16>, vector<16x32xbf16>, vector<128x32xf32> -> vector<128x32xf32>
    %273 = arith.addf %266, %272 : vector<128x32xf32>
    %c2_223 = arith.constant 2 : index
    %c1_224 = arith.constant 1 : index
    %c2_225 = arith.constant 2 : index
    %c0_226 = arith.constant 0 : index
    %c0_227 = arith.constant 0 : index
    %274 = vector.load %arg12[%c2_223, %c1_224, %c2_225, %c0_226, %c0_227] : memref<4x6x6x8x16xbf16, #tpu.memory_space<vmem>>, vector<1x4x4x8x16xbf16>
    %275 = vector.shape_cast %274 : vector<1x4x4x8x16xbf16> to vector<4x4x8x16xbf16>
    %276 = vector.shape_cast %275 : vector<4x4x8x16xbf16> to vector<128x16xbf16>
    %277 = vector.extract_strided_slice %25 {offsets = [1, 2, 0, 0], sizes = [1, 1, 16, 32], strides = [1, 1, 1, 1]} : vector<3x3x16x32xbf16> to vector<1x1x16x32xbf16>
    %278 = vector.shape_cast %277 : vector<1x1x16x32xbf16> to vector<16x32xbf16>
    %cst_228 = arith.constant dense<0.000000e+00> : vector<128x32xf32>
    %279 = tpu.matmul %276, %278, %cst_228 {dimension_numbers = #tpu.dot_dimension_numbers<[1], [0], [0], [1], [0, 0, 1, 1], [], []>} : vector<128x16xbf16>, vector<16x32xbf16>, vector<128x32xf32> -> vector<128x32xf32>
    %280 = arith.addf %273, %279 : vector<128x32xf32>
    %c0_229 = arith.constant 0 : index
    %c2_230 = arith.constant 2 : index
    %c1_231 = arith.constant 1 : index
    %c0_232 = arith.constant 0 : index
    %c0_233 = arith.constant 0 : index
    %281 = vector.load %arg12[%c0_229, %c2_230, %c1_231, %c0_232, %c0_233] : memref<4x6x6x8x16xbf16, #tpu.memory_space<vmem>>, vector<1x4x4x8x16xbf16>
    %282 = vector.shape_cast %281 : vector<1x4x4x8x16xbf16> to vector<4x4x8x16xbf16>
    %283 = vector.shape_cast %282 : vector<4x4x8x16xbf16> to vector<128x16xbf16>
    %284 = vector.extract_strided_slice %25 {offsets = [2, 0, 0, 0], sizes = [1, 1, 16, 32], strides = [1, 1, 1, 1]} : vector<3x3x16x32xbf16> to vector<1x1x16x32xbf16>
    %285 = vector.shape_cast %284 : vector<1x1x16x32xbf16> to vector<16x32xbf16>
    %cst_234 = arith.constant dense<0.000000e+00> : vector<128x32xf32>
    %286 = tpu.matmul %283, %285, %cst_234 {dimension_numbers = #tpu.dot_dimension_numbers<[1], [0], [0], [1], [0, 0, 1, 1], [], []>} : vector<128x16xbf16>, vector<16x32xbf16>, vector<128x32xf32> -> vector<128x32xf32>
    %287 = arith.addf %280, %286 : vector<128x32xf32>
    %c1_235 = arith.constant 1 : index
    %c2_236 = arith.constant 2 : index
    %c1_237 = arith.constant 1 : index
    %c0_238 = arith.constant 0 : index
    %c0_239 = arith.constant 0 : index
    %288 = vector.load %arg12[%c1_235, %c2_236, %c1_237, %c0_238, %c0_239] : memref<4x6x6x8x16xbf16, #tpu.memory_space<vmem>>, vector<1x4x4x8x16xbf16>
    %289 = vector.shape_cast %288 : vector<1x4x4x8x16xbf16> to vector<4x4x8x16xbf16>
    %290 = vector.shape_cast %289 : vector<4x4x8x16xbf16> to vector<128x16xbf16>
    %291 = vector.extract_strided_slice %25 {offsets = [2, 1, 0, 0], sizes = [1, 1, 16, 32], strides = [1, 1, 1, 1]} : vector<3x3x16x32xbf16> to vector<1x1x16x32xbf16>
    %292 = vector.shape_cast %291 : vector<1x1x16x32xbf16> to vector<16x32xbf16>
    %cst_240 = arith.constant dense<0.000000e+00> : vector<128x32xf32>
    %293 = tpu.matmul %290, %292, %cst_240 {dimension_numbers = #tpu.dot_dimension_numbers<[1], [0], [0], [1], [0, 0, 1, 1], [], []>} : vector<128x16xbf16>, vector<16x32xbf16>, vector<128x32xf32> -> vector<128x32xf32>
    %294 = arith.addf %287, %293 : vector<128x32xf32>
    %c0_241 = arith.constant 0 : index
    %c2_242 = arith.constant 2 : index
    %c2_243 = arith.constant 2 : index
    %c0_244 = arith.constant 0 : index
    %c0_245 = arith.constant 0 : index
    %295 = vector.load %arg12[%c0_241, %c2_242, %c2_243, %c0_244, %c0_245] : memref<4x6x6x8x16xbf16, #tpu.memory_space<vmem>>, vector<1x4x4x8x16xbf16>
    %296 = vector.shape_cast %295 : vector<1x4x4x8x16xbf16> to vector<4x4x8x16xbf16>
    %297 = vector.shape_cast %296 : vector<4x4x8x16xbf16> to vector<128x16xbf16>
    %298 = vector.extract_strided_slice %25 {offsets = [2, 2, 0, 0], sizes = [1, 1, 16, 32], strides = [1, 1, 1, 1]} : vector<3x3x16x32xbf16> to vector<1x1x16x32xbf16>
    %299 = vector.shape_cast %298 : vector<1x1x16x32xbf16> to vector<16x32xbf16>
    %cst_246 = arith.constant dense<0.000000e+00> : vector<128x32xf32>
    %300 = tpu.matmul %297, %299, %cst_246 {dimension_numbers = #tpu.dot_dimension_numbers<[1], [0], [0], [1], [0, 0, 1, 1], [], []>} : vector<128x16xbf16>, vector<16x32xbf16>, vector<128x32xf32> -> vector<128x32xf32>
    %301 = arith.addf %294, %300 : vector<128x32xf32>
    %c0_247 = arith.constant 0 : index
    %c0_248 = arith.constant 0 : index
    %302 = vector.load %arg4[%c0_247, %c0_248] : memref<1x32xf32, #tpu.memory_space<vmem>>, vector<1x32xf32>
    %303 = vector.broadcast %302 : vector<1x32xf32> to vector<128x32xf32>
    %304 = arith.addf %301, %303 : vector<128x32xf32>
    %cst_249 = arith.constant 0.000000e+00 : f32
    %305 = vector.broadcast %cst_249 : f32 to vector<128x32xf32>
    %306 = arith.maximumf %304, %305 : vector<128x32xf32>
    %307 = arith.truncf %306 : vector<128x32xf32> to vector<128x32xbf16>
    %308 = arith.maximumf %237, %307 : vector<128x32xbf16>
    %309 = vector.shape_cast %308 : vector<128x32xbf16> to vector<16x8x32xbf16>
    %c0_250 = arith.constant 0 : index
    %c0_251 = arith.constant 0 : index
    %c0_252 = arith.constant 0 : index
    %310 = vector.load %arg5[%c0_250, %c0_251, %c0_252] : memref<16x32x96xbf16, #tpu.memory_space<vmem>>, vector<16x32x96xbf16>
    %cst_253 = arith.constant 0.000000e+00 : f32
    %311 = vector.broadcast %cst_253 : f32 to vector<8x96xf32>
    %312 = vector.extract_strided_slice %309 {offsets = [0, 0, 0], sizes = [1, 8, 32], strides = [1, 1, 1]} : vector<16x8x32xbf16> to vector<1x8x32xbf16>
    %313 = vector.shape_cast %312 : vector<1x8x32xbf16> to vector<8x32xbf16>
    %314 = vector.extract_strided_slice %310 {offsets = [0, 0, 0], sizes = [1, 32, 96], strides = [1, 1, 1]} : vector<16x32x96xbf16> to vector<1x32x96xbf16>
    %315 = vector.shape_cast %314 : vector<1x32x96xbf16> to vector<32x96xbf16>
    %cst_254 = arith.constant dense<0.000000e+00> : vector<8x96xf32>
    %316 = tpu.matmul %313, %315, %cst_254 {dimension_numbers = #tpu.dot_dimension_numbers<[1], [0], [0], [1], [0, 0, 1, 1], [], []>} : vector<8x32xbf16>, vector<32x96xbf16>, vector<8x96xf32> -> vector<8x96xf32>
    %317 = arith.addf %311, %316 : vector<8x96xf32>
    %318 = vector.extract_strided_slice %309 {offsets = [1, 0, 0], sizes = [1, 8, 32], strides = [1, 1, 1]} : vector<16x8x32xbf16> to vector<1x8x32xbf16>
    %319 = vector.shape_cast %318 : vector<1x8x32xbf16> to vector<8x32xbf16>
    %320 = vector.extract_strided_slice %310 {offsets = [1, 0, 0], sizes = [1, 32, 96], strides = [1, 1, 1]} : vector<16x32x96xbf16> to vector<1x32x96xbf16>
    %321 = vector.shape_cast %320 : vector<1x32x96xbf16> to vector<32x96xbf16>
    %cst_255 = arith.constant dense<0.000000e+00> : vector<8x96xf32>
    %322 = tpu.matmul %319, %321, %cst_255 {dimension_numbers = #tpu.dot_dimension_numbers<[1], [0], [0], [1], [0, 0, 1, 1], [], []>} : vector<8x32xbf16>, vector<32x96xbf16>, vector<8x96xf32> -> vector<8x96xf32>
    %323 = arith.addf %317, %322 : vector<8x96xf32>
    %324 = vector.extract_strided_slice %309 {offsets = [2, 0, 0], sizes = [1, 8, 32], strides = [1, 1, 1]} : vector<16x8x32xbf16> to vector<1x8x32xbf16>
    %325 = vector.shape_cast %324 : vector<1x8x32xbf16> to vector<8x32xbf16>
    %326 = vector.extract_strided_slice %310 {offsets = [2, 0, 0], sizes = [1, 32, 96], strides = [1, 1, 1]} : vector<16x32x96xbf16> to vector<1x32x96xbf16>
    %327 = vector.shape_cast %326 : vector<1x32x96xbf16> to vector<32x96xbf16>
    %cst_256 = arith.constant dense<0.000000e+00> : vector<8x96xf32>
    %328 = tpu.matmul %325, %327, %cst_256 {dimension_numbers = #tpu.dot_dimension_numbers<[1], [0], [0], [1], [0, 0, 1, 1], [], []>} : vector<8x32xbf16>, vector<32x96xbf16>, vector<8x96xf32> -> vector<8x96xf32>
    %329 = arith.addf %323, %328 : vector<8x96xf32>
    %330 = vector.extract_strided_slice %309 {offsets = [3, 0, 0], sizes = [1, 8, 32], strides = [1, 1, 1]} : vector<16x8x32xbf16> to vector<1x8x32xbf16>
    %331 = vector.shape_cast %330 : vector<1x8x32xbf16> to vector<8x32xbf16>
    %332 = vector.extract_strided_slice %310 {offsets = [3, 0, 0], sizes = [1, 32, 96], strides = [1, 1, 1]} : vector<16x32x96xbf16> to vector<1x32x96xbf16>
    %333 = vector.shape_cast %332 : vector<1x32x96xbf16> to vector<32x96xbf16>
    %cst_257 = arith.constant dense<0.000000e+00> : vector<8x96xf32>
    %334 = tpu.matmul %331, %333, %cst_257 {dimension_numbers = #tpu.dot_dimension_numbers<[1], [0], [0], [1], [0, 0, 1, 1], [], []>} : vector<8x32xbf16>, vector<32x96xbf16>, vector<8x96xf32> -> vector<8x96xf32>
    %335 = arith.addf %329, %334 : vector<8x96xf32>
    %336 = vector.extract_strided_slice %309 {offsets = [4, 0, 0], sizes = [1, 8, 32], strides = [1, 1, 1]} : vector<16x8x32xbf16> to vector<1x8x32xbf16>
    %337 = vector.shape_cast %336 : vector<1x8x32xbf16> to vector<8x32xbf16>
    %338 = vector.extract_strided_slice %310 {offsets = [4, 0, 0], sizes = [1, 32, 96], strides = [1, 1, 1]} : vector<16x32x96xbf16> to vector<1x32x96xbf16>
    %339 = vector.shape_cast %338 : vector<1x32x96xbf16> to vector<32x96xbf16>
    %cst_258 = arith.constant dense<0.000000e+00> : vector<8x96xf32>
    %340 = tpu.matmul %337, %339, %cst_258 {dimension_numbers = #tpu.dot_dimension_numbers<[1], [0], [0], [1], [0, 0, 1, 1], [], []>} : vector<8x32xbf16>, vector<32x96xbf16>, vector<8x96xf32> -> vector<8x96xf32>
    %341 = arith.addf %335, %340 : vector<8x96xf32>
    %342 = vector.extract_strided_slice %309 {offsets = [5, 0, 0], sizes = [1, 8, 32], strides = [1, 1, 1]} : vector<16x8x32xbf16> to vector<1x8x32xbf16>
    %343 = vector.shape_cast %342 : vector<1x8x32xbf16> to vector<8x32xbf16>
    %344 = vector.extract_strided_slice %310 {offsets = [5, 0, 0], sizes = [1, 32, 96], strides = [1, 1, 1]} : vector<16x32x96xbf16> to vector<1x32x96xbf16>
    %345 = vector.shape_cast %344 : vector<1x32x96xbf16> to vector<32x96xbf16>
    %cst_259 = arith.constant dense<0.000000e+00> : vector<8x96xf32>
    %346 = tpu.matmul %343, %345, %cst_259 {dimension_numbers = #tpu.dot_dimension_numbers<[1], [0], [0], [1], [0, 0, 1, 1], [], []>} : vector<8x32xbf16>, vector<32x96xbf16>, vector<8x96xf32> -> vector<8x96xf32>
    %347 = arith.addf %341, %346 : vector<8x96xf32>
    %348 = vector.extract_strided_slice %309 {offsets = [6, 0, 0], sizes = [1, 8, 32], strides = [1, 1, 1]} : vector<16x8x32xbf16> to vector<1x8x32xbf16>
    %349 = vector.shape_cast %348 : vector<1x8x32xbf16> to vector<8x32xbf16>
    %350 = vector.extract_strided_slice %310 {offsets = [6, 0, 0], sizes = [1, 32, 96], strides = [1, 1, 1]} : vector<16x32x96xbf16> to vector<1x32x96xbf16>
    %351 = vector.shape_cast %350 : vector<1x32x96xbf16> to vector<32x96xbf16>
    %cst_260 = arith.constant dense<0.000000e+00> : vector<8x96xf32>
    %352 = tpu.matmul %349, %351, %cst_260 {dimension_numbers = #tpu.dot_dimension_numbers<[1], [0], [0], [1], [0, 0, 1, 1], [], []>} : vector<8x32xbf16>, vector<32x96xbf16>, vector<8x96xf32> -> vector<8x96xf32>
    %353 = arith.addf %347, %352 : vector<8x96xf32>
    %354 = vector.extract_strided_slice %309 {offsets = [7, 0, 0], sizes = [1, 8, 32], strides = [1, 1, 1]} : vector<16x8x32xbf16> to vector<1x8x32xbf16>
    %355 = vector.shape_cast %354 : vector<1x8x32xbf16> to vector<8x32xbf16>
    %356 = vector.extract_strided_slice %310 {offsets = [7, 0, 0], sizes = [1, 32, 96], strides = [1, 1, 1]} : vector<16x32x96xbf16> to vector<1x32x96xbf16>
    %357 = vector.shape_cast %356 : vector<1x32x96xbf16> to vector<32x96xbf16>
    %cst_261 = arith.constant dense<0.000000e+00> : vector<8x96xf32>
    %358 = tpu.matmul %355, %357, %cst_261 {dimension_numbers = #tpu.dot_dimension_numbers<[1], [0], [0], [1], [0, 0, 1, 1], [], []>} : vector<8x32xbf16>, vector<32x96xbf16>, vector<8x96xf32> -> vector<8x96xf32>
    %359 = arith.addf %353, %358 : vector<8x96xf32>
    %360 = vector.extract_strided_slice %309 {offsets = [8, 0, 0], sizes = [1, 8, 32], strides = [1, 1, 1]} : vector<16x8x32xbf16> to vector<1x8x32xbf16>
    %361 = vector.shape_cast %360 : vector<1x8x32xbf16> to vector<8x32xbf16>
    %362 = vector.extract_strided_slice %310 {offsets = [8, 0, 0], sizes = [1, 32, 96], strides = [1, 1, 1]} : vector<16x32x96xbf16> to vector<1x32x96xbf16>
    %363 = vector.shape_cast %362 : vector<1x32x96xbf16> to vector<32x96xbf16>
    %cst_262 = arith.constant dense<0.000000e+00> : vector<8x96xf32>
    %364 = tpu.matmul %361, %363, %cst_262 {dimension_numbers = #tpu.dot_dimension_numbers<[1], [0], [0], [1], [0, 0, 1, 1], [], []>} : vector<8x32xbf16>, vector<32x96xbf16>, vector<8x96xf32> -> vector<8x96xf32>
    %365 = arith.addf %359, %364 : vector<8x96xf32>
    %366 = vector.extract_strided_slice %309 {offsets = [9, 0, 0], sizes = [1, 8, 32], strides = [1, 1, 1]} : vector<16x8x32xbf16> to vector<1x8x32xbf16>
    %367 = vector.shape_cast %366 : vector<1x8x32xbf16> to vector<8x32xbf16>
    %368 = vector.extract_strided_slice %310 {offsets = [9, 0, 0], sizes = [1, 32, 96], strides = [1, 1, 1]} : vector<16x32x96xbf16> to vector<1x32x96xbf16>
    %369 = vector.shape_cast %368 : vector<1x32x96xbf16> to vector<32x96xbf16>
    %cst_263 = arith.constant dense<0.000000e+00> : vector<8x96xf32>
    %370 = tpu.matmul %367, %369, %cst_263 {dimension_numbers = #tpu.dot_dimension_numbers<[1], [0], [0], [1], [0, 0, 1, 1], [], []>} : vector<8x32xbf16>, vector<32x96xbf16>, vector<8x96xf32> -> vector<8x96xf32>
    %371 = arith.addf %365, %370 : vector<8x96xf32>
    %372 = vector.extract_strided_slice %309 {offsets = [10, 0, 0], sizes = [1, 8, 32], strides = [1, 1, 1]} : vector<16x8x32xbf16> to vector<1x8x32xbf16>
    %373 = vector.shape_cast %372 : vector<1x8x32xbf16> to vector<8x32xbf16>
    %374 = vector.extract_strided_slice %310 {offsets = [10, 0, 0], sizes = [1, 32, 96], strides = [1, 1, 1]} : vector<16x32x96xbf16> to vector<1x32x96xbf16>
    %375 = vector.shape_cast %374 : vector<1x32x96xbf16> to vector<32x96xbf16>
    %cst_264 = arith.constant dense<0.000000e+00> : vector<8x96xf32>
    %376 = tpu.matmul %373, %375, %cst_264 {dimension_numbers = #tpu.dot_dimension_numbers<[1], [0], [0], [1], [0, 0, 1, 1], [], []>} : vector<8x32xbf16>, vector<32x96xbf16>, vector<8x96xf32> -> vector<8x96xf32>
    %377 = arith.addf %371, %376 : vector<8x96xf32>
    %378 = vector.extract_strided_slice %309 {offsets = [11, 0, 0], sizes = [1, 8, 32], strides = [1, 1, 1]} : vector<16x8x32xbf16> to vector<1x8x32xbf16>
    %379 = vector.shape_cast %378 : vector<1x8x32xbf16> to vector<8x32xbf16>
    %380 = vector.extract_strided_slice %310 {offsets = [11, 0, 0], sizes = [1, 32, 96], strides = [1, 1, 1]} : vector<16x32x96xbf16> to vector<1x32x96xbf16>
    %381 = vector.shape_cast %380 : vector<1x32x96xbf16> to vector<32x96xbf16>
    %cst_265 = arith.constant dense<0.000000e+00> : vector<8x96xf32>
    %382 = tpu.matmul %379, %381, %cst_265 {dimension_numbers = #tpu.dot_dimension_numbers<[1], [0], [0], [1], [0, 0, 1, 1], [], []>} : vector<8x32xbf16>, vector<32x96xbf16>, vector<8x96xf32> -> vector<8x96xf32>
    %383 = arith.addf %377, %382 : vector<8x96xf32>
    %384 = vector.extract_strided_slice %309 {offsets = [12, 0, 0], sizes = [1, 8, 32], strides = [1, 1, 1]} : vector<16x8x32xbf16> to vector<1x8x32xbf16>
    %385 = vector.shape_cast %384 : vector<1x8x32xbf16> to vector<8x32xbf16>
    %386 = vector.extract_strided_slice %310 {offsets = [12, 0, 0], sizes = [1, 32, 96], strides = [1, 1, 1]} : vector<16x32x96xbf16> to vector<1x32x96xbf16>
    %387 = vector.shape_cast %386 : vector<1x32x96xbf16> to vector<32x96xbf16>
    %cst_266 = arith.constant dense<0.000000e+00> : vector<8x96xf32>
    %388 = tpu.matmul %385, %387, %cst_266 {dimension_numbers = #tpu.dot_dimension_numbers<[1], [0], [0], [1], [0, 0, 1, 1], [], []>} : vector<8x32xbf16>, vector<32x96xbf16>, vector<8x96xf32> -> vector<8x96xf32>
    %389 = arith.addf %383, %388 : vector<8x96xf32>
    %390 = vector.extract_strided_slice %309 {offsets = [13, 0, 0], sizes = [1, 8, 32], strides = [1, 1, 1]} : vector<16x8x32xbf16> to vector<1x8x32xbf16>
    %391 = vector.shape_cast %390 : vector<1x8x32xbf16> to vector<8x32xbf16>
    %392 = vector.extract_strided_slice %310 {offsets = [13, 0, 0], sizes = [1, 32, 96], strides = [1, 1, 1]} : vector<16x32x96xbf16> to vector<1x32x96xbf16>
    %393 = vector.shape_cast %392 : vector<1x32x96xbf16> to vector<32x96xbf16>
    %cst_267 = arith.constant dense<0.000000e+00> : vector<8x96xf32>
    %394 = tpu.matmul %391, %393, %cst_267 {dimension_numbers = #tpu.dot_dimension_numbers<[1], [0], [0], [1], [0, 0, 1, 1], [], []>} : vector<8x32xbf16>, vector<32x96xbf16>, vector<8x96xf32> -> vector<8x96xf32>
    %395 = arith.addf %389, %394 : vector<8x96xf32>
    %396 = vector.extract_strided_slice %309 {offsets = [14, 0, 0], sizes = [1, 8, 32], strides = [1, 1, 1]} : vector<16x8x32xbf16> to vector<1x8x32xbf16>
    %397 = vector.shape_cast %396 : vector<1x8x32xbf16> to vector<8x32xbf16>
    %398 = vector.extract_strided_slice %310 {offsets = [14, 0, 0], sizes = [1, 32, 96], strides = [1, 1, 1]} : vector<16x32x96xbf16> to vector<1x32x96xbf16>
    %399 = vector.shape_cast %398 : vector<1x32x96xbf16> to vector<32x96xbf16>
    %cst_268 = arith.constant dense<0.000000e+00> : vector<8x96xf32>
    %400 = tpu.matmul %397, %399, %cst_268 {dimension_numbers = #tpu.dot_dimension_numbers<[1], [0], [0], [1], [0, 0, 1, 1], [], []>} : vector<8x32xbf16>, vector<32x96xbf16>, vector<8x96xf32> -> vector<8x96xf32>
    %401 = arith.addf %395, %400 : vector<8x96xf32>
    %402 = vector.extract_strided_slice %309 {offsets = [15, 0, 0], sizes = [1, 8, 32], strides = [1, 1, 1]} : vector<16x8x32xbf16> to vector<1x8x32xbf16>
    %403 = vector.shape_cast %402 : vector<1x8x32xbf16> to vector<8x32xbf16>
    %404 = vector.extract_strided_slice %310 {offsets = [15, 0, 0], sizes = [1, 32, 96], strides = [1, 1, 1]} : vector<16x32x96xbf16> to vector<1x32x96xbf16>
    %405 = vector.shape_cast %404 : vector<1x32x96xbf16> to vector<32x96xbf16>
    %cst_269 = arith.constant dense<0.000000e+00> : vector<8x96xf32>
    %406 = tpu.matmul %403, %405, %cst_269 {dimension_numbers = #tpu.dot_dimension_numbers<[1], [0], [0], [1], [0, 0, 1, 1], [], []>} : vector<8x32xbf16>, vector<32x96xbf16>, vector<8x96xf32> -> vector<8x96xf32>
    %407 = arith.addf %401, %406 : vector<8x96xf32>
    %c0_270 = arith.constant 0 : index
    %c0_271 = arith.constant 0 : index
    %408 = vector.load %arg7[%c0_270, %c0_271] : memref<1x96xf32, #tpu.memory_space<vmem>>, vector<1x96xf32>
    %409 = vector.broadcast %408 : vector<1x96xf32> to vector<8x96xf32>
    %410 = arith.addf %407, %409 : vector<8x96xf32>
    %c0_272 = arith.constant 0 : index
    %c0_273 = arith.constant 0 : index
    %411 = vector.load %arg6[%c0_272, %c0_273] : memref<32x96xf32, #tpu.memory_space<vmem>>, vector<32x96xf32>
    %c0_274 = arith.constant 0 : index
    %c0_275 = arith.constant 0 : index
    %412 = vector.load %arg8[%c0_274, %c0_275] : memref<1x96xf32, #tpu.memory_space<vmem>>, vector<1x96xf32>
    %cst_276 = arith.constant 0.000000e+00 : f32
    %413 = vector.broadcast %cst_276 : f32 to vector<2x32xf32>
    %414 = vector.extract_strided_slice %410 {offsets = [0, 0], sizes = [2, 96], strides = [1, 1]} : vector<8x96xf32> to vector<2x96xf32>
    %cst_277 = arith.constant dense<0.000000e+00> : vector<2x96xf32>
    %415 = tpu.matmul %413, %411, %cst_277 {dimension_numbers = #tpu.dot_dimension_numbers<[1], [0], [0], [1], [0, 0, 1, 1], [], []>} : vector<2x32xf32>, vector<32x96xf32>, vector<2x96xf32> -> vector<2x96xf32>
    %416 = vector.broadcast %412 : vector<1x96xf32> to vector<2x96xf32>
    %417 = arith.addf %415, %416 : vector<2x96xf32>
    %418 = vector.extract_strided_slice %414 {offsets = [0, 0], sizes = [2, 32], strides = [1, 1]} : vector<2x96xf32> to vector<2x32xf32>
    %419 = vector.extract_strided_slice %417 {offsets = [0, 0], sizes = [2, 32], strides = [1, 1]} : vector<2x96xf32> to vector<2x32xf32>
    %420 = arith.addf %418, %419 : vector<2x32xf32>
    %cst_278 = arith.constant 0.000000e+00 : f32
    %421 = vector.broadcast %cst_278 : f32 to vector<2x32xf32>
    %422 = arith.subf %421, %420 : vector<2x32xf32>
    %423 = math.exp %422 : vector<2x32xf32>
    %cst_279 = arith.constant 1.000000e+00 : f32
    %424 = vector.broadcast %cst_279 : f32 to vector<2x32xf32>
    %425 = arith.addf %424, %423 : vector<2x32xf32>
    %426 = tpu.reciprocal %425 {approx = true} : vector<2x32xf32> -> vector<2x32xf32>
    %427 = vector.extract_strided_slice %414 {offsets = [0, 32], sizes = [2, 32], strides = [1, 1]} : vector<2x96xf32> to vector<2x32xf32>
    %428 = vector.extract_strided_slice %417 {offsets = [0, 32], sizes = [2, 32], strides = [1, 1]} : vector<2x96xf32> to vector<2x32xf32>
    %429 = arith.addf %427, %428 : vector<2x32xf32>
    %cst_280 = arith.constant 0.000000e+00 : f32
    %430 = vector.broadcast %cst_280 : f32 to vector<2x32xf32>
    %431 = arith.subf %430, %429 : vector<2x32xf32>
    %432 = math.exp %431 : vector<2x32xf32>
    %cst_281 = arith.constant 1.000000e+00 : f32
    %433 = vector.broadcast %cst_281 : f32 to vector<2x32xf32>
    %434 = arith.addf %433, %432 : vector<2x32xf32>
    %435 = tpu.reciprocal %434 {approx = true} : vector<2x32xf32> -> vector<2x32xf32>
    %436 = vector.extract_strided_slice %414 {offsets = [0, 64], sizes = [2, 32], strides = [1, 1]} : vector<2x96xf32> to vector<2x32xf32>
    %437 = vector.extract_strided_slice %417 {offsets = [0, 64], sizes = [2, 32], strides = [1, 1]} : vector<2x96xf32> to vector<2x32xf32>
    %438 = arith.mulf %426, %437 : vector<2x32xf32>
    %439 = arith.addf %436, %438 : vector<2x32xf32>
    %440 = math.tanh %439 : vector<2x32xf32>
    %cst_282 = arith.constant 1.000000e+00 : f32
    %441 = vector.broadcast %cst_282 : f32 to vector<2x32xf32>
    %442 = arith.subf %441, %435 : vector<2x32xf32>
    %443 = arith.mulf %442, %440 : vector<2x32xf32>
    %444 = arith.mulf %435, %413 : vector<2x32xf32>
    %445 = arith.addf %443, %444 : vector<2x32xf32>
    %446 = vector.extract_strided_slice %410 {offsets = [2, 0], sizes = [2, 96], strides = [1, 1]} : vector<8x96xf32> to vector<2x96xf32>
    %cst_283 = arith.constant dense<0.000000e+00> : vector<2x96xf32>
    %447 = tpu.matmul %445, %411, %cst_283 {dimension_numbers = #tpu.dot_dimension_numbers<[1], [0], [0], [1], [0, 0, 1, 1], [], []>} : vector<2x32xf32>, vector<32x96xf32>, vector<2x96xf32> -> vector<2x96xf32>
    %448 = vector.broadcast %412 : vector<1x96xf32> to vector<2x96xf32>
    %449 = arith.addf %447, %448 : vector<2x96xf32>
    %450 = vector.extract_strided_slice %446 {offsets = [0, 0], sizes = [2, 32], strides = [1, 1]} : vector<2x96xf32> to vector<2x32xf32>
    %451 = vector.extract_strided_slice %449 {offsets = [0, 0], sizes = [2, 32], strides = [1, 1]} : vector<2x96xf32> to vector<2x32xf32>
    %452 = arith.addf %450, %451 : vector<2x32xf32>
    %cst_284 = arith.constant 0.000000e+00 : f32
    %453 = vector.broadcast %cst_284 : f32 to vector<2x32xf32>
    %454 = arith.subf %453, %452 : vector<2x32xf32>
    %455 = math.exp %454 : vector<2x32xf32>
    %cst_285 = arith.constant 1.000000e+00 : f32
    %456 = vector.broadcast %cst_285 : f32 to vector<2x32xf32>
    %457 = arith.addf %456, %455 : vector<2x32xf32>
    %458 = tpu.reciprocal %457 {approx = true} : vector<2x32xf32> -> vector<2x32xf32>
    %459 = vector.extract_strided_slice %446 {offsets = [0, 32], sizes = [2, 32], strides = [1, 1]} : vector<2x96xf32> to vector<2x32xf32>
    %460 = vector.extract_strided_slice %449 {offsets = [0, 32], sizes = [2, 32], strides = [1, 1]} : vector<2x96xf32> to vector<2x32xf32>
    %461 = arith.addf %459, %460 : vector<2x32xf32>
    %cst_286 = arith.constant 0.000000e+00 : f32
    %462 = vector.broadcast %cst_286 : f32 to vector<2x32xf32>
    %463 = arith.subf %462, %461 : vector<2x32xf32>
    %464 = math.exp %463 : vector<2x32xf32>
    %cst_287 = arith.constant 1.000000e+00 : f32
    %465 = vector.broadcast %cst_287 : f32 to vector<2x32xf32>
    %466 = arith.addf %465, %464 : vector<2x32xf32>
    %467 = tpu.reciprocal %466 {approx = true} : vector<2x32xf32> -> vector<2x32xf32>
    %468 = vector.extract_strided_slice %446 {offsets = [0, 64], sizes = [2, 32], strides = [1, 1]} : vector<2x96xf32> to vector<2x32xf32>
    %469 = vector.extract_strided_slice %449 {offsets = [0, 64], sizes = [2, 32], strides = [1, 1]} : vector<2x96xf32> to vector<2x32xf32>
    %470 = arith.mulf %458, %469 : vector<2x32xf32>
    %471 = arith.addf %468, %470 : vector<2x32xf32>
    %472 = math.tanh %471 : vector<2x32xf32>
    %cst_288 = arith.constant 1.000000e+00 : f32
    %473 = vector.broadcast %cst_288 : f32 to vector<2x32xf32>
    %474 = arith.subf %473, %467 : vector<2x32xf32>
    %475 = arith.mulf %474, %472 : vector<2x32xf32>
    %476 = arith.mulf %467, %445 : vector<2x32xf32>
    %477 = arith.addf %475, %476 : vector<2x32xf32>
    %478 = vector.extract_strided_slice %410 {offsets = [4, 0], sizes = [2, 96], strides = [1, 1]} : vector<8x96xf32> to vector<2x96xf32>
    %cst_289 = arith.constant dense<0.000000e+00> : vector<2x96xf32>
    %479 = tpu.matmul %477, %411, %cst_289 {dimension_numbers = #tpu.dot_dimension_numbers<[1], [0], [0], [1], [0, 0, 1, 1], [], []>} : vector<2x32xf32>, vector<32x96xf32>, vector<2x96xf32> -> vector<2x96xf32>
    %480 = vector.broadcast %412 : vector<1x96xf32> to vector<2x96xf32>
    %481 = arith.addf %479, %480 : vector<2x96xf32>
    %482 = vector.extract_strided_slice %478 {offsets = [0, 0], sizes = [2, 32], strides = [1, 1]} : vector<2x96xf32> to vector<2x32xf32>
    %483 = vector.extract_strided_slice %481 {offsets = [0, 0], sizes = [2, 32], strides = [1, 1]} : vector<2x96xf32> to vector<2x32xf32>
    %484 = arith.addf %482, %483 : vector<2x32xf32>
    %cst_290 = arith.constant 0.000000e+00 : f32
    %485 = vector.broadcast %cst_290 : f32 to vector<2x32xf32>
    %486 = arith.subf %485, %484 : vector<2x32xf32>
    %487 = math.exp %486 : vector<2x32xf32>
    %cst_291 = arith.constant 1.000000e+00 : f32
    %488 = vector.broadcast %cst_291 : f32 to vector<2x32xf32>
    %489 = arith.addf %488, %487 : vector<2x32xf32>
    %490 = tpu.reciprocal %489 {approx = true} : vector<2x32xf32> -> vector<2x32xf32>
    %491 = vector.extract_strided_slice %478 {offsets = [0, 32], sizes = [2, 32], strides = [1, 1]} : vector<2x96xf32> to vector<2x32xf32>
    %492 = vector.extract_strided_slice %481 {offsets = [0, 32], sizes = [2, 32], strides = [1, 1]} : vector<2x96xf32> to vector<2x32xf32>
    %493 = arith.addf %491, %492 : vector<2x32xf32>
    %cst_292 = arith.constant 0.000000e+00 : f32
    %494 = vector.broadcast %cst_292 : f32 to vector<2x32xf32>
    %495 = arith.subf %494, %493 : vector<2x32xf32>
    %496 = math.exp %495 : vector<2x32xf32>
    %cst_293 = arith.constant 1.000000e+00 : f32
    %497 = vector.broadcast %cst_293 : f32 to vector<2x32xf32>
    %498 = arith.addf %497, %496 : vector<2x32xf32>
    %499 = tpu.reciprocal %498 {approx = true} : vector<2x32xf32> -> vector<2x32xf32>
    %500 = vector.extract_strided_slice %478 {offsets = [0, 64], sizes = [2, 32], strides = [1, 1]} : vector<2x96xf32> to vector<2x32xf32>
    %501 = vector.extract_strided_slice %481 {offsets = [0, 64], sizes = [2, 32], strides = [1, 1]} : vector<2x96xf32> to vector<2x32xf32>
    %502 = arith.mulf %490, %501 : vector<2x32xf32>
    %503 = arith.addf %500, %502 : vector<2x32xf32>
    %504 = math.tanh %503 : vector<2x32xf32>
    %cst_294 = arith.constant 1.000000e+00 : f32
    %505 = vector.broadcast %cst_294 : f32 to vector<2x32xf32>
    %506 = arith.subf %505, %499 : vector<2x32xf32>
    %507 = arith.mulf %506, %504 : vector<2x32xf32>
    %508 = arith.mulf %499, %477 : vector<2x32xf32>
    %509 = arith.addf %507, %508 : vector<2x32xf32>
    %510 = vector.extract_strided_slice %410 {offsets = [6, 0], sizes = [2, 96], strides = [1, 1]} : vector<8x96xf32> to vector<2x96xf32>
    %cst_295 = arith.constant dense<0.000000e+00> : vector<2x96xf32>
    %511 = tpu.matmul %509, %411, %cst_295 {dimension_numbers = #tpu.dot_dimension_numbers<[1], [0], [0], [1], [0, 0, 1, 1], [], []>} : vector<2x32xf32>, vector<32x96xf32>, vector<2x96xf32> -> vector<2x96xf32>
    %512 = vector.broadcast %412 : vector<1x96xf32> to vector<2x96xf32>
    %513 = arith.addf %511, %512 : vector<2x96xf32>
    %514 = vector.extract_strided_slice %510 {offsets = [0, 0], sizes = [2, 32], strides = [1, 1]} : vector<2x96xf32> to vector<2x32xf32>
    %515 = vector.extract_strided_slice %513 {offsets = [0, 0], sizes = [2, 32], strides = [1, 1]} : vector<2x96xf32> to vector<2x32xf32>
    %516 = arith.addf %514, %515 : vector<2x32xf32>
    %cst_296 = arith.constant 0.000000e+00 : f32
    %517 = vector.broadcast %cst_296 : f32 to vector<2x32xf32>
    %518 = arith.subf %517, %516 : vector<2x32xf32>
    %519 = math.exp %518 : vector<2x32xf32>
    %cst_297 = arith.constant 1.000000e+00 : f32
    %520 = vector.broadcast %cst_297 : f32 to vector<2x32xf32>
    %521 = arith.addf %520, %519 : vector<2x32xf32>
    %522 = tpu.reciprocal %521 {approx = true} : vector<2x32xf32> -> vector<2x32xf32>
    %523 = vector.extract_strided_slice %510 {offsets = [0, 32], sizes = [2, 32], strides = [1, 1]} : vector<2x96xf32> to vector<2x32xf32>
    %524 = vector.extract_strided_slice %513 {offsets = [0, 32], sizes = [2, 32], strides = [1, 1]} : vector<2x96xf32> to vector<2x32xf32>
    %525 = arith.addf %523, %524 : vector<2x32xf32>
    %cst_298 = arith.constant 0.000000e+00 : f32
    %526 = vector.broadcast %cst_298 : f32 to vector<2x32xf32>
    %527 = arith.subf %526, %525 : vector<2x32xf32>
    %528 = math.exp %527 : vector<2x32xf32>
    %cst_299 = arith.constant 1.000000e+00 : f32
    %529 = vector.broadcast %cst_299 : f32 to vector<2x32xf32>
    %530 = arith.addf %529, %528 : vector<2x32xf32>
    %531 = tpu.reciprocal %530 {approx = true} : vector<2x32xf32> -> vector<2x32xf32>
    %532 = vector.extract_strided_slice %510 {offsets = [0, 64], sizes = [2, 32], strides = [1, 1]} : vector<2x96xf32> to vector<2x32xf32>
    %533 = vector.extract_strided_slice %513 {offsets = [0, 64], sizes = [2, 32], strides = [1, 1]} : vector<2x96xf32> to vector<2x32xf32>
    %534 = arith.mulf %522, %533 : vector<2x32xf32>
    %535 = arith.addf %532, %534 : vector<2x32xf32>
    %536 = math.tanh %535 : vector<2x32xf32>
    %cst_300 = arith.constant 1.000000e+00 : f32
    %537 = vector.broadcast %cst_300 : f32 to vector<2x32xf32>
    %538 = arith.subf %537, %531 : vector<2x32xf32>
    %539 = arith.mulf %538, %536 : vector<2x32xf32>
    %540 = arith.mulf %531, %509 : vector<2x32xf32>
    %541 = arith.addf %539, %540 : vector<2x32xf32>
    %c0_301 = arith.constant 0 : index
    %c0_302 = arith.constant 0 : index
    %542 = vector.load %arg9[%c0_301, %c0_302] : memref<32x1xf32, #tpu.memory_space<vmem>>, vector<32x1xf32>
    %cst_303 = arith.constant dense<0.000000e+00> : vector<2x1xf32>
    %543 = tpu.matmul %541, %542, %cst_303 {dimension_numbers = #tpu.dot_dimension_numbers<[1], [0], [0], [1], [0, 0, 1, 1], [], []>} : vector<2x32xf32>, vector<32x1xf32>, vector<2x1xf32> -> vector<2x1xf32>
    %c0_304 = arith.constant 0 : index
    %c0_305 = arith.constant 0 : index
    %544 = vector.load %arg10[%c0_304, %c0_305] : memref<1x1xf32, #tpu.memory_space<vmem>>, vector<1x1xf32>
    %545 = vector.broadcast %544 : vector<1x1xf32> to vector<2x1xf32>
    %546 = arith.addf %543, %545 : vector<2x1xf32>
    %c0_306 = arith.constant 0 : index
    %c0_307 = arith.constant 0 : index
    %547 = vector.load %arg11[%c0_306, %c0_307] : memref<2x1xf32, #tpu.memory_space<vmem>>, vector<2x1xf32>
    tpu.vector_store %arg11[%c0_306, %c0_307], %546 {strides = array<i32>} : memref<2x1xf32, #tpu.memory_space<vmem>>, vector<2x1xf32>,
    return
  }
}

</mosaic_0001>

<bundles_post_ra>
// kernel: cnn_gru_forward_pallas.1
= control target key start
LH: loop header
LB: loop body
LE: loop exit
PB: predicated region body
PF: predicated region fallthrough
CT: control target
= control target key end

     0   :  { %vm960_vm0 = vcmask 261120   ;;  %vm2882_vm1 = vcmask 125952   ;;  %vm3414_vm2 = vcmask 130048   ;;  %vm13675_vm3 = vmmov 0   ;;  %s16526_s1 = inlined_call_operand.vmem [shape: bf16[32,16], index: 1, kind: input, shape index: {}]   ;;  %s16527_s0 = inlined_call_operand.vmem [shape: bf16[2048,32], index: 0, kind: input, shape index: {}]   ;;  %s16528_s2 = inlined_call_operand.vmem [shape: f32[1,16], index: 2, kind: input, shape index: {}]   ;;  %s16529_s3 = inlined_call_operand.vmem [shape: bf16[3,3,16,32], index: 3, kind: input, shape index: {}]   ;;  %s16530_s4 = inlined_call_operand.vmem [shape: f32[1,32], index: 4, kind: input, shape index: {}]   ;;  %s16531_s5 = inlined_call_operand.vmem [shape: bf16[16,32,96], index: 5, kind: input, shape index: {}]   ;;  %s16532_s6 = inlined_call_operand.vmem [shape: f32[32,96], index: 6, kind: input, shape index: {}]   ;;  %s16533_s8 = inlined_call_operand.vmem [shape: f32[1,96], index: 8, kind: input, shape index: {}]   ;;  %s16534_s7 = inlined_call_operand.vmem [shape: f32[1,96], index: 7, kind: input, shape index: {}]   ;;  %s16535_s9 = inlined_call_operand.vmem [shape: f32[32,1], index: 9, kind: input, shape index: {}]   ;;  %s16536_s10 = inlined_call_operand.<no memory space> [shape: f32[1,1], index: 10, kind: input, shape index: {}]   ;;  %s16537_s11 = inlined_call_operand.vmem [shape: f32[2,1], index: 11, kind: output, shape index: {}]  }
   0x1   :  { %v13323_v0 = vld [vmem:[%s16526_s1] sm:$0xff]   ;;  %v13324_v1 = vld [vmem:[%s16526_s1 + $0x8] sm:$0xff]   ;;  %v13327_v4 = vld [vmem:[%s16527_s0 + $0x10] sm:$0xff]   ;;  %vm10331_vm4 = vcmask 1024  }
   0x2   :  { %11684 = vmatprep.subr.bf16.mxu0 %v13323_v0  ;;  %v13325_v2 = vld [vmem:[%s16527_s0] sm:$0xff]   ;;  %v13326_v3 = vld [vmem:[%s16527_s0 + $0x8] sm:$0xff]   ;;  %v13328_v5 = vld [vmem:[%s16527_s0 + $0x18] sm:$0xff]  }
   0x3   :  { %11685 = vmatpush3.bf16.msra.mxu0 %v13323_v0  ;;  %11688 = vmatprep.mubr.msk.bf16.mxu0 %vm960_vm0, %v13325_v2  ;;  %v13329_v6 = vld [vmem:[%s16527_s0 + $0x20] sm:$0xff]   ;;  %v13330_v7 = vld [vmem:[%s16527_s0 + $0x28] sm:$0xff]   ;;  %v13331_v8 = vld [vmem:[%s16527_s0 + $0x30] sm:$0xff]  }
   0x4   :  { %11686 = vmatprep.subr.bf16.mxu0 %v13324_v1  ;;  %v13332_v9 = vld [vmem:[%s16527_s0 + $0x38] sm:$0xff]   ;;  %v13333_v10 = vld [vmem:[%s16527_s0 + $0x40] sm:$0xff]   ;;  %v13334_v11 = vld [vmem:[%s16527_s0 + $0x48] sm:$0xff]  }
   0x5   :  { %v13335_v12 = vld [vmem:[%s16527_s0 + $0x50] sm:$0xff]   ;;  %v13336_v13 = vld [vmem:[%s16527_s0 + $0x58] sm:$0xff]   ;;  %v13337_v14 = vld [vmem:[%s16527_s0 + $0x60] sm:$0xff]  }
   0x6   :  { %v13338_v15 = vld [vmem:[%s16527_s0 + $0x68] sm:$0xff]   ;;  %v13339_v16 = vld [vmem:[%s16527_s0 + $0x70] sm:$0xff]   ;;  %v13340_v17 = vld [vmem:[%s16527_s0 + $0x78] sm:$0xff]  }
   0x7   :  { %11687 = vmatpush3.bf16.msra.mxu0 %v13324_v1  ;;  %v13341_v18 = vld [vmem:[%s16527_s0 + $0x80] sm:$0xff]   ;;  %v13342_v19 = vld [vmem:[%s16527_s0 + $0x88] sm:$0xff]   ;;  %v13343_v20 = vld [vmem:[%s16527_s0 + $0x90] sm:$0xff]  }
   0x8   :  { %v13344_v21 = vld [vmem:[%s16527_s0 + $0x98] sm:$0xff]   ;;  %v13345_v22 = vld [vmem:[%s16527_s0 + $0xa0] sm:$0xff]   ;;  %v13346_v23 = vld [vmem:[%s16527_s0 + $0xa8] sm:$0xff]  }
   0x9   :  { %v13347_v24 = vld [vmem:[%s16527_s0 + $0xb0] sm:$0xff]   ;;  %v13348_v25 = vld [vmem:[%s16527_s0 + $0xb8] sm:$0xff]   ;;  %v13349_v26 = vld [vmem:[%s16527_s0 + $0xc0] sm:$0xff]  }
   0xa   :  { %11689 = vmatmul.mubr.msk.bf16.vlgmr.msra.gmra.mrb[0].mxu0 %vm960_vm0, %v13326_v3  ;;  %v13350_v27 = vld [vmem:[%s16527_s0 + $0xc8] sm:$0xff]   ;;  %v13351_v28 = vld [vmem:[%s16527_s0 + $0xd0] sm:$0xff]   ;;  %v13352_v29 = vld [vmem:[%s16527_s0 + $0xd8] sm:$0xff]  }
   0xb   :  { %11692 = vmatprep.mubr.msk.bf16.mxu0 %vm960_vm0, %v13327_v4  ;;  %v13353_v30 = vld [vmem:[%s16527_s0 + $0xe0] sm:$0xff]   ;;  %v13354_v31 = vld [vmem:[%s16527_s0 + $0xe8] sm:$0xff]   ;;  %v13355_v32 = vld [vmem:[%s16527_s0 + $0xf0] sm:$0xff]  }
   0xc   :  { %v13356_v33 = vld [vmem:[%s16527_s0 + $0xf8] sm:$0xff]   ;;  %v13357_v34 = vld [vmem:[%s16527_s0 + $0x100] sm:$0xff]   ;;  %v13358_v35 = vld [vmem:[%s16527_s0 + $0x108] sm:$0xff]  }
   0xd   :  { %v13359_v36 = vld [vmem:[%s16527_s0 + $0x110] sm:$0xff]   ;;  %v13360_v37 = vld [vmem:[%s16527_s0 + $0x118] sm:$0xff]   ;;  %v13361_v38 = vld [vmem:[%s16527_s0 + $0x120] sm:$0xff]  }
   0xe   :  { %v13362_v39 = vld [vmem:[%s16527_s0 + $0x128] sm:$0xff]   ;;  %v13363_v40 = vld [vmem:[%s16527_s0 + $0x130] sm:$0xff]   ;;  %v13364_v41 = vld [vmem:[%s16527_s0 + $0x138] sm:$0xff]  }
   0xf   :  { %v13365_v42 = vld [vmem:[%s16527_s0 + $0x140] sm:$0xff]   ;;  %v13366_v43 = vld [vmem:[%s16527_s0 + $0x148] sm:$0xff]   ;;  %v13367_v44 = vld [vmem:[%s16527_s0 + $0x150] sm:$0xff]  }
  0x10   :  { %v13368_v45 = vld [vmem:[%s16527_s0 + $0x158] sm:$0xff]   ;;  %v13369_v46 = vld [vmem:[%s16527_s0 + $0x160] sm:$0xff]   ;;  %v13370_v47 = vld [vmem:[%s16527_s0 + $0x168] sm:$0xff]  }
  0x11   :  { %v13371_v48 = vld [vmem:[%s16527_s0 + $0x170] sm:$0xff]   ;;  %v13372_v49 = vld [vmem:[%s16527_s0 + $0x178] sm:$0xff]   ;;  %v13373_v50 = vld [vmem:[%s16527_s0 + $0x180] sm:$0xff]  }
  0x12   :  { %11693 = vmatmul.mubr.msk.bf16.gmra.mrb[4].mxu0 %vm960_vm0, %v13328_v5  ;;  %v13374_v51 = vld [vmem:[%s16527_s0 + $0x188] sm:$0xff]   ;;  %v13375_v52 = vld [vmem:[%s16527_s0 + $0x190] sm:$0xff]   ;;  %v13376_v53 = vld [vmem:[%s16527_s0 + $0x198] sm:$0xff]  }
  0x13   :  { %11696 = vmatprep.mubr.msk.bf16.mxu0 %vm960_vm0, %v13329_v6  ;;  %v13377_v54 = vld [vmem:[%s16527_s0 + $0x1a0] sm:$0xff]   ;;  %v13378_v55 = vld [vmem:[%s16527_s0 + $0x1a8] sm:$0xff]   ;;  %v13379_v56 = vld [vmem:[%s16527_s0 + $0x1b0] sm:$0xff]  }
  0x14   :  { %v13968_v57 = vld [vmem:[%s16528_s2] ss:$0 sm:$0xff]  ;;  %v13380_v60 = vld [vmem:[%s16527_s0 + $0x1b8] sm:$0xff]  }
  0x15   :  { %v13381_v63 = vld [vmem:[%s16527_s0 + $0x1c0] sm:$0xff]  }
  0x1a   :  { %11697 = vmatmul.mubr.msk.bf16.gmra.mrb[8].mxu0 %vm960_vm0, %v13330_v7 }
  0x1b   :  { %11700 = vmatprep.mubr.msk.bf16.mxu0 %vm960_vm0, %v13331_v8 }
  0x22   :  { %11701 = vmatmul.mubr.msk.bf16.gmra.mrb[12].mxu0 %vm960_vm0, %v13332_v9 }
  0x23   :  { %11704 = vmatprep.mubr.msk.bf16.mxu0 %vm960_vm0, %v13333_v10 }
  0x2a   :  { %11705 = vmatmul.mubr.msk.bf16.gmra.mrb[16].mxu0 %vm960_vm0, %v13334_v11 }
  0x2b   :  { %11708 = vmatprep.mubr.msk.bf16.mxu0 %vm960_vm0, %v13335_v12  ;;  %v13382_v12 = vld [vmem:[%s16527_s0 + $0x1c8] sm:$0xff]  }
  0x32   :  { %11709 = vmatmul.mubr.msk.bf16.gmra.mrb[20].mxu0 %vm960_vm0, %v13336_v13 }
  0x33   :  { %11712 = vmatprep.mubr.msk.bf16.mxu0 %vm960_vm0, %v13337_v14 }
  0x3a   :  { %11713 = vmatmul.mubr.msk.bf16.gmra.mrb[24].mxu0 %vm960_vm0, %v13338_v15  ;;  %v13383_v15 = vld [vmem:[%s16527_s0 + $0x1d0] sm:$0xff]  }
  0x3b   :  { %11716 = vmatprep.mubr.msk.bf16.mxu0 %vm960_vm0, %v13339_v16 }
  0x42   :  { %11717 = vmatmul.mubr.msk.bf16.gmra.mrb[28].mxu0 %vm960_vm0, %v13340_v17 }
  0x43   :  { %11720 = vmatprep.mubr.msk.bf16.mxu0 %vm960_vm0, %v13341_v18 }
  0x4a   :  { %11721 = vmatmul.mubr.msk.bf16.gmra.mrb[32].mxu0 %vm960_vm0, %v13342_v19 }
  0x4b   :  { %11724 = vmatprep.mubr.msk.bf16.mxu0 %vm960_vm0, %v13343_v20 }
  0x52   :  { %11725 = vmatmul.mubr.msk.bf16.gmra.mrb[36].mxu0 %vm960_vm0, %v13344_v21 }
  0x53   :  { %11728 = vmatprep.mubr.msk.bf16.mxu0 %vm960_vm0, %v13345_v22 }
  0x5a   :  { %11729 = vmatmul.mubr.msk.bf16.gmra.mrb[40].mxu0 %vm960_vm0, %v13346_v23 }
  0x5b   :  { %11732 = vmatprep.mubr.msk.bf16.mxu0 %vm960_vm0, %v13347_v24 }
  0x62   :  { %11733 = vmatmul.mubr.msk.bf16.gmra.mrb[44].mxu0 %vm960_vm0, %v13348_v25 }
  0x63   :  { %11736 = vmatprep.mubr.msk.bf16.mxu0 %vm960_vm0, %v13349_v26 }
  0x6a   :  { %11737 = vmatmul.mubr.msk.bf16.gmra.mrb[48].mxu0 %vm960_vm0, %v13350_v27 }
  0x6b   :  { %11740 = vmatprep.mubr.msk.bf16.mxu0 %vm960_vm0, %v13351_v28  ;;  %v13384_v28 = vld [vmem:[%s16527_s0 + $0x1d8] sm:$0xff]  }
  0x72   :  { %11741 = vmatmul.mubr.msk.bf16.gmra.mrb[52].mxu0 %vm960_vm0, %v13352_v29 }
  0x73   :  { %11744 = vmatprep.mubr.msk.bf16.mxu0 %vm960_vm0, %v13353_v30 }
  0x7a   :  { %11745 = vmatmul.mubr.msk.bf16.gmra.mrb[56].mxu0 %vm960_vm0, %v13354_v31  ;;  %v13385_v31 = vld [vmem:[%s16527_s0 + $0x1e0] sm:$0xff]  }
  0x7b   :  { %11748 = vmatprep.mubr.msk.bf16.mxu0 %vm960_vm0, %v13355_v32 }
  0x82   :  { %11749 = vmatmul.mubr.msk.bf16.gmra.mrb[60].mxu0 %vm960_vm0, %v13356_v33 }
  0x83   :  { %11752 = vmatprep.mubr.msk.bf16.mxu0 %vm960_vm0, %v13357_v34 }
  0x8a   :  { %11753 = vmatmul.mubr.msk.bf16.gmra.mrb[64].mxu0 %vm960_vm0, %v13358_v35 }
  0x8b   :  { %11756 = vmatprep.mubr.msk.bf16.mxu0 %vm960_vm0, %v13359_v36 }
  0x92   :  { %11757 = vmatmul.mubr.msk.bf16.gmra.mrb[68].mxu0 %vm960_vm0, %v13360_v37 }
  0x93   :  { %11760 = vmatprep.mubr.msk.bf16.mxu0 %vm960_vm0, %v13361_v38 }
  0x9a   :  { %11761 = vmatmul.mubr.msk.bf16.gmra.mrb[72].mxu0 %vm960_vm0, %v13362_v39 }
  0x9b   :  { %11764 = vmatprep.mubr.msk.bf16.mxu0 %vm960_vm0, %v13363_v40 }
  0xa2   :  { %11765 = vmatmul.mubr.msk.bf16.gmra.mrb[76].mxu0 %vm960_vm0, %v13364_v41 }
  0xa3   :  { %11768 = vmatprep.mubr.msk.bf16.mxu0 %vm960_vm0, %v13365_v42 }
  0xaa   :  { %11769 = vmatmul.mubr.msk.bf16.gmra.mrb[80].mxu0 %vm960_vm0, %v13366_v43 }
  0xab   :  { %11772 = vmatprep.mubr.msk.bf16.mxu0 %vm960_vm0, %v13367_v44  ;;  %v13386_v44 = vld [vmem:[%s16527_s0 + $0x1e8] sm:$0xff]  }
  0xb2   :  { %11773 = vmatmul.mubr.msk.bf16.gmra.mrb[84].mxu0 %vm960_vm0, %v13368_v45 }
  0xb3   :  { %11776 = vmatprep.mubr.msk.bf16.mxu0 %vm960_vm0, %v13369_v46 }
  0xba   :  { %11777 = vmatmul.mubr.msk.bf16.gmra.mrb[88].mxu0 %vm960_vm0, %v13370_v47  ;;  %v13387_v47 = vld [vmem:[%s16527_s0 + $0x1f0] sm:$0xff]  }
  0xbb   :  { %11780 = vmatprep.mubr.msk.bf16.mxu0 %vm960_vm0, %v13371_v48 }
  0xc2   :  { %11781 = vmatmul.mubr.msk.bf16.gmra.mrb[92].mxu0 %vm960_vm0, %v13372_v49 }
  0xc3   :  { %11784 = vmatprep.mubr.msk.bf16.mxu0 %vm960_vm0, %v13373_v50 }
  0xca   :  { %11785 = vmatmul.mubr.msk.bf16.gmra.mrb[96].mxu0 %vm960_vm0, %v13374_v51 }
  0xcb   :  { %11788 = vmatprep.mubr.msk.bf16.mxu0 %vm960_vm0, %v13375_v52 }
  0xd2   :  { %11789 = vmatmul.mubr.msk.bf16.gmra.mrb[100].mxu0 %vm960_vm0, %v13376_v53 }
  0xd3   :  { %11792 = vmatprep.mubr.msk.bf16.mxu0 %vm960_vm0, %v13377_v54 }
  0xda   :  { %11793 = vmatmul.mubr.msk.bf16.gmra.mrb[104].mxu0 %vm960_vm0, %v13378_v55 }
  0xdb   :  { %11796 = vmatprep.mubr.msk.bf16.mxu0 %vm960_vm0, %v13379_v56 }
  0xdd   :  { %v11690_v58 = vpop.f32.mrb[0].mxu0 }
  0xde   :  { %v1379_v59 = vpop.f32.mrb[1].mxu0  ;;  %v1388_v61 = vadd.f32 %v11690_v58, %v13968_v57 }
  0xdf   :  { %v11691_v62 = vpop.f32.mrb[2].mxu0  ;;  %v1380_v0 = vadd.f32 %v13968_v57, %v1379_v59 }
  0xe0   :  { %v1382_v1 = vpop.f32.mrb[3].mxu0  ;;  %v1391_v2 = vadd.f32 %v11691_v62, %v13968_v57  ;;  %v2404_v4 = vmax.f32 %v1388_v61, 0.0  ;;  %v13388_v62 = vld [vmem:[%s16527_s0 + $0x1f8] sm:$0xff]  }
  0xe1   :  { %v1383_v3 = vadd.f32 %v13968_v57, %v1382_v1  ;;  %v2402_v6 = vmax.f32 %v1380_v0, 0.0  ;;  %v13389_v1 = vld [vmem:[%s16527_s0 + $0x200] sm:$0xff]  }
  0xe2   :  { %11797 = vmatmul.mubr.msk.bf16.gmra.mrb[108].mxu0 %vm960_vm0, %v13380_v60  ;;  %v2405_v5 = vmax.f32 %v1391_v2, 0.0 }
  0xe3   :  { %11800 = vmatprep.mubr.msk.bf16.mxu0 %vm960_vm0, %v13381_v63  ;;  %v2403_v7 = vmax.f32 %v1383_v3, 0.0 }
  0xe4   :  { %v13982_v8 = vpack.c.bf16 %v2405_v5, %v2404_v4 }
  0xe5   :  { %v11694_v9 = vpop.f32.mrb[4].mxu0  ;;  %v13984_v10 = vpack.c.bf16 %v2403_v7, %v2402_v6 }
  0xe6   :  { %v1395_v11 = vpop.f32.mrb[5].mxu0  ;;  %v1404_v13 = vadd.f32 %v11694_v9, %v13968_v57 }
  0xe7   :  { %v11695_v14 = vpop.f32.mrb[6].mxu0  ;;  %v1396_v16 = vadd.f32 %v13968_v57, %v1395_v11 }
  0xe8   :  { %v1398_v17 = vpop.f32.mrb[7].mxu0  ;;  %v1407_v18 = vadd.f32 %v11695_v14, %v13968_v57  ;;  %v2408_v20 = vmax.f32 %v1404_v13, 0.0 }
  0xe9   :  { %v1399_v19 = vadd.f32 %v13968_v57, %v1398_v17  ;;  %v2406_v22 = vmax.f32 %v1396_v16, 0.0  ;;  %v13390_v16 = vld [vmem:[%s16527_s0 + $0x208] sm:$0xff]  }
  0xea   :  { %11801 = vmatmul.mubr.msk.bf16.gmra.mrb[112].mxu0 %vm960_vm0, %v13382_v12  ;;  %v2409_v21 = vmax.f32 %v1407_v18, 0.0 }
  0xeb   :  { %11804 = vmatprep.mubr.msk.bf16.mxu0 %vm960_vm0, %v13383_v15  ;;  %v2407_v23 = vmax.f32 %v1399_v19, 0.0  ;;  %v13391_v19 = vld [vmem:[%s16527_s0 + $0x210] sm:$0xff]  }
  0xec   :  { %v13998_v24 = vpack.c.bf16 %v2409_v21, %v2408_v20 }
  0xed   :  { %v11698_v25 = vpop.f32.mrb[8].mxu0  ;;  %v14000_v26 = vpack.c.bf16 %v2407_v23, %v2406_v22 }
  0xee   :  { %v1411_v27 = vpop.f32.mrb[9].mxu0  ;;  %v1420_v29 = vadd.f32 %v11698_v25, %v13968_v57 }
  0xef   :  { %v11699_v30 = vpop.f32.mrb[10].mxu0  ;;  %v1412_v32 = vadd.f32 %v13968_v57, %v1411_v27 }
  0xf0   :  { %v1414_v33 = vpop.f32.mrb[11].mxu0  ;;  %v1423_v34 = vadd.f32 %v11699_v30, %v13968_v57  ;;  %v2412_v36 = vmax.f32 %v1420_v29, 0.0 }
  0xf1   :  { %v1415_v35 = vadd.f32 %v13968_v57, %v1414_v33  ;;  %v2410_v38 = vmax.f32 %v1412_v32, 0.0 }
  0xf2   :  { %11805 = vmatmul.mubr.msk.bf16.gmra.mrb[116].mxu0 %vm960_vm0, %v13384_v28  ;;  %v2413_v37 = vmax.f32 %v1423_v34, 0.0  ;;  %v13392_v34 = vld [vmem:[%s16527_s0 + $0x218] sm:$0xff]  }
  0xf3   :  { %11808 = vmatprep.mubr.msk.bf16.mxu0 %vm960_vm0, %v13385_v31  ;;  %v2411_v39 = vmax.f32 %v1415_v35, 0.0 }
  0xf4   :  { %v14014_v40 = vpack.c.bf16 %v2413_v37, %v2412_v36  ;;  %v13393_v37 = vld [vmem:[%s16527_s0 + $0x220] sm:$0xff]  }
  0xf5   :  { %v11702_v41 = vpop.f32.mrb[12].mxu0  ;;  %v14016_v42 = vpack.c.bf16 %v2411_v39, %v2410_v38 }
  0xf6   :  { %v1427_v43 = vpop.f32.mrb[13].mxu0  ;;  %v1436_v45 = vadd.f32 %v11702_v41, %v13968_v57 }
  0xf7   :  { %v11703_v46 = vpop.f32.mrb[14].mxu0  ;;  %v1428_v48 = vadd.f32 %v13968_v57, %v1427_v43 }
  0xf8   :  { %v1430_v49 = vpop.f32.mrb[15].mxu0  ;;  %v1439_v50 = vadd.f32 %v11703_v46, %v13968_v57  ;;  %v2416_v52 = vmax.f32 %v1436_v45, 0.0 }
  0xf9   :  { %v1431_v51 = vadd.f32 %v13968_v57, %v1430_v49  ;;  %v2414_v54 = vmax.f32 %v1428_v48, 0.0 }
  0xfa   :  { %11809 = vmatmul.mubr.msk.bf16.gmra.mrb[120].mxu0 %vm960_vm0, %v13386_v44  ;;  %v2417_v53 = vmax.f32 %v1439_v50, 0.0 }
  0xfb   :  { %11812 = vmatprep.mubr.msk.bf16.mxu0 %vm960_vm0, %v13387_v47  ;;  %v2415_v55 = vmax.f32 %v1431_v51, 0.0 }
  0xfc   :  { %v14030_v56 = vpack.c.bf16 %v2417_v53, %v2416_v52  ;;  %v13394_v52 = vld [vmem:[%s16527_s0 + $0x228] sm:$0xff]  }
  0xfd   :  { %v11706_v58 = vpop.f32.mrb[16].mxu0  ;;  %v14032_v59 = vpack.c.bf16 %v2415_v55, %v2414_v54  ;;  %v13395_v55 = vld [vmem:[%s16527_s0 + $0x230] sm:$0xff]  }
  0xfe   :  { %v1452_v60 = vadd.f32 %v11706_v58, %v13968_v57  ;;  %v1443_v61 = vpop.f32.mrb[17].mxu0 }
  0xff   :  { %v1444_v63 = vadd.f32 %v13968_v57, %v1443_v61  ;;  %v11707_v0 = vpop.f32.mrb[18].mxu0 }
 0x100   :  { %v1455_v2 = vadd.f32 %v11707_v0, %v13968_v57  ;;  %v1446_v3 = vpop.f32.mrb[19].mxu0  ;;  %v2420_v5 = vmax.f32 %v1452_v60, 0.0 }
 0x101   :  { %v1447_v4 = vadd.f32 %v13968_v57, %v1446_v3  ;;  %v2418_v7 = vmax.f32 %v1444_v63, 0.0 }
 0x102   :  { %v2421_v6 = vmax.f32 %v1455_v2, 0.0  ;;  %11813 = vmatmul.mubr.msk.bf16.gmra.mrb[124].mxu0 %vm960_vm0, %v13388_v62 }
 0x103   :  { %v2419_v9 = vmax.f32 %v1447_v4, 0.0  ;;  %11816 = vmatprep.mubr.msk.bf16.mxu0 %vm960_vm0, %v13389_v1 }
 0x104   :  { %v14046_v11 = vpack.c.bf16 %v2421_v6, %v2420_v5 }
 0x105   :  { %v14048_v12 = vpack.c.bf16 %v2419_v9, %v2418_v7  ;;  %v11710_v13 = vpop.f32.mrb[20].mxu0  ;;  %v13396_v7 = vld [vmem:[%s16527_s0 + $0x238] sm:$0xff]  }
 0x106   :  { %v1468_v14 = vadd.f32 %v11710_v13, %v13968_v57  ;;  %v1459_v15 = vpop.f32.mrb[21].mxu0 }
 0x107   :  { %v1460_v17 = vadd.f32 %v13968_v57, %v1459_v15  ;;  %v11711_v18 = vpop.f32.mrb[22].mxu0 }
 0x108   :  { %v1471_v20 = vadd.f32 %v11711_v18, %v13968_v57  ;;  %v1462_v21 = vpop.f32.mrb[23].mxu0  ;;  %v2424_v23 = vmax.f32 %v1468_v14, 0.0  ;;  %v13397_v14 = vld [vmem:[%s16527_s0 + $0x240] sm:$0xff]  }
 0x109   :  { %v1463_v22 = vadd.f32 %v13968_v57, %v1462_v21  ;;  %v2422_v27 = vmax.f32 %v1460_v17, 0.0 }
 0x10a   :  { %v2425_v25 = vmax.f32 %v1471_v20, 0.0  ;;  %11817 = vmatmul.mubr.msk.bf16.gmra.mrb[128].mxu0 %vm960_vm0, %v13390_v16 }
 0x10b   :  { %v2423_v28 = vmax.f32 %v1463_v22, 0.0  ;;  %11820 = vmatprep.mubr.msk.bf16.mxu0 %vm960_vm0, %v13391_v19 }
 0x10c   :  { %v14062_v29 = vpack.c.bf16 %v2425_v25, %v2424_v23 }
 0x10d   :  { %v14064_v30 = vpack.c.bf16 %v2423_v28, %v2422_v27  ;;  %v11714_v31 = vpop.f32.mrb[24].mxu0 }
 0x10e   :  { %v1484_v32 = vadd.f32 %v11714_v31, %v13968_v57  ;;  %v1475_v33 = vpop.f32.mrb[25].mxu0  ;;  %v13398_v31 = vld [vmem:[%s16527_s0 + $0x248] sm:$0xff]  }
 0x10f   :  { %v1476_v35 = vadd.f32 %v13968_v57, %v1475_v33  ;;  %v11715_v36 = vpop.f32.mrb[26].mxu0 }
 0x110   :  { %v1487_v38 = vadd.f32 %v11715_v36, %v13968_v57  ;;  %v1478_v39 = vpop.f32.mrb[27].mxu0  ;;  %v2428_v43 = vmax.f32 %v1484_v32, 0.0 }
 0x111   :  { %v1479_v41 = vadd.f32 %v13968_v57, %v1478_v39  ;;  %v2426_v45 = vmax.f32 %v1476_v35, 0.0 }
 0x112   :  { %v2429_v44 = vmax.f32 %v1487_v38, 0.0  ;;  %11821 = vmatmul.mubr.msk.bf16.gmra.mrb[132].mxu0 %vm960_vm0, %v13392_v34  ;;  %v13399_v34 = vld [vmem:[%s16527_s0 + $0x250] sm:$0xff]  }
 0x113   :  { %v2427_v46 = vmax.f32 %v1479_v41, 0.0  ;;  %11824 = vmatprep.mubr.msk.bf16.mxu0 %vm960_vm0, %v13393_v37 }
 0x114   :  { %v14078_v47 = vpack.c.bf16 %v2429_v44, %v2428_v43 }
 0x115   :  { %v14080_v48 = vpack.c.bf16 %v2427_v46, %v2426_v45  ;;  %v11718_v49 = vpop.f32.mrb[28].mxu0 }
 0x116   :  { %v1500_v50 = vadd.f32 %v11718_v49, %v13968_v57  ;;  %v1491_v51 = vpop.f32.mrb[29].mxu0 }
 0x117   :  { %v1492_v53 = vadd.f32 %v13968_v57, %v1491_v51  ;;  %v11719_v54 = vpop.f32.mrb[30].mxu0  ;;  %v13400_v51 = vld [vmem:[%s16527_s0 + $0x258] sm:$0xff]  }
 0x118   :  { %v1503_v58 = vadd.f32 %v11719_v54, %v13968_v57  ;;  %v1494_v60 = vpop.f32.mrb[31].mxu0  ;;  %v2432_v62 = vmax.f32 %v1500_v50, 0.0  ;;  %v13401_v54 = vld [vmem:[%s16527_s0 + $0x260] sm:$0xff]  }
 0x119   :  { %v1495_v61 = vadd.f32 %v13968_v57, %v1494_v60  ;;  %v2430_v0 = vmax.f32 %v1492_v53, 0.0 }
 0x11a   :  { %v2433_v63 = vmax.f32 %v1503_v58, 0.0  ;;  %11825 = vmatmul.mubr.msk.bf16.gmra.mrb[136].mxu0 %vm960_vm0, %v13394_v52 }
 0x11b   :  { %v2431_v1 = vmax.f32 %v1495_v61, 0.0  ;;  %11828 = vmatprep.mubr.msk.bf16.mxu0 %vm960_vm0, %v13395_v55 }
 0x11c   :  { %v14094_v2 = vpack.c.bf16 %v2433_v63, %v2432_v62 }
 0x11d   :  { %v14096_v3 = vpack.c.bf16 %v2431_v1, %v2430_v0  ;;  %v11722_v4 = vpop.f32.mrb[32].mxu0 }
 0x11e   :  { %16591 = vst [vmem:[#allocation4_spill] sm:$0xff] %v14094_v2  ;;  %v1516_v5 = vadd.f32 %v11722_v4, %v13968_v57  ;;  %v1507_v6 = vpop.f32.mrb[33].mxu0 }
 0x11f   :  { %16592 = vst [vmem:[#allocation5_spill] sm:$0xff] %v14096_v3  ;;  %v1508_v9 = vadd.f32 %v13968_v57, %v1507_v6  ;;  %v11723_v13 = vpop.f32.mrb[34].mxu0 }
 0x120   :  { %v1519_v15 = vadd.f32 %v11723_v13, %v13968_v57  ;;  %v1510_v16 = vpop.f32.mrb[35].mxu0  ;;  %v2436_v18 = vmax.f32 %v1516_v5, 0.0 }
 0x121   :  { %v1511_v17 = vadd.f32 %v13968_v57, %v1510_v16  ;;  %v2434_v20 = vmax.f32 %v1508_v9, 0.0  ;;  %v13402_v9 = vld [vmem:[%s16527_s0 + $0x268] sm:$0xff]  }
 0x122   :  { %v2437_v19 = vmax.f32 %v1519_v15, 0.0  ;;  %11829 = vmatmul.mubr.msk.bf16.gmra.mrb[140].mxu0 %vm960_vm0, %v13396_v7  ;;  %v13403_v15 = vld [vmem:[%s16527_s0 + $0x270] sm:$0xff]  }
 0x123   :  { %v2435_v21 = vmax.f32 %v1511_v17, 0.0  ;;  %11832 = vmatprep.mubr.msk.bf16.mxu0 %vm960_vm0, %v13397_v14 }
 0x124   :  { %v14110_v22 = vpack.c.bf16 %v2437_v19, %v2436_v18 }
 0x125   :  { %v14112_v23 = vpack.c.bf16 %v2435_v21, %v2434_v20  ;;  %v11726_v25 = vpop.f32.mrb[36].mxu0 }
 0x126   :  { %16593 = vst [vmem:[#allocation6_spill] sm:$0xff] %v14110_v22  ;;  %v1532_v27 = vadd.f32 %v11726_v25, %v13968_v57  ;;  %v1523_v28 = vpop.f32.mrb[37].mxu0 }
 0x127   :  { %16594 = vst [vmem:[#allocation7_spill] sm:$0xff] %v14112_v23  ;;  %v1524_v32 = vadd.f32 %v13968_v57, %v1523_v28  ;;  %v11727_v33 = vpop.f32.mrb[38].mxu0 }
 0x128   :  { %v1535_v35 = vadd.f32 %v11727_v33, %v13968_v57  ;;  %v1526_v36 = vpop.f32.mrb[39].mxu0  ;;  %v2440_v38 = vmax.f32 %v1532_v27, 0.0 }
 0x129   :  { %v1527_v37 = vadd.f32 %v13968_v57, %v1526_v36  ;;  %v2438_v41 = vmax.f32 %v1524_v32, 0.0 }
 0x12a   :  { %v2441_v39 = vmax.f32 %v1535_v35, 0.0  ;;  %11833 = vmatmul.mubr.msk.bf16.gmra.mrb[144].mxu0 %vm960_vm0, %v13398_v31 }
 0x12b   :  { %v2439_v43 = vmax.f32 %v1527_v37, 0.0  ;;  %11836 = vmatprep.mubr.msk.bf16.mxu0 %vm960_vm0, %v13399_v34  ;;  %v13404_v34 = vld [vmem:[%s16527_s0 + $0x278] sm:$0xff]   ;;  %v13405_v37 = vld [vmem:[%s16527_s0 + $0x280] sm:$0xff]  }
 0x12c   :  { %v14126_v44 = vpack.c.bf16 %v2441_v39, %v2440_v38 }
 0x12d   :  { %v14128_v45 = vpack.c.bf16 %v2439_v43, %v2438_v41  ;;  %v11730_v46 = vpop.f32.mrb[40].mxu0 }
 0x12e   :  { %16595 = vst [vmem:[#allocation8_spill] sm:$0xff] %v14126_v44  ;;  %v1548_v49 = vadd.f32 %v11730_v46, %v13968_v57  ;;  %v1539_v50 = vpop.f32.mrb[41].mxu0 }
 0x12f   :  { %16596 = vst [vmem:[#allocation9_spill] sm:$0xff] %v14128_v45  ;;  %v1540_v52 = vadd.f32 %v13968_v57, %v1539_v50  ;;  %v11731_v53 = vpop.f32.mrb[42].mxu0 }
 0x130   :  { %v1551_v55 = vadd.f32 %v11731_v53, %v13968_v57  ;;  %v1542_v58 = vpop.f32.mrb[43].mxu0  ;;  %v2444_v61 = vmax.f32 %v1548_v49, 0.0 }
 0x131   :  { %v1543_v60 = vadd.f32 %v13968_v57, %v1542_v58  ;;  %v2442_v63 = vmax.f32 %v1540_v52, 0.0  ;;  %v13406_v58 = vld [vmem:[%s16527_s0 + $0x288] sm:$0xff]  }
 0x132   :  { %v2445_v62 = vmax.f32 %v1551_v55, 0.0  ;;  %11837 = vmatmul.mubr.msk.bf16.gmra.mrb[148].mxu0 %vm960_vm0, %v13400_v51 }
 0x133   :  { %v2443_v0 = vmax.f32 %v1543_v60, 0.0  ;;  %11840 = vmatprep.mubr.msk.bf16.mxu0 %vm960_vm0, %v13401_v54 }
 0x134   :  { %v14142_v1 = vpack.c.bf16 %v2445_v62, %v2444_v61  ;;  %v13407_v62 = vld [vmem:[%s16527_s0 + $0x290] sm:$0xff]  }
 0x135   :  { %v14144_v4 = vpack.c.bf16 %v2443_v0, %v2442_v63  ;;  %v11734_v5 = vpop.f32.mrb[44].mxu0 }
 0x136   :  { %16597 = vst [vmem:[#allocation10_spill] sm:$0xff] %v14142_v1  ;;  %v1564_v6 = vadd.f32 %v11734_v5, %v13968_v57  ;;  %v1555_v7 = vpop.f32.mrb[45].mxu0 }
 0x137   :  { %16598 = vst [vmem:[#allocation11_spill] sm:$0xff] %v14144_v4  ;;  %v1556_v13 = vadd.f32 %v13968_v57, %v1555_v7  ;;  %v11735_v14 = vpop.f32.mrb[46].mxu0 }
 0x138   :  { %v1567_v16 = vadd.f32 %v11735_v14, %v13968_v57  ;;  %v1558_v17 = vpop.f32.mrb[47].mxu0  ;;  %v2448_v19 = vmax.f32 %v1564_v6, 0.0 }
 0x139   :  { %v1559_v18 = vadd.f32 %v13968_v57, %v1558_v17  ;;  %v2446_v21 = vmax.f32 %v1556_v13, 0.0 }
 0x13a   :  { %v2449_v20 = vmax.f32 %v1567_v16, 0.0  ;;  %11841 = vmatmul.mubr.msk.bf16.gmra.mrb[152].mxu0 %vm960_vm0, %v13402_v9 }
 0x13b   :  { %v2447_v25 = vmax.f32 %v1559_v18, 0.0  ;;  %11844 = vmatprep.mubr.msk.bf16.mxu0 %vm960_vm0, %v13403_v15 }
 0x13c   :  { %v14158_v27 = vpack.c.bf16 %v2449_v20, %v2448_v19  ;;  %v13408_v19 = vld [vmem:[%s16527_s0 + $0x298] sm:$0xff]  }
 0x13d   :  { %v14160_v28 = vpack.c.bf16 %v2447_v25, %v2446_v21  ;;  %v11738_v31 = vpop.f32.mrb[48].mxu0  ;;  %v13409_v25 = vld [vmem:[%s16527_s0 + $0x2a0] sm:$0xff]  }
 0x13e   :  { %16599 = vst [vmem:[#allocation12_spill] sm:$0xff] %v14158_v27  ;;  %v1580_v32 = vadd.f32 %v11738_v31, %v13968_v57  ;;  %v1571_v33 = vpop.f32.mrb[49].mxu0 }
 0x13f   :  { %16600 = vst [vmem:[#allocation13_spill] sm:$0xff] %v14160_v28  ;;  %v1572_v35 = vadd.f32 %v13968_v57, %v1571_v33  ;;  %v11739_v36 = vpop.f32.mrb[50].mxu0 }
 0x140   :  { %v1583_v38 = vadd.f32 %v11739_v36, %v13968_v57  ;;  %v1574_v39 = vpop.f32.mrb[51].mxu0  ;;  %v2452_v43 = vmax.f32 %v1580_v32, 0.0 }
 0x141   :  { %v1575_v41 = vadd.f32 %v13968_v57, %v1574_v39  ;;  %v2450_v49 = vmax.f32 %v1572_v35, 0.0 }
 0x142   :  { %v2453_v46 = vmax.f32 %v1583_v38, 0.0  ;;  %11845 = vmatmul.mubr.msk.bf16.gmra.mrb[156].mxu0 %vm960_vm0, %v13404_v34 }
 0x143   :  { %v2451_v50 = vmax.f32 %v1575_v41, 0.0  ;;  %11848 = vmatprep.mubr.msk.bf16.mxu0 %vm960_vm0, %v13405_v37 }
 0x144   :  { %v14174_v51 = vpack.c.bf16 %v2453_v46, %v2452_v43 }
 0x145   :  { %v14176_v52 = vpack.c.bf16 %v2451_v50, %v2450_v49  ;;  %v11742_v53 = vpop.f32.mrb[52].mxu0  ;;  %v13410_v49 = vld [vmem:[%s16527_s0 + $0x2a8] sm:$0xff]  }
 0x146   :  { %16601 = vst [vmem:[#allocation14_spill] sm:$0xff] %v14174_v51  ;;  %v1596_v54 = vadd.f32 %v11742_v53, %v13968_v57  ;;  %v1587_v55 = vpop.f32.mrb[53].mxu0 }
 0x147   :  { %16602 = vst [vmem:[#allocation15_spill] sm:$0xff] %v14176_v52  ;;  %v1588_v60 = vadd.f32 %v13968_v57, %v1587_v55  ;;  %v11743_v61 = vpop.f32.mrb[54].mxu0 }
 0x148   :  { %v1599_v63 = vadd.f32 %v11743_v61, %v13968_v57  ;;  %v1590_v0 = vpop.f32.mrb[55].mxu0  ;;  %v2456_v6 = vmax.f32 %v1596_v54, 0.0  ;;  %v13411_v54 = vld [vmem:[%s16527_s0 + $0x2b0] sm:$0xff]  }
 0x149   :  { %v1591_v5 = vadd.f32 %v13968_v57, %v1590_v0  ;;  %v2454_v9 = vmax.f32 %v1588_v60, 0.0 }
 0x14a   :  { %v2457_v7 = vmax.f32 %v1599_v63, 0.0  ;;  %11849 = vmatmul.mubr.msk.bf16.gmra.mrb[160].mxu0 %vm960_vm0, %v13406_v58 }
 0x14b   :  { %v2455_v13 = vmax.f32 %v1591_v5, 0.0  ;;  %11852 = vmatprep.mubr.msk.bf16.mxu0 %vm960_vm0, %v13407_v62 }
 0x14c   :  { %v14190_v14 = vpack.c.bf16 %v2457_v7, %v2456_v6 }
 0x14d   :  { %v14192_v15 = vpack.c.bf16 %v2455_v13, %v2454_v9  ;;  %v11746_v16 = vpop.f32.mrb[56].mxu0 }
 0x14e   :  { %16603 = vst [vmem:[#allocation16_spill] sm:$0xff] %v14190_v14  ;;  %v1612_v17 = vadd.f32 %v11746_v16, %v13968_v57  ;;  %v1603_v18 = vpop.f32.mrb[57].mxu0  ;;  %v13412_v16 = vld [vmem:[%s16527_s0 + $0x2b8] sm:$0xff]  }
 0x14f   :  { %16604 = vst [vmem:[#allocation17_spill] sm:$0xff] %v14192_v15  ;;  %v1604_v20 = vadd.f32 %v13968_v57, %v1603_v18  ;;  %v11747_v21 = vpop.f32.mrb[58].mxu0 }
 0x150   :  { %v1615_v31 = vadd.f32 %v11747_v21, %v13968_v57  ;;  %v1606_v32 = vpop.f32.mrb[59].mxu0  ;;  %v2460_v34 = vmax.f32 %v1612_v17, 0.0 }
 0x151   :  { %v1607_v33 = vadd.f32 %v13968_v57, %v1606_v32  ;;  %v2458_v36 = vmax.f32 %v1604_v20, 0.0 }
 0x152   :  { %v2461_v35 = vmax.f32 %v1615_v31, 0.0  ;;  %11853 = vmatmul.mubr.msk.bf16.gmra.mrb[164].mxu0 %vm960_vm0, %v13408_v19  ;;  %v13413_v19 = vld [vmem:[%s16527_s0 + $0x2c0] sm:$0xff]  }
 0x153   :  { %v2459_v37 = vmax.f32 %v1607_v33, 0.0  ;;  %11856 = vmatprep.mubr.msk.bf16.mxu0 %vm960_vm0, %v13409_v25 }
 0x154   :  { %v14206_v38 = vpack.c.bf16 %v2461_v35, %v2460_v34 }
 0x155   :  { %v14208_v39 = vpack.c.bf16 %v2459_v37, %v2458_v36  ;;  %v11750_v41 = vpop.f32.mrb[60].mxu0 }
 0x156   :  { %16605 = vst [vmem:[#allocation18_spill] sm:$0xff] %v14206_v38  ;;  %v1628_v43 = vadd.f32 %v11750_v41, %v13968_v57  ;;  %v1619_v46 = vpop.f32.mrb[61].mxu0 }
 0x157   :  { %16606 = vst [vmem:[#allocation19_spill] sm:$0xff] %v14208_v39  ;;  %v1620_v50 = vadd.f32 %v13968_v57, %v1619_v46  ;;  %v11751_v53 = vpop.f32.mrb[62].mxu0 }
 0x158   :  { %v1631_v55 = vadd.f32 %v11751_v53, %v13968_v57  ;;  %v1622_v58 = vpop.f32.mrb[63].mxu0  ;;  %v2464_v61 = vmax.f32 %v1628_v43, 0.0 }
 0x159   :  { %v1623_v60 = vadd.f32 %v13968_v57, %v1622_v58  ;;  %v2462_v63 = vmax.f32 %v1620_v50, 0.0 }
 0x15a   :  { %v2465_v62 = vmax.f32 %v1631_v55, 0.0  ;;  %11857 = vmatmul.mubr.msk.bf16.gmra.mrb[168].mxu0 %vm960_vm0, %v13410_v49  ;;  %v13414_v49 = vld [vmem:[%s16527_s0 + $0x2c8] sm:$0xff]   ;;  %v13415_v55 = vld [vmem:[%s16527_s0 + $0x2d0] sm:$0xff]  }
 0x15b   :  { %v2463_v0 = vmax.f32 %v1623_v60, 0.0  ;;  %11860 = vmatprep.mubr.msk.bf16.mxu0 %vm960_vm0, %v13411_v54 }
 0x15c   :  { %v14222_v5 = vpack.c.bf16 %v2465_v62, %v2464_v61 }
 0x15d   :  { %v14224_v6 = vpack.c.bf16 %v2463_v0, %v2462_v63  ;;  %v11754_v7 = vpop.f32.mrb[64].mxu0 }
 0x15e   :  { %16607 = vst [vmem:[#allocation20_spill] sm:$0xff] %v14222_v5  ;;  %v1644_v9 = vadd.f32 %v11754_v7, %v13968_v57  ;;  %v1635_v13 = vpop.f32.mrb[65].mxu0 }
 0x15f   :  { %16608 = vst [vmem:[#allocation21_spill] sm:$0xff] %v14224_v6  ;;  %v1636_v17 = vadd.f32 %v13968_v57, %v1635_v13  ;;  %v11755_v18 = vpop.f32.mrb[66].mxu0 }
 0x160   :  { %v1647_v20 = vadd.f32 %v11755_v18, %v13968_v57  ;;  %v1638_v21 = vpop.f32.mrb[67].mxu0  ;;  %v2468_v31 = vmax.f32 %v1644_v9, 0.0 }
 0x161   :  { %v1639_v25 = vadd.f32 %v13968_v57, %v1638_v21  ;;  %v2466_v33 = vmax.f32 %v1636_v17, 0.0 }
 0x162   :  { %v2469_v32 = vmax.f32 %v1647_v20, 0.0  ;;  %11861 = vmatmul.mubr.msk.bf16.gmra.mrb[172].mxu0 %vm960_vm0, %v13412_v16  ;;  %v13416_v20 = vld [vmem:[%s16527_s0 + $0x2d8] sm:$0xff]  }
 0x163   :  { %v2467_v34 = vmax.f32 %v1639_v25, 0.0  ;;  %11864 = vmatprep.mubr.msk.bf16.mxu0 %vm960_vm0, %v13413_v19 }
 0x164   :  { %v14238_v35 = vpack.c.bf16 %v2469_v32, %v2468_v31  ;;  %v13417_v32 = vld [vmem:[%s16527_s0 + $0x2e0] sm:$0xff]  }
 0x165   :  { %v14240_v36 = vpack.c.bf16 %v2467_v34, %v2466_v33  ;;  %v11758_v37 = vpop.f32.mrb[68].mxu0 }
 0x166   :  { %v1660_v43 = vadd.f32 %v11758_v37, %v13968_v57  ;;  %v1651_v46 = vpop.f32.mrb[69].mxu0 }
 0x167   :  { %v1652_v53 = vadd.f32 %v13968_v57, %v1651_v46  ;;  %v11759_v54 = vpop.f32.mrb[70].mxu0 }
 0x168   :  { %v1663_v58 = vadd.f32 %v11759_v54, %v13968_v57  ;;  %v1654_v60 = vpop.f32.mrb[71].mxu0  ;;  %v2472_v62 = vmax.f32 %v1660_v43, 0.0 }
 0x169   :  { %v1655_v61 = vadd.f32 %v13968_v57, %v1654_v60  ;;  %v2470_v0 = vmax.f32 %v1652_v53, 0.0 }
 0x16a   :  { %v2473_v63 = vmax.f32 %v1663_v58, 0.0  ;;  %11865 = vmatmul.mubr.msk.bf16.gmra.mrb[176].mxu0 %vm960_vm0, %v13414_v49 }
 0x16b   :  { %v2471_v7 = vmax.f32 %v1655_v61, 0.0  ;;  %11868 = vmatprep.mubr.msk.bf16.mxu0 %vm960_vm0, %v13415_v55 }
 0x16c   :  { %v14258_v9 = vpack.c.bf16 %v2473_v63, %v2472_v62  ;;  %v13418_v63 = vld [vmem:[%s16527_s0 + $0x2e8] sm:$0xff]  }
 0x16d   :  { %v14260_v13 = vpack.c.bf16 %v2471_v7, %v2470_v0  ;;  %v11762_v16 = vpop.f32.mrb[72].mxu0 }
 0x16e   :  { %v1676_v18 = vadd.f32 %v11762_v16, %v13968_v57  ;;  %v1667_v19 = vpop.f32.mrb[73].mxu0 }
 0x16f   :  { %v1668_v25 = vadd.f32 %v13968_v57, %v1667_v19  ;;  %v11763_v31 = vpop.f32.mrb[74].mxu0 }
 0x170   :  { %v1679_v33 = vadd.f32 %v11763_v31, %v13968_v57  ;;  %v1670_v34 = vpop.f32.mrb[75].mxu0  ;;  %v2476_v43 = vmax.f32 %v1676_v18, 0.0  ;;  %v13419_v18 = vld [vmem:[%s16527_s0 + $0x2f0] sm:$0xff]  }
 0x171   :  { %v1671_v37 = vadd.f32 %v13968_v57, %v1670_v34  ;;  %v2474_v49 = vmax.f32 %v1668_v25, 0.0 }
 0x172   :  { %v2477_v46 = vmax.f32 %v1679_v33, 0.0  ;;  %11869 = vmatmul.mubr.msk.bf16.gmra.mrb[180].mxu0 %vm960_vm0, %v13416_v20 }
 0x173   :  { %v2475_v53 = vmax.f32 %v1671_v37, 0.0  ;;  %11872 = vmatprep.mubr.msk.bf16.mxu0 %vm960_vm0, %v13417_v32 }
 0x174   :  { %v14278_v54 = vpack.c.bf16 %v2477_v46, %v2476_v43 }
 0x175   :  { %v14280_v55 = vpack.c.bf16 %v2475_v53, %v2474_v49  ;;  %v11766_v58 = vpop.f32.mrb[76].mxu0 }
 0x176   :  { %v1692_v61 = vadd.f32 %v11766_v58, %v13968_v57  ;;  %v1683_v62 = vpop.f32.mrb[77].mxu0 }
 0x177   :  { %v1684_v7 = vadd.f32 %v13968_v57, %v1683_v62  ;;  %v11767_v16 = vpop.f32.mrb[78].mxu0 }
 0x178   :  { %v1695_v19 = vadd.f32 %v11767_v16, %v13968_v57  ;;  %v1686_v20 = vpop.f32.mrb[79].mxu0  ;;  %v2480_v31 = vmax.f32 %v1692_v61, 0.0  ;;  %v13420_v61 = vld [vmem:[%s16527_s0 + $0x2f8] sm:$0xff]   ;;  %v13421_v16 = vld [vmem:[%s16527_s0 + $0x300] sm:$0xff]  }
 0x179   :  { %v1687_v25 = vadd.f32 %v13968_v57, %v1686_v20  ;;  %v2478_v33 = vmax.f32 %v1684_v7, 0.0 }
 0x17a   :  { %v2481_v32 = vmax.f32 %v1695_v19, 0.0  ;;  %11873 = vmatmul.mubr.msk.bf16.gmra.mrb[184].mxu0 %vm960_vm0, %v13418_v63 }
 0x17b   :  { %v2479_v34 = vmax.f32 %v1687_v25, 0.0  ;;  %11876 = vmatprep.mubr.msk.bf16.mxu0 %vm960_vm0, %v13419_v18 }
 0x17c   :  { %v14298_v37 = vpack.c.bf16 %v2481_v32, %v2480_v31 }
 0x17d   :  { %v14300_v43 = vpack.c.bf16 %v2479_v34, %v2478_v33  ;;  %v11770_v46 = vpop.f32.mrb[80].mxu0 }
 0x17e   :  { %v1708_v53 = vadd.f32 %v11770_v46, %v13968_v57  ;;  %v1699_v58 = vpop.f32.mrb[81].mxu0 }
 0x17f   :  { %v1700_v63 = vadd.f32 %v13968_v57, %v1699_v58  ;;  %v11771_v7 = vpop.f32.mrb[82].mxu0 }
 0x180   :  { %v1711_v18 = vadd.f32 %v11771_v7, %v13968_v57  ;;  %v1702_v19 = vpop.f32.mrb[83].mxu0  ;;  %v2484_v25 = vmax.f32 %v1708_v53, 0.0  ;;  %v13422_v53 = vld [vmem:[%s16527_s0 + $0x308] sm:$0xff]  }
 0x181   :  { %v1703_v20 = vadd.f32 %v13968_v57, %v1702_v19  ;;  %v2482_v32 = vmax.f32 %v1700_v63, 0.0 }
 0x182   :  { %v2485_v31 = vmax.f32 %v1711_v18, 0.0  ;;  %11877 = vmatmul.mubr.msk.bf16.gmra.mrb[188].mxu0 %vm960_vm0, %v13420_v61  ;;  %v13423_v18 = vld [vmem:[%s16527_s0 + $0x310] sm:$0xff]  }
 0x183   :  { %v2483_v33 = vmax.f32 %v1703_v20, 0.0  ;;  %11880 = vmatprep.mubr.msk.bf16.mxu0 %vm960_vm0, %v13421_v16 }
 0x184   :  { %v14318_v34 = vpack.c.bf16 %v2485_v31, %v2484_v25 }
 0x185   :  { %v14320_v46 = vpack.c.bf16 %v2483_v33, %v2482_v32  ;;  %v11774_v58 = vpop.f32.mrb[84].mxu0 }
 0x186   :  { %v1724_v7 = vadd.f32 %v11774_v58, %v13968_v57  ;;  %v1715_v49 = vpop.f32.mrb[85].mxu0 }
 0x187   :  { %v1716_v63 = vadd.f32 %v13968_v57, %v1715_v49  ;;  %v11775_v16 = vpop.f32.mrb[86].mxu0 }
 0x188   :  { %v1727_v19 = vadd.f32 %v11775_v16, %v13968_v57  ;;  %v1718_v20 = vpop.f32.mrb[87].mxu0  ;;  %v2488_v31 = vmax.f32 %v1724_v7, 0.0  ;;  %v13424_v7 = vld [vmem:[%s16527_s0 + $0x318] sm:$0xff]  }
 0x189   :  { %v1719_v25 = vadd.f32 %v13968_v57, %v1718_v20  ;;  %v2486_v33 = vmax.f32 %v1716_v63, 0.0 }
 0x18a   :  { %v2489_v32 = vmax.f32 %v1727_v19, 0.0  ;;  %11881 = vmatmul.mubr.msk.bf16.gmra.mrb[192].mxu0 %vm960_vm0, %v13422_v53  ;;  %v13425_v19 = vld [vmem:[%s16527_s0 + $0x320] sm:$0xff]  }
 0x18b   :  { %v2487_v58 = vmax.f32 %v1719_v25, 0.0  ;;  %11884 = vmatprep.mubr.msk.bf16.mxu0 %vm960_vm0, %v13423_v18 }
 0x18c   :  { %v14338_v61 = vpack.c.bf16 %v2489_v32, %v2488_v31 }
 0x18d   :  { %v14340_v49 = vpack.c.bf16 %v2487_v58, %v2486_v33  ;;  %v11778_v62 = vpop.f32.mrb[88].mxu0 }
 0x18e   :  { %v1740_v16 = vadd.f32 %v11778_v62, %v13968_v57  ;;  %v1731_v60 = vpop.f32.mrb[89].mxu0 }
 0x18f   :  { %v1732_v63 = vadd.f32 %v13968_v57, %v1731_v60  ;;  %v11779_v18 = vpop.f32.mrb[90].mxu0 }
 0x190   :  { %v1743_v20 = vadd.f32 %v11779_v18, %v13968_v57  ;;  %v1734_v25 = vpop.f32.mrb[91].mxu0  ;;  %v2492_v31 = vmax.f32 %v1740_v16, 0.0  ;;  %v13426_v16 = vld [vmem:[%s16527_s0 + $0x328] sm:$0xff]  }
 0x191   :  { %v1735_v62 = vadd.f32 %v13968_v57, %v1734_v25  ;;  %v2490_v33 = vmax.f32 %v1732_v63, 0.0 }
 0x192   :  { %v2493_v32 = vmax.f32 %v1743_v20, 0.0  ;;  %11885 = vmatmul.mubr.msk.bf16.gmra.mrb[196].mxu0 %vm960_vm0, %v13424_v7  ;;  %v13427_v20 = vld [vmem:[%s16527_s0 + $0x330] sm:$0xff]  }
 0x193   :  { %v2491_v58 = vmax.f32 %v1735_v62, 0.0  ;;  %11888 = vmatprep.mubr.msk.bf16.mxu0 %vm960_vm0, %v13425_v19 }
 0x194   :  { %v14358_v53 = vpack.c.bf16 %v2493_v32, %v2492_v31 }
 0x195   :  { %v14360_v60 = vpack.c.bf16 %v2491_v58, %v2490_v33  ;;  %v11782_v0 = vpop.f32.mrb[92].mxu0 }
 0x196   :  { %v1756_v18 = vadd.f32 %v11782_v0, %v13968_v57  ;;  %v1747_v17 = vpop.f32.mrb[93].mxu0 }
 0x197   :  { %v1748_v63 = vadd.f32 %v13968_v57, %v1747_v17  ;;  %v11783_v19 = vpop.f32.mrb[94].mxu0 }
 0x198   :  { %v1759_v25 = vadd.f32 %v11783_v19, %v13968_v57  ;;  %v1750_v62 = vpop.f32.mrb[95].mxu0  ;;  %v2496_v31 = vmax.f32 %v1756_v18, 0.0  ;;  %v13428_v18 = vld [vmem:[%s16527_s0 + $0x338] sm:$0xff]  }
 0x199   :  { %v1751_v0 = vadd.f32 %v13968_v57, %v1750_v62  ;;  %v2494_v33 = vmax.f32 %v1748_v63, 0.0 }
 0x19a   :  { %v2497_v32 = vmax.f32 %v1759_v25, 0.0  ;;  %11889 = vmatmul.mubr.msk.bf16.gmra.mrb[200].mxu0 %vm960_vm0, %v13426_v16  ;;  %v13429_v25 = vld [vmem:[%s16527_s0 + $0x340] sm:$0xff]  }
 0x19b   :  { %v2495_v58 = vmax.f32 %v1751_v0, 0.0  ;;  %11892 = vmatprep.mubr.msk.bf16.mxu0 %vm960_vm0, %v13427_v20 }
 0x19c   :  { %v14378_v7 = vpack.c.bf16 %v2497_v32, %v2496_v31 }
 0x19d   :  { %v14380_v17 = vpack.c.bf16 %v2495_v58, %v2494_v33  ;;  %v11786_v21 = vpop.f32.mrb[96].mxu0 }
 0x19e   :  { %16609 = vst [vmem:[#allocation22_spill] sm:$0xff] %v14378_v7  ;;  %v1772_v19 = vadd.f32 %v11786_v21, %v13968_v57  ;;  %v1763_v41 = vpop.f32.mrb[97].mxu0 }
 0x19f   :  { %16610 = vst [vmem:[#allocation23_spill] sm:$0xff] %v14380_v17  ;;  %v1764_v63 = vadd.f32 %v13968_v57, %v1763_v41  ;;  %v11787_v20 = vpop.f32.mrb[98].mxu0 }
 0x1a0   :  { %v1775_v62 = vadd.f32 %v11787_v20, %v13968_v57  ;;  %v1766_v0 = vpop.f32.mrb[99].mxu0  ;;  %v2500_v31 = vmax.f32 %v1772_v19, 0.0  ;;  %v13430_v19 = vld [vmem:[%s16527_s0 + $0x348] sm:$0xff]  }
 0x1a1   :  { %v1767_v21 = vadd.f32 %v13968_v57, %v1766_v0  ;;  %v2498_v33 = vmax.f32 %v1764_v63, 0.0 }
 0x1a2   :  { %v2501_v32 = vmax.f32 %v1775_v62, 0.0  ;;  %11893 = vmatmul.mubr.msk.bf16.gmra.mrb[204].mxu0 %vm960_vm0, %v13428_v18  ;;  %v13431_v62 = vld [vmem:[%s16527_s0 + $0x350] sm:$0xff]  }
 0x1a3   :  { %v2499_v58 = vmax.f32 %v1767_v21, 0.0  ;;  %11896 = vmatprep.mubr.msk.bf16.mxu0 %vm960_vm0, %v13429_v25 }
 0x1a4   :  { %v14398_v16 = vpack.c.bf16 %v2501_v32, %v2500_v31 }
 0x1a5   :  { %v14400_v41 = vpack.c.bf16 %v2499_v58, %v2498_v33  ;;  %v11790_v50 = vpop.f32.mrb[100].mxu0 }
 0x1a6   :  { %16611 = vst [vmem:[#allocation24_spill] sm:$0xff] %v14398_v16  ;;  %v1788_v20 = vadd.f32 %v11790_v50, %v13968_v57  ;;  %v1779_v17 = vpop.f32.mrb[101].mxu0 }
 0x1a7   :  { %16612 = vst [vmem:[#allocation25_spill] sm:$0xff] %v14400_v41  ;;  %v1780_v63 = vadd.f32 %v13968_v57, %v1779_v17  ;;  %v11791_v25 = vpop.f32.mrb[102].mxu0 }
 0x1a8   :  { %v1791_v0 = vadd.f32 %v11791_v25, %v13968_v57  ;;  %v1782_v21 = vpop.f32.mrb[103].mxu0  ;;  %v2504_v31 = vmax.f32 %v1788_v20, 0.0  ;;  %v13432_v20 = vld [vmem:[%s16527_s0 + $0x358] sm:$0xff]  }
 0x1a9   :  { %v1783_v50 = vadd.f32 %v13968_v57, %v1782_v21  ;;  %v2502_v33 = vmax.f32 %v1780_v63, 0.0 }
 0x1aa   :  { %v2505_v32 = vmax.f32 %v1791_v0, 0.0  ;;  %11897 = vmatmul.mubr.msk.bf16.gmra.mrb[208].mxu0 %vm960_vm0, %v13430_v19  ;;  %v13433_v0 = vld [vmem:[%s16527_s0 + $0x360] sm:$0xff]  }
 0x1ab   :  { %v2503_v58 = vmax.f32 %v1783_v50, 0.0  ;;  %11900 = vmatprep.mubr.msk.bf16.mxu0 %vm960_vm0, %v13431_v62 }
 0x1ac   :  { %v14418_v18 = vpack.c.bf16 %v2505_v32, %v2504_v31 }
 0x1ad   :  { %v14420_v17 = vpack.c.bf16 %v2503_v58, %v2502_v33  ;;  %v11794_v3 = vpop.f32.mrb[104].mxu0 }
 0x1ae   :  { %16613 = vst [vmem:[#allocation26_spill] sm:$0xff] %v14418_v18  ;;  %v1804_v25 = vadd.f32 %v11794_v3, %v13968_v57  ;;  %v1795_v41 = vpop.f32.mrb[105].mxu0 }
 0x1af   :  { %16614 = vst [vmem:[#allocation27_spill] sm:$0xff] %v14420_v17  ;;  %v1796_v63 = vadd.f32 %v13968_v57, %v1795_v41  ;;  %v11795_v62 = vpop.f32.mrb[106].mxu0 }
 0x1b0   :  { %v1807_v21 = vadd.f32 %v11795_v62, %v13968_v57  ;;  %v1798_v50 = vpop.f32.mrb[107].mxu0  ;;  %v2508_v31 = vmax.f32 %v1804_v25, 0.0  ;;  %v13434_v25 = vld [vmem:[%s16527_s0 + $0x368] sm:$0xff]  }
 0x1b1   :  { %v1799_v3 = vadd.f32 %v13968_v57, %v1798_v50  ;;  %v2506_v33 = vmax.f32 %v1796_v63, 0.0  ;;  %v14453_v63 = vld [vmem:[%s16528_s2] ss:$0 sm:$0xff] }
 0x1b2   :  { %v2509_v32 = vmax.f32 %v1807_v21, 0.0  ;;  %11901 = vmatmul.mubr.msk.bf16.gmra.mrb[212].mxu0 %vm960_vm0, %v13432_v20 }
 0x1b3   :  { %v2507_v58 = vmax.f32 %v1799_v3, 0.0  ;;  %11904 = vmatprep.mubr.msk.bf16.mxu0 %vm960_vm0, %v13433_v0 }
 0x1b4   :  { %v14438_v19 = vpack.c.bf16 %v2509_v32, %v2508_v31 }
 0x1b5   :  { %v14440_v41 = vpack.c.bf16 %v2507_v58, %v2506_v33  ;;  %v11798_v23 = vpop.f32.mrb[108].mxu0 }
 0x1b6   :  { %16615 = vst [vmem:[#allocation28_spill] sm:$0xff] %v14438_v19  ;;  %v1820_v62 = vadd.f32 %v11798_v23, %v13968_v57  ;;  %v1811_v17 = vpop.f32.mrb[109].mxu0  ;;  %v13435_v57 = vld [vmem:[%s16527_s0 + $0x370] sm:$0xff]  }
 0x1b7   :  { %16616 = vst [vmem:[#allocation29_spill] sm:$0xff] %v14440_v41  ;;  %v1812_v0 = vadd.f32 %v14453_v63, %v1811_v17  ;;  %v11799_v21 = vpop.f32.mrb[110].mxu0 }
 0x1b8   :  { %v1823_v23 = vadd.f32 %v14453_v63, %v11799_v21  ;;  %v1814_v50 = vpop.f32.mrb[111].mxu0  ;;  %v2512_v31 = vmax.f32 %v1820_v62, 0.0  ;;  %v13436_v62 = vld [vmem:[%s16527_s0 + $0x378] sm:$0xff]  }
 0x1b9   :  { %v1815_v3 = vadd.f32 %v14453_v63, %v1814_v50  ;;  %v2510_v33 = vmax.f32 %v1812_v0, 0.0 }
 0x1ba   :  { %v2513_v32 = vmax.f32 %v1823_v23, 0.0  ;;  %11905 = vmatmul.mubr.msk.bf16.gmra.mrb[216].mxu0 %vm960_vm0, %v13434_v25  ;;  %v13437_v23 = vld [vmem:[%s16527_s0 + $0x380] sm:$0xff]  }
 0x1bb   :  { %v2511_v58 = vmax.f32 %v1815_v3, 0.0  ;;  %11908 = vmatprep.mubr.msk.bf16.mxu0 %vm960_vm0, %v13435_v57 }
 0x1bc   :  { %v14463_v20 = vpack.c.bf16 %v2513_v32, %v2512_v31 }
 0x1bd   :  { %v14465_v17 = vpack.c.bf16 %v2511_v58, %v2510_v33  ;;  %v11802_v45 = vpop.f32.mrb[112].mxu0 }
 0x1be   :  { %16617 = vst [vmem:[#allocation30_spill] sm:$0xff] %v14463_v20  ;;  %v1836_v21 = vadd.f32 %v14453_v63, %v11802_v45  ;;  %v1827_v41 = vpop.f32.mrb[113].mxu0 }
 0x1bf   :  { %16618 = vst [vmem:[#allocation31_spill] sm:$0xff] %v14465_v17  ;;  %v1828_v0 = vadd.f32 %v14453_v63, %v1827_v41  ;;  %v11803_v57 = vpop.f32.mrb[114].mxu0 }
 0x1c0   :  { %v1839_v50 = vadd.f32 %v14453_v63, %v11803_v57  ;;  %v1830_v3 = vpop.f32.mrb[115].mxu0  ;;  %v2516_v31 = vmax.f32 %v1836_v21, 0.0  ;;  %v13438_v21 = vld [vmem:[%s16527_s0 + $0x388] sm:$0xff]  }
 0x1c1   :  { %v1831_v45 = vadd.f32 %v14453_v63, %v1830_v3  ;;  %v2514_v33 = vmax.f32 %v1828_v0, 0.0 }
 0x1c2   :  { %v2517_v32 = vmax.f32 %v1839_v50, 0.0  ;;  %11909 = vmatmul.mubr.msk.bf16.gmra.mrb[220].mxu0 %vm960_vm0, %v13436_v62  ;;  %v13439_v50 = vld [vmem:[%s16527_s0 + $0x390] sm:$0xff]  }
 0x1c3   :  { %v2515_v58 = vmax.f32 %v1831_v45, 0.0  ;;  %11912 = vmatprep.mubr.msk.bf16.mxu0 %vm960_vm0, %v13437_v23 }
 0x1c4   :  { %v14483_v25 = vpack.c.bf16 %v2517_v32, %v2516_v31 }
 0x1c5   :  { %v14485_v41 = vpack.c.bf16 %v2515_v58, %v2514_v33  ;;  %v11806_v4 = vpop.f32.mrb[116].mxu0 }
 0x1c6   :  { %16619 = vst [vmem:[#allocation32_spill] sm:$0xff] %v14483_v25  ;;  %v1852_v57 = vadd.f32 %v14453_v63, %v11806_v4  ;;  %v1843_v17 = vpop.f32.mrb[117].mxu0 }
 0x1c7   :  { %16620 = vst [vmem:[#allocation33_spill] sm:$0xff] %v14485_v41  ;;  %v1844_v0 = vadd.f32 %v14453_v63, %v1843_v17  ;;  %v11807_v23 = vpop.f32.mrb[118].mxu0 }
 0x1c8   :  { %v1855_v3 = vadd.f32 %v14453_v63, %v11807_v23  ;;  %v1846_v45 = vpop.f32.mrb[119].mxu0  ;;  %v2520_v31 = vmax.f32 %v1852_v57, 0.0  ;;  %v13440_v57 = vld [vmem:[%s16527_s0 + $0x398] sm:$0xff]  }
 0x1c9   :  { %v1847_v4 = vadd.f32 %v14453_v63, %v1846_v45  ;;  %v2518_v33 = vmax.f32 %v1844_v0, 0.0 }
 0x1ca   :  { %v2521_v32 = vmax.f32 %v1855_v3, 0.0  ;;  %11913 = vmatmul.mubr.msk.bf16.gmra.mrb[224].mxu0 %vm960_vm0, %v13438_v21  ;;  %v13441_v3 = vld [vmem:[%s16527_s0 + $0x3a0] sm:$0xff]  }
 0x1cb   :  { %v2519_v58 = vmax.f32 %v1847_v4, 0.0  ;;  %11916 = vmatprep.mubr.msk.bf16.mxu0 %vm960_vm0, %v13439_v50 }
 0x1cc   :  { %v14503_v62 = vpack.c.bf16 %v2521_v32, %v2520_v31 }
 0x1cd   :  { %v14505_v17 = vpack.c.bf16 %v2519_v58, %v2518_v33  ;;  %v11810_v28 = vpop.f32.mrb[120].mxu0 }
 0x1ce   :  { %16621 = vst [vmem:[#allocation34_spill] sm:$0xff] %v14503_v62  ;;  %v1868_v23 = vadd.f32 %v14453_v63, %v11810_v28  ;;  %v1859_v41 = vpop.f32.mrb[121].mxu0 }
 0x1cf   :  { %16622 = vst [vmem:[#allocation35_spill] sm:$0xff] %v14505_v17  ;;  %v1860_v0 = vadd.f32 %v14453_v63, %v1859_v41  ;;  %v11811_v50 = vpop.f32.mrb[122].mxu0 }
 0x1d0   :  { %v1871_v45 = vadd.f32 %v14453_v63, %v11811_v50  ;;  %v1862_v4 = vpop.f32.mrb[123].mxu0  ;;  %v2524_v31 = vmax.f32 %v1868_v23, 0.0  ;;  %v13442_v23 = vld [vmem:[%s16527_s0 + $0x3a8] sm:$0xff]  }
 0x1d1   :  { %v1863_v28 = vadd.f32 %v14453_v63, %v1862_v4  ;;  %v2522_v33 = vmax.f32 %v1860_v0, 0.0 }
 0x1d2   :  { %v2525_v32 = vmax.f32 %v1871_v45, 0.0  ;;  %11917 = vmatmul.mubr.msk.bf16.gmra.mrb[228].mxu0 %vm960_vm0, %v13440_v57  ;;  %v13443_v45 = vld [vmem:[%s16527_s0 + $0x3b0] sm:$0xff]  }
 0x1d3   :  { %v2523_v58 = vmax.f32 %v1863_v28, 0.0  ;;  %11920 = vmatprep.mubr.msk.bf16.mxu0 %vm960_vm0, %v13441_v3 }
 0x1d4   :  { %v14523_v21 = vpack.c.bf16 %v2525_v32, %v2524_v31 }
 0x1d5   :  { %v14525_v41 = vpack.c.bf16 %v2523_v58, %v2522_v33  ;;  %v11814_v52 = vpop.f32.mrb[124].mxu0 }
 0x1d6   :  { %16623 = vst [vmem:[#allocation36_spill] sm:$0xff] %v14523_v21  ;;  %v1884_v50 = vadd.f32 %v14453_v63, %v11814_v52  ;;  %v1875_v17 = vpop.f32.mrb[125].mxu0 }
 0x1d7   :  { %16624 = vst [vmem:[#allocation37_spill] sm:$0xff] %v14525_v41  ;;  %v1876_v0 = vadd.f32 %v14453_v63, %v1875_v17  ;;  %v11815_v3 = vpop.f32.mrb[126].mxu0 }
 0x1d8   :  { %v1887_v4 = vadd.f32 %v14453_v63, %v11815_v3  ;;  %v1878_v28 = vpop.f32.mrb[127].mxu0  ;;  %v2528_v31 = vmax.f32 %v1884_v50, 0.0  ;;  %v13444_v50 = vld [vmem:[%s16527_s0 + $0x3b8] sm:$0xff]  }
 0x1d9   :  { %v1879_v52 = vadd.f32 %v14453_v63, %v1878_v28  ;;  %v2526_v33 = vmax.f32 %v1876_v0, 0.0 }
 0x1da   :  { %v2529_v32 = vmax.f32 %v1887_v4, 0.0  ;;  %11921 = vmatmul.mubr.msk.bf16.gmra.mrb[232].mxu0 %vm960_vm0, %v13442_v23  ;;  %v13445_v4 = vld [vmem:[%s16527_s0 + $0x3c0] sm:$0xff]  }
 0x1db   :  { %v2527_v58 = vmax.f32 %v1879_v52, 0.0  ;;  %11924 = vmatprep.mubr.msk.bf16.mxu0 %vm960_vm0, %v13443_v45 }
 0x1dc   :  { %v14543_v57 = vpack.c.bf16 %v2529_v32, %v2528_v31 }
 0x1dd   :  { %v14545_v17 = vpack.c.bf16 %v2527_v58, %v2526_v33  ;;  %v11818_v15 = vpop.f32.mrb[128].mxu0 }
 0x1de   :  { %16625 = vst [vmem:[#allocation38_spill] sm:$0xff] %v14543_v57  ;;  %v1900_v3 = vadd.f32 %v14453_v63, %v11818_v15  ;;  %v1891_v41 = vpop.f32.mrb[129].mxu0 }
 0x1df   :  { %16626 = vst [vmem:[#allocation39_spill] sm:$0xff] %v14545_v17  ;;  %v1892_v0 = vadd.f32 %v14453_v63, %v1891_v41  ;;  %v11819_v45 = vpop.f32.mrb[130].mxu0 }
 0x1e0   :  { %v1903_v28 = vadd.f32 %v14453_v63, %v11819_v45  ;;  %v1894_v52 = vpop.f32.mrb[131].mxu0  ;;  %v2532_v31 = vmax.f32 %v1900_v3, 0.0  ;;  %v14573_v3 = vld [vmem:[%s16527_s0 + $0x3c8] sm:$0xff]  }
 0x1e1   :  { %v1895_v15 = vadd.f32 %v14453_v63, %v1894_v52  ;;  %v2530_v33 = vmax.f32 %v1892_v0, 0.0 }
 0x1e2   :  { %v2533_v32 = vmax.f32 %v1903_v28, 0.0  ;;  %11925 = vmatmul.mubr.msk.bf16.gmra.mrb[236].mxu0 %vm960_vm0, %v13444_v50 }
 0x1e3   :  { %v2531_v58 = vmax.f32 %v1895_v15, 0.0  ;;  %11928 = vmatprep.mubr.msk.bf16.mxu0 %vm960_vm0, %v13445_v4  ;;  %v14581_v4 = vld [vmem:[%s16527_s0 + $0x3d0] sm:$0xff]   ;;  %v13673_v15 = vmov 0  }
 0x1e4   :  { %v14563_v23 = vpack.c.bf16 %v2533_v32, %v2532_v31  ;;  %2892 = vst.msk [vmem:[#allocation2 + $0x24] sm:$0xf] %vm2882_vm1, %v13673_v15  ;;  %2893 = vst.msk [vmem:[#allocation2 + $0x28] sm:$0xf] %vm2882_vm1, %v13673_v15 }
 0x1e5   :  { %v14565_v41 = vpack.c.bf16 %v2531_v58, %v2530_v33  ;;  %v11822_v39 = vpop.f32.mrb[132].mxu0  ;;  %2890 = vst.msk [vmem:[#allocation2 + $0x1c] sm:$0xf] %vm2882_vm1, %v13673_v15  ;;  %2891 = vst.msk [vmem:[#allocation2 + $0x20] sm:$0xf] %vm2882_vm1, %v13673_v15 }
 0x1e6   :  { %v14568_v6 = vadd.f32 %v14453_v63, %v11822_v39  ;;  %v1907_v45 = vpop.f32.mrb[133].mxu0  ;;  %2894 = vst.msk [vmem:[#allocation2 + $0x2c] sm:$0xf] %vm2882_vm1, %v13673_v15  ;;  %2896 = vst.msk [vmem:[#allocation2 + $0x34] sm:$0xf] %vm2882_vm1, %v13673_v15 }
 0x1e7   :  { %v14576_v50 = vadd.f32 %v14453_v63, %v1907_v45  ;;  %v11823_v0 = vpop.f32.mrb[134].mxu0  ;;  %2897 = vst.msk [vmem:[#allocation2 + $0x38] sm:$0xf] %vm2882_vm1, %v13673_v15  ;;  %2898 = vst.msk [vmem:[#allocation2 + $0x3c] sm:$0xf] %vm2882_vm1, %v13673_v15 }
 0x1e8   :  { %v14584_v28 = vadd.f32 %v14453_v63, %v11823_v0  ;;  %v1910_v39 = vpop.f32.mrb[135].mxu0  ;;  %2899 = vst.msk [vmem:[#allocation2 + $0x40] sm:$0xf] %vm2882_vm1, %v13673_v15  ;;  %2900 = vst.msk [vmem:[#allocation2 + $0x44] sm:$0xf] %vm2882_vm1, %v13673_v15  ;;  %v2536_v31 = vmax.f32 %v14568_v6, 0.0 }
 0x1e9   :  { %v14587_v52 = vadd.f32 %v14453_v63, %v1910_v39  ;;  %2902 = vst.msk [vmem:[#allocation2 + $0x4c] sm:$0xf] %vm2882_vm1, %v13673_v15  ;;  %2903 = vst.msk [vmem:[#allocation2 + $0x50] sm:$0xf] %vm2882_vm1, %v13673_v15  ;;  %v2534_v33 = vmax.f32 %v14576_v50, 0.0 }
 0x1ea   :  { %2904 = vst.msk [vmem:[#allocation2 + $0x54] sm:$0xf] %vm2882_vm1, %v13673_v15  ;;  %2905 = vst.msk [vmem:[#allocation2 + $0x58] sm:$0xf] %vm2882_vm1, %v13673_v15  ;;  %v2537_v32 = vmax.f32 %v14584_v28, 0.0  ;;  %11929 = vmatmul.mubr.msk.bf16.gmra.mrb[240].mxu0 %vm960_vm0, %v14573_v3  ;;  %v13448_v28 = vld [vmem:[%s16527_s0 + $0x3d8] sm:$0xff]  }
 0x1eb   :  { %2906 = vst.msk [vmem:[#allocation2 + $0x5c] sm:$0xf] %vm2882_vm1, %v13673_v15  ;;  %2908 = vst.msk [vmem:[#allocation2 + $0x64] sm:$0xf] %vm2882_vm1, %v13673_v15  ;;  %v2535_v58 = vmax.f32 %v14587_v52, 0.0  ;;  %11932 = vmatprep.mubr.msk.bf16.mxu0 %vm960_vm0, %v14581_v4  ;;  %v13449_v52 = vld [vmem:[%s16527_s0 + $0x3e0] sm:$0xff]  }
 0x1ec   :  { %2909 = vst.msk [vmem:[#allocation2 + $0x68] sm:$0xf] %vm2882_vm1, %v13673_v15  ;;  %2910 = vst.msk [vmem:[#allocation2 + $0x6c] sm:$0xf] %vm2882_vm1, %v13673_v15  ;;  %v14797_v45 = vpack.c.bf16 %v2537_v32, %v2536_v31 }
 0x1ed   :  { %2911 = vst.msk [vmem:[#allocation2 + $0x70] sm:$0xf] %vm2882_vm1, %v13673_v15  ;;  %2912 = vst.msk [vmem:[#allocation2 + $0x74] sm:$0xf] %vm2882_vm1, %v13673_v15  ;;  %v14799_v0 = vpack.c.bf16 %v2535_v58, %v2534_v33  ;;  %v11826_v39 = vpop.f32.mrb[136].mxu0  ;;  %v13455_v33 = vld [vmem:[%s16529_s3 + $0x8] sm:$0xff]  }
 0x1ee   :  { %2914 = vst.msk [vmem:[#allocation2 + $0x7c] sm:$0xf] %vm2882_vm1, %v13673_v15  ;;  %2915 = vst.msk [vmem:[#allocation2 + $0x80] sm:$0xf] %vm2882_vm1, %v13673_v15  ;;  %v1923_v6 = vpop.f32.mrb[137].mxu0  ;;  %12268 = vmatprep.subr.bf16.mxu0 %v13455_v33  ;;  %11944 = vmatprep.subr.bf16.mxu1 %v13455_v33 }
 0x1ef   :  { %2916 = vst.msk [vmem:[#allocation2 + $0x84] sm:$0xf] %vm2882_vm1, %v13673_v15  ;;  %2917 = vst.msk [vmem:[#allocation2 + $0x88] sm:$0xf] %vm2882_vm1, %v13673_v15  ;;  %v1924_v3 = vadd.f32 %v14453_v63, %v1923_v6  ;;  %v11827_v50 = vpop.f32.mrb[138].mxu0  ;;  %12269 = vmatpush3.bf16.msra.mxu0 %v13455_v33  ;;  %11945 = vmatpush3.bf16.msra.mxu1 %v13455_v33 }
 0x1f0   :  { %2918 = vst.msk [vmem:[#allocation2 + $0x8c] sm:$0xf] %vm2882_vm1, %v13673_v15  ;;  %2925 = vst.msk [vmem:[#allocation2 + $0xa8] sm:$0xf] %vm2882_vm1, %v13673_v15  ;;  %v1935_v4 = vadd.f32 %v14453_v63, %v11827_v50  ;;  %v1926_v31 = vpop.f32.mrb[139].mxu0 }
 0x1f1   :  { %2926 = vst.msk [vmem:[#allocation2 + $0xac] sm:$0xf] %vm2882_vm1, %v13673_v15  ;;  %2927 = vst.msk [vmem:[#allocation2 + $0xb0] sm:$0xf] %vm2882_vm1, %v13673_v15  ;;  %v1927_v32 = vadd.f32 %v14453_v63, %v1926_v31  ;;  %v2538_v17 = vmax.f32 %v1924_v3, 0.0 }
 0x1f2   :  { %2928 = vst.msk [vmem:[#allocation2 + $0xb4] sm:$0xf] %vm2882_vm1, %v13673_v15  ;;  %2929 = vst.msk [vmem:[#allocation2 + $0xb8] sm:$0xf] %vm2882_vm1, %v13673_v15  ;;  %11933 = vmatmul.mubr.msk.bf16.gmra.mrb[244].mxu0 %vm960_vm0, %v13448_v28 }
 0x1f3   :  { %2931 = vst.msk [vmem:[#allocation2 + $0xc0] sm:$0xf] %vm2882_vm1, %v13673_v15  ;;  %2932 = vst.msk [vmem:[#allocation2 + $0xc4] sm:$0xf] %vm2882_vm1, %v13673_v15  ;;  %v2539_v6 = vmax.f32 %v1927_v32, 0.0  ;;  %11936 = vmatprep.mubr.msk.bf16.mxu0 %vm960_vm0, %v13449_v52  ;;  %v13451_v52 = vld [vmem:[%s16527_s0 + $0x3f0] sm:$0xff]  }
 0x1f4   :  { %2933 = vst.msk [vmem:[#allocation2 + $0xc8] sm:$0xf] %vm2882_vm1, %v13673_v15  ;;  %2934 = vst.msk [vmem:[#allocation2 + $0xcc] sm:$0xf] %vm2882_vm1, %v13673_v15 }
 0x1f5   :  { %2935 = vst.msk [vmem:[#allocation2 + $0xd0] sm:$0xf] %vm2882_vm1, %v13673_v15  ;;  %2937 = vst.msk [vmem:[#allocation2 + $0xd8] sm:$0xf] %vm2882_vm1, %v13673_v15  ;;  %v14818_v50 = vpack.c.bf16 %v2539_v6, %v2538_v17  ;;  %v11830_v31 = vpop.f32.mrb[140].mxu0 }
 0x1f6   :  { %2938 = vst.msk [vmem:[#allocation2 + $0xdc] sm:$0xf] %vm2882_vm1, %v13673_v15  ;;  %2939 = vst.msk [vmem:[#allocation2 + $0xe0] sm:$0xf] %vm2882_vm1, %v13673_v15  ;;  %v1948_v57 = vadd.f32 %v14453_v63, %v11830_v31  ;;  %v1939_v38 = vpop.f32.mrb[141].mxu0 }
 0x1f7   :  { %2940 = vst.msk [vmem:[#allocation2 + $0xe4] sm:$0xf] %vm2882_vm1, %v13673_v15  ;;  %2941 = vst.msk [vmem:[#allocation2 + $0xe8] sm:$0xf] %vm2882_vm1, %v13673_v15  ;;  %v1940_v28 = vadd.f32 %v14453_v63, %v1939_v38  ;;  %v11831_v3 = vpop.f32.mrb[142].mxu0 }
 0x1f8   :  { %2943 = vst.msk [vmem:[#allocation2 + $0xf0] sm:$0xf] %vm2882_vm1, %v13673_v15  ;;  %2944 = vst.msk [vmem:[#allocation2 + $0xf4] sm:$0xf] %vm2882_vm1, %v13673_v15  ;;  %v1942_v17 = vpop.f32.mrb[143].mxu0  ;;  %v2544_v33 = vmax.f32 %v1948_v57, 0.0 }
 0x1f9   :  { %2945 = vst.msk [vmem:[#allocation2 + $0xf8] sm:$0xf] %vm2882_vm1, %v13673_v15  ;;  %2946 = vst.msk [vmem:[#allocation2 + $0xfc] sm:$0xf] %vm2882_vm1, %v13673_v15  ;;  %v1943_v32 = vadd.f32 %v14453_v63, %v1942_v17 }
 0x1fa   :  { %2947 = vst.msk [vmem:[#allocation2 + $0x100] sm:$0xf] %vm2882_vm1, %v13673_v15  ;;  %2949 = vst.msk [vmem:[#allocation2 + $0x108] sm:$0xf] %vm2882_vm1, %v13673_v15 }
 0x1fb   :  { %2950 = vst.msk [vmem:[#allocation2 + $0x10c] sm:$0xf] %vm2882_vm1, %v13673_v15  ;;  %2951 = vst.msk [vmem:[#allocation2 + $0x110] sm:$0xf] %vm2882_vm1, %v13673_v15  ;;  %v2543_v6 = vmax.f32 %v1943_v32, 0.0 }
 0x1fc   :  { %2952 = vst.msk [vmem:[#allocation2 + $0x114] sm:$0xf] %vm2882_vm1, %v13673_v15  ;;  %2953 = vst.msk [vmem:[#allocation2 + $0x118] sm:$0xf] %vm2882_vm1, %v13673_v15 }
 0x1fd   :  { %2956 = vst.msk [vmem:[#allocation2 + $0x124] sm:$0xf] %vm2882_vm1, %v13673_v15  ;;  %2957 = vst.msk [vmem:[#allocation2 + $0x128] sm:$0xf] %vm2882_vm1, %v13673_v15  ;;  %v11834_v21 = vpop.f32.mrb[144].mxu0 }
 0x1fe   :  { %2958 = vst.msk [vmem:[#allocation2 + $0x12c] sm:$0xf] %vm2882_vm1, %v13673_v15  ;;  %2959 = vst.msk [vmem:[#allocation2 + $0x130] sm:$0xf] %vm2882_vm1, %v13673_v15  ;;  %v1964_v14 = vadd.f32 %v14453_v63, %v11834_v21  ;;  %v1955_v62 = vpop.f32.mrb[145].mxu0 }
 0x1ff   :  { %2960 = vst.msk [vmem:[#allocation2 + $0x134] sm:$0xf] %vm2882_vm1, %v13673_v15  ;;  %2962 = vst.msk [vmem:[#allocation2 + $0x13c] sm:$0xf] %vm2882_vm1, %v13673_v15  ;;  %v1956_v57 = vadd.f32 %v14453_v63, %v1955_v62 }
 0x200   :  { %2963 = vst.msk [vmem:[#allocation2 + $0x140] sm:$0xf] %vm2882_vm1, %v13673_v15  ;;  %2964 = vst.msk [vmem:[#allocation2 + $0x144] sm:$0xf] %vm2882_vm1, %v13673_v15  ;;  %v2548_v17 = vmax.f32 %v1964_v14, 0.0 }
 0x201   :  { %2965 = vst.msk [vmem:[#allocation2 + $0x148] sm:$0xf] %vm2882_vm1, %v13673_v15  ;;  %2966 = vst.msk [vmem:[#allocation2 + $0x14c] sm:$0xf] %vm2882_vm1, %v13673_v15 }
 0x202   :  { %2968 = vst.msk [vmem:[#allocation2 + $0x154] sm:$0xf] %vm2882_vm1, %v13673_v15  ;;  %2969 = vst.msk [vmem:[#allocation2 + $0x158] sm:$0xf] %vm2882_vm1, %v13673_v15 }
 0x203   :  { %2970 = vst.msk [vmem:[#allocation2 + $0x15c] sm:$0xf] %vm2882_vm1, %v13673_v15  ;;  %2971 = vst.msk [vmem:[#allocation2 + $0x160] sm:$0xf] %vm2882_vm1, %v13673_v15 }
 0x204   :  { %2972 = vst.msk [vmem:[#allocation2 + $0x164] sm:$0xf] %vm2882_vm1, %v13673_v15  ;;  %2974 = vst.msk [vmem:[#allocation2 + $0x16c] sm:$0xf] %vm2882_vm1, %v13673_v15 }
 0x205   :  { %2975 = vst.msk [vmem:[#allocation2 + $0x170] sm:$0xf] %vm2882_vm1, %v13673_v15  ;;  %2976 = vst.msk [vmem:[#allocation2 + $0x174] sm:$0xf] %vm2882_vm1, %v13673_v15 }
 0x206   :  { %2977 = vst.msk [vmem:[#allocation2 + $0x178] sm:$0xf] %vm2882_vm1, %v13673_v15  ;;  %2978 = vst.msk [vmem:[#allocation2 + $0x17c] sm:$0xf] %vm2882_vm1, %v13673_v15 }
 0x207   :  { %2980 = vst.msk [vmem:[#allocation2 + $0x184] sm:$0xf] %vm2882_vm1, %v13673_v15  ;;  %2981 = vst.msk [vmem:[#allocation2 + $0x188] sm:$0xf] %vm2882_vm1, %v13673_v15 }
 0x208   :  { %2982 = vst.msk [vmem:[#allocation2 + $0x18c] sm:$0xf] %vm2882_vm1, %v13673_v15  ;;  %2983 = vst.msk [vmem:[#allocation2 + $0x190] sm:$0xf] %vm2882_vm1, %v13673_v15 }
 0x209   :  { %2984 = vst.msk [vmem:[#allocation2 + $0x194] sm:$0xf] %vm2882_vm1, %v13673_v15  ;;  %2991 = vst.msk [vmem:[#allocation2 + $0x1b0] sm:$0xf] %vm2882_vm1, %v13673_v15 }
 0x20a   :  { %2992 = vst.msk [vmem:[#allocation2 + $0x1b4] sm:$0xf] %vm2882_vm1, %v13673_v15  ;;  %2993 = vst.msk [vmem:[#allocation2 + $0x1b8] sm:$0xf] %vm2882_vm1, %v13673_v15 }
 0x20b   :  { %2994 = vst.msk [vmem:[#allocation2 + $0x1bc] sm:$0xf] %vm2882_vm1, %v13673_v15  ;;  %2995 = vst.msk [vmem:[#allocation2 + $0x1c0] sm:$0xf] %vm2882_vm1, %v13673_v15 }
 0x20c   :  { %2997 = vst.msk [vmem:[#allocation2 + $0x1c8] sm:$0xf] %vm2882_vm1, %v13673_v15  ;;  %2998 = vst.msk [vmem:[#allocation2 + $0x1cc] sm:$0xf] %vm2882_vm1, %v13673_v15 }
 0x20d   :  { %2999 = vst.msk [vmem:[#allocation2 + $0x1d0] sm:$0xf] %vm2882_vm1, %v13673_v15  ;;  %3000 = vst.msk [vmem:[#allocation2 + $0x1d4] sm:$0xf] %vm2882_vm1, %v13673_v15 }
 0x20e   :  { %3001 = vst.msk [vmem:[#allocation2 + $0x1d8] sm:$0xf] %vm2882_vm1, %v13673_v15  ;;  %3003 = vst.msk [vmem:[#allocation2 + $0x1e0] sm:$0xf] %vm2882_vm1, %v13673_v15 }
 0x20f   :  { %3004 = vst.msk [vmem:[#allocation2 + $0x1e4] sm:$0xf] %vm2882_vm1, %v13673_v15  ;;  %3005 = vst.msk [vmem:[#allocation2 + $0x1e8] sm:$0xf] %vm2882_vm1, %v13673_v15 }
 0x210   :  { %3006 = vst.msk [vmem:[#allocation2 + $0x1ec] sm:$0xf] %vm2882_vm1, %v13673_v15  ;;  %3007 = vst.msk [vmem:[#allocation2 + $0x1f0] sm:$0xf] %vm2882_vm1, %v13673_v15 }
 0x211   :  { %3009 = vst.msk [vmem:[#allocation2 + $0x1f8] sm:$0xf] %vm2882_vm1, %v13673_v15  ;;  %3010 = vst.msk [vmem:[#allocation2 + $0x1fc] sm:$0xf] %vm2882_vm1, %v13673_v15 }
 0x212   :  { %3011 = vst.msk [vmem:[#allocation2 + $0x200] sm:$0xf] %vm2882_vm1, %v13673_v15  ;;  %3012 = vst.msk [vmem:[#allocation2 + $0x204] sm:$0xf] %vm2882_vm1, %v13673_v15 }
 0x213   :  { %3013 = vst.msk [vmem:[#allocation2 + $0x208] sm:$0xf] %vm2882_vm1, %v13673_v15  ;;  %3015 = vst.msk [vmem:[#allocation2 + $0x210] sm:$0xf] %vm2882_vm1, %v13673_v15 }
 0x214   :  { %3016 = vst.msk [vmem:[#allocation2 + $0x214] sm:$0xf] %vm2882_vm1, %v13673_v15  ;;  %3017 = vst.msk [vmem:[#allocation2 + $0x218] sm:$0xf] %vm2882_vm1, %v13673_v15 }
 0x215   :  { %3018 = vst.msk [vmem:[#allocation2 + $0x21c] sm:$0xf] %vm2882_vm1, %v13673_v15  ;;  %3019 = vst.msk [vmem:[#allocation2 + $0x220] sm:$0xf] %vm2882_vm1, %v13673_v15  ;;  %v1932_v15 = vadd.f32 %v14453_v63, %v11826_v39  ;;  %v2541_v39 = vmax.f32 %v1935_v4, 0.0  ;;  %v1951_v4 = vadd.f32 %v14453_v63, %v11831_v3  ;;  %v13452_v3 = vld [vmem:[%s16527_s0 + $0x3f8] sm:$0xff]  }
 0x217   :  { %v2540_v58 = vmax.f32 %v1932_v15, 0.0  ;;  %v13450_v15 = vld [vmem:[%s16527_s0 + $0x3e8] sm:$0xff]  }
 0x218   :  { %11937 = vmatmul.mubr.msk.bf16.gmra.mrb[248].mxu0 %vm960_vm0, %v13450_v15 }
 0x219   :  { %v14816_v5 = vpack.c.bf16 %v2541_v39, %v2540_v58  ;;  %v2545_v58 = vmax.f32 %v1951_v4, 0.0  ;;  %v2542_v39 = vmax.f32 %v1940_v28, 0.0  ;;  %11940 = vmatprep.mubr.msk.bf16.mxu0 %vm960_vm0, %v13451_v52  ;;  %v11835_v4 = vpop.f32.mrb[146].mxu0 }
 0x21a   :  { %v1967_v15 = vadd.f32 %v14453_v63, %v11835_v4  ;;  %v1958_v28 = vpop.f32.mrb[147].mxu0 }
 0x21b   :  { %v14832_v31 = vpack.c.bf16 %v2545_v58, %v2544_v33  ;;  %v14834_v38 = vpack.c.bf16 %v2543_v6, %v2542_v39  ;;  %v1959_v52 = vadd.f32 %v14453_v63, %v1958_v28  ;;  %v2546_v33 = vmax.f32 %v1956_v57, 0.0  ;;  %v11838_v6 = vpop.f32.mrb[148].mxu0 }
 0x21c   :  { %v2549_v32 = vmax.f32 %v1967_v15, 0.0  ;;  %v1980_v51 = vadd.f32 %v14453_v63, %v11838_v6  ;;  %v1971_v62 = vpop.f32.mrb[149].mxu0 }
 0x21d   :  { %v2547_v58 = vmax.f32 %v1959_v52, 0.0  ;;  %v1972_v25 = vadd.f32 %v14453_v63, %v1971_v62  ;;  %v11839_v4 = vpop.f32.mrb[150].mxu0 }
 0x21e   :  { %v14844_v21 = vpack.c.bf16 %v2549_v32, %v2548_v17  ;;  %v1983_v27 = vadd.f32 %v14453_v63, %v11839_v4  ;;  %v1974_v28 = vpop.f32.mrb[151].mxu0  ;;  %v2552_v15 = vmax.f32 %v1980_v51, 0.0 }
 0x21f   :  { %v14846_v39 = vpack.c.bf16 %v2547_v58, %v2546_v33  ;;  %v1975_v14 = vadd.f32 %v14453_v63, %v1974_v28  ;;  %v2550_v57 = vmax.f32 %v1972_v25, 0.0  ;;  %v11842_v33 = vpop.f32.mrb[152].mxu0 }
 0x220   :  { %11941 = vmatmul.mubr.msk.bf16.gmra.mrb[252].mxu0 %vm960_vm0, %v13452_v3  ;;  %v2553_v3 = vmax.f32 %v1983_v27, 0.0  ;;  %v1996_v58 = vadd.f32 %v14453_v63, %v11842_v33  ;;  %v1987_v6 = vpop.f32.mrb[153].mxu0 }
 0x221   :  { %v2551_v52 = vmax.f32 %v1975_v14, 0.0  ;;  %v1988_v62 = vadd.f32 %v14453_v63, %v1987_v6  ;;  %v11843_v20 = vpop.f32.mrb[154].mxu0  ;;  %v14863_v14 = vld [vmem:[%s16529_s3] sm:$0xff]  }
 0x222   :  { %v14852_v17 = vpack.c.bf16 %v2553_v3, %v2552_v15  ;;  %v1999_v4 = vadd.f32 %v14453_v63, %v11843_v20  ;;  %v1990_v1 = vpop.f32.mrb[155].mxu0  ;;  %v2556_v19 = vmax.f32 %v1996_v58, 0.0  ;;  %12286 = vmatprep.subr.bf16.mxu0 %v14863_v14  ;;  %11962 = vmatprep.subr.bf16.mxu1 %v14863_v14 }
 0x223   :  { %v14854_v32 = vpack.c.bf16 %v2551_v52, %v2550_v57  ;;  %v1991_v51 = vadd.f32 %v14453_v63, %v1990_v1  ;;  %v2554_v27 = vmax.f32 %v1988_v62, 0.0  ;;  %v11846_v57 = vpop.f32.mrb[156].mxu0 }
 0x224   :  { %v2557_v25 = vmax.f32 %v1999_v4, 0.0  ;;  %v2012_v20 = vadd.f32 %v14453_v63, %v11846_v57  ;;  %v2003_v1 = vpop.f32.mrb[157].mxu0 }
 0x225   :  { %v2555_v28 = vmax.f32 %v1991_v51, 0.0  ;;  %v2004_v52 = vadd.f32 %v14453_v63, %v2003_v1  ;;  %v11847_v33 = vpop.f32.mrb[158].mxu0 }
 0x226   :  { %v14865_v15 = vpack.c.bf16 %v2557_v25, %v2556_v19  ;;  %v2015_v58 = vadd.f32 %v14453_v63, %v11847_v33  ;;  %v2006_v6 = vpop.f32.mrb[159].mxu0  ;;  %v2560_v19 = vmax.f32 %v2012_v20, 0.0 }
 0x227   :  { %v14867_v3 = vpack.c.bf16 %v2555_v28, %v2554_v27  ;;  %v2007_v62 = vadd.f32 %v14453_v63, %v2006_v6  ;;  %v2558_v51 = vmax.f32 %v2004_v52, 0.0  ;;  %v11850_v44 = vpop.f32.mrb[160].mxu0 }
 0x228   :  { %v2561_v4 = vmax.f32 %v2015_v58, 0.0  ;;  %v2028_v57 = vadd.f32 %v14453_v63, %v11850_v44  ;;  %v2019_v18 = vpop.f32.mrb[161].mxu0 }
 0x229   :  { %v2559_v27 = vmax.f32 %v2007_v62, 0.0  ;;  %v2020_v1 = vadd.f32 %v14453_v63, %v2019_v18  ;;  %v11851_v22 = vpop.f32.mrb[162].mxu0 }
 0x22a   :  { %v14875_v25 = vpack.c.bf16 %v2561_v4, %v2560_v19  ;;  %v2031_v33 = vadd.f32 %v14453_v63, %v11851_v22  ;;  %v2022_v16 = vpop.f32.mrb[163].mxu0  ;;  %v2564_v20 = vmax.f32 %v2028_v57, 0.0 }
 0x22b   :  { %v14877_v28 = vpack.c.bf16 %v2559_v27, %v2558_v51  ;;  %v2023_v6 = vadd.f32 %v14453_v63, %v2022_v16  ;;  %v2562_v52 = vmax.f32 %v2020_v1, 0.0  ;;  %v11854_v51 = vpop.f32.mrb[164].mxu0 }
 0x22c   :  { %v2565_v58 = vmax.f32 %v2031_v33, 0.0  ;;  %v2044_v44 = vadd.f32 %v14453_v63, %v11854_v51  ;;  %v2035_v27 = vpop.f32.mrb[165].mxu0 }
 0x22d   :  { %16627 = vst [vmem:[#allocation40_spill] sm:$0xff] %v14877_v28  ;;  %v2563_v62 = vmax.f32 %v2023_v6, 0.0  ;;  %v2036_v18 = vadd.f32 %v14453_v63, %v2035_v27  ;;  %v11855_v28 = vpop.f32.mrb[166].mxu0 }
 0x22e   :  { %v14883_v19 = vpack.c.bf16 %v2565_v58, %v2564_v20  ;;  %v2047_v22 = vadd.f32 %v14453_v63, %v11855_v28  ;;  %v2038_v2 = vpop.f32.mrb[167].mxu0  ;;  %v2568_v57 = vmax.f32 %v2044_v44, 0.0  ;;  %v13474_v28 = vld [vmem:[#allocation2 + $0x12c] sm:$0xff]  }
 0x22f   :  { %v14885_v4 = vpack.c.bf16 %v2563_v62, %v2562_v52  ;;  %v2039_v16 = vadd.f32 %v14453_v63, %v2038_v2  ;;  %v2566_v1 = vmax.f32 %v2036_v18, 0.0  ;;  %v11858_v52 = vpop.f32.mrb[168].mxu0 }
 0x230   :  { %16628 = vst [vmem:[#allocation41_spill] sm:$0xff] %v14883_v19  ;;  %v2569_v33 = vmax.f32 %v2047_v22, 0.0  ;;  %v2060_v62 = vadd.f32 %v14453_v63, %v11858_v52  ;;  %v2051_v51 = vpop.f32.mrb[169].mxu0 }
 0x231   :  { %16629 = vst [vmem:[#allocation42_spill] sm:$0xff] %v14885_v4  ;;  %v2567_v6 = vmax.f32 %v2039_v16, 0.0  ;;  %v13472_v4 = vld [vmem:[#allocation2 + $0x124] sm:$0xff]   ;;  %v2052_v27 = vadd.f32 %v14453_v63, %v2051_v51  ;;  %v11859_v19 = vpop.f32.mrb[170].mxu0  ;;  %v14916_v51 = vld [vmem:[%s16528_s2] ss:$0 sm:$0xff] }
 0x232   :  { %v14891_v20 = vpack.c.bf16 %v2569_v33, %v2568_v57  ;;  %v2063_v2 = vadd.f32 %v14453_v63, %v11859_v19  ;;  %v2054_v44 = vpop.f32.mrb[171].mxu0  ;;  %11946 = vmatprep.mubr.msk.bf16.mxu1 %vm3414_vm2, %v13472_v4  ;;  %v2572_v22 = vmax.f32 %v2060_v62, 0.0 }
 0x233   :  { %v14893_v58 = vpack.c.bf16 %v2567_v6, %v2566_v1  ;;  %v2055_v18 = vadd.f32 %v14453_v63, %v2054_v44  ;;  %11947 = vmatmul.mubr.msk.bf16.vlgmr.msra.gmra.mrb[0].mxu1 %vm3414_vm2, %v13474_v28  ;;  %v2570_v57 = vmax.f32 %v2052_v27, 0.0  ;;  %v14905_v1 = vld [vmem:[%s16529_s3 + $0x10] sm:$0xff]  }
 0x234   :  { %16630 = vst [vmem:[#allocation43_spill] sm:$0xff] %v14891_v20  ;;  %v2573_v16 = vmax.f32 %v2063_v2, 0.0  ;;  %11963 = vmatpush3.bf16.msra.mxu1 %v14863_v14 }
 0x235   :  { %16631 = vst [vmem:[#allocation44_spill] sm:$0xff] %v14893_v58  ;;  %v2571_v33 = vmax.f32 %v2055_v18, 0.0  ;;  %v11862_v4 = vpop.f32.mrb[172].mxu0  ;;  %11980 = vmatprep.subr.bf16.mxu1 %v14905_v1 }
 0x236   :  { %v14907_v6 = vpack.c.bf16 %v2573_v16, %v2572_v22  ;;  %v2076_v52 = vadd.f32 %v14453_v63, %v11862_v4  ;;  %v2067_v62 = vpop.f32.mrb[173].mxu0 }
 0x237   :  { %v14909_v19 = vpack.c.bf16 %v2571_v33, %v2570_v57  ;;  %v2068_v27 = vadd.f32 %v14916_v51, %v2067_v62  ;;  %v11863_v28 = vpop.f32.mrb[174].mxu0 }
 0x238   :  { %16632 = vst [vmem:[#allocation45_spill] sm:$0xff] %v14907_v6  ;;  %v2079_v2 = vadd.f32 %v14916_v51, %v11863_v28  ;;  %v2070_v44 = vpop.f32.mrb[175].mxu0  ;;  %v2576_v22 = vmax.f32 %v2076_v52, 0.0 }
 0x239   :  { %16633 = vst [vmem:[#allocation46_spill] sm:$0xff] %v14909_v19  ;;  %v2071_v18 = vadd.f32 %v14916_v51, %v2070_v44  ;;  %v2574_v57 = vmax.f32 %v2068_v27, 0.0 }
 0x23a   :  { %v2577_v16 = vmax.f32 %v2079_v2, 0.0 }
 0x23b   :  { %v2575_v33 = vmax.f32 %v2071_v18, 0.0 }
 0x23c   :  { %v14921_v19 = vpack.c.bf16 %v2577_v16, %v2576_v22 }
 0x23d   :  { %v14923_v63 = vpack.c.bf16 %v2575_v33, %v2574_v57  ;;  %v11866_v4 = vpop.f32.mrb[176].mxu0 }
 0x23e   :  { %16634 = vst [vmem:[#allocation47_spill] sm:$0xff] %v14921_v19  ;;  %v2092_v6 = vadd.f32 %v14916_v51, %v11866_v4  ;;  %v2083_v58 = vpop.f32.mrb[177].mxu0 }
 0x23f   :  { %16635 = vst [vmem:[#allocation48_spill] sm:$0xff] %v14923_v63  ;;  %v2084_v62 = vadd.f32 %v14916_v51, %v2083_v58  ;;  %v11867_v20 = vpop.f32.mrb[178].mxu0 }
 0x240   :  { %v2095_v28 = vadd.f32 %v14916_v51, %v11867_v20  ;;  %v2086_v7 = vpop.f32.mrb[179].mxu0  ;;  %v2580_v52 = vmax.f32 %v2092_v6, 0.0 }
 0x241   :  { %v2087_v44 = vadd.f32 %v14916_v51, %v2086_v7  ;;  %v2578_v27 = vmax.f32 %v2084_v62, 0.0 }
 0x242   :  { %v2581_v2 = vmax.f32 %v2095_v28, 0.0 }
 0x243   :  { %v2579_v18 = vmax.f32 %v2087_v44, 0.0 }
 0x244   :  { %v14929_v22 = vpack.c.bf16 %v2581_v2, %v2580_v52 }
 0x245   :  { %v14931_v16 = vpack.c.bf16 %v2579_v18, %v2578_v27  ;;  %v11870_v57 = vpop.f32.mrb[180].mxu0 }
 0x246   :  { %16636 = vst [vmem:[#allocation49_spill] sm:$0xff] %v14929_v22  ;;  %v2108_v33 = vadd.f32 %v14916_v51, %v11870_v57  ;;  %v2099_v4 = vpop.f32.mrb[181].mxu0 }
 0x247   :  { %16637 = vst [vmem:[#allocation50_spill] sm:$0xff] %v14931_v16  ;;  %v2100_v58 = vadd.f32 %v14916_v51, %v2099_v4  ;;  %v11871_v63 = vpop.f32.mrb[182].mxu0 }
 0x248   :  { %v2111_v20 = vadd.f32 %v14916_v51, %v11871_v63  ;;  %v2102_v19 = vpop.f32.mrb[183].mxu0  ;;  %v2584_v6 = vmax.f32 %v2108_v33, 0.0 }
 0x249   :  { %v2103_v7 = vadd.f32 %v14916_v51, %v2102_v19  ;;  %v2582_v62 = vmax.f32 %v2100_v58, 0.0 }
 0x24a   :  { %v2585_v28 = vmax.f32 %v2111_v20, 0.0 }
 0x24b   :  { %v2583_v44 = vmax.f32 %v2103_v7, 0.0 }
 0x24c   :  { %v14937_v52 = vpack.c.bf16 %v2585_v28, %v2584_v6 }
 0x24d   :  { %v14939_v2 = vpack.c.bf16 %v2583_v44, %v2582_v62  ;;  %v11874_v27 = vpop.f32.mrb[184].mxu0 }
 0x24e   :  { %16638 = vst [vmem:[#allocation51_spill] sm:$0xff] %v14937_v52  ;;  %v2124_v18 = vadd.f32 %v14916_v51, %v11874_v27  ;;  %v2115_v57 = vpop.f32.mrb[185].mxu0 }
 0x24f   :  { %16639 = vst [vmem:[#allocation52_spill] sm:$0xff] %v14939_v2  ;;  %v2116_v4 = vadd.f32 %v14916_v51, %v2115_v57  ;;  %v11875_v16 = vpop.f32.mrb[186].mxu0 }
 0x250   :  { %v2127_v63 = vadd.f32 %v14916_v51, %v11875_v16  ;;  %v2118_v22 = vpop.f32.mrb[187].mxu0  ;;  %v2588_v33 = vmax.f32 %v2124_v18, 0.0 }
 0x251   :  { %v2119_v19 = vadd.f32 %v14916_v51, %v2118_v22  ;;  %v2586_v58 = vmax.f32 %v2116_v4, 0.0 }
 0x252   :  { %v2589_v20 = vmax.f32 %v2127_v63, 0.0 }
 0x253   :  { %v2587_v7 = vmax.f32 %v2119_v19, 0.0 }
 0x254   :  { %v14945_v6 = vpack.c.bf16 %v2589_v20, %v2588_v33 }
 0x255   :  { %v14947_v28 = vpack.c.bf16 %v2587_v7, %v2586_v58  ;;  %v11878_v62 = vpop.f32.mrb[188].mxu0 }
 0x256   :  { %16640 = vst [vmem:[#allocation53_spill] sm:$0xff] %v14945_v6  ;;  %v2140_v44 = vadd.f32 %v14916_v51, %v11878_v62  ;;  %v2131_v27 = vpop.f32.mrb[189].mxu0 }
 0x257   :  { %16641 = vst [vmem:[#allocation54_spill] sm:$0xff] %v14947_v28  ;;  %v2132_v57 = vadd.f32 %v14916_v51, %v2131_v27  ;;  %v11879_v2 = vpop.f32.mrb[190].mxu0 }
 0x258   :  { %v2143_v16 = vadd.f32 %v14916_v51, %v11879_v2  ;;  %v2134_v52 = vpop.f32.mrb[191].mxu0  ;;  %v2592_v18 = vmax.f32 %v2140_v44, 0.0 }
 0x259   :  { %v2135_v22 = vadd.f32 %v14916_v51, %v2134_v52  ;;  %v2590_v4 = vmax.f32 %v2132_v57, 0.0 }
 0x25a   :  { %v2593_v63 = vmax.f32 %v2143_v16, 0.0 }
 0x25b   :  { %v2591_v19 = vmax.f32 %v2135_v22, 0.0 }
 0x25c   :  { %v14953_v33 = vpack.c.bf16 %v2593_v63, %v2592_v18 }
 0x25d   :  { %v14955_v20 = vpack.c.bf16 %v2591_v19, %v2590_v4  ;;  %v11882_v58 = vpop.f32.mrb[192].mxu0 }
 0x25e   :  { %16642 = vst [vmem:[#allocation55_spill] sm:$0xff] %v14953_v33  ;;  %v2156_v7 = vadd.f32 %v14916_v51, %v11882_v58  ;;  %v2147_v62 = vpop.f32.mrb[193].mxu0 }
 0x25f   :  { %16643 = vst [vmem:[#allocation56_spill] sm:$0xff] %v14955_v20  ;;  %v2148_v27 = vadd.f32 %v14916_v51, %v2147_v62  ;;  %v11883_v28 = vpop.f32.mrb[194].mxu0 }
 0x260   :  { %v2159_v2 = vadd.f32 %v14916_v51, %v11883_v28  ;;  %v2150_v6 = vpop.f32.mrb[195].mxu0  ;;  %v2596_v44 = vmax.f32 %v2156_v7, 0.0 }
 0x261   :  { %v2151_v52 = vadd.f32 %v14916_v51, %v2150_v6  ;;  %v2594_v57 = vmax.f32 %v2148_v27, 0.0  ;;  %v16644_v6 = vmax.bf16 %v14238_v35, %v13982_v8 }
 0x262   :  { %v2597_v16 = vmax.f32 %v2159_v2, 0.0 }
 0x263   :  { %v2595_v22 = vmax.f32 %v2151_v52, 0.0  ;;  %v16645_v52 = vmax.bf16 %v14240_v36, %v13984_v10 }
 0x264   :  { %v2755_v18 = vpack.c.bf16 %v2597_v16, %v2596_v44 }
 0x265   :  { %v2754_v63 = vpack.c.bf16 %v2595_v22, %v2594_v57  ;;  %v11886_v4 = vpop.f32.mrb[196].mxu0 }
 0x266   :  { %v2819_v19 = vmax.bf16 %v2755_v18, %v14563_v23  ;;  %v2172_v58 = vadd.f32 %v14916_v51, %v11886_v4  ;;  %v2163_v20 = vpop.f32.mrb[197].mxu0 }
 0x267   :  { %v2818_v62 = vmax.bf16 %v2754_v63, %v14565_v41  ;;  %v2164_v33 = vadd.f32 %v14916_v51, %v2163_v20  ;;  %v11887_v28 = vpop.f32.mrb[198].mxu0 }
 0x268   :  { %v2851_v7 = vmax.bf16 %v2819_v19, %v16644_v6  ;;  %v2175_v27 = vadd.f32 %v14916_v51, %v11887_v28  ;;  %v2166_v2 = vpop.f32.mrb[199].mxu0  ;;  %v2600_v22 = vmax.f32 %v2172_v58, 0.0  ;;  %v16646_v6 = vmax.bf16 %v14258_v9, %v13998_v24 }
 0x269   :  { %v2850_v44 = vmax.bf16 %v2818_v62, %v16645_v52  ;;  %v2167_v23 = vadd.f32 %v14916_v51, %v2166_v2  ;;  %v2598_v63 = vmax.f32 %v2164_v33, 0.0  ;;  %v16647_v52 = vmax.bf16 %v14260_v13, %v14000_v26 }
 0x26a   :  { %v10598_v16 = vcombine.low %v2851_v7, %v2851_v7  ;;  %v10599_v57 = vcombine.high %v2851_v7, %v2851_v7  ;;  %v2601_v41 = vmax.f32 %v2175_v27, 0.0 }
 0x26b   :  { %v10596_v18 = vcombine.low %v2850_v44, %v2850_v44  ;;  %v10597_v20 = vcombine.high %v2850_v44, %v2850_v44  ;;  %v2599_v4 = vmax.f32 %v2167_v23, 0.0 }
 0x26c   :  { %3254 = vst.msk [vmem:[#allocation2 + $0x24] sm:$0xf] %vm2882_vm1, %v10598_v16  ;;  %3255 = vst.msk [vmem:[#allocation2 + $0x28] sm:$0xf] %vm2882_vm1, %v10599_v57  ;;  %v2757_v8 = vpack.c.bf16 %v2601_v41, %v2600_v22 }
 0x26d   :  { %3252 = vst.msk [vmem:[#allocation2 + $0x1c] sm:$0xf] %vm2882_vm1, %v10596_v18  ;;  %3253 = vst.msk [vmem:[#allocation2 + $0x20] sm:$0xf] %vm2882_vm1, %v10597_v20  ;;  %v2756_v10 = vpack.c.bf16 %v2599_v4, %v2598_v63  ;;  %v11890_v35 = vpop.f32.mrb[200].mxu0 }
 0x26e   :  { %v2821_v36 = vmax.bf16 %v2757_v8, %v14797_v45  ;;  %v2188_v19 = vadd.f32 %v14916_v51, %v11890_v35  ;;  %v2179_v58 = vpop.f32.mrb[201].mxu0 }
 0x26f   :  { %v2820_v62 = vmax.bf16 %v2756_v10, %v14799_v0  ;;  %v2180_v33 = vadd.f32 %v14916_v51, %v2179_v58  ;;  %v11891_v28 = vpop.f32.mrb[202].mxu0  ;;  %v16648_v58 = vmax.bf16 %v14278_v54, %v14014_v40 }
 0x270   :  { %v2853_v7 = vmax.bf16 %v2821_v36, %v16646_v6  ;;  %v2191_v27 = vadd.f32 %v14916_v51, %v11891_v28  ;;  %v2182_v2 = vpop.f32.mrb[203].mxu0  ;;  %v2604_v57 = vmax.f32 %v2188_v19, 0.0 }
 0x271   :  { %v2852_v44 = vmax.bf16 %v2820_v62, %v16647_v52  ;;  %v2183_v45 = vadd.f32 %v14916_v51, %v2182_v2  ;;  %v2602_v18 = vmax.f32 %v2180_v33, 0.0 }
 0x272   :  { %v10602_v23 = vcombine.low %v2853_v7, %v2853_v7  ;;  %v10603_v16 = vcombine.high %v2853_v7, %v2853_v7  ;;  %v2605_v0 = vmax.f32 %v2191_v27, 0.0 }
 0x273   :  { %v10600_v22 = vcombine.low %v2852_v44, %v2852_v44  ;;  %v10601_v41 = vcombine.high %v2852_v44, %v2852_v44  ;;  %v2603_v20 = vmax.f32 %v2183_v45, 0.0  ;;  %v13453_v63 = vld [vmem:[#allocation2 + $0x24] sm:$0xff]  }
 0x274   :  { %3258 = vst.msk [vmem:[#allocation2 + $0x3c] sm:$0xf] %vm2882_vm1, %v10602_v23  ;;  %3259 = vst.msk [vmem:[#allocation2 + $0x40] sm:$0xf] %vm2882_vm1, %v10603_v16  ;;  %v2759_v24 = vpack.c.bf16 %v2605_v0, %v2604_v57  ;;  %v13456_v9 = vld [vmem:[#allocation2 + $0x1c] sm:$0xff]  }
 0x275   :  { %3256 = vst.msk [vmem:[#allocation2 + $0x34] sm:$0xf] %vm2882_vm1, %v10600_v22  ;;  %3257 = vst.msk [vmem:[#allocation2 + $0x38] sm:$0xf] %vm2882_vm1, %v10601_v41  ;;  %v2758_v26 = vpack.c.bf16 %v2603_v20, %v2602_v18  ;;  %v11894_v13 = vpop.f32.mrb[204].mxu0  ;;  %12270 = vmatprep.mubr.msk.bf16.mxu0 %vm3414_vm2, %v13456_v9 }
 0x276   :  { %v2823_v4 = vmax.bf16 %v2759_v24, %v14816_v5  ;;  %v2204_v8 = vadd.f32 %v14916_v51, %v11894_v13  ;;  %v2195_v10 = vpop.f32.mrb[205].mxu0  ;;  %12271 = vmatmul.mubr.msk.bf16.vlgmr.msra.gmra.mrb[0].mxu0 %vm3414_vm2, %v13453_v63  ;;  %v16649_v5 = vmax.bf16 %v14280_v55, %v14016_v42  ;;  %v16650_v24 = vmax.bf16 %v14298_v37, %v14030_v56 }
 0x277   :  { %v2822_v35 = vmax.bf16 %v2758_v26, %v14818_v50  ;;  %v2196_v36 = vadd.f32 %v14916_v51, %v2195_v10  ;;  %v11895_v19 = vpop.f32.mrb[206].mxu0  ;;  %12287 = vmatpush3.bf16.msra.mxu0 %v14863_v14 }
 0x278   :  { %v2855_v62 = vmax.bf16 %v2823_v4, %v16648_v58  ;;  %v2207_v33 = vadd.f32 %v14916_v51, %v11895_v19  ;;  %v2198_v28 = vpop.f32.mrb[207].mxu0  ;;  %12304 = vmatprep.subr.bf16.mxu0 %v14905_v1  ;;  %v2608_v2 = vmax.f32 %v2204_v8, 0.0 }
 0x279   :  { %v2854_v6 = vmax.bf16 %v2822_v35, %v16649_v5  ;;  %v2199_v50 = vadd.f32 %v14916_v51, %v2198_v28  ;;  %v2606_v54 = vmax.f32 %v2196_v36, 0.0 }
 0x27a   :  { %v10606_v7 = vcombine.low %v2855_v62, %v2855_v62  ;;  %v10607_v27 = vcombine.high %v2855_v62, %v2855_v62  ;;  %v2609_v52 = vmax.f32 %v2207_v33, 0.0 }
 0x27b   :  { %v10604_v44 = vcombine.low %v2854_v6, %v2854_v6  ;;  %v10605_v40 = vcombine.high %v2854_v6, %v2854_v6  ;;  %v2607_v45 = vmax.f32 %v2199_v50, 0.0  ;;  %v13459_v16 = vld [vmem:[#allocation2 + $0x3c] sm:$0xff]  }
 0x27c   :  { %3262 = vst.msk [vmem:[#allocation2 + $0x54] sm:$0xf] %vm2882_vm1, %v10606_v7  ;;  %3263 = vst.msk [vmem:[#allocation2 + $0x58] sm:$0xf] %vm2882_vm1, %v10607_v27  ;;  %v2761_v14 = vpack.c.bf16 %v2609_v52, %v2608_v2  ;;  %v13458_v23 = vld [vmem:[#allocation2 + $0x34] sm:$0xff]   ;;  %v16652_v2 = vmax.bf16 %v14318_v34, %v14046_v11 }
 0x27d   :  { %3260 = vst.msk [vmem:[#allocation2 + $0x4c] sm:$0xf] %vm2882_vm1, %v10604_v44  ;;  %3261 = vst.msk [vmem:[#allocation2 + $0x50] sm:$0xf] %vm2882_vm1, %v10605_v40  ;;  %v2760_v42 = vpack.c.bf16 %v2607_v45, %v2606_v54  ;;  %v11898_v55 = vpop.f32.mrb[208].mxu0  ;;  %12274 = vmatprep.mubr.msk.bf16.mxu0 %vm3414_vm2, %v13458_v23 }
 0x27e   :  { %v2825_v57 = vmax.bf16 %v2761_v14, %v14832_v31  ;;  %v2220_v0 = vadd.f32 %v14916_v51, %v11898_v55  ;;  %v2211_v22 = vpop.f32.mrb[209].mxu0  ;;  %12275 = vmatmul.mubr.msk.bf16.gmra.mrb[4].mxu0 %vm3414_vm2, %v13459_v16  ;;  %v16651_v31 = vmax.bf16 %v14300_v43, %v14032_v59 }
 0x27f   :  { %v2824_v41 = vmax.bf16 %v2760_v42, %v14834_v38  ;;  %v2212_v18 = vadd.f32 %v14916_v51, %v2211_v22  ;;  %v11899_v20 = vpop.f32.mrb[210].mxu0 }
 0x280   :  { %v2857_v9 = vmax.bf16 %v2825_v57, %v16650_v24  ;;  %v2223_v63 = vadd.f32 %v14916_v51, %v11899_v20  ;;  %v2214_v26 = vpop.f32.mrb[211].mxu0  ;;  %v2612_v10 = vmax.f32 %v2220_v0, 0.0 }
 0x281   :  { %v2856_v13 = vmax.bf16 %v2824_v41, %v16651_v31  ;;  %v2215_v4 = vadd.f32 %v14916_v51, %v2214_v26  ;;  %v2610_v58 = vmax.f32 %v2212_v18, 0.0 }
 0x282   :  { %v10610_v8 = vcombine.low %v2857_v9, %v2857_v9  ;;  %v10611_v38 = vcombine.high %v2857_v9, %v2857_v9  ;;  %v2613_v35 = vmax.f32 %v2223_v63, 0.0  ;;  %v16654_v63 = vmax.bf16 %v14338_v61, %v14062_v29 }
 0x283   :  { %v10608_v36 = vcombine.low %v2856_v13, %v2856_v13  ;;  %v10609_v19 = vcombine.high %v2856_v13, %v2856_v13  ;;  %v2611_v62 = vmax.f32 %v2215_v4, 0.0  ;;  %v13462_v33 = vld [vmem:[#allocation2 + $0x54] sm:$0xff]  }
 0x284   :  { %3266 = vst.msk [vmem:[#allocation2 + $0x6c] sm:$0xf] %vm2882_vm1, %v10610_v8  ;;  %3267 = vst.msk [vmem:[#allocation2 + $0x70] sm:$0xf] %vm2882_vm1, %v10611_v38  ;;  %v2763_v56 = vpack.c.bf16 %v2613_v35, %v2612_v10  ;;  %v13461_v37 = vld [vmem:[#allocation2 + $0x4c] sm:$0xff]  }
 0x285   :  { %3264 = vst.msk [vmem:[#allocation2 + $0x64] sm:$0xf] %vm2882_vm1, %v10608_v36  ;;  %3265 = vst.msk [vmem:[#allocation2 + $0x68] sm:$0xf] %vm2882_vm1, %v10609_v19  ;;  %v2762_v59 = vpack.c.bf16 %v2611_v62, %v2610_v58  ;;  %v11902_v43 = vpop.f32.mrb[212].mxu0  ;;  %12278 = vmatprep.mubr.msk.bf16.mxu0 %vm3414_vm2, %v13461_v37 }
 0x286   :  { %v2827_v28 = vmax.bf16 %v2763_v56, %v14844_v21  ;;  %v2236_v5 = vadd.f32 %v14916_v51, %v11902_v43  ;;  %v2227_v6 = vpop.f32.mrb[213].mxu0  ;;  %12279 = vmatmul.mubr.msk.bf16.gmra.mrb[8].mxu0 %vm3414_vm2, %v13462_v33  ;;  %v16653_v21 = vmax.bf16 %v14320_v46, %v14048_v12 }
 0x287   :  { %v2826_v50 = vmax.bf16 %v2762_v59, %v14846_v39  ;;  %v2228_v7 = vadd.f32 %v14916_v51, %v2227_v6  ;;  %v11903_v27 = vpop.f32.mrb[214].mxu0  ;;  %v15076_v6 = vld [vmem:[%s16529_s3 + $0x18] sm:$0xff]  }
 0x288   :  { %v2859_v52 = vmax.bf16 %v2827_v28, %v16652_v2  ;;  %v2239_v44 = vadd.f32 %v14916_v51, %v11903_v27  ;;  %v2230_v40 = vpop.f32.mrb[215].mxu0  ;;  %v2616_v23 = vmax.f32 %v2236_v5, 0.0  ;;  %v16656_v27 = vmax.bf16 %v14358_v53, %v14078_v47 }
 0x289   :  { %v2858_v54 = vmax.bf16 %v2826_v50, %v16653_v21  ;;  %v2231_v45 = vadd.f32 %v14916_v51, %v2230_v40  ;;  %v2614_v57 = vmax.f32 %v2228_v7, 0.0 }
 0x28a   :  { %v10614_v14 = vcombine.low %v2859_v52, %v2859_v52  ;;  %v10615_v39 = vcombine.high %v2859_v52, %v2859_v52  ;;  %v2617_v42 = vmax.f32 %v2239_v44, 0.0 }
 0x28b   :  { %v10612_v55 = vcombine.low %v2858_v54, %v2858_v54  ;;  %v10613_v16 = vcombine.high %v2858_v54, %v2858_v54  ;;  %v2615_v0 = vmax.f32 %v2231_v45, 0.0  ;;  %v13464_v22 = vld [vmem:[#allocation2 + $0x6c] sm:$0xff]  }
 0x28c   :  { %3270 = vst.msk [vmem:[#allocation2 + $0xb4] sm:$0xf] %vm2882_vm1, %v10614_v14  ;;  %3271 = vst.msk [vmem:[#allocation2 + $0xb8] sm:$0xf] %vm2882_vm1, %v10615_v39  ;;  %v2765_v11 = vpack.c.bf16 %v2617_v42, %v2616_v23  ;;  %v13463_v34 = vld [vmem:[#allocation2 + $0x64] sm:$0xff]   ;;  %v16657_v14 = vmax.bf16 %v14360_v60, %v14080_v48 }
 0x28d   :  { %3268 = vst.msk [vmem:[#allocation2 + $0xac] sm:$0xf] %vm2882_vm1, %v10612_v55  ;;  %3269 = vst.msk [vmem:[#allocation2 + $0xb0] sm:$0xf] %vm2882_vm1, %v10613_v16  ;;  %v2764_v12 = vpack.c.bf16 %v2615_v0, %v2614_v57  ;;  %v11906_v46 = vpop.f32.mrb[216].mxu0  ;;  %12282 = vmatprep.mubr.msk.bf16.mxu0 %vm3414_vm2, %v13463_v34 }
 0x28e   :  { %v2829_v41 = vmax.bf16 %v2765_v11, %v14852_v17  ;;  %v2252_v18 = vadd.f32 %v14916_v51, %v11906_v46  ;;  %v2243_v20 = vpop.f32.mrb[217].mxu0  ;;  %12283 = vmatmul.mubr.msk.bf16.gmra.mrb[12].mxu0 %vm3414_vm2, %v13464_v22  ;;  %v16655_v17 = vmax.bf16 %v14340_v49, %v14064_v30  ;;  %v16658_v46 = vld [vmem:[#allocation22_spill] sm:$0xff]  ;;  %v16659_v22 = vld [vmem:[#allocation4_spill] sm:$0xff] }
 0x28f   :  { %v2828_v24 = vmax.bf16 %v2764_v12, %v14854_v32  ;;  %v11907_v9 = vpop.f32.mrb[218].mxu0  ;;  %v2244_v31 = vadd.f32 %v14916_v51, %v2243_v20  ;;  %v16661_v20 = vld [vmem:[#allocation40_spill] sm:$0xff] }
 0x290   :  { %v2861_v26 = vmax.bf16 %v2829_v41, %v16654_v63  ;;  %v2255_v13 = vadd.f32 %v14916_v51, %v11907_v9  ;;  %v2246_v4 = vpop.f32.mrb[219].mxu0  ;;  %v2620_v35 = vmax.f32 %v2252_v18, 0.0  ;;  %v16660_v41 = vmax.bf16 %v16658_v46, %v16659_v22 }
 0x291   :  { %v2860_v8 = vmax.bf16 %v2828_v24, %v16655_v17  ;;  %v2247_v38 = vadd.f32 %v14916_v51, %v2246_v4  ;;  %v2618_v61 = vmax.f32 %v2244_v31, 0.0  ;;  %v16662_v4 = vld [vmem:[#allocation23_spill] sm:$0xff]  ;;  %v16663_v17 = vld [vmem:[#allocation5_spill] sm:$0xff] }
 0x292   :  { %v10618_v10 = vcombine.low %v2861_v26, %v2861_v26  ;;  %v10619_v32 = vcombine.high %v2861_v26, %v2861_v26  ;;  %v2621_v36 = vmax.f32 %v2255_v13, 0.0 }
 0x293   :  { %v3907_v19 = vld [vmem:[#allocation2 + $0xb4] sm:$0xf]  ;;  %v10616_v58 = vcombine.low %v2860_v8, %v2860_v8  ;;  %v10617_v62 = vcombine.high %v2860_v8, %v2860_v8  ;;  %v2619_v37 = vmax.f32 %v2247_v38, 0.0  ;;  %v16664_v8 = vmax.bf16 %v16662_v4, %v16663_v17 }
 0x294   :  { %v3906_v29 = vld [vmem:[#allocation2 + $0xb0] sm:$0xf]  ;;  %3274 = vst.msk [vmem:[#allocation2 + $0xcc] sm:$0xf] %vm2882_vm1, %v10618_v10  ;;  %3275 = vst.msk [vmem:[#allocation2 + $0xd0] sm:$0xf] %vm2882_vm1, %v10619_v32  ;;  %v2767_v56 = vpack.c.bf16 %v2621_v36, %v2620_v35 }
 0x295   :  { %v15065_v59 = vcombine.low %v3906_v29, %v3907_v19  ;;  %3272 = vst.msk [vmem:[#allocation2 + $0xc4] sm:$0xf] %vm2882_vm1, %v10616_v58  ;;  %3273 = vst.msk [vmem:[#allocation2 + $0xc8] sm:$0xf] %vm2882_vm1, %v10617_v62  ;;  %v11910_v30 = vpop.f32.mrb[220].mxu0  ;;  %v15069_v49 = vld [vmem:[#allocation2 + $0xa8] sm:$0xff]   ;;  %v2766_v33 = vpack.c.bf16 %v2619_v37, %v2618_v61 }
 0x296   :  { %v2831_v43 = vmax.bf16 %v2767_v56, %v14865_v15  ;;  %v2268_v28 = vadd.f32 %v14916_v51, %v11910_v30  ;;  %v2259_v5 = vpop.f32.mrb[221].mxu0  ;;  %12288 = vmatprep.mubr.msk.bf16.mxu0 %vm3414_vm2, %v15069_v49  ;;  %v16665_v56 = vld [vmem:[#allocation41_spill] sm:$0xff] }
 0x297   :  { %v2260_v50 = vadd.f32 %v14916_v51, %v2259_v5  ;;  %v11911_v7 = vpop.f32.mrb[222].mxu0  ;;  %v2830_v15 = vmax.bf16 %v2766_v33, %v14867_v3  ;;  %12289 = vmatmul.mubr.msk.bf16.vlgmr.msra.gmra.mrb[0].mxu0 %vm3414_vm2, %v15065_v59 }
 0x298   :  { %v2863_v2 = vmax.bf16 %v2831_v43, %v16656_v27  ;;  %v2271_v52 = vadd.f32 %v14916_v51, %v11911_v7  ;;  %v2262_v44 = vpop.f32.mrb[223].mxu0  ;;  %v2624_v40 = vmax.f32 %v2268_v28, 0.0  ;;  %12305 = vmatpush3.bf16.msra.mxu0 %v14905_v1  ;;  %v16666_v28 = vld [vmem:[#allocation42_spill] sm:$0xff]  ;;  %v16667_v27 = vld [vmem:[#allocation24_spill] sm:$0xff] }
 0x299   :  { %v2263_v21 = vadd.f32 %v14916_v51, %v2262_v44  ;;  %v2862_v47 = vmax.bf16 %v2830_v15, %v16657_v14  ;;  %12322 = vmatprep.subr.bf16.mxu0 %v15076_v6  ;;  %v2622_v3 = vmax.f32 %v2260_v50, 0.0 }
 0x29a   :  { %v10622_v54 = vcombine.low %v2863_v2, %v2863_v2  ;;  %v10623_v45 = vcombine.high %v2863_v2, %v2863_v2  ;;  %v2625_v53 = vmax.f32 %v2271_v52, 0.0  ;;  %v16668_v2 = vld [vmem:[#allocation6_spill] sm:$0xff] }
 0x29b   :  { %v10620_v39 = vcombine.low %v2862_v47, %v2862_v47  ;;  %v10621_v23 = vcombine.high %v2862_v47, %v2862_v47  ;;  %v2623_v55 = vmax.f32 %v2263_v21, 0.0  ;;  %v16669_v15 = vmax.bf16 %v16667_v27, %v16668_v2  ;;  %v16670_v21 = vld [vmem:[#allocation25_spill] sm:$0xff] }
 0x29c   :  { %3278 = vst.msk [vmem:[#allocation2 + $0xe4] sm:$0xf] %vm2882_vm1, %v10622_v54  ;;  %3279 = vst.msk [vmem:[#allocation2 + $0xe8] sm:$0xf] %vm2882_vm1, %v10623_v45  ;;  %v2769_v42 = vpack.c.bf16 %v2625_v53, %v2624_v40  ;;  %v15096_v1 = vld [vmem:[#allocation2 + $0xc0] sm:$0xff]   ;;  %v15102_v11 = vld [vmem:[#allocation2 + $0xc8] sm:$0xff]  }
 0x29d   :  { %v11914_v16 = vpop.f32.mrb[224].mxu0  ;;  %3276 = vst.msk [vmem:[#allocation2 + $0xdc] sm:$0xf] %vm2882_vm1, %v10620_v39  ;;  %3277 = vst.msk [vmem:[#allocation2 + $0xe0] sm:$0xf] %vm2882_vm1, %v10621_v23  ;;  %v2768_v60 = vpack.c.bf16 %v2623_v55, %v2622_v3  ;;  %12292 = vmatprep.mubr.msk.bf16.mxu0 %vm3414_vm2, %v15096_v1  ;;  %v16671_v54 = vld [vmem:[#allocation7_spill] sm:$0xff] }
 0x29e   :  { %v2833_v48 = vmax.bf16 %v2769_v42, %v14875_v25  ;;  %v2284_v57 = vadd.f32 %v14916_v51, %v11914_v16  ;;  %v2275_v0 = vpop.f32.mrb[225].mxu0  ;;  %v16672_v45 = vmax.bf16 %v16670_v21, %v16671_v54  ;;  %v16682_v54 = vld [vmem:[#allocation46_spill] sm:$0xff] }
 0x29f   :  { %v2276_v34 = vadd.f32 %v14916_v51, %v2275_v0  ;;  %v11915_v12 = vpop.f32.mrb[226].mxu0  ;;  %v2832_v24 = vmax.bf16 %v2768_v60, %v16661_v20  ;;  %12293 = vmatmul.mubr.msk.bf16.gmra.mrb[4].mxu0 %vm3414_vm2, %v15102_v11  ;;  %v16674_v20 = vld [vmem:[#allocation44_spill] sm:$0xff] }
 0x2a0   :  { %v2865_v18 = vmax.bf16 %v2833_v48, %v16660_v41  ;;  %v2287_v25 = vadd.f32 %v14916_v51, %v11915_v12  ;;  %v2278_v9 = vpop.f32.mrb[227].mxu0  ;;  %v2628_v63 = vmax.f32 %v2284_v57, 0.0  ;;  %v16673_v12 = vld [vmem:[#allocation43_spill] sm:$0xff] }
 0x2a1   :  { %v2279_v26 = vadd.f32 %v14916_v51, %v2278_v9  ;;  %v2864_v38 = vmax.bf16 %v2832_v24, %v16664_v8  ;;  %v2626_v32 = vmax.f32 %v2276_v34, 0.0 }
 0x2a2   :  { %v10626_v31 = vcombine.low %v2865_v18, %v2865_v18  ;;  %v10627_v13 = vcombine.high %v2865_v18, %v2865_v18  ;;  %v2629_v10 = vmax.f32 %v2287_v25, 0.0 }
 0x2a3   :  { %v2627_v35 = vmax.f32 %v2279_v26, 0.0  ;;  %v10624_v36 = vcombine.low %v2864_v38, %v2864_v38  ;;  %v10625_v19 = vcombine.high %v2864_v38, %v2864_v38  ;;  %v16675_v26 = vld [vmem:[#allocation26_spill] sm:$0xff]  ;;  %v16678_v38 = vld [vmem:[#allocation27_spill] sm:$0xff] }
 0x2a4   :  { %3282 = vst.msk [vmem:[#allocation2 + $0xfc] sm:$0xf] %vm2882_vm1, %v10626_v31  ;;  %3283 = vst.msk [vmem:[#allocation2 + $0x100] sm:$0xf] %vm2882_vm1, %v10627_v13  ;;  %v2771_v58 = vpack.c.bf16 %v2629_v10, %v2628_v63  ;;  %v15120_v61 = vld [vmem:[#allocation2 + $0xd8] sm:$0xff]   ;;  %v15126_v33 = vld [vmem:[#allocation2 + $0xe0] sm:$0xff]  }
 0x2a5   :  { %v2770_v62 = vpack.c.bf16 %v2627_v35, %v2626_v32  ;;  %v11918_v29 = vpop.f32.mrb[228].mxu0  ;;  %3280 = vst.msk [vmem:[#allocation2 + $0xf4] sm:$0xf] %vm2882_vm1, %v10624_v36  ;;  %3281 = vst.msk [vmem:[#allocation2 + $0xf8] sm:$0xf] %vm2882_vm1, %v10625_v19  ;;  %12296 = vmatprep.mubr.msk.bf16.mxu0 %vm3414_vm2, %v15120_v61  ;;  %v15156_v63 = vld [vmem:[#allocation2 + $0xac] sm:$0xff]  }
 0x2a6   :  { %v2835_v37 = vmax.bf16 %v2771_v58, %v16665_v56  ;;  %v2300_v30 = vadd.f32 %v14916_v51, %v11918_v29  ;;  %v2291_v43 = vpop.f32.mrb[229].mxu0  ;;  %v16676_v31 = vld [vmem:[#allocation8_spill] sm:$0xff]  ;;  %v16679_v10 = vld [vmem:[#allocation9_spill] sm:$0xff] }
 0x2a7   :  { %v2834_v5 = vmax.bf16 %v2770_v62, %v16666_v28  ;;  %v2292_v50 = vadd.f32 %v14916_v51, %v2291_v43  ;;  %v11919_v7 = vpop.f32.mrb[230].mxu0  ;;  %12297 = vmatmul.mubr.msk.bf16.gmra.mrb[8].mxu0 %vm3414_vm2, %v15126_v33  ;;  %v16677_v13 = vmax.bf16 %v16675_v26, %v16676_v31  ;;  %v16680_v32 = vmax.bf16 %v16678_v38, %v16679_v10  ;;  %v15221_v10 = vld [vmem:[%s16528_s2] ss:$0 sm:$0xff] }
 0x2a8   :  { %v2867_v52 = vmax.bf16 %v2835_v37, %v16669_v15  ;;  %v2303_v44 = vadd.f32 %v14916_v51, %v11919_v7  ;;  %v2294_v40 = vpop.f32.mrb[231].mxu0  ;;  %v2632_v39 = vmax.f32 %v2300_v30, 0.0  ;;  %v15183_v15 = vld [vmem:[#allocation2 + $0xb4] sm:$0xff]  }
 0x2a9   :  { %v2866_v14 = vmax.bf16 %v2834_v5, %v16672_v45  ;;  %v2295_v47 = vadd.f32 %v14916_v51, %v2294_v40  ;;  %v2630_v16 = vmax.f32 %v2292_v50, 0.0  ;;  %v15177_v50 = vld [vmem:[%s16529_s3 + $0x20] sm:$0xff]  }
 0x2aa   :  { %v10630_v53 = vcombine.low %v2867_v52, %v2867_v52  ;;  %v10631_v3 = vcombine.high %v2867_v52, %v2867_v52  ;;  %v2633_v23 = vmax.f32 %v2303_v44, 0.0  ;;  %v16681_v52 = vld [vmem:[#allocation45_spill] sm:$0xff] }
 0x2ab   :  { %v10628_v42 = vcombine.low %v2866_v14, %v2866_v14  ;;  %v10629_v55 = vcombine.high %v2866_v14, %v2866_v14  ;;  %v2631_v48 = vmax.f32 %v2295_v47, 0.0 }
 0x2ac   :  { %3286 = vst.msk [vmem:[#allocation2 + $0x144] sm:$0xf] %vm2882_vm1, %v10630_v53  ;;  %3287 = vst.msk [vmem:[#allocation2 + $0x148] sm:$0xf] %vm2882_vm1, %v10631_v3  ;;  %v2773_v60 = vpack.c.bf16 %v2633_v23, %v2632_v39  ;;  %v15146_v34 = vld [vmem:[#allocation2 + $0xf0] sm:$0xff]   ;;  %v15150_v18 = vld [vmem:[#allocation2 + $0xf8] sm:$0xff]  }
 0x2ad   :  { %3284 = vst.msk [vmem:[#allocation2 + $0x13c] sm:$0xf] %vm2882_vm1, %v10628_v42  ;;  %3285 = vst.msk [vmem:[#allocation2 + $0x140] sm:$0xf] %vm2882_vm1, %v10629_v55  ;;  %v2772_v57 = vpack.c.bf16 %v2631_v48, %v2630_v16  ;;  %v11922_v0 = vpop.f32.mrb[232].mxu0  ;;  %12300 = vmatprep.mubr.msk.bf16.mxu0 %vm3414_vm2, %v15146_v34  ;;  %v15193_v53 = vld [vmem:[#allocation2 + $0xc4] sm:$0xff]  }
 0x2ae   :  { %v2837_v46 = vmax.bf16 %v2773_v60, %v16673_v12  ;;  %v2316_v22 = vadd.f32 %v14916_v51, %v11922_v0  ;;  %v2307_v41 = vpop.f32.mrb[233].mxu0  ;;  %v16683_v3 = vld [vmem:[#allocation28_spill] sm:$0xff]  ;;  %v16684_v39 = vld [vmem:[#allocation10_spill] sm:$0xff]  ;;  %v16686_v48 = vld [vmem:[#allocation29_spill] sm:$0xff] }
 0x2af   :  { %v2836_v24 = vmax.bf16 %v2772_v57, %v16674_v20  ;;  %v2308_v25 = vadd.f32 %v14916_v51, %v2307_v41  ;;  %v11923_v9 = vpop.f32.mrb[234].mxu0  ;;  %12301 = vmatmul.mubr.msk.bf16.gmra.mrb[12].mxu0 %vm3414_vm2, %v15150_v18  ;;  %v16685_v23 = vmax.bf16 %v16683_v3, %v16684_v39  ;;  %v16687_v60 = vld [vmem:[#allocation11_spill] sm:$0xff]  ;;  %v13490_v39 = vld [vmem:[#allocation2 + $0x1b0] sm:$0xff]  }
 0x2b0   :  { %v2869_v4 = vmax.bf16 %v2837_v46, %v16677_v13  ;;  %v2319_v17 = vadd.f32 %v14916_v51, %v11923_v9  ;;  %v2310_v8 = vpop.f32.mrb[235].mxu0  ;;  %12306 = vmatprep.mubr.msk.bf16.mxu0 %vm3414_vm2, %v15156_v63  ;;  %v2636_v62 = vmax.f32 %v2316_v22, 0.0  ;;  %v16688_v57 = vmax.bf16 %v16686_v48, %v16687_v60 }
 0x2b1   :  { %v2868_v35 = vmax.bf16 %v2836_v24, %v16680_v32  ;;  %v2311_v36 = vadd.f32 %v14916_v51, %v2310_v8  ;;  %v2634_v30 = vmax.f32 %v2308_v25, 0.0  ;;  %v16689_v8 = vld [vmem:[#allocation47_spill] sm:$0xff] }
 0x2b2   :  { %v10634_v19 = vcombine.low %v2869_v4, %v2869_v4  ;;  %v10635_v58 = vcombine.high %v2869_v4, %v2869_v4  ;;  %v2637_v29 = vmax.f32 %v2319_v17, 0.0 }
 0x2b3   :  { %v10632_v56 = vcombine.low %v2868_v35, %v2868_v35  ;;  %v10633_v37 = vcombine.high %v2868_v35, %v2868_v35  ;;  %v2635_v43 = vmax.f32 %v2311_v36, 0.0  ;;  %v15181_v2 = vld [vmem:[#allocation2 + $0x144] sm:$0xff]   ;;  %v15226_v36 = vld [vmem:[#allocation2 + $0xcc] sm:$0xff]  }
 0x2b4   :  { %3290 = vst.msk [vmem:[#allocation2 + $0x15c] sm:$0xf] %vm2882_vm1, %v10634_v19  ;;  %3291 = vst.msk [vmem:[#allocation2 + $0x160] sm:$0xf] %vm2882_vm1, %v10635_v58  ;;  %v2775_v28 = vpack.c.bf16 %v2637_v29, %v2636_v62  ;;  %v15172_v5 = vld [vmem:[#allocation2 + $0x13c] sm:$0xff]  }
 0x2b5   :  { %3288 = vst.msk [vmem:[#allocation2 + $0x154] sm:$0xf] %vm2882_vm1, %v10632_v56  ;;  %3289 = vst.msk [vmem:[#allocation2 + $0x158] sm:$0xf] %vm2882_vm1, %v10633_v37  ;;  %v2774_v7 = vpack.c.bf16 %v2635_v43, %v2634_v30  ;;  %v11926_v27 = vpop.f32.mrb[236].mxu0  ;;  %11950 = vmatprep.mubr.msk.bf16.mxu1 %vm3414_vm2, %v15172_v5  ;;  %v16690_v19 = vld [vmem:[#allocation48_spill] sm:$0xff] }
 0x2b6   :  { %v2839_v44 = vmax.bf16 %v2775_v28, %v16681_v52  ;;  %v2332_v40 = vadd.f32 %v14916_v51, %v11926_v27  ;;  %v2323_v21 = vpop.f32.mrb[237].mxu0  ;;  %11951 = vmatmul.mubr.msk.bf16.gmra.mrb[4].mxu1 %vm3414_vm2, %v15181_v2  ;;  %v15232_v56 = vld [vmem:[#allocation2 + $0xdc] sm:$0xff]   ;;  %v16691_v37 = vld [vmem:[#allocation30_spill] sm:$0xff] }
 0x2b7   :  { %v2838_v45 = vmax.bf16 %v2774_v7, %v16682_v54  ;;  %v2324_v14 = vadd.f32 %v14916_v51, %v2323_v21  ;;  %v11927_v47 = vpop.f32.mrb[238].mxu0  ;;  %12307 = vmatmul.mubr.msk.bf16.vlgmr.msra.gmra.mrb[0].mxu0 %vm3414_vm2, %v15183_v15  ;;  %v16692_v30 = vld [vmem:[#allocation12_spill] sm:$0xff]  ;;  %v16694_v52 = vld [vmem:[#allocation31_spill] sm:$0xff] }
 0x2b8   :  { %v2871_v42 = vmax.bf16 %v2839_v44, %v16685_v23  ;;  %v2335_v55 = vadd.f32 %v14916_v51, %v11927_v47  ;;  %v2326_v16 = vpop.f32.mrb[239].mxu0  ;;  %12310 = vmatprep.mubr.msk.bf16.mxu0 %vm3414_vm2, %v15193_v53  ;;  %12323 = vmatpush3.bf16.msra.mxu0 %v15076_v6  ;;  %v2640_v41 = vmax.f32 %v2332_v40, 0.0  ;;  %v16693_v43 = vmax.bf16 %v16691_v37, %v16692_v30  ;;  %v16695_v44 = vld [vmem:[#allocation13_spill] sm:$0xff] }
 0x2b9   :  { %v2870_v0 = vmax.bf16 %v2838_v45, %v16688_v57  ;;  %v2327_v12 = vadd.f32 %v14916_v51, %v2326_v16  ;;  %12340 = vmatprep.subr.bf16.mxu0 %v15177_v50  ;;  %v2638_v9 = vmax.f32 %v2324_v14, 0.0  ;;  %v16696_v40 = vmax.bf16 %v16694_v52, %v16695_v44  ;;  %v13491_v52 = vld [vmem:[#allocation2 + $0x1b8] sm:$0xff]  }
 0x2ba   :  { %v10638_v46 = vcombine.low %v2871_v42, %v2871_v42  ;;  %v10639_v22 = vcombine.high %v2871_v42, %v2871_v42  ;;  %v2641_v20 = vmax.f32 %v2335_v55, 0.0 }
 0x2bb   :  { %v10636_v24 = vcombine.low %v2870_v0, %v2870_v0  ;;  %v10637_v25 = vcombine.high %v2870_v0, %v2870_v0  ;;  %v2639_v26 = vmax.f32 %v2327_v12, 0.0  ;;  %v15215_v17 = vld [vmem:[#allocation2 + $0x15c] sm:$0xff]  }
 0x2bc   :  { %3294 = vst.msk [vmem:[#allocation2 + $0x174] sm:$0xf] %vm2882_vm1, %v10638_v46  ;;  %3295 = vst.msk [vmem:[#allocation2 + $0x178] sm:$0xf] %vm2882_vm1, %v10639_v22  ;;  %v2777_v51 = vpack.c.bf16 %v2641_v20, %v2640_v41  ;;  %v15211_v31 = vld [vmem:[#allocation2 + $0x154] sm:$0xff]   ;;  %v16697_v46 = vld [vmem:[#allocation49_spill] sm:$0xff] }
 0x2bd   :  { %3292 = vst.msk [vmem:[#allocation2 + $0x16c] sm:$0xf] %vm2882_vm1, %v10636_v24  ;;  %3293 = vst.msk [vmem:[#allocation2 + $0x170] sm:$0xf] %vm2882_vm1, %v10637_v25  ;;  %v2776_v13 = vpack.c.bf16 %v2639_v26, %v2638_v9  ;;  %v11930_v4 = vpop.f32.mrb[240].mxu0  ;;  %11954 = vmatprep.mubr.msk.bf16.mxu1 %vm3414_vm2, %v15211_v31  ;;  %v15258_v24 = vld [vmem:[#allocation2 + $0xe4] sm:$0xff]  }
 0x2be   :  { %v2841_v38 = vmax.bf16 %v2777_v51, %v16689_v8  ;;  %v2348_v32 = vadd.f32 %v15221_v10, %v11930_v4  ;;  %v2339_v35 = vpop.f32.mrb[241].mxu0  ;;  %11955 = vmatmul.mubr.msk.bf16.gmra.mrb[8].mxu1 %vm3414_vm2, %v15215_v17  ;;  %v16698_v25 = vld [vmem:[#allocation50_spill] sm:$0xff]  ;;  %v16699_v4 = vld [vmem:[#allocation32_spill] sm:$0xff] }
 0x2bf   :  { %v2840_v58 = vmax.bf16 %v2776_v13, %v16690_v19  ;;  %v2340_v62 = vadd.f32 %v15221_v10, %v2339_v35  ;;  %v11931_v29 = vpop.f32.mrb[242].mxu0  ;;  %12311 = vmatmul.mubr.msk.bf16.gmra.mrb[4].mxu0 %vm3414_vm2, %v15226_v36  ;;  %v15264_v13 = vld [vmem:[#allocation2 + $0xf4] sm:$0xff]  }
 0x2c0   :  { %v2873_v28 = vmax.bf16 %v2841_v38, %v16693_v43  ;;  %v2351_v7 = vadd.f32 %v15221_v10, %v11931_v29  ;;  %v2342_v27 = vpop.f32.mrb[243].mxu0  ;;  %12314 = vmatprep.mubr.msk.bf16.mxu0 %vm3414_vm2, %v15232_v56  ;;  %v2644_v47 = vmax.f32 %v2348_v32, 0.0  ;;  %v16700_v8 = vld [vmem:[#allocation14_spill] sm:$0xff] }
 0x2c1   :  { %v2872_v21 = vmax.bf16 %v2840_v58, %v16696_v40  ;;  %v2343_v54 = vadd.f32 %v15221_v10, %v2342_v27  ;;  %v2642_v55 = vmax.f32 %v2340_v62, 0.0  ;;  %v16701_v38 = vmax.bf16 %v16699_v4, %v16700_v8  ;;  %v16702_v58 = vld [vmem:[#allocation33_spill] sm:$0xff]  ;;  %v16703_v62 = vld [vmem:[#allocation15_spill] sm:$0xff] }
 0x2c2   :  { %v10642_v45 = vcombine.low %v2873_v28, %v2873_v28  ;;  %v10643_v14 = vcombine.high %v2873_v28, %v2873_v28  ;;  %v2645_v3 = vmax.f32 %v2351_v7, 0.0  ;;  %v16704_v29 = vmax.bf16 %v16702_v58, %v16703_v62  ;;  %v16711_v4 = vld [vmem:[#allocation17_spill] sm:$0xff] }
 0x2c3   :  { %v10640_v23 = vcombine.low %v2872_v21, %v2872_v21  ;;  %v10641_v42 = vcombine.high %v2872_v21, %v2872_v21  ;;  %v2643_v16 = vmax.f32 %v2343_v54, 0.0  ;;  %v15252_v12 = vld [vmem:[#allocation2 + $0x174] sm:$0xff]  }
 0x2c4   :  { %3298 = vst.msk [vmem:[#allocation2 + $0x18c] sm:$0xf] %vm2882_vm1, %v10642_v45  ;;  %3299 = vst.msk [vmem:[#allocation2 + $0x190] sm:$0xf] %vm2882_vm1, %v10643_v14  ;;  %v2779_v48 = vpack.c.bf16 %v2645_v3, %v2644_v47  ;;  %v15248_v60 = vld [vmem:[#allocation2 + $0x16c] sm:$0xff]   ;;  %v16705_v3 = vld [vmem:[#allocation51_spill] sm:$0xff] }
 0x2c5   :  { %3296 = vst.msk [vmem:[#allocation2 + $0x184] sm:$0xf] %vm2882_vm1, %v10640_v23  ;;  %3297 = vst.msk [vmem:[#allocation2 + $0x188] sm:$0xf] %vm2882_vm1, %v10641_v42  ;;  %v2778_v57 = vpack.c.bf16 %v2643_v16, %v2642_v55  ;;  %v11934_v0 = vpop.f32.mrb[244].mxu0  ;;  %11958 = vmatprep.mubr.msk.bf16.mxu1 %vm3414_vm2, %v15248_v60  ;;  %v15285_v55 = vld [vmem:[#allocation2 + $0xfc] sm:$0xff]  }
 0x2c6   :  { %v2843_v22 = vmax.bf16 %v2779_v48, %v16697_v46  ;;  %v2364_v41 = vadd.f32 %v15221_v10, %v11934_v0  ;;  %v2355_v20 = vpop.f32.mrb[245].mxu0  ;;  %11959 = vmatmul.mubr.msk.bf16.gmra.mrb[12].mxu1 %vm3414_vm2, %v15252_v12  ;;  %v16706_v16 = vld [vmem:[#allocation52_spill] sm:$0xff]  ;;  %v16707_v0 = vld [vmem:[#allocation34_spill] sm:$0xff] }
 0x2c7   :  { %v2842_v9 = vmax.bf16 %v2778_v57, %v16698_v25  ;;  %v2356_v26 = vadd.f32 %v15221_v10, %v2355_v20  ;;  %v11935_v51 = vpop.f32.mrb[246].mxu0  ;;  %12315 = vmatmul.mubr.msk.bf16.gmra.mrb[8].mxu0 %vm3414_vm2, %v15258_v24  ;;  %11964 = vmatprep.mubr.msk.bf16.mxu1 %vm3414_vm2, %v13490_v39  ;;  %v16708_v46 = vld [vmem:[#allocation16_spill] sm:$0xff] }
 0x2c8   :  { %v2875_v32 = vmax.bf16 %v2843_v22, %v16701_v38  ;;  %v2367_v35 = vadd.f32 %v15221_v10, %v11935_v51  ;;  %v2358_v19 = vpop.f32.mrb[247].mxu0  ;;  %12318 = vmatprep.mubr.msk.bf16.mxu0 %vm3414_vm2, %v15264_v13  ;;  %v2648_v7 = vmax.f32 %v2364_v41, 0.0  ;;  %v16709_v22 = vmax.bf16 %v16707_v0, %v16708_v46  ;;  %v16710_v51 = vld [vmem:[#allocation35_spill] sm:$0xff] }
 0x2c9   :  { %v2874_v37 = vmax.bf16 %v2842_v9, %v16704_v29  ;;  %v2359_v30 = vadd.f32 %v15221_v10, %v2358_v19  ;;  %v2646_v21 = vmax.f32 %v2356_v26, 0.0  ;;  %v15297_v26 = vld [vmem:[%s16529_s3 + $0x10] sm:$0xff]   ;;  %v16712_v8 = vmax.bf16 %v16710_v51, %v16711_v4 }
 0x2ca   :  { %v10646_v43 = vcombine.low %v2875_v32, %v2875_v32  ;;  %v10647_v28 = vcombine.high %v2875_v32, %v2875_v32  ;;  %v2649_v27 = vmax.f32 %v2367_v35, 0.0 }
 0x2cb   :  { %v10644_v44 = vcombine.low %v2874_v37, %v2874_v37  ;;  %v10645_v40 = vcombine.high %v2874_v37, %v2874_v37  ;;  %v2647_v54 = vmax.f32 %v2359_v30, 0.0 }
 0x2cc   :  { %3302 = vst.msk [vmem:[#allocation2 + $0x1d4] sm:$0xf] %vm2882_vm1, %v10646_v43  ;;  %3303 = vst.msk [vmem:[#allocation2 + $0x1d8] sm:$0xf] %vm2882_vm1, %v10647_v28  ;;  %v2781_v45 = vpack.c.bf16 %v2649_v27, %v2648_v7 }
 0x2cd   :  { %3300 = vst.msk [vmem:[#allocation2 + $0x1cc] sm:$0xf] %vm2882_vm1, %v10644_v44  ;;  %3301 = vst.msk [vmem:[#allocation2 + $0x1d0] sm:$0xf] %vm2882_vm1, %v10645_v40  ;;  %v2780_v14 = vpack.c.bf16 %v2647_v54, %v2646_v21 }
 0x2ce   :  { %v2845_v39 = vmax.bf16 %v2781_v45, %v16705_v3  ;;  %11965 = vmatmul.mubr.msk.bf16.vlgmr.msra.gmra.mrb[0].mxu1 %vm3414_vm2, %v13491_v52  ;;  %v15312_v52 = vld [vmem:[%s16529_s3 + $0x28] sm:$0xff]  }
 0x2cf   :  { %v2844_v48 = vmax.bf16 %v2780_v14, %v16706_v16  ;;  %11981 = vmatpush3.bf16.msra.mxu1 %v15297_v26  ;;  %12319 = vmatmul.mubr.msk.bf16.gmra.mrb[12].mxu0 %vm3414_vm2, %v15285_v55  ;;  %v16713_v45 = vld [vmem:[#allocation53_spill] sm:$0xff] }
 0x2d0   :  { %v2877_v41 = vmax.bf16 %v2845_v39, %v16709_v22  ;;  %11998 = vmatprep.subr.bf16.mxu1 %v15076_v6  ;;  %v16717_v22 = vld [vmem:[#allocation54_spill] sm:$0xff] }
 0x2d1   :  { %v2876_v38 = vmax.bf16 %v2844_v48, %v16712_v8  ;;  %v16714_v48 = vld [vmem:[#allocation36_spill] sm:$0xff] }
 0x2d2   :  { %v10650_v35 = vcombine.low %v2877_v41, %v2877_v41  ;;  %v10651_v19 = vcombine.high %v2877_v41, %v2877_v41 }
 0x2d3   :  { %v4506_v29 = vld [vmem:[#allocation2 + $0x1d4] sm:$0xf]  ;;  %v10648_v37 = vcombine.low %v2876_v38, %v2876_v38  ;;  %v10649_v30 = vcombine.high %v2876_v38, %v2876_v38 }
 0x2d4   :  { %v4505_v43 = vld [vmem:[#allocation2 + $0x1d0] sm:$0xf]  ;;  %3306 = vst.msk [vmem:[#allocation2 + $0x1ec] sm:$0xf] %vm2882_vm1, %v10650_v35  ;;  %3307 = vst.msk [vmem:[#allocation2 + $0x1f0] sm:$0xf] %vm2882_vm1, %v10651_v19 }
 0x2d5   :  { %v15314_v44 = vcombine.low %v4505_v43, %v4506_v29  ;;  %3304 = vst.msk [vmem:[#allocation2 + $0x1e4] sm:$0xf] %vm2882_vm1, %v10648_v37  ;;  %3305 = vst.msk [vmem:[#allocation2 + $0x1e8] sm:$0xf] %vm2882_vm1, %v10649_v30  ;;  %v13494_v21 = vld [vmem:[#allocation2 + $0x1c8] sm:$0xff]   ;;  %v16719_v35 = vld [vmem:[#allocation19_spill] sm:$0xff] }
 0x2d6   :  { %v15318_v54 = vld [vmem:[#allocation2 + $0x1c8] sm:$0xff]   ;;  %11968 = vmatprep.mubr.msk.bf16.mxu1 %vm3414_vm2, %v13494_v21 }
 0x2d7   :  { %12324 = vmatprep.mubr.msk.bf16.mxu0 %vm3414_vm2, %v15318_v54 }
 0x2d8   :  { %12325 = vmatmul.mubr.msk.bf16.vlgmr.msra.gmra.mrb[0].mxu0 %vm3414_vm2, %v15314_v44 }
 0x2d9   :  { %12341 = vmatpush3.bf16.msra.mxu0 %v15177_v50 }
 0x2da   :  { %12358 = vmatprep.subr.bf16.mxu0 %v15312_v52 }
 0x2eb   :  { %v11938_v47 = vpop.f32.mrb[248].mxu0 }
 0x2ec   :  { %v2380_v23 = vadd.f32 %v15221_v10, %v11938_v47  ;;  %v2371_v42 = vpop.f32.mrb[249].mxu0 }
 0x2ed   :  { %v11939_v57 = vpop.f32.mrb[250].mxu0  ;;  %v2372_v20 = vadd.f32 %v15221_v10, %v2371_v42 }
 0x2ee   :  { %v2383_v25 = vadd.f32 %v15221_v10, %v11939_v57  ;;  %v2374_v9 = vpop.f32.mrb[251].mxu0  ;;  %v2652_v58 = vmax.f32 %v2380_v23, 0.0  ;;  %v13496_v23 = vld [vmem:[#allocation2 + $0x1d0] sm:$0xff]  }
 0x2ef   :  { %v2375_v32 = vadd.f32 %v15221_v10, %v2374_v9  ;;  %v2650_v28 = vmax.f32 %v2372_v20, 0.0  ;;  %v16715_v57 = vld [vmem:[#allocation18_spill] sm:$0xff]  ;;  %11969 = vmatmul.mubr.msk.bf16.gmra.mrb[4].mxu1 %vm3414_vm2, %v13496_v23 }
 0x2f0   :  { %v2653_v62 = vmax.f32 %v2383_v25, 0.0  ;;  %v16716_v0 = vmax.bf16 %v16714_v48, %v16715_v57  ;;  %v16727_v48 = vld [vmem:[#allocation21_spill] sm:$0xff] }
 0x2f1   :  { %v2651_v27 = vmax.f32 %v2375_v32, 0.0  ;;  %v16718_v32 = vld [vmem:[#allocation37_spill] sm:$0xff] }
 0x2f2   :  { %v2783_v7 = vpack.c.bf16 %v2653_v62, %v2652_v58  ;;  %v16720_v19 = vmax.bf16 %v16718_v32, %v16719_v35 }
 0x2f3   :  { %v11942_v40 = vpop.f32.mrb[252].mxu0  ;;  %v2782_v47 = vpack.c.bf16 %v2651_v27, %v2650_v28  ;;  %v13499_v27 = vld [vmem:[#allocation2 + $0x1e8] sm:$0xff]  }
 0x2f4   :  { %v2847_v14 = vmax.bf16 %v2783_v7, %v16713_v45  ;;  %v2396_v3 = vadd.f32 %v15221_v10, %v11942_v40  ;;  %v2387_v39 = vpop.f32.mrb[253].mxu0  ;;  %v15342_v7 = vld [vmem:[#allocation2 + $0x1e0] sm:$0xff]   ;;  %v15348_v45 = vld [vmem:[#allocation2 + $0x1e8] sm:$0xff]  }
 0x2f5   :  { %v2388_v42 = vadd.f32 %v15221_v10, %v2387_v39  ;;  %v11943_v16 = vpop.f32.mrb[254].mxu0  ;;  %v2846_v41 = vmax.bf16 %v2782_v47, %v16717_v22  ;;  %v16721_v40 = vld [vmem:[#allocation55_spill] sm:$0xff]  ;;  %12328 = vmatprep.mubr.msk.bf16.mxu0 %vm3414_vm2, %v15342_v7  ;;  %v16724_v39 = vld [vmem:[#allocation20_spill] sm:$0xff] }
 0x2f6   :  { %v2879_v46 = vmax.bf16 %v2847_v14, %v16716_v0  ;;  %v2656_v20 = vmax.f32 %v2396_v3, 0.0  ;;  %v2399_v25 = vadd.f32 %v15221_v10, %v11943_v16  ;;  %v2390_v9 = vpop.f32.mrb[255].mxu0  ;;  %v16722_v14 = vld [vmem:[#allocation56_spill] sm:$0xff]  ;;  %v16723_v3 = vld [vmem:[#allocation38_spill] sm:$0xff]  ;;  %12329 = vmatmul.mubr.msk.bf16.gmra.mrb[4].mxu0 %vm3414_vm2, %v15348_v45  ;;  %v16726_v16 = vld [vmem:[#allocation39_spill] sm:$0xff] }
 0x2f7   :  { %v2654_v51 = vmax.f32 %v2388_v42, 0.0  ;;  %v2391_v4 = vadd.f32 %v15221_v10, %v2390_v9  ;;  %v2878_v58 = vmax.bf16 %v2846_v41, %v16720_v19  ;;  %v13497_v10 = vld [vmem:[#allocation2 + $0x1e0] sm:$0xff]   ;;  %v16725_v23 = vmax.bf16 %v16723_v3, %v16724_v39  ;;  %v15390_v19 = vld [vmem:[#allocation2 + $0x1cc] sm:$0xff]  }
 0x2f8   :  { %v10654_v8 = vcombine.low %v2879_v46, %v2879_v46  ;;  %v10655_v38 = vcombine.high %v2879_v46, %v2879_v46  ;;  %v2657_v62 = vmax.f32 %v2399_v25, 0.0  ;;  %11972 = vmatprep.mubr.msk.bf16.mxu1 %vm3414_vm2, %v13497_v10  ;;  %v16728_v57 = vmax.bf16 %v16726_v16, %v16727_v48  ;;  %v15364_v25 = vld [vmem:[#allocation2 + $0x1b4] sm:$0xff]   ;;  %v15427_v10 = vld [vmem:[#allocation2 + $0x15c] sm:$0xff]   ;;  %v15459_v3 = vld [vmem:[#allocation2 + $0x1cc] sm:$0xff]  }
 0x2f9   :  { %v2655_v29 = vmax.f32 %v2391_v4, 0.0  ;;  %v10652_v37 = vcombine.low %v2878_v58, %v2878_v58  ;;  %v10653_v30 = vcombine.high %v2878_v58, %v2878_v58  ;;  %11973 = vmatmul.mubr.msk.bf16.gmra.mrb[8].mxu1 %vm3414_vm2, %v13499_v27  ;;  %v15392_v58 = vld [vmem:[#allocation2 + $0x13c] sm:$0xff]   ;;  %v15433_v27 = vld [vmem:[#allocation2 + $0x16c] sm:$0xff]   ;;  %v15478_v39 = vld [vmem:[#allocation2 + $0x1e4] sm:$0xff]  }
 0x2fa   :  { %3310 = vst.msk [vmem:[#allocation2 + $0x204] sm:$0xf] %vm2882_vm1, %v10654_v8  ;;  %3311 = vst.msk [vmem:[#allocation2 + $0x208] sm:$0xf] %vm2882_vm1, %v10655_v38  ;;  %v2785_v43 = vpack.c.bf16 %v2657_v62, %v2656_v20  ;;  %v15380_v38 = vld [vmem:[#allocation2 + $0x1bc] sm:$0xff]   ;;  %v15402_v62 = vld [vmem:[#allocation2 + $0x1d4] sm:$0xff]  }
 0x2fb   :  { %v2784_v28 = vpack.c.bf16 %v2655_v29, %v2654_v51  ;;  %3308 = vst.msk [vmem:[#allocation2 + $0x1fc] sm:$0xf] %vm2882_vm1, %v10652_v37  ;;  %3309 = vst.msk [vmem:[#allocation2 + $0x200] sm:$0xf] %vm2882_vm1, %v10653_v30  ;;  %v15404_v29 = vld [vmem:[#allocation2 + $0x144] sm:$0xff]   ;;  %v15415_v30 = vld [vmem:[#allocation2 + $0x154] sm:$0xff]  }
 0x2fc   :  { %v2849_v21 = vmax.bf16 %v2785_v43, %v16721_v40  ;;  %v15406_v37 = vld [vmem:[#allocation2 + $0x1e4] sm:$0xff]   ;;  %v15425_v43 = vld [vmem:[#allocation2 + $0x1ec] sm:$0xff]   ;;  %v15523_v16 = vld [vmem:[#allocation2 + $0x34] sm:$0xff]  }
 0x2fd   :  { %v2848_v47 = vmax.bf16 %v2784_v28, %v16722_v14  ;;  %v15447_v14 = vld [vmem:[#allocation2 + $0x184] sm:$0xff]   ;;  %v7075_v48 = vld [vmem:[#allocation2 + $0xcc] sm:$0xf] }
 0x2fe   :  { %v2881_v42 = vmax.bf16 %v2849_v21, %v16725_v23  ;;  %v15443_v21 = vld [vmem:[#allocation2 + $0x174] sm:$0xff]  }
 0x2ff   :  { %v2880_v0 = vmax.bf16 %v2848_v47, %v16728_v57  ;;  %v15455_v47 = vld [vmem:[#allocation2 + $0x18c] sm:$0xff]   ;;  %v7074_v57 = vld [vmem:[#allocation2 + $0xc8] sm:$0xf] }
 0x300   :  { %v10658_v46 = vcombine.low %v2881_v42, %v2881_v42  ;;  %v10659_v22 = vcombine.high %v2881_v42, %v2881_v42  ;;  %v15516_v42 = vld [vmem:[#allocation2 + $0x24] sm:$0xff]  }
 0x301   :  { %v10656_v41 = vcombine.low %v2880_v0, %v2880_v0  ;;  %v10657_v20 = vcombine.high %v2880_v0, %v2880_v0  ;;  %v15441_v40 = vld [vmem:[#allocation2 + $0x204] sm:$0xff]   ;;  %v10959_v0 = vcombine.low %v7074_v57, %v7075_v48 }
 0x302   :  { %3314 = vst.msk [vmem:[#allocation2 + $0x21c] sm:$0xf] %vm2882_vm1, %v10658_v46  ;;  %3315 = vst.msk [vmem:[#allocation2 + $0x220] sm:$0xf] %vm2882_vm1, %v10659_v22  ;;  %v13501_v9 = vld [vmem:[#allocation2 + $0x1f8] sm:$0xff]   ;;  %v13503_v4 = vld [vmem:[#allocation2 + $0x200] sm:$0xff]  }
 0x303   :  { %3312 = vst.msk [vmem:[#allocation2 + $0x214] sm:$0xf] %vm2882_vm1, %v10656_v41  ;;  %3313 = vst.msk [vmem:[#allocation2 + $0x218] sm:$0xf] %vm2882_vm1, %v10657_v20  ;;  %v15368_v51 = vld [vmem:[#allocation2 + $0x1f8] sm:$0xff]   ;;  %11976 = vmatprep.mubr.msk.bf16.mxu1 %vm3414_vm2, %v13501_v9  ;;  %v15371_v8 = vld [vmem:[#allocation2 + $0x200] sm:$0xff]  }
 0x304   :  { %12332 = vmatprep.mubr.msk.bf16.mxu0 %vm3414_vm2, %v15368_v51  ;;  %11977 = vmatmul.mubr.msk.bf16.gmra.mrb[12].mxu1 %vm3414_vm2, %v13503_v4  ;;  %v15429_v28 = vld [vmem:[#allocation2 + $0x1fc] sm:$0xff]   ;;  %v15539_v20 = vld [vmem:[#allocation2 + $0x4c] sm:$0xff]   ;;  %v15546_v4 = vld [vmem:[#allocation2 + $0x54] sm:$0xff]  }
 0x305   :  { %12333 = vmatmul.mubr.msk.bf16.gmra.mrb[8].mxu0 %vm3414_vm2, %v15371_v8  ;;  %11982 = vmatprep.mubr.msk.bf16.mxu1 %vm3414_vm2, %v15364_v25  ;;  %v15532_v46 = vld [vmem:[%s16529_s3 + $0x40] sm:$0xff]   ;;  %v13533_v41 = vld [vmem:[#allocation2 + $0xd8] sm:$0xff]   ;;  %v13537_v57 = vld [vmem:[#allocation2 + $0x108] sm:$0xff]  }
 0x306   :  { %v15534_v22 = vld [vmem:[#allocation2 + $0x3c] sm:$0xff]   ;;  %v15551_v48 = vld [vmem:[#allocation2 + $0x64] sm:$0xff]  }
 0x307   :  { %v13534_v9 = vld [vmem:[#allocation2 + $0xe0] sm:$0xff]   ;;  %16729 = vst [vmem:[#allocation22_spill] sm:$0xff] %v15551_v48 }
 0x30a   :  { %v15382_v32 = vld [vmem:[#allocation2 + $0x210] sm:$0xff]   ;;  %v15384_v35 = vld [vmem:[#allocation2 + $0x218] sm:$0xff]  }
 0x30b   :  { %12336 = vmatprep.mubr.msk.bf16.mxu0 %vm3414_vm2, %v15382_v32  ;;  %v15504_v23 = vld [vmem:[#allocation2 + $0x214] sm:$0xff]  }
 0x30c   :  { %11983 = vmatmul.mubr.msk.bf16.vlgmr.msra.gmra.mrb[0].mxu1 %vm3414_vm2, %v15380_v38 }
 0x30d   :  { %11999 = vmatpush3.bf16.msra.mxu1 %v15076_v6  ;;  %12337 = vmatmul.mubr.msk.bf16.gmra.mrb[12].mxu0 %vm3414_vm2, %v15384_v35  ;;  %v15411_v6 = vld [vmem:[%s16529_s3 + $0x30] sm:$0xff]  }
 0x30e   :  { %11986 = vmatprep.mubr.msk.bf16.mxu1 %vm3414_vm2, %v15390_v19  ;;  %12342 = vmatprep.mubr.msk.bf16.mxu0 %vm3414_vm2, %v15392_v58 }
 0x30f   :  { %12016 = vmatprep.subr.bf16.mxu1 %v15177_v50 }
 0x314   :  { %11987 = vmatmul.mubr.msk.bf16.gmra.mrb[4].mxu1 %vm3414_vm2, %v15402_v62 }
 0x315   :  { %12343 = vmatmul.mubr.msk.bf16.vlgmr.msra.gmra.mrb[0].mxu0 %vm3414_vm2, %v15404_v29  ;;  %11990 = vmatprep.mubr.msk.bf16.mxu1 %vm3414_vm2, %v15406_v37 }
 0x316   :  { %12346 = vmatprep.mubr.msk.bf16.mxu0 %vm3414_vm2, %v15415_v30  ;;  %12359 = vmatpush3.bf16.msra.mxu0 %v15312_v52 }
 0x317   :  { %12376 = vmatprep.subr.bf16.mxu0 %v15411_v6 }
 0x31c   :  { %11991 = vmatmul.mubr.msk.bf16.gmra.mrb[8].mxu1 %vm3414_vm2, %v15425_v43 }
 0x31d   :  { %12347 = vmatmul.mubr.msk.bf16.gmra.mrb[4].mxu0 %vm3414_vm2, %v15427_v10  ;;  %11994 = vmatprep.mubr.msk.bf16.mxu1 %vm3414_vm2, %v15429_v28 }
 0x31e   :  { %12350 = vmatprep.mubr.msk.bf16.mxu0 %vm3414_vm2, %v15433_v27 }
 0x324   :  { %11995 = vmatmul.mubr.msk.bf16.gmra.mrb[12].mxu1 %vm3414_vm2, %v15441_v40 }
 0x325   :  { %12351 = vmatmul.mubr.msk.bf16.gmra.mrb[8].mxu0 %vm3414_vm2, %v15443_v21  ;;  %12000 = vmatprep.mubr.msk.bf16.mxu1 %vm3414_vm2, %v15069_v49  ;;  %v15469_v49 = vld [vmem:[#allocation2 + $0x1d4] sm:$0xff]  }
 0x326   :  { %12354 = vmatprep.mubr.msk.bf16.mxu0 %vm3414_vm2, %v15447_v14 }
 0x32c   :  { %12001 = vmatmul.mubr.msk.bf16.vlgmr.msra.gmra.mrb[0].mxu1 %vm3414_vm2, %v15065_v59  ;;  %v15474_v59 = vld [vmem:[%s16529_s3 + $0x38] sm:$0xff]  }
 0x32d   :  { %12017 = vmatpush3.bf16.msra.mxu1 %v15177_v50  ;;  %12355 = vmatmul.mubr.msk.bf16.gmra.mrb[12].mxu0 %vm3414_vm2, %v15455_v47 }
 0x32e   :  { %12004 = vmatprep.mubr.msk.bf16.mxu1 %vm3414_vm2, %v15096_v1  ;;  %12360 = vmatprep.mubr.msk.bf16.mxu0 %vm3414_vm2, %v15459_v3  ;;  %v15488_v1 = vld [vmem:[#allocation2 + $0x1ec] sm:$0xff]  }
 0x32f   :  { %12034 = vmatprep.subr.bf16.mxu1 %v15312_v52 }
 0x334   :  { %12005 = vmatmul.mubr.msk.bf16.gmra.mrb[4].mxu1 %vm3414_vm2, %v15102_v11  ;;  %v15492_v11 = vld [vmem:[#allocation2 + $0x1fc] sm:$0xff]  }
 0x335   :  { %12361 = vmatmul.mubr.msk.bf16.vlgmr.msra.gmra.mrb[0].mxu0 %vm3414_vm2, %v15469_v49  ;;  %12008 = vmatprep.mubr.msk.bf16.mxu1 %vm3414_vm2, %v15120_v61  ;;  %v15500_v61 = vld [vmem:[#allocation2 + $0x204] sm:$0xff]  }
 0x336   :  { %12364 = vmatprep.mubr.msk.bf16.mxu0 %vm3414_vm2, %v15478_v39  ;;  %12377 = vmatpush3.bf16.msra.mxu0 %v15411_v6 }
 0x337   :  { %12394 = vmatprep.subr.bf16.mxu0 %v15474_v59 }
 0x33c   :  { %12009 = vmatmul.mubr.msk.bf16.gmra.mrb[8].mxu1 %vm3414_vm2, %v15126_v33  ;;  %v15508_v33 = vld [vmem:[#allocation2 + $0x1c] sm:$0xff]  }
 0x33d   :  { %12365 = vmatmul.mubr.msk.bf16.gmra.mrb[4].mxu0 %vm3414_vm2, %v15488_v1  ;;  %12012 = vmatprep.mubr.msk.bf16.mxu1 %vm3414_vm2, %v15146_v34  ;;  %v15514_v34 = vld [vmem:[#allocation2 + $0x21c] sm:$0xff]  }
 0x33e   :  { %12368 = vmatprep.mubr.msk.bf16.mxu0 %vm3414_vm2, %v15492_v11 }
 0x344   :  { %12013 = vmatmul.mubr.msk.bf16.gmra.mrb[12].mxu1 %vm3414_vm2, %v15150_v18  ;;  %v13531_v18 = vld [vmem:[#allocation2 + $0xc0] sm:$0xff]  }
 0x345   :  { %12369 = vmatmul.mubr.msk.bf16.gmra.mrb[8].mxu0 %vm3414_vm2, %v15500_v61  ;;  %12018 = vmatprep.mubr.msk.bf16.mxu1 %vm3414_vm2, %v15508_v33 }
 0x346   :  { %12372 = vmatprep.mubr.msk.bf16.mxu0 %vm3414_vm2, %v15504_v23 }
 0x34c   :  { %12019 = vmatmul.mubr.msk.bf16.vlgmr.msra.gmra.mrb[0].mxu1 %vm3414_vm2, %v15516_v42 }
 0x34d   :  { %12035 = vmatpush3.bf16.msra.mxu1 %v15312_v52  ;;  %12373 = vmatmul.mubr.msk.bf16.gmra.mrb[12].mxu0 %vm3414_vm2, %v15514_v34 }
 0x34e   :  { %12022 = vmatprep.mubr.msk.bf16.mxu1 %vm3414_vm2, %v15523_v16  ;;  %12378 = vmatprep.mubr.msk.bf16.mxu0 %vm3414_vm2, %v13531_v18  ;;  %v13535_v18 = vld [vmem:[#allocation2 + $0xf0] sm:$0xff]  }
 0x34f   :  { %12052 = vmatprep.subr.bf16.mxu1 %v15411_v6 }
 0x354   :  { %12023 = vmatmul.mubr.msk.bf16.gmra.mrb[4].mxu1 %vm3414_vm2, %v15534_v22 }
 0x355   :  { %12379 = vmatmul.mubr.msk.bf16.vlgmr.msra.gmra.mrb[0].mxu0 %vm3414_vm2, %v10959_v0  ;;  %12026 = vmatprep.mubr.msk.bf16.mxu1 %vm3414_vm2, %v15539_v20  ;;  %v13536_v0 = vld [vmem:[#allocation2 + $0xf8] sm:$0xff]  }
 0x356   :  { %12382 = vmatprep.mubr.msk.bf16.mxu0 %vm3414_vm2, %v13533_v41  ;;  %12395 = vmatpush3.bf16.msra.mxu0 %v15474_v59  ;;  %v15556_v41 = vld [vmem:[#allocation2 + $0x6c] sm:$0xff]  }
 0x357   :  { %12412 = vmatprep.subr.bf16.mxu0 %v15532_v46 }
 0x35c   :  { %12027 = vmatmul.mubr.msk.bf16.gmra.mrb[8].mxu1 %vm3414_vm2, %v15546_v4 }
 0x35d   :  { %12383 = vmatmul.mubr.msk.bf16.gmra.mrb[4].mxu0 %vm3414_vm2, %v13534_v9  ;;  %12030 = vmatprep.mubr.msk.bf16.mxu1 %vm3414_vm2, %v15551_v48  ;;  %v13538_v9 = vld [vmem:[#allocation2 + $0x110] sm:$0xff]  }
 0x35e   :  { %12386 = vmatprep.mubr.msk.bf16.mxu0 %vm3414_vm2, %v13535_v18  ;;  %v15566_v48 = vld [vmem:[#allocation2 + $0x34] sm:$0xff]   ;;  %v15592_v18 = vld [vmem:[#allocation2 + $0x64] sm:$0xff]  }
 0x35f   :  { %16733 = vst [vmem:[#allocation5_spill] sm:$0xff] %v15592_v18 }
 0x364   :  { %12031 = vmatmul.mubr.msk.bf16.gmra.mrb[12].mxu1 %vm3414_vm2, %v15556_v41 }
 0x365   :  { %12387 = vmatmul.mubr.msk.bf16.gmra.mrb[8].mxu0 %vm3414_vm2, %v13536_v0  ;;  %12036 = vmatprep.mubr.msk.bf16.mxu1 %vm3414_vm2, %v15156_v63  ;;  %v15575_v63 = vld [vmem:[#allocation2 + $0x3c] sm:$0xff]   ;;  %v15602_v0 = vld [vmem:[#allocation2 + $0x6c] sm:$0xff]  }
 0x366   :  { %12390 = vmatprep.mubr.msk.bf16.mxu0 %vm3414_vm2, %v13537_v57  ;;  %16730 = vst [vmem:[#allocation4_spill] sm:$0xff] %v15575_v63  ;;  %v15600_v57 = vld [vmem:[#allocation2 + $0x7c] sm:$0xff]   ;;  %16735 = vst [vmem:[#allocation42_spill] sm:$0xff] %v15602_v0 }
 0x367   :  { %16734 = vst [vmem:[#allocation41_spill] sm:$0xff] %v15600_v57 }
 0x36c   :  { %12037 = vmatmul.mubr.msk.bf16.vlgmr.msra.gmra.mrb[0].mxu1 %vm3414_vm2, %v15183_v15  ;;  %v15579_v15 = vld [vmem:[#allocation2 + $0x4c] sm:$0xff]  }
 0x36d   :  { %12053 = vmatpush3.bf16.msra.mxu1 %v15411_v6  ;;  %12391 = vmatmul.mubr.msk.bf16.gmra.mrb[12].mxu0 %vm3414_vm2, %v13538_v9  ;;  %16731 = vst [vmem:[#allocation40_spill] sm:$0xff] %v15579_v15  ;;  %v15612_v9 = vld [vmem:[#allocation2 + $0x84] sm:$0xff]  }
 0x36e   :  { %12040 = vmatprep.mubr.msk.bf16.mxu1 %vm3414_vm2, %v15193_v53  ;;  %12396 = vmatprep.mubr.msk.bf16.mxu0 %vm3414_vm2, %v15566_v48  ;;  %v15588_v53 = vld [vmem:[#allocation2 + $0x54] sm:$0xff]   ;;  %16736 = vst [vmem:[#allocation24_spill] sm:$0xff] %v15612_v9 }
 0x36f   :  { %12070 = vmatprep.subr.bf16.mxu1 %v15474_v59  ;;  %16732 = vst [vmem:[#allocation23_spill] sm:$0xff] %v15588_v53 }
 0x374   :  { %12041 = vmatmul.mubr.msk.bf16.gmra.mrb[4].mxu1 %vm3414_vm2, %v15226_v36 }
 0x375   :  { %12397 = vmatmul.mubr.msk.bf16.vlgmr.msra.gmra.mrb[0].mxu0 %vm3414_vm2, %v15575_v63  ;;  %12044 = vmatprep.mubr.msk.bf16.mxu1 %vm3414_vm2, %v15232_v56 }
 0x376   :  { %12400 = vmatprep.mubr.msk.bf16.mxu0 %vm3414_vm2, %v15579_v15  ;;  %12413 = vmatpush3.bf16.msra.mxu0 %v15532_v46 }
 0x37c   :  { %12045 = vmatmul.mubr.msk.bf16.gmra.mrb[8].mxu1 %vm3414_vm2, %v15258_v24 }
 0x37d   :  { %12401 = vmatmul.mubr.msk.bf16.gmra.mrb[4].mxu0 %vm3414_vm2, %v15588_v53  ;;  %12048 = vmatprep.mubr.msk.bf16.mxu1 %vm3414_vm2, %v15264_v13 }
 0x37e   :  { %12404 = vmatprep.mubr.msk.bf16.mxu0 %vm3414_vm2, %v15592_v18  ;;  %v15616_v18 = vld [vmem:[#allocation2 + $0xc4] sm:$0xff]  }
 0x37f   :  { %16737 = vst [vmem:[#allocation6_spill] sm:$0xff] %v15616_v18 }
 0x384   :  { %12049 = vmatmul.mubr.msk.bf16.gmra.mrb[12].mxu1 %vm3414_vm2, %v15285_v55 }
 0x385   :  { %12405 = vmatmul.mubr.msk.bf16.gmra.mrb[8].mxu0 %vm3414_vm2, %v15602_v0  ;;  %12054 = vmatprep.mubr.msk.bf16.mxu1 %vm3414_vm2, %v15318_v54  ;;  %v15626_v54 = vld [vmem:[#allocation2 + $0xcc] sm:$0xff]  }
 0x386   :  { %12408 = vmatprep.mubr.msk.bf16.mxu0 %vm3414_vm2, %v15600_v57  ;;  %16738 = vst [vmem:[#allocation25_spill] sm:$0xff] %v15626_v54 }
 0x38c   :  { %12055 = vmatmul.mubr.msk.bf16.vlgmr.msra.gmra.mrb[0].mxu1 %vm3414_vm2, %v15314_v44  ;;  %v15630_v44 = vld [vmem:[#allocation2 + $0xdc] sm:$0xff]  }
 0x38d   :  { %12071 = vmatpush3.bf16.msra.mxu1 %v15474_v59  ;;  %12409 = vmatmul.mubr.msk.bf16.gmra.mrb[12].mxu0 %vm3414_vm2, %v15612_v9  ;;  %16739 = vst [vmem:[#allocation7_spill] sm:$0xff] %v15630_v44  ;;  %v15876_v9 = vld [vmem:[#allocation2 + $0x70] sm:$0xff]  }
 0x38e   :  { %12058 = vmatprep.mubr.msk.bf16.mxu1 %vm3414_vm2, %v15342_v7  ;;  %12414 = vmatprep.mubr.msk.bf16.mxu0 %vm3414_vm2, %v15616_v18  ;;  %v15638_v7 = vld [vmem:[#allocation2 + $0xe4] sm:$0xff]   ;;  %v15642_v18 = vld [vmem:[#allocation2 + $0xf4] sm:$0xff]  }
 0x38f   :  { %12088 = vmatprep.subr.bf16.mxu1 %v15532_v46  ;;  %16740 = vst [vmem:[#allocation43_spill] sm:$0xff] %v15638_v7  ;;  %16741 = vst [vmem:[#allocation44_spill] sm:$0xff] %v15642_v18 }
 0x394   :  { %12059 = vmatmul.mubr.msk.bf16.gmra.mrb[4].mxu1 %vm3414_vm2, %v15348_v45  ;;  %v15650_v45 = vld [vmem:[#allocation2 + $0x10c] sm:$0xff]  }
 0x395   :  { %12415 = vmatmul.mubr.msk.bf16.vlgmr.msra.gmra.mrb[0].mxu0 %vm3414_vm2, %v15626_v54  ;;  %12062 = vmatprep.mubr.msk.bf16.mxu1 %vm3414_vm2, %v15368_v51  ;;  %16742 = vst [vmem:[#allocation26_spill] sm:$0xff] %v15650_v45  ;;  %v15652_v51 = vld [vmem:[#allocation2 + $0xfc] sm:$0xff]  }
 0x396   :  { %12418 = vmatprep.mubr.msk.bf16.mxu0 %vm3414_vm2, %v15630_v44  ;;  %16743 = vst [vmem:[#allocation8_spill] sm:$0xff] %v15652_v51 }
 0x39c   :  { %12063 = vmatmul.mubr.msk.bf16.gmra.mrb[8].mxu1 %vm3414_vm2, %v15371_v8  ;;  %v15662_v8 = vld [vmem:[#allocation2 + $0x114] sm:$0xff]  }
 0x39d   :  { %12419 = vmatmul.mubr.msk.bf16.gmra.mrb[4].mxu0 %vm3414_vm2, %v15638_v7  ;;  %12066 = vmatprep.mubr.msk.bf16.mxu1 %vm3414_vm2, %v15382_v32  ;;  %16744 = vst [vmem:[#allocation27_spill] sm:$0xff] %v15662_v8  ;;  %v15674_v32 = vld [vmem:[%s16529_s3 + $0x8] sm:$0xff]  }
 0x39e   :  { %12422 = vmatprep.mubr.msk.bf16.mxu0 %vm3414_vm2, %v15642_v18 }
 0x3a4   :  { %12067 = vmatmul.mubr.msk.bf16.gmra.mrb[12].mxu1 %vm3414_vm2, %v15384_v35  ;;  %v15697_v35 = vld [vmem:[%s16529_s3] sm:$0xff]  }
 0x3a5   :  { %12423 = vmatmul.mubr.msk.bf16.gmra.mrb[8].mxu0 %vm3414_vm2, %v15652_v51  ;;  %12072 = vmatprep.mubr.msk.bf16.mxu1 %vm3414_vm2, %v15392_v58 }
 0x3a6   :  { %12426 = vmatprep.mubr.msk.bf16.mxu0 %vm3414_vm2, %v15650_v45 }
 0x3ac   :  { %12073 = vmatmul.mubr.msk.bf16.vlgmr.msra.gmra.mrb[0].mxu1 %vm3414_vm2, %v15404_v29 }
 0x3ad   :  { %12089 = vmatpush3.bf16.msra.mxu1 %v15532_v46  ;;  %12427 = vmatmul.mubr.msk.bf16.gmra.mrb[12].mxu0 %vm3414_vm2, %v15662_v8  ;;  %v15800_v8 = vld [vmem:[#allocation2 + $0xc4] sm:$0xff]  }
 0x3ae   :  { %12076 = vmatprep.mubr.msk.bf16.mxu1 %vm3414_vm2, %v15415_v30  ;;  %12106 = vmatprep.subr.bf16.mxu1 %v15674_v32 }
 0x3b4   :  { %12077 = vmatmul.mubr.msk.bf16.gmra.mrb[4].mxu1 %vm3414_vm2, %v15427_v10 }
 0x3b5   :  { %12080 = vmatprep.mubr.msk.bf16.mxu1 %vm3414_vm2, %v15433_v27 }
 0x3bc   :  { %12081 = vmatmul.mubr.msk.bf16.gmra.mrb[8].mxu1 %vm3414_vm2, %v15443_v21 }
 0x3bd   :  { %12084 = vmatprep.mubr.msk.bf16.mxu1 %vm3414_vm2, %v15447_v14 }
 0x3c4   :  { %12085 = vmatmul.mubr.msk.bf16.gmra.mrb[12].mxu1 %vm3414_vm2, %v15455_v47 }
 0x3c5   :  { %12090 = vmatprep.mubr.msk.bf16.mxu1 %vm3414_vm2, %v15459_v3 }
 0x3cc   :  { %12091 = vmatmul.mubr.msk.bf16.vlgmr.msra.gmra.mrb[0].mxu1 %vm3414_vm2, %v15469_v49 }
 0x3cd   :  { %12107 = vmatpush3.bf16.msra.mxu1 %v15674_v32  ;;  %12094 = vmatprep.mubr.msk.bf16.mxu1 %vm3414_vm2, %v15478_v39 }
 0x3ce   :  { %12124 = vmatprep.subr.bf16.mxu1 %v15697_v35 }
 0x3d4   :  { %12095 = vmatmul.mubr.msk.bf16.gmra.mrb[4].mxu1 %vm3414_vm2, %v15488_v1 }
 0x3d5   :  { %12098 = vmatprep.mubr.msk.bf16.mxu1 %vm3414_vm2, %v15492_v11 }
 0x3dc   :  { %12099 = vmatmul.mubr.msk.bf16.gmra.mrb[8].mxu1 %vm3414_vm2, %v15500_v61 }
 0x3dd   :  { %12102 = vmatprep.mubr.msk.bf16.mxu1 %vm3414_vm2, %v15504_v23 }
 0x3e4   :  { %12103 = vmatmul.mubr.msk.bf16.gmra.mrb[12].mxu1 %vm3414_vm2, %v15514_v34 }
 0x3e5   :  { %12108 = vmatprep.mubr.msk.bf16.mxu1 %vm3414_vm2, %v15364_v25  ;;  %v13657_v25 = vld [vmem:[#allocation2 + $0x124] sm:$0xff]  }
 0x3ec   :  { %12109 = vmatmul.mubr.msk.bf16.vlgmr.msra.gmra.mrb[16].mxu1 %vm3414_vm2, %v15380_v38  ;;  %v13658_v38 = vld [vmem:[#allocation2 + $0x12c] sm:$0xff]  }
 0x3ed   :  { %12125 = vmatpush3.bf16.msra.mxu1 %v15697_v35  ;;  %12112 = vmatprep.mubr.msk.bf16.mxu1 %vm3414_vm2, %v15390_v19  ;;  %v15736_v19 = vld [vmem:[%s16529_s3 + $0x18] sm:$0xff]  }
 0x3ee   :  { %12142 = vmatprep.subr.bf16.mxu1 %v15297_v26 }
 0x3f4   :  { %12113 = vmatmul.mubr.msk.bf16.gmra.mrb[20].mxu1 %vm3414_vm2, %v15402_v62  ;;  %v13557_v62 = vld [vmem:[#allocation2 + $0x140] sm:$0xff]  }
 0x3f5   :  { %12116 = vmatprep.mubr.msk.bf16.mxu1 %vm3414_vm2, %v15406_v37  ;;  %v16745_v37 = vld [vmem:[#allocation22_spill] sm:$0xff] }
 0x3fc   :  { %12117 = vmatmul.mubr.msk.bf16.gmra.mrb[24].mxu1 %vm3414_vm2, %v15425_v43  ;;  %v15782_v43 = vld [vmem:[#allocation2 + $0xac] sm:$0xff]  }
 0x3fd   :  { %12120 = vmatprep.mubr.msk.bf16.mxu1 %vm3414_vm2, %v15429_v28  ;;  %v15789_v28 = vld [vmem:[%s16530_s4] ss:$0 sm:$0xff] }
 0x404   :  { %12121 = vmatmul.mubr.msk.bf16.gmra.mrb[28].mxu1 %vm3414_vm2, %v15441_v40 }
 0x405   :  { %12126 = vmatprep.mubr.msk.bf16.mxu1 %vm3414_vm2, %v13657_v25 }
 0x40c   :  { %12127 = vmatmul.mubr.msk.bf16.vlgmr.msra.gmra.mrb[16].mxu1 %vm3414_vm2, %v13658_v38 }
 0x40d   :  { %12143 = vmatpush3.bf16.msra.mxu1 %v15297_v26  ;;  %12130 = vmatprep.mubr.msk.bf16.mxu1 %vm3414_vm2, %v15172_v5  ;;  %v13555_v5 = vld [vmem:[#allocation2 + $0x128] sm:$0xff]   ;;  %v13556_v26 = vld [vmem:[#allocation2 + $0x130] sm:$0xff]  }
 0x40e   :  { %12160 = vmatprep.subr.bf16.mxu1 %v15736_v19 }
 0x414   :  { %12131 = vmatmul.mubr.msk.bf16.gmra.mrb[20].mxu1 %vm3414_vm2, %v15181_v2  ;;  %v13558_v2 = vld [vmem:[#allocation2 + $0x148] sm:$0xff]  }
 0x415   :  { %12134 = vmatprep.mubr.msk.bf16.mxu1 %vm3414_vm2, %v15211_v31  ;;  %v13559_v31 = vld [vmem:[#allocation2 + $0x158] sm:$0xff]  }
 0x41c   :  { %12135 = vmatmul.mubr.msk.bf16.gmra.mrb[24].mxu1 %vm3414_vm2, %v15215_v17  ;;  %v13560_v17 = vld [vmem:[#allocation2 + $0x160] sm:$0xff]  }
 0x41d   :  { %12138 = vmatprep.mubr.msk.bf16.mxu1 %vm3414_vm2, %v15248_v60  ;;  %v13561_v60 = vld [vmem:[#allocation2 + $0x170] sm:$0xff]  }
 0x424   :  { %12139 = vmatmul.mubr.msk.bf16.gmra.mrb[28].mxu1 %vm3414_vm2, %v15252_v12  ;;  %v13562_v12 = vld [vmem:[#allocation2 + $0x178] sm:$0xff]  }
 0x425   :  { %12144 = vmatprep.mubr.msk.bf16.mxu1 %vm3414_vm2, %v13555_v5 }
 0x42c   :  { %12145 = vmatmul.mubr.msk.bf16.vlgmr.msra.gmra.mrb[16].mxu1 %vm3414_vm2, %v13556_v26 }
 0x42d   :  { %12161 = vmatpush3.bf16.msra.mxu1 %v15736_v19  ;;  %12148 = vmatprep.mubr.msk.bf16.mxu1 %vm3414_vm2, %v13557_v62 }
 0x42e   :  { %12178 = vmatprep.subr.bf16.mxu1 %v15177_v50  ;;  %v15766_v50 = vld [vmem:[%s16529_s3 + $0x20] sm:$0xff]  }
 0x434   :  { %12149 = vmatmul.mubr.msk.bf16.gmra.mrb[20].mxu1 %vm3414_vm2, %v13558_v2 }
 0x435   :  { %12152 = vmatprep.mubr.msk.bf16.mxu1 %vm3414_vm2, %v13559_v31 }
 0x43c   :  { %12153 = vmatmul.mubr.msk.bf16.gmra.mrb[24].mxu1 %vm3414_vm2, %v13560_v17  ;;  %v15795_v17 = vld [vmem:[#allocation2 + $0xb4] sm:$0xff]  }
 0x43d   :  { %12156 = vmatprep.mubr.msk.bf16.mxu1 %vm3414_vm2, %v13561_v60 }
 0x444   :  { %12157 = vmatmul.mubr.msk.bf16.gmra.mrb[28].mxu1 %vm3414_vm2, %v13562_v12 }
 0x445   :  { %12162 = vmatprep.mubr.msk.bf16.mxu1 %vm3414_vm2, %v15508_v33 }
 0x44c   :  { %12163 = vmatmul.mubr.msk.bf16.vlgmr.msra.gmra.mrb[16].mxu1 %vm3414_vm2, %v15516_v42 }
 0x44d   :  { %12179 = vmatpush3.bf16.msra.mxu1 %v15766_v50  ;;  %12166 = vmatprep.mubr.msk.bf16.mxu1 %vm3414_vm2, %v15523_v16 }
 0x44e   :  { %12196 = vmatprep.subr.bf16.mxu1 %v15312_v52 }
 0x454   :  { %12167 = vmatmul.mubr.msk.bf16.gmra.mrb[20].mxu1 %vm3414_vm2, %v15534_v22 }
 0x455   :  { %12170 = vmatprep.mubr.msk.bf16.mxu1 %vm3414_vm2, %v15539_v20 }
 0x45c   :  { %12171 = vmatmul.mubr.msk.bf16.gmra.mrb[24].mxu1 %vm3414_vm2, %v15546_v4 }
 0x45d   :  { %12174 = vmatprep.mubr.msk.bf16.mxu1 %vm3414_vm2, %v16745_v37 }
 0x464   :  { %12175 = vmatmul.mubr.msk.bf16.gmra.mrb[28].mxu1 %vm3414_vm2, %v15556_v41 }
 0x465   :  { %12180 = vmatprep.mubr.msk.bf16.mxu1 %vm3414_vm2, %v15782_v43 }
 0x468   :  { %v12416_v40 = vpop.f32.mrb[0].mxu0 }
 0x469   :  { %v7655_v25 = vadd.f32 %v12416_v40, %v15789_v28  ;;  %v7574_v38 = vpop.f32.mrb[1].mxu0 }
 0x46a   :  { %v7653_v5 = vadd.f32 %v15789_v28, %v7574_v38  ;;  %v12417_v26 = vpop.f32.mrb[2].mxu0 }
 0x46b   :  { %v7656_v62 = vadd.f32 %v12417_v26, %v15789_v28  ;;  %v7577_v2 = vpop.f32.mrb[3].mxu0  ;;  %v7671_v60 = vmax.f32 %v7655_v25, 0.0 }
 0x46c   :  { %v7654_v31 = vadd.f32 %v15789_v28, %v7577_v2  ;;  %12181 = vmatmul.mubr.msk.bf16.vlgmr.msra.gmra.mrb[16].mxu1 %vm3414_vm2, %v15795_v17  ;;  %v7669_v40 = vmax.f32 %v7653_v5, 0.0 }
 0x46d   :  { %v7672_v12 = vmax.f32 %v7656_v62, 0.0  ;;  %12197 = vmatpush3.bf16.msra.mxu1 %v15312_v52  ;;  %12184 = vmatprep.mubr.msk.bf16.mxu1 %vm3414_vm2, %v15800_v8 }
 0x46e   :  { %v7670_v38 = vmax.f32 %v7654_v31, 0.0  ;;  %12214 = vmatprep.subr.bf16.mxu1 %v15411_v6 }
 0x46f   :  { %v15805_v26 = vpack.c.bf16 %v7672_v12, %v7671_v60 }
 0x470   :  { %v15807_v2 = vpack.c.bf16 %v7670_v38, %v7669_v40  ;;  %v12420_v45 = vpop.f32.mrb[4].mxu0 }
 0x471   :  { %v7659_v51 = vadd.f32 %v12420_v45, %v15789_v28  ;;  %v7590_v25 = vpop.f32.mrb[5].mxu0 }
 0x472   :  { %v7657_v62 = vadd.f32 %v15789_v28, %v7590_v25  ;;  %v12421_v52 = vpop.f32.mrb[6].mxu0 }
 0x473   :  { %v7660_v18 = vadd.f32 %v12421_v52, %v15789_v28  ;;  %v7593_v7 = vpop.f32.mrb[7].mxu0  ;;  %v7675_v5 = vmax.f32 %v7659_v51, 0.0 }
 0x474   :  { %v7658_v44 = vadd.f32 %v15789_v28, %v7593_v7  ;;  %12185 = vmatmul.mubr.msk.bf16.gmra.mrb[20].mxu1 %vm3414_vm2, %v15226_v36  ;;  %v7673_v60 = vmax.f32 %v7657_v62, 0.0 }
 0x475   :  { %v7676_v31 = vmax.f32 %v7660_v18, 0.0  ;;  %12188 = vmatprep.mubr.msk.bf16.mxu1 %vm3414_vm2, %v15232_v56 }
 0x476   :  { %v7674_v12 = vmax.f32 %v7658_v44, 0.0 }
 0x477   :  { %v15817_v45 = vpack.c.bf16 %v7676_v31, %v7675_v5 }
 0x478   :  { %v15819_v40 = vpack.c.bf16 %v7674_v12, %v7673_v60  ;;  %v12424_v38 = vpop.f32.mrb[8].mxu0 }
 0x479   :  { %16746 = vst [vmem:[#allocation9_spill] sm:$0xff] %v15817_v45  ;;  %v7663_v25 = vadd.f32 %v12424_v38, %v15789_v28  ;;  %v7606_v52 = vpop.f32.mrb[9].mxu0 }
 0x47a   :  { %16747 = vst [vmem:[#allocation45_spill] sm:$0xff] %v15819_v40  ;;  %v7661_v7 = vadd.f32 %v15789_v28, %v7606_v52  ;;  %v12425_v54 = vpop.f32.mrb[10].mxu0 }
 0x47b   :  { %v7664_v36 = vadd.f32 %v12425_v54, %v15789_v28  ;;  %v7609_v51 = vpop.f32.mrb[11].mxu0  ;;  %v7679_v56 = vmax.f32 %v7663_v25, 0.0 }
 0x47c   :  { %v7662_v18 = vadd.f32 %v15789_v28, %v7609_v51  ;;  %12189 = vmatmul.mubr.msk.bf16.gmra.mrb[24].mxu1 %vm3414_vm2, %v15258_v24  ;;  %v7677_v62 = vmax.f32 %v7661_v7, 0.0 }
 0x47d   :  { %v7680_v44 = vmax.f32 %v7664_v36, 0.0  ;;  %12192 = vmatprep.mubr.msk.bf16.mxu1 %vm3414_vm2, %v15264_v13  ;;  %v15836_v36 = vld [vmem:[#allocation2 + $0x20] sm:$0xff]  }
 0x47e   :  { %v7678_v5 = vmax.f32 %v7662_v18, 0.0 }
 0x47f   :  { %v15829_v31 = vpack.c.bf16 %v7680_v44, %v7679_v56 }
 0x480   :  { %v15831_v60 = vpack.c.bf16 %v7678_v5, %v7677_v62  ;;  %v12428_v12 = vpop.f32.mrb[12].mxu0 }
 0x481   :  { %16748 = vst [vmem:[#allocation46_spill] sm:$0xff] %v15829_v31  ;;  %v7667_v54 = vadd.f32 %v12428_v12, %v15789_v28  ;;  %v7622_v38 = vpop.f32.mrb[13].mxu0  ;;  %v15847_v12 = vld [vmem:[#allocation2 + $0x28] sm:$0xff]  }
 0x482   :  { %16749 = vst [vmem:[#allocation28_spill] sm:$0xff] %v15831_v60  ;;  %v7665_v52 = vadd.f32 %v15789_v28, %v7622_v38  ;;  %v12429_v51 = vpop.f32.mrb[14].mxu0  ;;  %v15849_v38 = vld [vmem:[#allocation2 + $0x38] sm:$0xff]  }
 0x483   :  { %v7668_v24 = vadd.f32 %v12429_v51, %v15789_v28  ;;  %v7625_v25 = vpop.f32.mrb[15].mxu0  ;;  %v7683_v7 = vmax.f32 %v7667_v54, 0.0  ;;  %v15859_v54 = vld [vmem:[#allocation2 + $0x50] sm:$0xff]   ;;  %v15867_v51 = vld [vmem:[#allocation2 + $0x68] sm:$0xff]  }
 0x484   :  { %v7666_v13 = vadd.f32 %v15789_v28, %v7625_v25  ;;  %12193 = vmatmul.mubr.msk.bf16.gmra.mrb[28].mxu1 %vm3414_vm2, %v15285_v55  ;;  %v7681_v56 = vmax.f32 %v7665_v52, 0.0  ;;  %v15857_v55 = vld [vmem:[#allocation2 + $0x40] sm:$0xff]   ;;  %v15865_v52 = vld [vmem:[#allocation2 + $0x58] sm:$0xff]  }
 0x485   :  { %v7684_v18 = vmax.f32 %v7668_v24, 0.0  ;;  %12198 = vmatprep.mubr.msk.bf16.mxu1 %vm3414_vm2, %v15836_v36 }
 0x486   :  { %v7682_v44 = vmax.f32 %v7666_v13, 0.0 }
 0x487   :  { %v15843_v62 = vpack.c.bf16 %v7684_v18, %v7683_v7 }
 0x488   :  { %v15845_v5 = vpack.c.bf16 %v7682_v44, %v7681_v56 }
 0x489   :  { %16750 = vst [vmem:[#allocation10_spill] sm:$0xff] %v15843_v62 }
 0x48a   :  { %16751 = vst [vmem:[#allocation29_spill] sm:$0xff] %v15845_v5 }
 0x48c   :  { %12199 = vmatmul.mubr.msk.bf16.vlgmr.msra.gmra.mrb[16].mxu1 %vm3414_vm2, %v15847_v12 }
 0x48d   :  { %12215 = vmatpush3.bf16.msra.mxu1 %v15411_v6  ;;  %12202 = vmatprep.mubr.msk.bf16.mxu1 %vm3414_vm2, %v15849_v38 }
 0x48e   :  { %12232 = vmatprep.subr.bf16.mxu1 %v15474_v59 }
 0x494   :  { %12203 = vmatmul.mubr.msk.bf16.gmra.mrb[20].mxu1 %vm3414_vm2, %v15857_v55 }
 0x495   :  { %12206 = vmatprep.mubr.msk.bf16.mxu1 %vm3414_vm2, %v15859_v54 }
 0x49c   :  { %12207 = vmatmul.mubr.msk.bf16.gmra.mrb[24].mxu1 %vm3414_vm2, %v15865_v52 }
 0x49d   :  { %12210 = vmatprep.mubr.msk.bf16.mxu1 %vm3414_vm2, %v15867_v51 }
 0x49f   :  { %v12092_v24 = vpop.f32.mrb[0].mxu1 }
 0x4a0   :  { %v5111_v25 = vadd.f32 %v12092_v24, %v15789_v28  ;;  %v5023_v13 = vpop.f32.mrb[1].mxu1 }
 0x4a1   :  { %v5109_v7 = vadd.f32 %v15789_v28, %v5023_v13  ;;  %v12093_v18 = vpop.f32.mrb[2].mxu1 }
 0x4a2   :  { %v5112_v56 = vadd.f32 %v12093_v18, %v15789_v28  ;;  %v5026_v44 = vpop.f32.mrb[3].mxu1  ;;  %v5127_v62 = vmax.f32 %v5111_v25, 0.0 }
 0x4a3   :  { %v5110_v5 = vadd.f32 %v15789_v28, %v5026_v44  ;;  %v5125_v0 = vmax.f32 %v5109_v7, 0.0 }
 0x4a4   :  { %v5128_v57 = vmax.f32 %v5112_v56, 0.0  ;;  %12211 = vmatmul.mubr.msk.bf16.gmra.mrb[28].mxu1 %vm3414_vm2, %v15876_v9 }
 0x4a5   :  { %v5126_v60 = vmax.f32 %v5110_v5, 0.0  ;;  %12216 = vmatprep.mubr.msk.bf16.mxu1 %vm3414_vm2, %v15392_v58 }
 0x4a6   :  { %v15883_v24 = vpack.c.bf16 %v5128_v57, %v5127_v62 }
 0x4a7   :  { %v15885_v13 = vpack.c.bf16 %v5126_v60, %v5125_v0  ;;  %v12096_v18 = vpop.f32.mrb[4].mxu1 }
 0x4a8   :  { %v5115_v31 = vadd.f32 %v12096_v18, %v15789_v28  ;;  %v5039_v53 = vpop.f32.mrb[5].mxu1 }
 0x4a9   :  { %v5113_v44 = vadd.f32 %v15789_v28, %v5039_v53  ;;  %v12097_v25 = vpop.f32.mrb[6].mxu1 }
 0x4aa   :  { %v5116_v56 = vadd.f32 %v12097_v25, %v15789_v28  ;;  %v5042_v40 = vpop.f32.mrb[7].mxu1  ;;  %v5131_v5 = vmax.f32 %v5115_v31, 0.0 }
 0x4ab   :  { %v5114_v7 = vadd.f32 %v15789_v28, %v5042_v40  ;;  %v5129_v57 = vmax.f32 %v5113_v44, 0.0 }
 0x4ac   :  { %v5132_v45 = vmax.f32 %v5116_v56, 0.0  ;;  %12217 = vmatmul.mubr.msk.bf16.vlgmr.msra.gmra.mrb[16].mxu1 %vm3414_vm2, %v15404_v29 }
 0x4ad   :  { %v5130_v0 = vmax.f32 %v5114_v7, 0.0  ;;  %12233 = vmatpush3.bf16.msra.mxu1 %v15474_v59  ;;  %12220 = vmatprep.mubr.msk.bf16.mxu1 %vm3414_vm2, %v15415_v30 }
 0x4ae   :  { %v15896_v60 = vpack.c.bf16 %v5132_v45, %v5131_v5  ;;  %12250 = vmatprep.subr.bf16.mxu1 %v15532_v46 }
 0x4af   :  { %v15899_v53 = vpack.c.bf16 %v5130_v0, %v5129_v57  ;;  %v12100_v62 = vpop.f32.mrb[8].mxu1 }
 0x4b0   :  { %16752 = vst [vmem:[#allocation11_spill] sm:$0xff] %v15896_v60  ;;  %v5119_v40 = vadd.f32 %v12100_v62, %v15789_v28  ;;  %v5055_v31 = vpop.f32.mrb[9].mxu1 }
 0x4b1   :  { %16753 = vst [vmem:[#allocation47_spill] sm:$0xff] %v15899_v53  ;;  %v5117_v18 = vadd.f32 %v15789_v28, %v5055_v31  ;;  %v12101_v25 = vpop.f32.mrb[10].mxu1 }
 0x4b2   :  { %v5120_v44 = vadd.f32 %v12101_v25, %v15789_v28  ;;  %v5058_v56 = vpop.f32.mrb[11].mxu1  ;;  %v5135_v15 = vmax.f32 %v5119_v40, 0.0 }
 0x4b3   :  { %v5118_v7 = vadd.f32 %v15789_v28, %v5058_v56  ;;  %v5133_v45 = vmax.f32 %v5117_v18, 0.0 }
 0x4b4   :  { %v5136_v63 = vmax.f32 %v5120_v44, 0.0  ;;  %12221 = vmatmul.mubr.msk.bf16.gmra.mrb[20].mxu1 %vm3414_vm2, %v15427_v10 }
 0x4b5   :  { %v5134_v5 = vmax.f32 %v5118_v7, 0.0  ;;  %12224 = vmatprep.mubr.msk.bf16.mxu1 %vm3414_vm2, %v15433_v27 }
 0x4b6   :  { %v15909_v57 = vpack.c.bf16 %v5136_v63, %v5135_v15 }
 0x4b7   :  { %v15911_v0 = vpack.c.bf16 %v5134_v5, %v5133_v45  ;;  %v12104_v62 = vpop.f32.mrb[12].mxu1 }
 0x4b8   :  { %v5123_v31 = vadd.f32 %v12104_v62, %v15789_v28  ;;  %v5071_v25 = vpop.f32.mrb[13].mxu1  ;;  %v15951_v62 = vld [vmem:[#allocation2 + $0x158] sm:$0xff]  }
 0x4b9   :  { %v5121_v56 = vadd.f32 %v15789_v28, %v5071_v25  ;;  %v12105_v40 = vpop.f32.mrb[14].mxu1  ;;  %v15961_v25 = vld [vmem:[#allocation2 + $0x170] sm:$0xff]  }
 0x4ba   :  { %v5124_v44 = vadd.f32 %v12105_v40, %v15789_v28  ;;  %v5074_v53 = vpop.f32.mrb[15].mxu1  ;;  %v5139_v7 = vmax.f32 %v5123_v31, 0.0  ;;  %v15959_v31 = vld [vmem:[#allocation2 + $0x160] sm:$0xff]   ;;  %v15969_v40 = vld [vmem:[#allocation2 + $0x188] sm:$0xff]  }
 0x4bb   :  { %v5122_v18 = vadd.f32 %v15789_v28, %v5074_v53  ;;  %v5137_v63 = vmax.f32 %v5121_v56, 0.0  ;;  %v15949_v53 = vld [vmem:[#allocation2 + $0x148] sm:$0xff]   ;;  %v15967_v56 = vld [vmem:[#allocation2 + $0x178] sm:$0xff]  }
 0x4bc   :  { %v5140_v60 = vmax.f32 %v5124_v44, 0.0  ;;  %12225 = vmatmul.mubr.msk.bf16.gmra.mrb[24].mxu1 %vm3414_vm2, %v15443_v21  ;;  %v13664_v44 = vld [vmem:[%s16529_s3 + $0x10] sm:$0xff]  }
 0x4bd   :  { %v5138_v15 = vmax.f32 %v5122_v18, 0.0  ;;  %12228 = vmatprep.mubr.msk.bf16.mxu1 %vm3414_vm2, %v15447_v14  ;;  %v13665_v18 = vld [vmem:[#allocation2 + $0xcc] sm:$0xff]  }
 0x4be   :  { %v15921_v45 = vpack.c.bf16 %v5140_v60, %v5139_v7  ;;  %v15943_v60 = vld [vmem:[#allocation2 + $0x140] sm:$0xff]  }
 0x4bf   :  { %v15923_v5 = vpack.c.bf16 %v5138_v15, %v5137_v63  ;;  %v13666_v7 = vld [vmem:[#allocation2 + $0xdc] sm:$0xff]  }
 0x4c0   :  { %v16757_v63 = vld [vmem:[#allocation47_spill] sm:$0xff] }
 0x4c4   :  { %12229 = vmatmul.mubr.msk.bf16.gmra.mrb[28].mxu1 %vm3414_vm2, %v15455_v47 }
 0x4c5   :  { %12234 = vmatprep.mubr.msk.bf16.mxu1 %vm3414_vm2, %v15459_v3 }
 0x4cc   :  { %12235 = vmatmul.mubr.msk.bf16.vlgmr.msra.gmra.mrb[16].mxu1 %vm3414_vm2, %v15469_v49 }
 0x4cd   :  { %12251 = vmatpush3.bf16.msra.mxu1 %v15532_v46  ;;  %12238 = vmatprep.mubr.msk.bf16.mxu1 %vm3414_vm2, %v15478_v39 }
 0x4ce   :  { %12430 = vmatprep.subr.bf16.mxu1 %v15674_v32 }
 0x4d4   :  { %12239 = vmatmul.mubr.msk.bf16.gmra.mrb[20].mxu1 %vm3414_vm2, %v15488_v1 }
 0x4d5   :  { %12242 = vmatprep.mubr.msk.bf16.mxu1 %vm3414_vm2, %v15492_v11 }
 0x4dc   :  { %12243 = vmatmul.mubr.msk.bf16.gmra.mrb[24].mxu1 %vm3414_vm2, %v15500_v61 }
 0x4dd   :  { %12246 = vmatprep.mubr.msk.bf16.mxu1 %vm3414_vm2, %v15504_v23 }
 0x4e4   :  { %12247 = vmatmul.mubr.msk.bf16.gmra.mrb[28].mxu1 %vm3414_vm2, %v15514_v34 }
 0x4e5   :  { %12252 = vmatprep.mubr.msk.bf16.mxu1 %vm3414_vm2, %v15943_v60 }
 0x4ec   :  { %12253 = vmatmul.mubr.msk.bf16.vlgmr.msra.gmra.mrb[16].mxu1 %vm3414_vm2, %v15949_v53 }
 0x4ed   :  { %12431 = vmatpush3.bf16.msra.mxu1 %v15674_v32  ;;  %12256 = vmatprep.mubr.msk.bf16.mxu1 %vm3414_vm2, %v15951_v62  ;;  %v15975_v32 = vld [vmem:[#allocation2 + $0x190] sm:$0xff]  }
 0x4ee   :  { %12448 = vmatprep.subr.bf16.mxu1 %v15697_v35 }
 0x4f4   :  { %12257 = vmatmul.mubr.msk.bf16.gmra.mrb[20].mxu1 %vm3414_vm2, %v15959_v31 }
 0x4f5   :  { %12260 = vmatprep.mubr.msk.bf16.mxu1 %vm3414_vm2, %v15961_v25 }
 0x4fc   :  { %12261 = vmatmul.mubr.msk.bf16.gmra.mrb[24].mxu1 %vm3414_vm2, %v15967_v56 }
 0x4fd   :  { %12264 = vmatprep.mubr.msk.bf16.mxu1 %vm3414_vm2, %v15969_v40 }
 0x504   :  { %12265 = vmatmul.mubr.msk.bf16.gmra.mrb[28].mxu1 %vm3414_vm2, %v15975_v32 }
 0x505   :  { %12432 = vmatprep.mubr.msk.bf16.mxu1 %vm3414_vm2, %v15782_v43  ;;  %v13667_v43 = vld [vmem:[#allocation2 + $0xe4] sm:$0xff]  }
 0x50c   :  { %12433 = vmatmul.mubr.msk.bf16.vlgmr.msra.gmra.mrb[32].mxu1 %vm3414_vm2, %v15795_v17  ;;  %v13668_v17 = vld [vmem:[#allocation2 + $0xf4] sm:$0xff]  }
 0x50d   :  { %12449 = vmatpush3.bf16.msra.mxu1 %v15697_v35  ;;  %12436 = vmatprep.mubr.msk.bf16.mxu1 %vm3414_vm2, %v15800_v8  ;;  %v13669_v35 = vld [vmem:[#allocation2 + $0xfc] sm:$0xff]  }
 0x50e   :  { %12466 = vmatprep.subr.bf16.mxu1 %v13664_v44 }
 0x514   :  { %12437 = vmatmul.mubr.msk.bf16.gmra.mrb[36].mxu1 %vm3414_vm2, %v13665_v18 }
 0x515   :  { %12440 = vmatprep.mubr.msk.bf16.mxu1 %vm3414_vm2, %v13666_v7  ;;  %v16760_v7 = vld [vmem:[#allocation23_spill] sm:$0xff] }
 0x51c   :  { %12441 = vmatmul.mubr.msk.bf16.gmra.mrb[40].mxu1 %vm3414_vm2, %v13667_v43 }
 0x51d   :  { %12444 = vmatprep.mubr.msk.bf16.mxu1 %vm3414_vm2, %v13668_v17 }
 0x524   :  { %12445 = vmatmul.mubr.msk.bf16.gmra.mrb[44].mxu1 %vm3414_vm2, %v13669_v35  ;;  %v16761_v35 = vld [vmem:[#allocation5_spill] sm:$0xff] }
 0x525   :  { %12450 = vmatprep.mubr.msk.bf16.mxu1 %vm3414_vm2, %v15508_v33  ;;  %v13670_v33 = vld [vmem:[%s16529_s3 + $0x28] sm:$0xff]  }
 0x52c   :  { %12451 = vmatmul.mubr.msk.bf16.vlgmr.msra.gmra.mrb[32].mxu1 %vm3414_vm2, %v15516_v42 }
 0x52d   :  { %12467 = vmatpush3.bf16.msra.mxu1 %v13664_v44  ;;  %12454 = vmatprep.mubr.msk.bf16.mxu1 %vm3414_vm2, %v15523_v16 }
 0x52e   :  { %12484 = vmatprep.subr.bf16.mxu1 %v15736_v19 }
 0x534   :  { %12455 = vmatmul.mubr.msk.bf16.gmra.mrb[36].mxu1 %vm3414_vm2, %v15534_v22 }
 0x535   :  { %12458 = vmatprep.mubr.msk.bf16.mxu1 %vm3414_vm2, %v15539_v20 }
 0x53c   :  { %12459 = vmatmul.mubr.msk.bf16.gmra.mrb[40].mxu1 %vm3414_vm2, %v15546_v4 }
 0x53d   :  { %12462 = vmatprep.mubr.msk.bf16.mxu1 %vm3414_vm2, %v16745_v37  ;;  %v16754_v37 = vld [vmem:[#allocation4_spill] sm:$0xff] }
 0x544   :  { %12463 = vmatmul.mubr.msk.bf16.gmra.mrb[44].mxu1 %vm3414_vm2, %v15556_v41 }
 0x545   :  { %12468 = vmatprep.mubr.msk.bf16.mxu1 %vm3414_vm2, %v15836_v36 }
 0x54c   :  { %12469 = vmatmul.mubr.msk.bf16.vlgmr.msra.gmra.mrb[32].mxu1 %vm3414_vm2, %v15847_v12 }
 0x54d   :  { %12485 = vmatpush3.bf16.msra.mxu1 %v15736_v19  ;;  %12472 = vmatprep.mubr.msk.bf16.mxu1 %vm3414_vm2, %v15849_v38  ;;  %v13671_v38 = vld [vmem:[%s16529_s3 + $0x38] sm:$0xff]  }
 0x54e   :  { %12502 = vmatprep.subr.bf16.mxu1 %v15766_v50 }
 0x554   :  { %12473 = vmatmul.mubr.msk.bf16.gmra.mrb[36].mxu1 %vm3414_vm2, %v15857_v55  ;;  %v16755_v55 = vld [vmem:[#allocation40_spill] sm:$0xff] }
 0x555   :  { %12476 = vmatprep.mubr.msk.bf16.mxu1 %vm3414_vm2, %v15859_v54 }
 0x55c   :  { %12477 = vmatmul.mubr.msk.bf16.gmra.mrb[40].mxu1 %vm3414_vm2, %v15865_v52  ;;  %v16756_v52 = vld [vmem:[#allocation11_spill] sm:$0xff] }
 0x55d   :  { %12480 = vmatprep.mubr.msk.bf16.mxu1 %vm3414_vm2, %v15867_v51 }
 0x564   :  { %12481 = vmatmul.mubr.msk.bf16.gmra.mrb[44].mxu1 %vm3414_vm2, %v15876_v9 }
 0x565   :  { %12486 = vmatprep.mubr.msk.bf16.mxu1 %vm3414_vm2, %v15392_v58  ;;  %v13674_v58 = vmov 0.0  }
 0x566   :  { %12592 = vmatprep.subr.bf16.mxu0 %v13674_v58  ;;  %12596 = vmatprep.mubr.msk.bf16.mxu0 %vm13675_vm3, %v13674_v58 }
 0x56c   :  { %12487 = vmatmul.mubr.msk.bf16.vlgmr.msra.gmra.mrb[32].mxu1 %vm3414_vm2, %v15404_v29 }
 0x56d   :  { %12503 = vmatpush3.bf16.msra.mxu1 %v15766_v50  ;;  %12490 = vmatprep.mubr.msk.bf16.mxu1 %vm3414_vm2, %v15415_v30 }
 0x56e   :  { %12520 = vmatprep.subr.bf16.mxu1 %v13670_v33 }
 0x574   :  { %12491 = vmatmul.mubr.msk.bf16.gmra.mrb[36].mxu1 %vm3414_vm2, %v15427_v10 }
 0x575   :  { %12494 = vmatprep.mubr.msk.bf16.mxu1 %vm3414_vm2, %v15433_v27 }
 0x57c   :  { %12495 = vmatmul.mubr.msk.bf16.gmra.mrb[40].mxu1 %vm3414_vm2, %v15443_v21 }
 0x57d   :  { %12498 = vmatprep.mubr.msk.bf16.mxu1 %vm3414_vm2, %v15447_v14 }
 0x584   :  { %12499 = vmatmul.mubr.msk.bf16.gmra.mrb[44].mxu1 %vm3414_vm2, %v15455_v47 }
 0x585   :  { %12504 = vmatprep.mubr.msk.bf16.mxu1 %vm3414_vm2, %v15459_v3 }
 0x58c   :  { %12505 = vmatmul.mubr.msk.bf16.vlgmr.msra.gmra.mrb[32].mxu1 %vm3414_vm2, %v15469_v49 }
 0x58d   :  { %12521 = vmatpush3.bf16.msra.mxu1 %v13670_v33  ;;  %12508 = vmatprep.mubr.msk.bf16.mxu1 %vm3414_vm2, %v15478_v39 }
 0x58e   :  { %12538 = vmatprep.subr.bf16.mxu1 %v15411_v6 }
 0x594   :  { %12509 = vmatmul.mubr.msk.bf16.gmra.mrb[36].mxu1 %vm3414_vm2, %v15488_v1 }
 0x595   :  { %12512 = vmatprep.mubr.msk.bf16.mxu1 %vm3414_vm2, %v15492_v11 }
 0x59c   :  { %12513 = vmatmul.mubr.msk.bf16.gmra.mrb[40].mxu1 %vm3414_vm2, %v15500_v61 }
 0x59d   :  { %12516 = vmatprep.mubr.msk.bf16.mxu1 %vm3414_vm2, %v15504_v23 }
 0x5a4   :  { %12517 = vmatmul.mubr.msk.bf16.gmra.mrb[44].mxu1 %vm3414_vm2, %v15514_v34 }
 0x5a5   :  { %12522 = vmatprep.mubr.msk.bf16.mxu1 %vm3414_vm2, %v15943_v60 }
 0x5ac   :  { %12523 = vmatmul.mubr.msk.bf16.vlgmr.msra.gmra.mrb[32].mxu1 %vm3414_vm2, %v15949_v53 }
 0x5ad   :  { %12539 = vmatpush3.bf16.msra.mxu1 %v15411_v6  ;;  %12526 = vmatprep.mubr.msk.bf16.mxu1 %vm3414_vm2, %v15951_v62 }
 0x5ae   :  { %12556 = vmatprep.subr.bf16.mxu1 %v15474_v59 }
 0x5b4   :  { %12527 = vmatmul.mubr.msk.bf16.gmra.mrb[36].mxu1 %vm3414_vm2, %v15959_v31 }
 0x5b5   :  { %12530 = vmatprep.mubr.msk.bf16.mxu1 %vm3414_vm2, %v15961_v25  ;;  %v16758_v25 = vld [vmem:[#allocation9_spill] sm:$0xff] }
 0x5bc   :  { %12531 = vmatmul.mubr.msk.bf16.gmra.mrb[40].mxu1 %vm3414_vm2, %v15967_v56 }
 0x5bd   :  { %12534 = vmatprep.mubr.msk.bf16.mxu1 %vm3414_vm2, %v15969_v40  ;;  %v16759_v40 = vld [vmem:[#allocation45_spill] sm:$0xff] }
 0x5bf   :  { %v12254_v29 = vpop.f32.mrb[16].mxu1 }
 0x5c0   :  { %v6379_v6 = vadd.f32 %v12254_v29, %v15789_v28  ;;  %v6298_v30 = vpop.f32.mrb[17].mxu1 }
 0x5c1   :  { %v6377_v10 = vadd.f32 %v15789_v28, %v6298_v30  ;;  %v12255_v27 = vpop.f32.mrb[18].mxu1 }
 0x5c2   :  { %v6380_v21 = vadd.f32 %v12255_v27, %v15789_v28  ;;  %v6301_v14 = vpop.f32.mrb[19].mxu1  ;;  %v6395_v3 = vmax.f32 %v6379_v6, 0.0 }
 0x5c3   :  { %v6378_v47 = vadd.f32 %v15789_v28, %v6301_v14  ;;  %v6393_v59 = vmax.f32 %v6377_v10, 0.0 }
 0x5c4   :  { %v6396_v49 = vmax.f32 %v6380_v21, 0.0  ;;  %12535 = vmatmul.mubr.msk.bf16.gmra.mrb[44].mxu1 %vm3414_vm2, %v15975_v32 }
 0x5c5   :  { %v6394_v39 = vmax.f32 %v6378_v47, 0.0  ;;  %12540 = vmatprep.mubr.msk.bf16.mxu1 %vm3414_vm2, %v15566_v48 }
 0x5c6   :  { %v6410_v1 = vpack.c.bf16 %v6396_v49, %v6395_v3 }
 0x5c7   :  { %v6409_v11 = vpack.c.bf16 %v6394_v39, %v6393_v59  ;;  %v12258_v61 = vpop.f32.mrb[20].mxu1  ;;  %v16762_v59 = vld [vmem:[#allocation46_spill] sm:$0xff] }
 0x5c8   :  { %v6418_v23 = vmax.bf16 %v6410_v1, %v15883_v24  ;;  %v6383_v34 = vadd.f32 %v12258_v61, %v15789_v28  ;;  %v6314_v42 = vpop.f32.mrb[21].mxu1 }
 0x5c9   :  { %v6417_v16 = vmax.bf16 %v6409_v11, %v15885_v13  ;;  %v6381_v22 = vadd.f32 %v15789_v28, %v6314_v42  ;;  %v12259_v20 = vpop.f32.mrb[22].mxu1  ;;  %v16763_v11 = vld [vmem:[#allocation28_spill] sm:$0xff] }
 0x5ca   :  { %v6384_v4 = vadd.f32 %v12259_v20, %v15789_v28  ;;  %v6317_v41 = vpop.f32.mrb[23].mxu1  ;;  %v16097_v9 = vmax.bf16 %v15805_v26, %v6418_v23  ;;  %v6399_v19 = vmax.f32 %v6383_v34, 0.0  ;;  %v16764_v34 = vld [vmem:[#allocation42_spill] sm:$0xff] }
 0x5cb   :  { %v6382_v48 = vadd.f32 %v15789_v28, %v6317_v41  ;;  %v16101_v8 = vmax.bf16 %v15807_v2, %v6417_v16  ;;  %v6397_v36 = vmax.f32 %v6381_v22, 0.0  ;;  %v16765_v16 = vld [vmem:[#allocation41_spill] sm:$0xff] }
 0x5cc   :  { %v6400_v50 = vmax.f32 %v6384_v4, 0.0  ;;  %12541 = vmatmul.mubr.msk.bf16.vlgmr.msra.gmra.mrb[32].mxu1 %vm3414_vm2, %v16754_v37 }
 0x5cd   :  { %v6398_v12 = vmax.f32 %v6382_v48, 0.0  ;;  %12557 = vmatpush3.bf16.msra.mxu1 %v13671_v38  ;;  %12544 = vmatprep.mubr.msk.bf16.mxu1 %vm3414_vm2, %v16755_v55  ;;  %v16766_v48 = vld [vmem:[#allocation10_spill] sm:$0xff]  ;;  %v16770_v38 = vld [vmem:[#allocation25_spill] sm:$0xff]  ;;  %v16772_v55 = vld [vmem:[#allocation43_spill] sm:$0xff] }
 0x5ce   :  { %v6412_v26 = vpack.c.bf16 %v6400_v50, %v6399_v19  ;;  %12574 = vmatprep.subr.bf16.mxu1 %v15532_v46  ;;  %v16767_v50 = vld [vmem:[#allocation29_spill] sm:$0xff] }
 0x5cf   :  { %v6411_v2 = vpack.c.bf16 %v6398_v12, %v6397_v36  ;;  %v12262_v54 = vpop.f32.mrb[24].mxu1  ;;  %v16768_v36 = vld [vmem:[#allocation24_spill] sm:$0xff]  ;;  %v16769_v12 = vld [vmem:[#allocation6_spill] sm:$0xff] }
 0x5d0   :  { %v6420_v51 = vmax.bf16 %v6412_v26, %v16756_v52  ;;  %v6387_v24 = vadd.f32 %v12262_v54, %v15789_v28  ;;  %v6330_v13 = vpop.f32.mrb[25].mxu1  ;;  %v16773_v26 = vld [vmem:[#allocation44_spill] sm:$0xff]  ;;  %v16775_v54 = vld [vmem:[#allocation26_spill] sm:$0xff] }
 0x5d1   :  { %v6419_v15 = vmax.bf16 %v6411_v2, %v16757_v63  ;;  %v6385_v60 = vadd.f32 %v15789_v28, %v6330_v13  ;;  %v12263_v53 = vpop.f32.mrb[26].mxu1  ;;  %v16774_v2 = vld [vmem:[#allocation8_spill] sm:$0xff]  ;;  %v13579_v52 = vld [vmem:[#allocation2 + $0x38] sm:$0xff]   ;;  %v13581_v63 = vld [vmem:[#allocation2 + $0x50] sm:$0xff]  }
 0x5d2   :  { %v6388_v62 = vadd.f32 %v12263_v53, %v15789_v28  ;;  %v6333_v31 = vpop.f32.mrb[27].mxu1  ;;  %v16117_v56 = vmax.bf16 %v16758_v25, %v6420_v51  ;;  %v6403_v44 = vmax.f32 %v6387_v24, 0.0  ;;  %v16776_v51 = vld [vmem:[#allocation27_spill] sm:$0xff]  ;;  %v13588_v25 = vld [vmem:[%s16531_s5 + $0x10] sm:$0xff]  }
 0x5d3   :  { %v6386_v46 = vadd.f32 %v15789_v28, %v6333_v31  ;;  %v16121_v32 = vmax.bf16 %v16759_v40, %v6419_v15  ;;  %v6401_v43 = vmax.f32 %v6385_v60, 0.0  ;;  %v13587_v24 = vld [vmem:[%s16531_s5 + $0x80] sm:$0xff]   ;;  %v13582_v15 = vld [vmem:[#allocation2 + $0x58] sm:$0xff]   ;;  %v13583_v60 = vld [vmem:[#allocation2 + $0x68] sm:$0xff]   ;;  %12593 = vmatpush3.bf16.msra.mxu0 %v13588_v25 }
 0x5d4   :  { %v6404_v18 = vmax.f32 %v6388_v62, 0.0  ;;  %12545 = vmatmul.mubr.msk.bf16.gmra.mrb[36].mxu1 %vm3414_vm2, %v16760_v7  ;;  %v13580_v13 = vld [vmem:[#allocation2 + $0x40] sm:$0xff]   ;;  %v13584_v62 = vld [vmem:[#allocation2 + $0x70] sm:$0xff]   ;;  %v13586_v31 = vld [vmem:[#allocation2 + $0x88] sm:$0xff]   ;;  %12594 = vmatprep.subr.bf16.mxu0 %v13674_v58 }
 0x5d5   :  { %v6402_v17 = vmax.f32 %v6386_v46, 0.0  ;;  %12548 = vmatprep.mubr.msk.bf16.mxu1 %vm3414_vm2, %v16761_v35  ;;  %v13585_v53 = vld [vmem:[#allocation2 + $0x80] sm:$0xff]   ;;  %v13589_v46 = vld [vmem:[%s16531_s5 + $0x18] sm:$0xff]   ;;  %v13590_v40 = vld [vmem:[%s16531_s5 + $0x88] sm:$0xff]  }
 0x5d6   :  { %v6414_v33 = vpack.c.bf16 %v6404_v18, %v6403_v44 }
 0x5d7   :  { %v6413_v29 = vpack.c.bf16 %v6402_v17, %v6401_v43  ;;  %v12266_v6 = vpop.f32.mrb[28].mxu1  ;;  %12595 = vmatpush3.bf16.msra.mxu0 %v13589_v46 }
 0x5d8   :  { %v6422_v30 = vmax.bf16 %v6414_v33, %v15909_v57  ;;  %v6391_v10 = vadd.f32 %v12266_v6, %v15789_v28  ;;  %v6346_v27 = vpop.f32.mrb[29].mxu1  ;;  %12600 = vmatprep.subr.bf16.mxu0 %v13674_v58 }
 0x5d9   :  { %v6421_v21 = vmax.bf16 %v6413_v29, %v15911_v0  ;;  %v6389_v14 = vadd.f32 %v15789_v28, %v6346_v27  ;;  %v12267_v47 = vpop.f32.mrb[30].mxu1 }
 0x5da   :  { %v6392_v3 = vadd.f32 %v12267_v47, %v15789_v28  ;;  %v6349_v49 = vpop.f32.mrb[31].mxu1  ;;  %v16133_v39 = vmax.bf16 %v16762_v59, %v6422_v30  ;;  %v6407_v57 = vmax.f32 %v6391_v10, 0.0 }
 0x5db   :  { %v6390_v1 = vadd.f32 %v15789_v28, %v6349_v49  ;;  %v16137_v61 = vmax.bf16 %v16763_v11, %v6421_v21  ;;  %v6405_v0 = vmax.f32 %v6389_v14, 0.0 }
 0x5dc   :  { %v6408_v23 = vmax.f32 %v6392_v3, 0.0  ;;  %12549 = vmatmul.mubr.msk.bf16.gmra.mrb[40].mxu1 %vm3414_vm2, %v16764_v34 }
 0x5dd   :  { %v6406_v42 = vmax.f32 %v6390_v1, 0.0  ;;  %12552 = vmatprep.mubr.msk.bf16.mxu1 %vm3414_vm2, %v16765_v16 }
 0x5de   :  { %v6416_v22 = vpack.c.bf16 %v6408_v23, %v6407_v57 }
 0x5df   :  { %v6415_v20 = vpack.c.bf16 %v6406_v42, %v6405_v0  ;;  %v13591_v0 = vld [vmem:[%s16531_s5] sm:$0xff]  }
 0x5e0   :  { %v6424_v4 = vmax.bf16 %v6416_v22, %v15921_v45  ;;  %v13672_v45 = vld [vmem:[%s16529_s3 + $0x40] sm:$0xff]   ;;  %s13677_s3 = smov 64  }
 0x5e1   :  { %v6423_v41 = vmax.bf16 %v6415_v20, %v15923_v5  ;;  %v16771_v5 = vld [vmem:[#allocation7_spill] sm:$0xff] }
 0x5e2   :  { %v16146_v19 = vmax.bf16 %v16766_v48, %v6424_v4 }
 0x5e3   :  { %v16149_v37 = vmax.bf16 %v16767_v50, %v6423_v41  ;;  %v13592_v41 = vld [vmem:[%s16531_s5 + $0x8] sm:$0xff]  }
 0x5e4   :  { %12553 = vmatmul.mubr.msk.bf16.gmra.mrb[44].mxu1 %vm3414_vm2, %v16768_v36 }
 0x5e5   :  { %12558 = vmatprep.mubr.msk.bf16.mxu1 %vm3414_vm2, %v16769_v12 }
 0x5ec   :  { %12559 = vmatmul.mubr.msk.bf16.vlgmr.msra.gmra.mrb[32].mxu1 %vm3414_vm2, %v16770_v38 }
 0x5ed   :  { %12575 = vmatpush3.bf16.msra.mxu1 %v13672_v45  ;;  %12562 = vmatprep.mubr.msk.bf16.mxu1 %vm3414_vm2, %v16771_v5 }
 0x5ee   :  { %12656 = vmatprep.subr.bf16.mxu1 %v13674_v58 }
 0x5f4   :  { %12563 = vmatmul.mubr.msk.bf16.gmra.mrb[36].mxu1 %vm3414_vm2, %v16772_v55 }
 0x5f5   :  { %12566 = vmatprep.mubr.msk.bf16.mxu1 %vm3414_vm2, %v16773_v26 }
 0x5fc   :  { %12567 = vmatmul.mubr.msk.bf16.gmra.mrb[40].mxu1 %vm3414_vm2, %v16774_v2 }
 0x5fd   :  { %12570 = vmatprep.mubr.msk.bf16.mxu1 %vm3414_vm2, %v16775_v54  ;;  %v13593_v54 = vld [vmem:[%s16531_s5 + $0x20] sm:$0xff]  }
 0x604   :  { %12571 = vmatmul.mubr.msk.bf16.gmra.mrb[44].mxu1 %vm3414_vm2, %v16776_v51 }
 0x605   :  { %12576 = vmatprep.mubr.msk.bf16.mxu1 %vm3414_vm2, %v13579_v52 }
 0x60c   :  { %12577 = vmatmul.mubr.msk.bf16.vlgmr.msra.gmra.mrb[32].mxu1 %vm3414_vm2, %v13580_v13 }
 0x60d   :  { %12580 = vmatprep.mubr.msk.bf16.mxu1 %vm3414_vm2, %v13581_v63  ;;  %12657 = vmatpush3.bf16.msra.mxu1 %v13587_v24 }
 0x60e   :  { %12658 = vmatprep.subr.bf16.mxu1 %v13674_v58 }
 0x611   :  { %12659 = vmatpush3.bf16.msra.mxu1 %v13590_v40 }
 0x612   :  { %12672 = vmatprep.subr.bf16.mxu1 %v13674_v58 }
 0x614   :  { %12581 = vmatmul.mubr.msk.bf16.gmra.mrb[36].mxu1 %vm3414_vm2, %v13582_v15  ;;  %v13594_v15 = vld [vmem:[%s16531_s5 + $0x28] sm:$0xff]  }
 0x615   :  { %12584 = vmatprep.mubr.msk.bf16.mxu1 %vm3414_vm2, %v13583_v60 }
 0x61c   :  { %12585 = vmatmul.mubr.msk.bf16.gmra.mrb[40].mxu1 %vm3414_vm2, %v13584_v62 }
 0x61d   :  { %12588 = vmatprep.mubr.msk.bf16.mxu1 %vm3414_vm2, %v13585_v53 }
 0x624   :  { %12589 = vmatmul.mubr.msk.bf16.gmra.mrb[44].mxu1 %vm3414_vm2, %v13586_v31 }
 0x625   :  { %12660 = vmatprep.mubr.msk.bf16.mxu1 %vm13675_vm3, %v13674_v58 }
 0x6df   :  { %v12578_v44 = vpop.f32.mrb[32].mxu1 }
 0x6e0   :  { %v8769_v18 = vadd.f32 %v12578_v44, %v15789_v28  ;;  %v8688_v7 = vpop.f32.mrb[33].mxu1 }
 0x6e1   :  { %v8767_v43 = vadd.f32 %v15789_v28, %v8688_v7  ;;  %v12579_v17 = vpop.f32.mrb[34].mxu1 }
 0x6e2   :  { %v8770_v35 = vadd.f32 %v12579_v17, %v15789_v28  ;;  %v8691_v33 = vpop.f32.mrb[35].mxu1  ;;  %v8785_v6 = vmax.f32 %v8769_v18, 0.0 }
 0x6e3   :  { %v8768_v29 = vadd.f32 %v15789_v28, %v8691_v33  ;;  %v8783_v10 = vmax.f32 %v8767_v43, 0.0  ;;  %v13595_v43 = vld [vmem:[%s16531_s5 + $0xa0] sm:$0xff]  }
 0x6e4   :  { %v8786_v30 = vmax.f32 %v8770_v35, 0.0 }
 0x6e5   :  { %v8784_v27 = vmax.f32 %v8768_v29, 0.0 }
 0x6e6   :  { %v8800_v21 = vpack.c.bf16 %v8786_v30, %v8785_v6 }
 0x6e7   :  { %v8799_v14 = vpack.c.bf16 %v8784_v27, %v8783_v10  ;;  %v12582_v47 = vpop.f32.mrb[36].mxu1  ;;  %v13597_v27 = vld [vmem:[%s16531_s5 + $0xa8] sm:$0xff]  }
 0x6e8   :  { %v16206_v3 = vmax.bf16 %v8800_v21, %v16097_v9  ;;  %v8773_v49 = vadd.f32 %v12582_v47, %v15789_v28  ;;  %v8704_v59 = vpop.f32.mrb[37].mxu1 }
 0x6e9   :  { %v8807_v1 = vmax.bf16 %v8799_v14, %v16101_v8  ;;  %v8771_v11 = vadd.f32 %v15789_v28, %v8704_v59  ;;  %v12583_v57 = vpop.f32.mrb[38].mxu1 }
 0x6ea   :  { %v8774_v23 = vadd.f32 %v12583_v57, %v15789_v28  ;;  %v8707_v34 = vpop.f32.mrb[39].mxu1  ;;  %v8789_v9 = vmax.f32 %v8773_v49, 0.0  ;;  %v11088_v17 = vcombine.low %v16206_v3, %v16206_v3  ;;  %v13599_v49 = vld [vmem:[%s16531_s5 + $0xc0] sm:$0xff]   ;;  %v11089_v59 = vcombine.high %v16206_v3, %v16206_v3  ;;  %v13602_v3 = vld [vmem:[%s16531_s5 + $0x48] sm:$0xff]   ;;  %v13604_v57 = vld [vmem:[%s16531_s5 + $0x50] sm:$0xff]  }
 0x6eb   :  { %v11087_v42 = vcombine.high %v8807_v1, %v8807_v1  ;;  %v8772_v16 = vadd.f32 %v15789_v28, %v8707_v34  ;;  %v8787_v20 = vmax.f32 %v8771_v11, 0.0  ;;  %v11086_v52 = vcombine.low %v8807_v1, %v8807_v1  ;;  %v13603_v11 = vld [vmem:[%s16531_s5 + $0xe0] sm:$0xff]  }
 0x6ec   :  { %v8790_v22 = vmax.f32 %v8774_v23, 0.0 }
 0x6ed   :  { %v8788_v4 = vmax.f32 %v8772_v16, 0.0  ;;  %12597 = vmatmul.mubr.msk.bf16.vlgmr.msra.gmra.mrb[16].mxu0 %vm960_vm0, %v11087_v42  ;;  %v13606_v42 = vld [vmem:[%s16531_s5 + $0x58] sm:$0xff]   ;;  %v9821_v16 = vld [vmem:[%s16532_s6] sm:$0xff] }
 0x6ee   :  { %v8802_v8 = vpack.c.bf16 %v8790_v22, %v8789_v9  ;;  %12601 = vmatpush3.bf16.msra.mxu0 %v13591_v0  ;;  %12604 = vmatprep.mubr.msk.bf16.mxu0 %vm13675_vm3, %v13674_v58  ;;  %v13605_v0 = vld [vmem:[%s16531_s5 + $0xe8] sm:$0xff]  }
 0x6ef   :  { %v8801_v48 = vpack.c.bf16 %v8788_v4, %v8787_v20  ;;  %v12586_v50 = vpop.f32.mrb[40].mxu1  ;;  %12602 = vmatprep.subr.bf16.mxu0 %v13674_v58  ;;  %v9822_v9 = vld [vmem:[%s16532_s6 + $0x8] sm:$0xff]  ;;  %v13607_v20 = vld [vmem:[%s16531_s5 + $0x60] sm:$0xff]  }
 0x6f0   :  { %v16224_v36 = vmax.bf16 %v8802_v8, %v16117_v56  ;;  %v8777_v12 = vadd.f32 %v12586_v50, %v15789_v28  ;;  %v8720_v38 = vpop.f32.mrb[41].mxu1  ;;  %v16343_v22 = vpack.c.bf16 %v9822_v9, %v9821_v16  ;;  %v9824_v50 = vld [vmem:[%s16532_s6 + $0x18] sm:$0xff] }
 0x6f1   :  { %v16228_v45 = vmax.bf16 %v8801_v48, %v16121_v32  ;;  %v8775_v5 = vadd.f32 %v15789_v28, %v8720_v38  ;;  %v12587_v55 = vpop.f32.mrb[42].mxu1  ;;  %v9823_v48 = vld [vmem:[%s16532_s6 + $0x10] sm:$0xff]  ;;  %v13608_v38 = vld [vmem:[%s16531_s5 + $0x68] sm:$0xff]  }
 0x6f2   :  { %v8778_v26 = vadd.f32 %v12587_v55, %v15789_v28  ;;  %v8723_v2 = vpop.f32.mrb[43].mxu1  ;;  %12603 = vmatpush3.bf16.msra.mxu0 %v13592_v41  ;;  %v8793_v51 = vmax.f32 %v8777_v12, 0.0  ;;  %v13676_v41 = vmov 0.0|0.0   ;;  %v16363_v12 = vpack.c.bf16 %v9824_v50, %v9823_v48  ;;  %v13610_v55 = vld [vmem:[%s16531_s5 + $0x78] sm:$0xff]  }
 0x6f3   :  { %v8776_v56 = vadd.f32 %v15789_v28, %v8723_v2  ;;  %12608 = vmatprep.subr.bf16.mxu0 %v13674_v58  ;;  %v8791_v32 = vmax.f32 %v8775_v5, 0.0  ;;  %v11090_v23 = vcombine.low %v16228_v45, %v16228_v45  ;;  %v11091_v4 = vcombine.high %v16228_v45, %v16228_v45  ;;  %v13609_v45 = vld [vmem:[%s16531_s5 + $0x70] sm:$0xff]  }
 0x6f4   :  { %v8794_v24 = vmax.f32 %v8778_v26, 0.0  ;;  %v11092_v5 = vcombine.low %v16224_v36, %v16224_v36  ;;  %v13611_v26 = vld [vmem:[%s16531_s5 + $0x90] sm:$0xff]   ;;  %v11093_v2 = vcombine.high %v16224_v36, %v16224_v36 }
 0x6f5   :  { %v8792_v13 = vmax.f32 %v8776_v56, 0.0  ;;  %12605 = vmatmul.mubr.msk.bf16.vlgmr.msra.gmra.mrb[20].mxu0 %vm960_vm0, %v11086_v52  ;;  %v13613_v36 = vld [vmem:[%s16531_s5 + $0xb0] sm:$0xff]   ;;  %v13614_v56 = vld [vmem:[%s16531_s5 + $0xb8] sm:$0xff]  }
 0x6f6   :  { %v8804_v63 = vpack.c.bf16 %v8794_v24, %v8793_v51  ;;  %12609 = vmatpush3.bf16.msra.mxu0 %v13593_v54  ;;  %12612 = vmatprep.mubr.msk.bf16.mxu0 %vm13675_vm3, %v13674_v58  ;;  %v13612_v54 = vld [vmem:[%s16531_s5 + $0x98] sm:$0xff]   ;;  %v13615_v51 = vld [vmem:[%s16531_s5 + $0xd0] sm:$0xff]  }
 0x6f7   :  { %v8803_v60 = vpack.c.bf16 %v8792_v13, %v8791_v32  ;;  %v12590_v53 = vpop.f32.mrb[44].mxu1  ;;  %12610 = vmatprep.subr.bf16.mxu0 %v13674_v58  ;;  %v13616_v32 = vld [vmem:[%s16531_s5 + $0xd8] sm:$0xff]   ;;  %v13617_v13 = vld [vmem:[%s16531_s5 + $0xf0] sm:$0xff]  }
 0x6f8   :  { %v16245_v62 = vmax.bf16 %v8804_v63, %v16133_v39  ;;  %v8781_v31 = vadd.f32 %v12590_v53, %v15789_v28  ;;  %v8736_v25 = vpop.f32.mrb[45].mxu1  ;;  %v13596_v39 = vld [vmem:[%s16531_s5 + $0x30] sm:$0xff]  }
 0x6f9   :  { %v16249_v46 = vmax.bf16 %v8803_v60, %v16137_v61  ;;  %v8779_v40 = vadd.f32 %v15789_v28, %v8736_v25  ;;  %v12591_v44 = vpop.f32.mrb[46].mxu1 }
 0x6fa   :  { %v8782_v18 = vadd.f32 %v12591_v44, %v15789_v28  ;;  %v8739_v7 = vpop.f32.mrb[47].mxu1  ;;  %12611 = vmatpush3.bf16.msra.mxu0 %v13594_v15  ;;  %v8797_v33 = vmax.f32 %v8781_v31, 0.0  ;;  %v11096_v1 = vcombine.low %v16245_v62, %v16245_v62  ;;  %v11097_v24 = vcombine.high %v16245_v62, %v16245_v62  ;;  %v13618_v15 = vld [vmem:[%s16531_s5 + $0xf8] sm:$0xff]  }
 0x6fb   :  { %v11094_v61 = vcombine.low %v16249_v46, %v16249_v46  ;;  %v8780_v35 = vadd.f32 %v15789_v28, %v8739_v7  ;;  %12616 = vmatprep.subr.bf16.mxu0 %v13674_v58  ;;  %v8795_v6 = vmax.f32 %v8779_v40, 0.0  ;;  %v13598_v28 = vld [vmem:[%s16531_s5 + $0x38] sm:$0xff]   ;;  %v11095_v52 = vcombine.high %v16249_v46, %v16249_v46 }
 0x6fc   :  { %v8798_v29 = vmax.f32 %v8782_v18, 0.0 }
 0x6fd   :  { %v8796_v30 = vmax.f32 %v8780_v35, 0.0  ;;  %12613 = vmatmul.mubr.msk.bf16.vlgmr.msra.gmra.mrb[24].mxu0 %vm960_vm0, %v11088_v17  ;;  %12661 = vmatmul.mubr.msk.bf16.vlgmr.msra.gmra.mrb[48].mxu1 %vm960_vm0, %v11094_v61 }
 0x6fe   :  { %v8806_v10 = vpack.c.bf16 %v8798_v29, %v8797_v33  ;;  %12673 = vmatpush3.bf16.msra.mxu1 %v13595_v43  ;;  %12617 = vmatpush3.bf16.msra.mxu0 %v13596_v39 }
 0x6ff   :  { %v8805_v21 = vpack.c.bf16 %v8796_v30, %v8795_v6  ;;  %12674 = vmatprep.subr.bf16.mxu1 %v13674_v58  ;;  %12618 = vmatprep.subr.bf16.mxu0 %v13674_v58 }
 0x700   :  { %v16276_v14 = vmax.bf16 %v8806_v10, %v16146_v19  ;;  %12620 = vmatprep.mubr.msk.bf16.mxu0 %vm13675_vm3, %v13674_v58  ;;  %12676 = vmatprep.mubr.msk.bf16.mxu1 %vm13675_vm3, %v13674_v58  ;;  %v13600_v19 = vld [vmem:[%s16531_s5 + $0x40] sm:$0xff]  }
 0x701   :  { %v16283_v47 = vmax.bf16 %v8805_v21, %v16149_v37  ;;  %v13601_v37 = vld [vmem:[%s16531_s5 + $0xc8] sm:$0xff]  }
 0x702   :  { %12675 = vmatpush3.bf16.msra.mxu1 %v13597_v27  ;;  %12619 = vmatpush3.bf16.msra.mxu0 %v13598_v28  ;;  %v11100_v8 = vcombine.low %v16276_v14, %v16276_v14  ;;  %v11101_v60 = vcombine.high %v16276_v14, %v16276_v14 }
 0x703   :  { %12688 = vmatprep.subr.bf16.mxu1 %v13674_v58  ;;  %12624 = vmatprep.subr.bf16.mxu0 %v13674_v58  ;;  %v11098_v34 = vcombine.low %v16283_v47, %v16283_v47  ;;  %v11099_v63 = vcombine.high %v16283_v47, %v16283_v47 }
 0x705   :  { %12621 = vmatmul.mubr.msk.bf16.vlgmr.msra.gmra.mrb[28].mxu0 %vm960_vm0, %v11089_v59  ;;  %12677 = vmatmul.mubr.msk.bf16.vlgmr.msra.gmra.mrb[52].mxu1 %vm960_vm0, %v11096_v1 }
 0x706   :  { %12689 = vmatpush3.bf16.msra.mxu1 %v13599_v49  ;;  %12625 = vmatpush3.bf16.msra.mxu0 %v13600_v19 }
 0x707   :  { %12690 = vmatprep.subr.bf16.mxu1 %v13674_v58  ;;  %12626 = vmatprep.subr.bf16.mxu0 %v13674_v58 }
 0x708   :  { %12628 = vmatprep.mubr.msk.bf16.mxu0 %vm13675_vm3, %v13674_v58  ;;  %12692 = vmatprep.mubr.msk.bf16.mxu1 %vm13675_vm3, %v13674_v58 }
 0x70a   :  { %12691 = vmatpush3.bf16.msra.mxu1 %v13601_v37  ;;  %12627 = vmatpush3.bf16.msra.mxu0 %v13602_v3 }
 0x70b   :  { %12704 = vmatprep.subr.bf16.mxu1 %v13674_v58  ;;  %12632 = vmatprep.subr.bf16.mxu0 %v13674_v58 }
 0x70d   :  { %12629 = vmatmul.mubr.msk.bf16.vlgmr.msra.gmra.mrb[32].mxu0 %vm960_vm0, %v11090_v23  ;;  %12693 = vmatmul.mubr.msk.bf16.vlgmr.msra.gmra.mrb[56].mxu1 %vm960_vm0, %v11098_v34 }
 0x70e   :  { %12705 = vmatpush3.bf16.msra.mxu1 %v13603_v11  ;;  %12633 = vmatpush3.bf16.msra.mxu0 %v13604_v57 }
 0x70f   :  { %12706 = vmatprep.subr.bf16.mxu1 %v13674_v58  ;;  %12634 = vmatprep.subr.bf16.mxu0 %v13674_v58 }
 0x710   :  { %12636 = vmatprep.mubr.msk.bf16.mxu0 %vm13675_vm3, %v13674_v58  ;;  %12708 = vmatprep.mubr.msk.bf16.mxu1 %vm13675_vm3, %v13674_v58 }
 0x712   :  { %12707 = vmatpush3.bf16.msra.mxu1 %v13605_v0  ;;  %12635 = vmatpush3.bf16.msra.mxu0 %v13606_v42 }
 0x713   :  { %12775 = vmatprep.subr.bf16.mxu1 %v13676_v41  ;;  %12640 = vmatprep.subr.bf16.mxu0 %v13674_v58 }
 0x715   :  { %12637 = vmatmul.mubr.msk.bf16.vlgmr.msra.gmra.mrb[36].mxu0 %vm960_vm0, %v11091_v4  ;;  %12709 = vmatmul.mubr.msk.bf16.vlgmr.msra.gmra.mrb[60].mxu1 %vm960_vm0, %v11100_v8 }
 0x716   :  { %12777 = vmatpush3.bf16.msra.mxu1 %v16343_v22  ;;  %12641 = vmatpush3.bf16.msra.mxu0 %v13607_v20 }
 0x717   :  { %12778 = vmatprep.subr.bf16.mxu1 %v13676_v41  ;;  %12642 = vmatprep.subr.bf16.mxu0 %v13674_v58 }
 0x718   :  { %12644 = vmatprep.mubr.msk.bf16.mxu0 %vm13675_vm3, %v13674_v58  ;;  %12728 = vmatprep.mubr.msk.f32.mxu1 %vm13675_vm3, %v13674_v58 }
 0x71a   :  { %12780 = vmatpush3.bf16.msra.mxu1 %v16363_v12  ;;  %12643 = vmatpush3.bf16.msra.mxu0 %v13608_v38 }
 0x71b   :  { %12648 = vmatprep.subr.bf16.mxu0 %v13674_v58  ;;  %12787 = vmatprep.subr.bf16.mxu1 %v13676_v41 }
 0x71d   :  { %12645 = vmatmul.mubr.msk.bf16.vlgmr.msra.gmra.mrb[40].mxu0 %vm960_vm0, %v11092_v5  ;;  %12729 = vmatmul.mubr.f32.vlgmr.msra.gmra.mrb[64].mxu1 %v13674_v58  ;;  %v16461_v5 = vld [vmem:[%s16533_s8] ss:$0 sm:$0xff] }
 0x71e   :  { %12649 = vmatpush3.bf16.msra.mxu0 %v13609_v45  ;;  %12652 = vmatprep.mubr.msk.bf16.mxu0 %vm13675_vm3, %v13674_v58 }
 0x71f   :  { %12650 = vmatprep.subr.bf16.mxu0 %v13674_v58  ;;  %12789 = vmatpush3.bf16.msra.mxu1 %v16343_v22 }
 0x720   :  { %12790 = vmatprep.subr.bf16.mxu1 %v13676_v41  ;;  %12750 = vmatprep.mubr.msk.f32.mxu1 %vm13675_vm3, %v13674_v58 }
 0x722   :  { %12651 = vmatpush3.bf16.msra.mxu0 %v13610_v55 }
 0x723   :  { %12664 = vmatprep.subr.bf16.mxu0 %v13674_v58  ;;  %12792 = vmatpush3.bf16.msra.mxu1 %v16363_v12 }
 0x724   :  { %12799 = vmatprep.subr.bf16.mxu1 %v13676_v41 }
 0x725   :  { %12653 = vmatmul.mubr.msk.bf16.vlgmr.msra.gmra.mrb[44].mxu0 %vm960_vm0, %v11093_v2 }
 0x726   :  { %12665 = vmatpush3.bf16.msra.mxu0 %v13611_v26  ;;  %12668 = vmatprep.mubr.msk.bf16.mxu0 %vm13675_vm3, %v13674_v58 }
 0x727   :  { %12666 = vmatprep.subr.bf16.mxu0 %v13674_v58 }
 0x72a   :  { %12667 = vmatpush3.bf16.msra.mxu0 %v13612_v54 }
 0x72b   :  { %12680 = vmatprep.subr.bf16.mxu0 %v13674_v58 }
 0x72d   :  { %12669 = vmatmul.mubr.msk.bf16.vlgmr.msra.gmra.mrb[48].mxu0 %vm960_vm0, %v11095_v52 }
 0x72e   :  { %12681 = vmatpush3.bf16.msra.mxu0 %v13613_v36  ;;  %12684 = vmatprep.mubr.msk.bf16.mxu0 %vm13675_vm3, %v13674_v58 }
 0x72f   :  { %12682 = vmatprep.subr.bf16.mxu0 %v13674_v58 }
 0x732   :  { %12683 = vmatpush3.bf16.msra.mxu0 %v13614_v56 }
 0x733   :  { %12696 = vmatprep.subr.bf16.mxu0 %v13674_v58 }
 0x735   :  { %12685 = vmatmul.mubr.msk.bf16.vlgmr.msra.gmra.mrb[52].mxu0 %vm960_vm0, %v11097_v24 }
 0x736   :  { %12697 = vmatpush3.bf16.msra.mxu0 %v13615_v51  ;;  %12700 = vmatprep.mubr.msk.bf16.mxu0 %vm13675_vm3, %v13674_v58 }
 0x737   :  { %12698 = vmatprep.subr.bf16.mxu0 %v13674_v58 }
 0x73a   :  { %12699 = vmatpush3.bf16.msra.mxu0 %v13616_v32 }
 0x73b   :  { %12712 = vmatprep.subr.bf16.mxu0 %v13674_v58 }
 0x73d   :  { %12701 = vmatmul.mubr.msk.bf16.vlgmr.msra.gmra.mrb[56].mxu0 %vm960_vm0, %v11099_v63 }
 0x73e   :  { %12713 = vmatpush3.bf16.msra.mxu0 %v13617_v13  ;;  %12716 = vmatprep.mubr.msk.bf16.mxu0 %vm13675_vm3, %v13674_v58 }
 0x73f   :  { %12714 = vmatprep.subr.bf16.mxu0 %v13674_v58 }
 0x742   :  { %12715 = vmatpush3.bf16.msra.mxu0 %v13618_v15 }
 0x743   :  { %12781 = vmatprep.subr.bf16.mxu0 %v13676_v41 }
 0x745   :  { %12717 = vmatmul.mubr.msk.bf16.vlgmr.msra.gmra.mrb[60].mxu0 %vm960_vm0, %v11101_v60 }
 0x746   :  { %12783 = vmatpush3.bf16.msra.mxu0 %v16343_v22  ;;  %12739 = vmatprep.mubr.msk.f32.mxu0 %vm13675_vm3, %v13674_v58 }
 0x747   :  { %12784 = vmatprep.subr.bf16.mxu0 %v13676_v41 }
 0x74a   :  { %12786 = vmatpush3.bf16.msra.mxu0 %v16363_v12 }
 0x74b   :  { %12793 = vmatprep.subr.bf16.mxu0 %v13676_v41 }
 0x7c0   :  { %v8968_v53 = vpop.f32.mrb[16].mxu0 }
 0x7c1   :  { %v12598_v62 = vpop.f32.mrb[17].mxu0 }
 0x7c2   :  { %v8971_v31 = vpop.f32.mrb[18].mxu0 }
 0x7c3   :  { %v12599_v25 = vpop.f32.mrb[19].mxu0 }
 0x7c8   :  { %v9023_v46 = vpop.f32.mrb[20].mxu0 }
 0x7c9   :  { %v9024_v40 = vadd.f32 %v9023_v46, %v8968_v53  ;;  %v12606_v44 = vpop.f32.mrb[21].mxu0 }
 0x7ca   :  { %v9026_v18 = vpop.f32.mrb[22].mxu0 }
 0x7cb   :  { %v12607_v7 = vpop.f32.mrb[23].mxu0 }
 0x7d0   :  { %v9078_v43 = vpop.f32.mrb[24].mxu0  ;;  %v9414_v39 = vpop.f32.mrb[48].mxu1 }
 0x7d1   :  { %v9084_v17 = vadd.f32 %v9078_v43, %v9024_v40  ;;  %v12614_v61 = vpop.f32.mrb[25].mxu0  ;;  %v12662_v35 = vpop.f32.mrb[49].mxu1 }
 0x7d2   :  { %v9081_v33 = vpop.f32.mrb[26].mxu0  ;;  %v9417_v29 = vpop.f32.mrb[50].mxu1 }
 0x7d3   :  { %v12615_v6 = vpop.f32.mrb[27].mxu0  ;;  %v12663_v30 = vpop.f32.mrb[51].mxu1 }
 0x7d8   :  { %v9134_v10 = vpop.f32.mrb[28].mxu0  ;;  %v9526_v27 = vpop.f32.mrb[52].mxu1 }
 0x7d9   :  { %v9140_v28 = vadd.f32 %v9134_v10, %v9084_v17  ;;  %v12622_v21 = vpop.f32.mrb[29].mxu0  ;;  %v12678_v14 = vpop.f32.mrb[53].mxu1 }
 0x7da   :  { %v9137_v47 = vpop.f32.mrb[30].mxu0  ;;  %v9529_v49 = vpop.f32.mrb[54].mxu1 }
 0x7db   :  { %v12623_v19 = vpop.f32.mrb[31].mxu0  ;;  %v12679_v59 = vpop.f32.mrb[55].mxu1 }
 0x7e0   :  { %v9190_v1 = vpop.f32.mrb[32].mxu0  ;;  %v9638_v37 = vpop.f32.mrb[56].mxu1 }
 0x7e1   :  { %v9196_v3 = vadd.f32 %v9190_v1, %v9140_v28  ;;  %v12630_v11 = vpop.f32.mrb[33].mxu0  ;;  %v12694_v57 = vpop.f32.mrb[57].mxu1 }
 0x7e2   :  { %v9193_v23 = vpop.f32.mrb[34].mxu0  ;;  %v9641_v34 = vpop.f32.mrb[58].mxu1 }
 0x7e3   :  { %v12631_v0 = vpop.f32.mrb[35].mxu0  ;;  %v12695_v42 = vpop.f32.mrb[59].mxu1 }
 0x7e8   :  { %v9246_v16 = vpop.f32.mrb[36].mxu0  ;;  %v9750_v9 = vpop.f32.mrb[60].mxu1 }
 0x7e9   :  { %v9252_v20 = vadd.f32 %v9246_v16, %v9196_v3  ;;  %v12638_v4 = vpop.f32.mrb[37].mxu0  ;;  %v12710_v8 = vpop.f32.mrb[61].mxu1 }
 0x7ea   :  { %v9249_v48 = vpop.f32.mrb[38].mxu0  ;;  %v9753_v50 = vpop.f32.mrb[62].mxu1 }
 0x7eb   :  { %v12639_v38 = vpop.f32.mrb[39].mxu0  ;;  %v12711_v45 = vpop.f32.mrb[63].mxu1 }
 0x7f0   :  { %v9302_v55 = vpop.f32.mrb[40].mxu0  ;;  %v9901_v26 = vpop.f32.mrb[64].mxu1 }
 0x7f1   :  { %v9308_v2 = vadd.f32 %v9302_v55, %v9252_v20  ;;  %v9902_v54 = vadd.f32 %v16461_v5, %v9901_v26  ;;  %v12646_v36 = vpop.f32.mrb[41].mxu0  ;;  %v12730_v52 = vpop.f32.mrb[65].mxu1 }
 0x7f2   :  { %v9305_v56 = vpop.f32.mrb[42].mxu0 }
 0x7f3   :  { %v12647_v51 = vpop.f32.mrb[43].mxu0  ;;  %9912 = vrot.lane.b32.xlu0 %v9902_v54, %s13677_s3 }
 0x7f8   :  { %v9358_v24 = vpop.f32.mrb[44].mxu0 }
 0x7f9   :  { %v9364_v32 = vadd.f32 %v9358_v24, %v9308_v2  ;;  %v12654_v13 = vpop.f32.mrb[45].mxu0 }
 0x7fa   :  { %v9361_v63 = vpop.f32.mrb[46].mxu0 }
 0x7fb   :  { %v12655_v15 = vpop.f32.mrb[47].mxu0  ;;  %v9420_v60 = vadd.f32 %v9414_v39, %v9364_v32 }
 0x800   :  { %v9470_v53 = vpop.f32.mrb[48].mxu0 }
 0x801   :  { %v9476_v62 = vadd.f32 %v9470_v53, %v9420_v60  ;;  %v12670_v31 = vpop.f32.mrb[49].mxu0 }
 0x802   :  { %v9473_v25 = vpop.f32.mrb[50].mxu0 }
 0x803   :  { %v12671_v46 = vpop.f32.mrb[51].mxu0  ;;  %v9532_v40 = vadd.f32 %v9526_v27, %v9476_v62  ;;  %v11150_v27 = vld [vmem:[%s16534_s7] ss:$0 sm:$0xff]  ;;  %s13678_s7 = smov 96  }
 0x808   :  { %v9582_v44 = vpop.f32.mrb[52].mxu0 }
 0x809   :  { %v9588_v18 = vadd.f32 %v9582_v44, %v9532_v40  ;;  %v12686_v7 = vpop.f32.mrb[53].mxu0 }
 0x80a   :  { %v9585_v43 = vpop.f32.mrb[54].mxu0 }
 0x80b   :  { %v12687_v17 = vpop.f32.mrb[55].mxu0  ;;  %v9644_v61 = vadd.f32 %v9638_v37, %v9588_v18 }
 0x810   :  { %v9694_v35 = vpop.f32.mrb[56].mxu0 }
 0x811   :  { %v9700_v33 = vadd.f32 %v9694_v35, %v9644_v61  ;;  %v12702_v29 = vpop.f32.mrb[57].mxu0 }
 0x812   :  { %v9697_v6 = vpop.f32.mrb[58].mxu0 }
 0x813   :  { %v12703_v30 = vpop.f32.mrb[59].mxu0  ;;  %v9756_v10 = vadd.f32 %v9750_v9, %v9700_v33 }
 0x818   :  { %v9806_v28 = vpop.f32.mrb[60].mxu0 }
 0x819   :  { %v9812_v39 = vadd.f32 %v9806_v28, %v9756_v10  ;;  %v12718_v21 = vpop.f32.mrb[61].mxu0 }
 0x81a   :  { %v9809_v14 = vpop.f32.mrb[62].mxu0 }
 0x81b   :  { %v12719_v47 = vpop.f32.mrb[63].mxu0  ;;  %v16468_v49 = vadd.f32 %v11150_v27, %v9812_v39 }
 0x81d   :  { %v9905_v19 = vadd.f32 %v9902_v54, %v16468_v49 }
 0x81f   :  { %v9906_v59 = vsub.f32 0.0, %v9905_v19 }
 0x821   :  { %v9907_v1 = vmul.f32 1.442695, %v9906_v59 }
 0x823   :  { %13619 = vpow2.f32 %v9907_v1 }
 0x82d   :  { %v13620_v37 = vpop.eup %13619 }
 0x82e   :  { %v9909_v3 = vadd.f32 1.0, %v13620_v37 }
 0x830   :  { %13621 = vrcp.f32 %v9909_v3 }
 0x83a   :  { %v13622_v11 = vpop.eup %13621 }
 0x83b   :  { %v9922_v16 = vsub.f32 1.0, %v13622_v11  ;;  %v9928_v20 = vmul.f32 0.0, %v13622_v11 }
 0x865   :  { %v9913_v57 = vpop.permute.xlu0 %9912 }
 0x866   :  { %v9915_v23 = vmul.f32 %v13622_v11, %v9913_v57 }
 0x868   :  { %9917 = vrot.lane.b32.xlu0 %v9915_v23, %s13677_s3 }
 0x8da   :  { %v9918_v34 = vpop.permute.xlu0 %9917 }
 0x8db   :  { %v9920_v0 = vadd.f32 %v9918_v34, %v16468_v49 }
 0x8dd   :  { %13623 = vtanh.f32 %v9920_v0 }
 0x8e7   :  { %v13624_v42 = vpop.eup %13623 }
 0x8e8   :  { %9924 = vrot.lane.b32.xlu1 %v13624_v42, %s13678_s7 }
 0x95a   :  { %v9925_v9 = vpop.permute.xlu1 %9924 }
 0x95b   :  { %v9927_v4 = vmul.f32 %v9925_v9, %v9922_v16 }
 0x95d   :  { %v9929_v8 = vadd.f32 %v9928_v20, %v9927_v4 }
 0x95f   :  { %9931 = vrot.lane.b32.xlu1 %v9929_v8, %s13678_s7  ;;  %v10030_v13 = vrot.slane %v9929_v8, 6  ;;  %v10244_v8 = vld [vmem:[%s16535_s9] sm:$0xff] }
 0x9d1   :  { %v9932_v48 = vpop.permute.xlu1 %9931 }
 0x9d2   :  { %12740 = vmatmul.mubr.msk.f32.vlgmr.msra.gmra.mrb[64].mxu0 %vm960_vm0, %v9932_v48  ;;  %v10245_v48 = vld [vmem:[%s16535_s9 + $0x8] sm:$0xff] }
 0x9d3   :  { %12795 = vmatpush3.bf16.msra.mxu0 %v16343_v22  ;;  %12761 = vmatprep.mubr.msk.f32.mxu0 %vm13675_vm3, %v13674_v58 }
 0x9d4   :  { %12796 = vmatprep.subr.bf16.mxu0 %v13676_v41 }
 0x9d7   :  { %12798 = vmatpush3.bf16.msra.mxu0 %v16363_v12 }
 0xaa5   :  { %v10001_v50 = vpop.f32.mrb[64].mxu0 }
 0xaa6   :  { %v10002_v38 = vadd.f32 %v16461_v5, %v10001_v50  ;;  %v12741_v45 = vpop.f32.mrb[65].mxu0  ;;  %v10246_v50 = vld [vmem:[%s16535_s9 + $0x10] sm:$0xff] }
 0xaa7   :  { %v10247_v45 = vld [vmem:[%s16535_s9 + $0x18] sm:$0xff] }
 0xaa8   :  { %v10006_v55 = vrot.slane %v10002_v38, 6  ;;  %v12800_v38 = vpack.c.bf16 %v10245_v48, %v10244_v8 }
 0xaaa   :  { %10014 = vrot.lane.b32.xlu0 %v10006_v55, %s13677_s3  ;;  %v10008_v26 = vadd.f32 %v10006_v55, %v16468_v49 }
 0xaac   :  { %v10009_v2 = vsub.f32 0.0, %v10008_v26  ;;  %v16_v26 = vstv %s16536_s10 }
 0xaad   :  { %17 = vst [vmem:[#allocation3] sm:$0x1] %v16_v26 }
 0xaae   :  { %v10010_v54 = vmul.f32 1.442695, %v10009_v2 }
 0xab0   :  { %13625 = vpow2.f32 %v10010_v54 }
 0xaba   :  { %v13626_v22 = vpop.eup %13625 }
 0xabb   :  { %v10012_v36 = vadd.f32 1.0, %v13626_v22 }
 0xabd   :  { %13627 = vrcp.f32 %v10012_v36 }
 0xac7   :  { %v13628_v52 = vpop.eup %13627 }
 0xac8   :  { %v10024_v63 = vsub.f32 1.0, %v13628_v52  ;;  %v10032_v53 = vmul.f32 %v13628_v52, %v10030_v13 }
 0xb1c   :  { %v10015_v56 = vpop.permute.xlu0 %10014 }
 0xb1d   :  { %v10017_v51 = vmul.f32 %v13628_v52, %v10015_v56 }
 0xb1f   :  { %10019 = vrot.lane.b32.xlu1 %v10017_v51, %s13677_s3 }
 0xb91   :  { %v10020_v12 = vpop.permute.xlu1 %10019 }
 0xb92   :  { %v10022_v24 = vadd.f32 %v10020_v12, %v16468_v49 }
 0xb94   :  { %13629 = vtanh.f32 %v10022_v24 }
 0xb9e   :  { %v13630_v32 = vpop.eup %13629 }
 0xb9f   :  { %10026 = vrot.lane.b32.xlu0 %v13630_v32, %s13678_s7 }
 0xc11   :  { %v10027_v15 = vpop.permute.xlu0 %10026 }
 0xc12   :  { %v10029_v60 = vmul.f32 %v10027_v15, %v10024_v63 }
 0xc14   :  { %v10033_v62 = vadd.f32 %v10032_v53, %v10029_v60 }
 0xc16   :  { %v10035_v31 = vrot.slane %v10033_v62, 2  ;;  %v10135_v28 = vrot.slane %v10033_v62, 6 }
 0xc18   :  { %10036 = vrot.lane.b32.xlu1 %v10035_v31, %s13678_s7 }
 0xc8a   :  { %v10037_v25 = vpop.permute.xlu1 %10036 }
 0xc8b   :  { %12751 = vmatmul.mubr.msk.f32.vlgmr.msra.gmra.mrb[66].mxu1 %vm960_vm0, %v10037_v25 }
 0xc8c   :  { %12772 = vmatprep.mubr.msk.f32.mxu1 %vm13675_vm3, %v13674_v58  ;;  %12801 = vmatpush3.bf16.msra.mxu1 %v12800_v38 }
 0xc8d   :  { %12802 = vmatprep.subr.bf16.mxu1 %v13676_v41  ;;  %v11155_v41 = vld [vmem:[#allocation3] ss:$0 sm:$0xff] }
 0xd5e   :  { %v10106_v46 = vpop.f32.mrb[66].mxu1 }
 0xd5f   :  { %v10107_v40 = vadd.f32 %v16461_v5, %v10106_v46  ;;  %v12752_v44 = vpop.f32.mrb[67].mxu1 }
 0xd61   :  { %v10111_v18 = vrot.slane %v10107_v40, 4 }
 0xd63   :  { %10119 = vrot.lane.b32.xlu0 %v10111_v18, %s13677_s3  ;;  %v10113_v7 = vadd.f32 %v10111_v18, %v16468_v49 }
 0xd65   :  { %v10114_v43 = vsub.f32 0.0, %v10113_v7 }
 0xd67   :  { %v10115_v17 = vmul.f32 1.442695, %v10114_v43 }
 0xd69   :  { %13631 = vpow2.f32 %v10115_v17 }
 0xd73   :  { %v13632_v61 = vpop.eup %13631 }
 0xd74   :  { %v10117_v35 = vadd.f32 1.0, %v13632_v61 }
 0xd76   :  { %13633 = vrcp.f32 %v10117_v35 }
 0xd80   :  { %v13634_v33 = vpop.eup %13633 }
 0xd81   :  { %v10129_v39 = vsub.f32 1.0, %v13634_v33  ;;  %v10137_v14 = vmul.f32 %v13634_v33, %v10135_v28 }
 0xdd5   :  { %v10120_v29 = vpop.permute.xlu0 %10119 }
 0xdd6   :  { %v10122_v6 = vmul.f32 %v13634_v33, %v10120_v29 }
 0xdd8   :  { %10124 = vrot.lane.b32.xlu1 %v10122_v6, %s13677_s3 }
 0xe4a   :  { %v10125_v58 = vpop.permute.xlu1 %10124 }
 0xe4b   :  { %v10127_v30 = vadd.f32 %v10125_v58, %v16468_v49 }
 0xe4d   :  { %13635 = vtanh.f32 %v10127_v30 }
 0xe57   :  { %v13636_v10 = vpop.eup %13635 }
 0xe58   :  { %10131 = vrot.lane.b32.xlu0 %v13636_v10, %s13678_s7 }
 0xeca   :  { %v10132_v21 = vpop.permute.xlu0 %10131 }
 0xecb   :  { %v10134_v47 = vmul.f32 %v10132_v21, %v10129_v39 }
 0xecd   :  { %v10138_v27 = vadd.f32 %v10137_v14, %v10134_v47 }
 0xecf   :  { %v10140_v19 = vrot.slane %v10138_v27, 4  ;;  %v10240_v2 = vrot.slane %v10138_v27, 6 }
 0xed1   :  { %10141 = vrot.lane.b32.xlu1 %v10140_v19, %s13678_s7 }
 0xf43   :  { %v10142_v59 = vpop.permute.xlu1 %10141 }
 0xf44   :  { %12762 = vmatmul.mubr.msk.f32.vlgmr.msra.gmra.mrb[66].mxu0 %vm960_vm0, %v10142_v59 }
0x1017   :  { %v10211_v1 = vpop.f32.mrb[66].mxu0 }
0x1018   :  { %v10212_v37 = vadd.f32 %v16461_v5, %v10211_v1  ;;  %v12763_v3 = vpop.f32.mrb[67].mxu0 }
0x101a   :  { %v10216_v11 = vrot.slane %v10212_v37, 2 }
0x101c   :  { %10224 = vrot.lane.b32.xlu0 %v10216_v11, %s13677_s3  ;;  %v10218_v57 = vadd.f32 %v10216_v11, %v16468_v49 }
0x101e   :  { %v10219_v23 = vsub.f32 0.0, %v10218_v57 }
0x1020   :  { %v10220_v34 = vmul.f32 1.442695, %v10219_v23 }
0x1022   :  { %13637 = vpow2.f32 %v10220_v34 }
0x102c   :  { %v13638_v0 = vpop.eup %13637 }
0x102d   :  { %v10222_v42 = vadd.f32 1.0, %v13638_v0 }
0x102f   :  { %13639 = vrcp.f32 %v10222_v42 }
0x1039   :  { %v13640_v16 = vpop.eup %13639 }
0x103a   :  { %v10234_v54 = vsub.f32 1.0, %v13640_v16  ;;  %v10242_v36 = vmul.f32 %v13640_v16, %v10240_v2 }
0x108e   :  { %v10225_v9 = vpop.permute.xlu0 %10224 }
0x108f   :  { %v10227_v20 = vmul.f32 %v13640_v16, %v10225_v9 }
0x1091   :  { %10229 = vrot.lane.b32.xlu1 %v10227_v20, %s13677_s3 }
0x1103   :  { %v10230_v4 = vpop.permute.xlu1 %10229 }
0x1104   :  { %v10232_v5 = vadd.f32 %v10230_v4, %v16468_v49  ;;  %v12803_v49 = vpack.c.bf16 %v10247_v45, %v10246_v50 }
0x1106   :  { %13641 = vtanh.f32 %v10232_v5  ;;  %12804 = vmatpush3.bf16.msra.mxu1 %v12803_v49 }
0x1110   :  { %v13642_v55 = vpop.eup %13641 }
0x1111   :  { %10236 = vrot.lane.b32.xlu0 %v13642_v55, %s13678_s7 }
0x1183   :  { %v10237_v22 = vpop.permute.xlu0 %10236 }
0x1184   :  { %v10239_v52 = vmul.f32 %v10237_v22, %v10234_v54 }
0x1186   :  { %v10243_v56 = vadd.f32 %v10242_v36, %v10239_v52 }
0x1188   :  { %v10256_v51 = vrot.slane %v10243_v56, 6 }
0x118a   :  { %10257 = vrot.lane.b32.xlu1 %v10256_v51, %s13678_s7 }
0x11fc   :  { %v10258_v12 = vpop.permute.xlu1 %10257 }
0x11fd   :  { %12773 = vmatmul.mubr.msk.f32.vlgmr.msra.gmra.mrb[68].mxu1 %vm960_vm0, %v10258_v12 }
0x12d0   :  { %v10327_v24 = vpop.f32.mrb[68].mxu1 }
0x12d1   :  { %v10328_v32 = vadd.f32 %v11155_v41, %v10327_v24  ;;  %v12774_v13 = vpop.f32.mrb[69].mxu1 }
0x12d3   :  { %10332 = vst.msk [vmem:[%s16537_s11] sm:$0x3] %vm10331_vm4, %v10328_v32 }

</bundles_post_ra>
